<compile_context>
chip_gen: v6e
topology: v6e:2x2x1
jax: 0.10.0
libtpu: 0.0.40
codegen_flags: <defaults>
</compile_context>

<pallas_src>
import functools

import jax
import jax.numpy as jnp
from jax.experimental import pallas as pl
from jax.experimental.pallas import tpu as pltpu


def pad_same(dim, kernel, stride):
    # TODO(synk): the original `pad` helper from Model/module.py is not shown;
    # reimplemented as SAME-style symmetric padding (output = ceil(dim/stride)).
    out = -(-dim // stride)
    total = max((out - 1) * stride + kernel - dim, 0)
    return -(-total // 2)


# ---------------------------------------------------------------------------
# In-kernel building blocks.  Activation layout: (D, C, L) with the flattened
# spatial frame on lanes; flat index p maps to (h, w) = (p // row_stride,
# p % row_stride) of the ORIGINAL frame; only h < h_valid, w < w_valid
# positions hold real data (garbage outside never feeds valid outputs).
# ---------------------------------------------------------------------------
def _encoder_block(a, dw_w, dw_b, pw_w, pw_b, bn_scale, bn_shift,
                   pad_d, d_out, row_stride, h_valid, w_valid):
    d_in, c_in, lane_in = a.shape
    h_out, w_out = h_valid - 2, w_valid - 2
    lane_out = (h_out - 1) * row_stride + w_out
    zero_frame = jnp.zeros((c_in, lane_in), jnp.float32)

    def frame(j):                       # j-th plane of the zero-padded spectrum
        i = j - pad_d
        return a[i] if 0 <= i < d_in else zero_frame

    # Depthwise (5,3,3) conv, stride (3,1,1): 45 taps, each one wide VPU mul-add
    # over (d_out, C, lane_out); bias hoisted out of the tap loop.
    acc = jnp.zeros((d_out, c_in, lane_out), jnp.float32)
    for kd in range(5):
        slab = jnp.stack([frame(3 * dd + kd) for dd in range(d_out)], axis=0)
        for kh in range(3):
            for kw in range(3):
                s = kh * row_stride + kw
                tap = dw_w[kd * 9 + kh * 3 + kw]          # (C_in, 1)
                acc = acc + slab[:, :, s:s + lane_out] * tap[None]
    acc = acc + dw_b[None]

    # 1x1x1 conv (unrolled sum over C_in) + bias + ReLU + BatchNorm (inference).
    c_out = pw_w.shape[1]
    y = jnp.zeros((d_out, c_out, lane_out), jnp.float32)
    for ci in range(c_in):
        y = y + acc[:, ci:ci + 1, :] * pw_w[ci][None]     # (d_out,1,L)*(1,Cout,1)
    y = jnp.maximum(y + pw_b[None], 0.0)
    y = y * bn_scale[None] + bn_shift[None]
    return y, h_out, w_out


def _net_depthwise_kernel(x_ref, *refs, meta, row_stride, h0, w0):
    o_ref = refs[-1]
    p_refs = refs[:-1]

    a = x_ref[0]                                          # (D, C_in, H*W)
    h_valid, w_valid = h0, w0
    for b, (pad_d, d_out) in enumerate(meta):
        dw_w = p_refs[6 * b + 0][...]
        dw_b = p_refs[6 * b + 1][...]
        pw_w = p_refs[6 * b + 2][...]
        pw_b = p_refs[6 * b + 3][...]
        bn_s = p_refs[6 * b + 4][...]
        bn_t = p_refs[6 * b + 5][...]
        a, h_valid, w_valid = _encoder_block(
            a, dw_w, dw_b, pw_w, pw_b, bn_s, bn_t,
            pad_d, d_out, row_stride, h_valid, w_valid)

    # adaptive_max_pool3d(h, (None, 1, 1)): max over the valid HxW window.
    m = None
    for hh in range(h_valid):
        start = hh * row_stride
        seg = jnp.max(a[:, :, start:start + w_valid], axis=-1, keepdims=True)
        m = seg if m is None else jnp.maximum(m, seg)
    o_ref[0] = m                                          # (out_dim, hidden, 1)


def _const_index_map(ndim):
    return lambda n: (0,) * ndim


def net_depthwise_forward(x, params, meta):
    """x: (N, C_in, D, H, W) float32.  Returns (N, hidden * out_dim)."""
    n, c_in, d, h, w = x.shape
    hidden = params[0][2].shape[0]
    out_dim = meta[-1][1]

    # Kernel layout: (N, D, C, H*W) with the spatial frame flattened onto lanes.
    x_t = jnp.transpose(x, (0, 2, 1, 3, 4)).reshape(n, d, c_in, h * w)

    kparams = []
    for (dw_w, dw_b, pw_w, pw_b, gamma, beta, r_mean, r_var) in params:
        c = dw_w.shape[0]
        scale = gamma / jnp.sqrt(r_var + 1e-5)
        shift = beta - r_mean * scale
        kparams += [
            jnp.transpose(dw_w.reshape(c, 45))[:, :, None],   # (45, C, 1)
            dw_b[:, None],                                    # (C, 1)
            jnp.transpose(pw_w)[:, :, None],                  # (C_in, C_out, 1)
            pw_b[:, None],                                    # (C_out, 1)
            scale[:, None],
            shift[:, None],
        ]

    kernel = functools.partial(_net_depthwise_kernel, meta=tuple(meta),
                               row_stride=w, h0=h, w0=w)
    in_specs = [pl.BlockSpec((1, d, c_in, h * w), lambda i: (i, 0, 0, 0))]
    in_specs += [pl.BlockSpec(p.shape, _const_index_map(p.ndim)) for p in kparams]

    out = pl.pallas_call(
        kernel,
        out_shape=jax.ShapeDtypeStruct((n, out_dim, hidden, 1), jnp.float32),
        grid=(n,),
        in_specs=in_specs,
        out_specs=pl.BlockSpec((1, out_dim, hidden, 1), lambda i: (i, 0, 0, 0)),
        compiler_params=pltpu.CompilerParams(dimension_semantics=("parallel",)),
    )(x_t, *kparams)

    # (N, out_dim, hidden, 1) -> PyTorch h.view(batch, -1) ordering (channel-major)
    return jnp.transpose(out[..., 0], (0, 2, 1)).reshape(n, -1)


# ---------------------------------------------------------------------------
# Pure-JAX reference (XLA convs) for correctness checking.
# ---------------------------------------------------------------------------
def reference_forward(x, params, meta):
    h = x
    for (pad_d, _), p in zip(meta, params):
        dw_w, dw_b, pw_w, pw_b, gamma, beta, r_mean, r_var = p
        c = h.shape[1]
        h = jax.lax.conv_general_dilated(
            h, dw_w, window_strides=(3, 1, 1),
            padding=((pad_d, pad_d), (0, 0), (0, 0)),
            dimension_numbers=("NCDHW", "OIDHW", "NCDHW"),
            feature_group_count=c, precision=jax.lax.Precision.HIGHEST)
        h = h + dw_b[None, :, None, None, None]
        h = jax.lax.conv_general_dilated(
            h, pw_w[:, :, None, None, None], window_strides=(1, 1, 1),
            padding=((0, 0), (0, 0), (0, 0)),
            dimension_numbers=("NCDHW", "OIDHW", "NCDHW"),
            precision=jax.lax.Precision.HIGHEST)
        h = jnp.maximum(h + pw_b[None, :, None, None, None], 0.0)
        scale = gamma / jnp.sqrt(r_var + 1e-5)
        shift = beta - r_mean * scale
        h = h * scale[None, :, None, None, None] + shift[None, :, None, None, None]
    h = jnp.max(h, axis=(3, 4))            # adaptive_max_pool3d -> (N, C, D)
    return h.reshape(h.shape[0], -1)


def init_params(key, in_channel, hidden_size, dim):
    """Deterministic parameters with PyTorch Conv3d/BatchNorm3d shapes."""
    params, meta = [], []
    keys = jax.random.split(key, 12)
    ki = 0
    c, d = in_channel, dim
    for _ in range(3):
        p = pad_same(d, 5, 3)
        d_next = (d - 5 + 2 * p) // 3 + 1
        dw_w = 0.1 * jax.random.normal(keys[ki], (c, 1, 5, 3, 3), jnp.float32); ki += 1
        dw_b = 0.1 * jax.random.normal(keys[ki], (c,), jnp.float32); ki += 1
        pw_w = 0.1 * jax.random.normal(keys[ki], (hidden_size, c), jnp.float32); ki += 1
        pw_b = 0.1 * jax.random.normal(keys[ki], (hidden_size,), jnp.float32); ki += 1
        gamma = jnp.ones((hidden_size,), jnp.float32)
        beta = jnp.zeros((hidden_size,), jnp.float32)
        r_mean = jnp.zeros((hidden_size,), jnp.float32)
        r_var = jnp.ones((hidden_size,), jnp.float32)
        params.append((dw_w, dw_b, pw_w, pw_b, gamma, beta, r_mean, r_var))
        meta.append((p, d_next))
        c, d = hidden_size, d_next
    return params, meta, d  # d == out_dim


if __name__ == "__main__":
    N, C_IN, HIDDEN, DIM, H, W = 2, 4, 8, 16, 9, 9
    key = jax.random.PRNGKey(0)
    k_x, k_p = jax.random.split(key)
    x = jax.random.normal(k_x, (N, C_IN, DIM, H, W), jnp.float32)
    params, meta, out_dim = init_params(k_p, C_IN, HIDDEN, DIM)
    assert x.shape[2] == DIM               # mirrors the PyTorch forward assert

    fwd = jax.jit(functools.partial(net_depthwise_forward, meta=meta))
    out = jax.block_until_ready(fwd(x, params))

    ref = jax.block_until_ready(reference_forward(x, params, meta))
    expected_shape = (N, HIDDEN * out_dim)
    assert out.shape == expected_shape, (out.shape, expected_shape)
    assert bool(jnp.all(jnp.isfinite(out)))
    assert bool(jnp.allclose(out, ref, atol=2e-4, rtol=2e-4)), \
        float(jnp.max(jnp.abs(out - ref)))
    print("KERNEL_OK")
</pallas_src>

<mosaic_0001>
module attributes {stable_mosaic.version = 11 : i64} {
  func.func @_net_depthwise_kernel(%arg0: i32, %arg1: memref<1x16x4x81xf32, #tpu.memory_space<vmem>>, %arg2: memref<45x4x1xf32, #tpu.memory_space<vmem>>, %arg3: memref<4x1xf32, #tpu.memory_space<vmem>>, %arg4: memref<4x8x1xf32, #tpu.memory_space<vmem>>, %arg5: memref<8x1xf32, #tpu.memory_space<vmem>>, %arg6: memref<8x1xf32, #tpu.memory_space<vmem>>, %arg7: memref<8x1xf32, #tpu.memory_space<vmem>>, %arg8: memref<45x8x1xf32, #tpu.memory_space<vmem>>, %arg9: memref<8x1xf32, #tpu.memory_space<vmem>>, %arg10: memref<8x8x1xf32, #tpu.memory_space<vmem>>, %arg11: memref<8x1xf32, #tpu.memory_space<vmem>>, %arg12: memref<8x1xf32, #tpu.memory_space<vmem>>, %arg13: memref<8x1xf32, #tpu.memory_space<vmem>>, %arg14: memref<45x8x1xf32, #tpu.memory_space<vmem>>, %arg15: memref<8x1xf32, #tpu.memory_space<vmem>>, %arg16: memref<8x8x1xf32, #tpu.memory_space<vmem>>, %arg17: memref<8x1xf32, #tpu.memory_space<vmem>>, %arg18: memref<8x1xf32, #tpu.memory_space<vmem>>, %arg19: memref<8x1xf32, #tpu.memory_space<vmem>>, %arg20: memref<1x1x8x1xf32, #tpu.memory_space<vmem>>) attributes {dimension_semantics = [#tpu.dimension_semantics<parallel>], iteration_bounds = array<i64: 2>, scalar_prefetch = 0 : i64, scratch_operands = 0 : i64, tpu.core_type = #tpu.core_type<tc>, window_params = [{transform_indices = @transform_0, window_bounds = array<i64: 1, 16, 4, 81>}, {pipeline_mode = #tpu.pipeline_mode<synchronous>, transform_indices = @transform_1, window_bounds = array<i64: 45, 4, 1>}, {pipeline_mode = #tpu.pipeline_mode<synchronous>, transform_indices = @transform_2, window_bounds = array<i64: 4, 1>}, {pipeline_mode = #tpu.pipeline_mode<synchronous>, transform_indices = @transform_3, window_bounds = array<i64: 4, 8, 1>}, {pipeline_mode = #tpu.pipeline_mode<synchronous>, transform_indices = @transform_4, window_bounds = array<i64: 8, 1>}, {pipeline_mode = #tpu.pipeline_mode<synchronous>, transform_indices = @transform_5, window_bounds = array<i64: 8, 1>}, {pipeline_mode = #tpu.pipeline_mode<synchronous>, transform_indices = @transform_6, window_bounds = array<i64: 8, 1>}, {pipeline_mode = #tpu.pipeline_mode<synchronous>, transform_indices = @transform_7, window_bounds = array<i64: 45, 8, 1>}, {pipeline_mode = #tpu.pipeline_mode<synchronous>, transform_indices = @transform_8, window_bounds = array<i64: 8, 1>}, {pipeline_mode = #tpu.pipeline_mode<synchronous>, transform_indices = @transform_9, window_bounds = array<i64: 8, 8, 1>}, {pipeline_mode = #tpu.pipeline_mode<synchronous>, transform_indices = @transform_10, window_bounds = array<i64: 8, 1>}, {pipeline_mode = #tpu.pipeline_mode<synchronous>, transform_indices = @transform_11, window_bounds = array<i64: 8, 1>}, {pipeline_mode = #tpu.pipeline_mode<synchronous>, transform_indices = @transform_12, window_bounds = array<i64: 8, 1>}, {pipeline_mode = #tpu.pipeline_mode<synchronous>, transform_indices = @transform_13, window_bounds = array<i64: 45, 8, 1>}, {pipeline_mode = #tpu.pipeline_mode<synchronous>, transform_indices = @transform_14, window_bounds = array<i64: 8, 1>}, {pipeline_mode = #tpu.pipeline_mode<synchronous>, transform_indices = @transform_15, window_bounds = array<i64: 8, 8, 1>}, {pipeline_mode = #tpu.pipeline_mode<synchronous>, transform_indices = @transform_16, window_bounds = array<i64: 8, 1>}, {pipeline_mode = #tpu.pipeline_mode<synchronous>, transform_indices = @transform_17, window_bounds = array<i64: 8, 1>}, {pipeline_mode = #tpu.pipeline_mode<synchronous>, transform_indices = @transform_18, window_bounds = array<i64: 8, 1>}, {transform_indices = @transform_19, window_bounds = array<i64: 1, 1, 8, 1>}]} {
    %c0 = arith.constant 0 : index
    %c0_0 = arith.constant 0 : index
    %c0_1 = arith.constant 0 : index
    %c0_2 = arith.constant 0 : index
    %0 = vector.load %arg1[%c0, %c0_0, %c0_1, %c0_2] : memref<1x16x4x81xf32, #tpu.memory_space<vmem>>, vector<1x16x4x81xf32>
    %1 = vector.shape_cast %0 : vector<1x16x4x81xf32> to vector<16x4x81xf32>
    %c0_3 = arith.constant 0 : index
    %c0_4 = arith.constant 0 : index
    %c0_5 = arith.constant 0 : index
    %2 = vector.load %arg2[%c0_3, %c0_4, %c0_5] : memref<45x4x1xf32, #tpu.memory_space<vmem>>, vector<45x4x1xf32>
    %c0_6 = arith.constant 0 : index
    %c0_7 = arith.constant 0 : index
    %3 = vector.load %arg3[%c0_6, %c0_7] : memref<4x1xf32, #tpu.memory_space<vmem>>, vector<4x1xf32>
    %c0_8 = arith.constant 0 : index
    %c0_9 = arith.constant 0 : index
    %c0_10 = arith.constant 0 : index
    %4 = vector.load %arg4[%c0_8, %c0_9, %c0_10] : memref<4x8x1xf32, #tpu.memory_space<vmem>>, vector<4x8x1xf32>
    %c0_11 = arith.constant 0 : index
    %c0_12 = arith.constant 0 : index
    %5 = vector.load %arg5[%c0_11, %c0_12] : memref<8x1xf32, #tpu.memory_space<vmem>>, vector<8x1xf32>
    %c0_13 = arith.constant 0 : index
    %c0_14 = arith.constant 0 : index
    %6 = vector.load %arg6[%c0_13, %c0_14] : memref<8x1xf32, #tpu.memory_space<vmem>>, vector<8x1xf32>
    %c0_15 = arith.constant 0 : index
    %c0_16 = arith.constant 0 : index
    %7 = vector.load %arg7[%c0_15, %c0_16] : memref<8x1xf32, #tpu.memory_space<vmem>>, vector<8x1xf32>
    %cst = arith.constant 0.000000e+00 : f32
    %8 = vector.broadcast %cst : f32 to vector<4x81xf32>
    %cst_17 = arith.constant 0.000000e+00 : f32
    %9 = vector.broadcast %cst_17 : f32 to vector<6x4x61xf32>
    %10 = vector.extract_strided_slice %1 {offsets = [1, 0, 0], sizes = [1, 4, 81], strides = [1, 1, 1]} : vector<16x4x81xf32> to vector<1x4x81xf32>
    %11 = vector.shape_cast %10 : vector<1x4x81xf32> to vector<4x81xf32>
    %12 = vector.extract_strided_slice %1 {offsets = [4, 0, 0], sizes = [1, 4, 81], strides = [1, 1, 1]} : vector<16x4x81xf32> to vector<1x4x81xf32>
    %13 = vector.shape_cast %12 : vector<1x4x81xf32> to vector<4x81xf32>
    %14 = vector.extract_strided_slice %1 {offsets = [7, 0, 0], sizes = [1, 4, 81], strides = [1, 1, 1]} : vector<16x4x81xf32> to vector<1x4x81xf32>
    %15 = vector.shape_cast %14 : vector<1x4x81xf32> to vector<4x81xf32>
    %16 = vector.extract_strided_slice %1 {offsets = [10, 0, 0], sizes = [1, 4, 81], strides = [1, 1, 1]} : vector<16x4x81xf32> to vector<1x4x81xf32>
    %17 = vector.shape_cast %16 : vector<1x4x81xf32> to vector<4x81xf32>
    %18 = vector.extract_strided_slice %1 {offsets = [13, 0, 0], sizes = [1, 4, 81], strides = [1, 1, 1]} : vector<16x4x81xf32> to vector<1x4x81xf32>
    %19 = vector.shape_cast %18 : vector<1x4x81xf32> to vector<4x81xf32>
    %20 = vector.shape_cast %8 : vector<4x81xf32> to vector<1x4x81xf32>
    %21 = vector.shape_cast %11 : vector<4x81xf32> to vector<1x4x81xf32>
    %22 = vector.shape_cast %13 : vector<4x81xf32> to vector<1x4x81xf32>
    %23 = vector.shape_cast %15 : vector<4x81xf32> to vector<1x4x81xf32>
    %24 = vector.shape_cast %17 : vector<4x81xf32> to vector<1x4x81xf32>
    %25 = vector.shape_cast %19 : vector<4x81xf32> to vector<1x4x81xf32>
    %26 = tpu.concatenate %20, %21, %22, %23, %24, %25 in 0 : vector<1x4x81xf32>, vector<1x4x81xf32>, vector<1x4x81xf32>, vector<1x4x81xf32>, vector<1x4x81xf32>, vector<1x4x81xf32> -> vector<6x4x81xf32>
    %27 = vector.extract_strided_slice %2 {offsets = [0, 0, 0], sizes = [1, 4, 1], strides = [1, 1, 1]} : vector<45x4x1xf32> to vector<1x4x1xf32>
    %28 = vector.shape_cast %27 : vector<1x4x1xf32> to vector<4x1xf32>
    %29 = vector.extract_strided_slice %26 {offsets = [0, 0, 0], sizes = [6, 4, 61], strides = [1, 1, 1]} : vector<6x4x81xf32> to vector<6x4x61xf32>
    %30 = vector.shape_cast %28 : vector<4x1xf32> to vector<1x4x1xf32>
    %31 = vector.broadcast %30 : vector<1x4x1xf32> to vector<6x4x61xf32>
    %32 = arith.mulf %29, %31 : vector<6x4x61xf32>
    %33 = arith.addf %9, %32 : vector<6x4x61xf32>
    %34 = vector.extract_strided_slice %2 {offsets = [1, 0, 0], sizes = [1, 4, 1], strides = [1, 1, 1]} : vector<45x4x1xf32> to vector<1x4x1xf32>
    %35 = vector.shape_cast %34 : vector<1x4x1xf32> to vector<4x1xf32>
    %36 = vector.extract_strided_slice %26 {offsets = [0, 0, 1], sizes = [6, 4, 61], strides = [1, 1, 1]} : vector<6x4x81xf32> to vector<6x4x61xf32>
    %37 = vector.shape_cast %35 : vector<4x1xf32> to vector<1x4x1xf32>
    %38 = vector.broadcast %37 : vector<1x4x1xf32> to vector<6x4x61xf32>
    %39 = arith.mulf %36, %38 : vector<6x4x61xf32>
    %40 = arith.addf %33, %39 : vector<6x4x61xf32>
    %41 = vector.extract_strided_slice %2 {offsets = [2, 0, 0], sizes = [1, 4, 1], strides = [1, 1, 1]} : vector<45x4x1xf32> to vector<1x4x1xf32>
    %42 = vector.shape_cast %41 : vector<1x4x1xf32> to vector<4x1xf32>
    %43 = vector.extract_strided_slice %26 {offsets = [0, 0, 2], sizes = [6, 4, 61], strides = [1, 1, 1]} : vector<6x4x81xf32> to vector<6x4x61xf32>
    %44 = vector.shape_cast %42 : vector<4x1xf32> to vector<1x4x1xf32>
    %45 = vector.broadcast %44 : vector<1x4x1xf32> to vector<6x4x61xf32>
    %46 = arith.mulf %43, %45 : vector<6x4x61xf32>
    %47 = arith.addf %40, %46 : vector<6x4x61xf32>
    %48 = vector.extract_strided_slice %2 {offsets = [3, 0, 0], sizes = [1, 4, 1], strides = [1, 1, 1]} : vector<45x4x1xf32> to vector<1x4x1xf32>
    %49 = vector.shape_cast %48 : vector<1x4x1xf32> to vector<4x1xf32>
    %50 = vector.extract_strided_slice %26 {offsets = [0, 0, 9], sizes = [6, 4, 61], strides = [1, 1, 1]} : vector<6x4x81xf32> to vector<6x4x61xf32>
    %51 = vector.shape_cast %49 : vector<4x1xf32> to vector<1x4x1xf32>
    %52 = vector.broadcast %51 : vector<1x4x1xf32> to vector<6x4x61xf32>
    %53 = arith.mulf %50, %52 : vector<6x4x61xf32>
    %54 = arith.addf %47, %53 : vector<6x4x61xf32>
    %55 = vector.extract_strided_slice %2 {offsets = [4, 0, 0], sizes = [1, 4, 1], strides = [1, 1, 1]} : vector<45x4x1xf32> to vector<1x4x1xf32>
    %56 = vector.shape_cast %55 : vector<1x4x1xf32> to vector<4x1xf32>
    %57 = vector.extract_strided_slice %26 {offsets = [0, 0, 10], sizes = [6, 4, 61], strides = [1, 1, 1]} : vector<6x4x81xf32> to vector<6x4x61xf32>
    %58 = vector.shape_cast %56 : vector<4x1xf32> to vector<1x4x1xf32>
    %59 = vector.broadcast %58 : vector<1x4x1xf32> to vector<6x4x61xf32>
    %60 = arith.mulf %57, %59 : vector<6x4x61xf32>
    %61 = arith.addf %54, %60 : vector<6x4x61xf32>
    %62 = vector.extract_strided_slice %2 {offsets = [5, 0, 0], sizes = [1, 4, 1], strides = [1, 1, 1]} : vector<45x4x1xf32> to vector<1x4x1xf32>
    %63 = vector.shape_cast %62 : vector<1x4x1xf32> to vector<4x1xf32>
    %64 = vector.extract_strided_slice %26 {offsets = [0, 0, 11], sizes = [6, 4, 61], strides = [1, 1, 1]} : vector<6x4x81xf32> to vector<6x4x61xf32>
    %65 = vector.shape_cast %63 : vector<4x1xf32> to vector<1x4x1xf32>
    %66 = vector.broadcast %65 : vector<1x4x1xf32> to vector<6x4x61xf32>
    %67 = arith.mulf %64, %66 : vector<6x4x61xf32>
    %68 = arith.addf %61, %67 : vector<6x4x61xf32>
    %69 = vector.extract_strided_slice %2 {offsets = [6, 0, 0], sizes = [1, 4, 1], strides = [1, 1, 1]} : vector<45x4x1xf32> to vector<1x4x1xf32>
    %70 = vector.shape_cast %69 : vector<1x4x1xf32> to vector<4x1xf32>
    %71 = vector.extract_strided_slice %26 {offsets = [0, 0, 18], sizes = [6, 4, 61], strides = [1, 1, 1]} : vector<6x4x81xf32> to vector<6x4x61xf32>
    %72 = vector.shape_cast %70 : vector<4x1xf32> to vector<1x4x1xf32>
    %73 = vector.broadcast %72 : vector<1x4x1xf32> to vector<6x4x61xf32>
    %74 = arith.mulf %71, %73 : vector<6x4x61xf32>
    %75 = arith.addf %68, %74 : vector<6x4x61xf32>
    %76 = vector.extract_strided_slice %2 {offsets = [7, 0, 0], sizes = [1, 4, 1], strides = [1, 1, 1]} : vector<45x4x1xf32> to vector<1x4x1xf32>
    %77 = vector.shape_cast %76 : vector<1x4x1xf32> to vector<4x1xf32>
    %78 = vector.extract_strided_slice %26 {offsets = [0, 0, 19], sizes = [6, 4, 61], strides = [1, 1, 1]} : vector<6x4x81xf32> to vector<6x4x61xf32>
    %79 = vector.shape_cast %77 : vector<4x1xf32> to vector<1x4x1xf32>
    %80 = vector.broadcast %79 : vector<1x4x1xf32> to vector<6x4x61xf32>
    %81 = arith.mulf %78, %80 : vector<6x4x61xf32>
    %82 = arith.addf %75, %81 : vector<6x4x61xf32>
    %83 = vector.extract_strided_slice %2 {offsets = [8, 0, 0], sizes = [1, 4, 1], strides = [1, 1, 1]} : vector<45x4x1xf32> to vector<1x4x1xf32>
    %84 = vector.shape_cast %83 : vector<1x4x1xf32> to vector<4x1xf32>
    %85 = vector.extract_strided_slice %26 {offsets = [0, 0, 20], sizes = [6, 4, 61], strides = [1, 1, 1]} : vector<6x4x81xf32> to vector<6x4x61xf32>
    %86 = vector.shape_cast %84 : vector<4x1xf32> to vector<1x4x1xf32>
    %87 = vector.broadcast %86 : vector<1x4x1xf32> to vector<6x4x61xf32>
    %88 = arith.mulf %85, %87 : vector<6x4x61xf32>
    %89 = arith.addf %82, %88 : vector<6x4x61xf32>
    %90 = vector.extract_strided_slice %1 {offsets = [2, 0, 0], sizes = [1, 4, 81], strides = [1, 1, 1]} : vector<16x4x81xf32> to vector<1x4x81xf32>
    %91 = vector.shape_cast %90 : vector<1x4x81xf32> to vector<4x81xf32>
    %92 = vector.extract_strided_slice %1 {offsets = [5, 0, 0], sizes = [1, 4, 81], strides = [1, 1, 1]} : vector<16x4x81xf32> to vector<1x4x81xf32>
    %93 = vector.shape_cast %92 : vector<1x4x81xf32> to vector<4x81xf32>
    %94 = vector.extract_strided_slice %1 {offsets = [8, 0, 0], sizes = [1, 4, 81], strides = [1, 1, 1]} : vector<16x4x81xf32> to vector<1x4x81xf32>
    %95 = vector.shape_cast %94 : vector<1x4x81xf32> to vector<4x81xf32>
    %96 = vector.extract_strided_slice %1 {offsets = [11, 0, 0], sizes = [1, 4, 81], strides = [1, 1, 1]} : vector<16x4x81xf32> to vector<1x4x81xf32>
    %97 = vector.shape_cast %96 : vector<1x4x81xf32> to vector<4x81xf32>
    %98 = vector.extract_strided_slice %1 {offsets = [14, 0, 0], sizes = [1, 4, 81], strides = [1, 1, 1]} : vector<16x4x81xf32> to vector<1x4x81xf32>
    %99 = vector.shape_cast %98 : vector<1x4x81xf32> to vector<4x81xf32>
    %100 = vector.shape_cast %8 : vector<4x81xf32> to vector<1x4x81xf32>
    %101 = vector.shape_cast %91 : vector<4x81xf32> to vector<1x4x81xf32>
    %102 = vector.shape_cast %93 : vector<4x81xf32> to vector<1x4x81xf32>
    %103 = vector.shape_cast %95 : vector<4x81xf32> to vector<1x4x81xf32>
    %104 = vector.shape_cast %97 : vector<4x81xf32> to vector<1x4x81xf32>
    %105 = vector.shape_cast %99 : vector<4x81xf32> to vector<1x4x81xf32>
    %106 = tpu.concatenate %100, %101, %102, %103, %104, %105 in 0 : vector<1x4x81xf32>, vector<1x4x81xf32>, vector<1x4x81xf32>, vector<1x4x81xf32>, vector<1x4x81xf32>, vector<1x4x81xf32> -> vector<6x4x81xf32>
    %107 = vector.extract_strided_slice %2 {offsets = [9, 0, 0], sizes = [1, 4, 1], strides = [1, 1, 1]} : vector<45x4x1xf32> to vector<1x4x1xf32>
    %108 = vector.shape_cast %107 : vector<1x4x1xf32> to vector<4x1xf32>
    %109 = vector.extract_strided_slice %106 {offsets = [0, 0, 0], sizes = [6, 4, 61], strides = [1, 1, 1]} : vector<6x4x81xf32> to vector<6x4x61xf32>
    %110 = vector.shape_cast %108 : vector<4x1xf32> to vector<1x4x1xf32>
    %111 = vector.broadcast %110 : vector<1x4x1xf32> to vector<6x4x61xf32>
    %112 = arith.mulf %109, %111 : vector<6x4x61xf32>
    %113 = arith.addf %89, %112 : vector<6x4x61xf32>
    %114 = vector.extract_strided_slice %2 {offsets = [10, 0, 0], sizes = [1, 4, 1], strides = [1, 1, 1]} : vector<45x4x1xf32> to vector<1x4x1xf32>
    %115 = vector.shape_cast %114 : vector<1x4x1xf32> to vector<4x1xf32>
    %116 = vector.extract_strided_slice %106 {offsets = [0, 0, 1], sizes = [6, 4, 61], strides = [1, 1, 1]} : vector<6x4x81xf32> to vector<6x4x61xf32>
    %117 = vector.shape_cast %115 : vector<4x1xf32> to vector<1x4x1xf32>
    %118 = vector.broadcast %117 : vector<1x4x1xf32> to vector<6x4x61xf32>
    %119 = arith.mulf %116, %118 : vector<6x4x61xf32>
    %120 = arith.addf %113, %119 : vector<6x4x61xf32>
    %121 = vector.extract_strided_slice %2 {offsets = [11, 0, 0], sizes = [1, 4, 1], strides = [1, 1, 1]} : vector<45x4x1xf32> to vector<1x4x1xf32>
    %122 = vector.shape_cast %121 : vector<1x4x1xf32> to vector<4x1xf32>
    %123 = vector.extract_strided_slice %106 {offsets = [0, 0, 2], sizes = [6, 4, 61], strides = [1, 1, 1]} : vector<6x4x81xf32> to vector<6x4x61xf32>
    %124 = vector.shape_cast %122 : vector<4x1xf32> to vector<1x4x1xf32>
    %125 = vector.broadcast %124 : vector<1x4x1xf32> to vector<6x4x61xf32>
    %126 = arith.mulf %123, %125 : vector<6x4x61xf32>
    %127 = arith.addf %120, %126 : vector<6x4x61xf32>
    %128 = vector.extract_strided_slice %2 {offsets = [12, 0, 0], sizes = [1, 4, 1], strides = [1, 1, 1]} : vector<45x4x1xf32> to vector<1x4x1xf32>
    %129 = vector.shape_cast %128 : vector<1x4x1xf32> to vector<4x1xf32>
    %130 = vector.extract_strided_slice %106 {offsets = [0, 0, 9], sizes = [6, 4, 61], strides = [1, 1, 1]} : vector<6x4x81xf32> to vector<6x4x61xf32>
    %131 = vector.shape_cast %129 : vector<4x1xf32> to vector<1x4x1xf32>
    %132 = vector.broadcast %131 : vector<1x4x1xf32> to vector<6x4x61xf32>
    %133 = arith.mulf %130, %132 : vector<6x4x61xf32>
    %134 = arith.addf %127, %133 : vector<6x4x61xf32>
    %135 = vector.extract_strided_slice %2 {offsets = [13, 0, 0], sizes = [1, 4, 1], strides = [1, 1, 1]} : vector<45x4x1xf32> to vector<1x4x1xf32>
    %136 = vector.shape_cast %135 : vector<1x4x1xf32> to vector<4x1xf32>
    %137 = vector.extract_strided_slice %106 {offsets = [0, 0, 10], sizes = [6, 4, 61], strides = [1, 1, 1]} : vector<6x4x81xf32> to vector<6x4x61xf32>
    %138 = vector.shape_cast %136 : vector<4x1xf32> to vector<1x4x1xf32>
    %139 = vector.broadcast %138 : vector<1x4x1xf32> to vector<6x4x61xf32>
    %140 = arith.mulf %137, %139 : vector<6x4x61xf32>
    %141 = arith.addf %134, %140 : vector<6x4x61xf32>
    %142 = vector.extract_strided_slice %2 {offsets = [14, 0, 0], sizes = [1, 4, 1], strides = [1, 1, 1]} : vector<45x4x1xf32> to vector<1x4x1xf32>
    %143 = vector.shape_cast %142 : vector<1x4x1xf32> to vector<4x1xf32>
    %144 = vector.extract_strided_slice %106 {offsets = [0, 0, 11], sizes = [6, 4, 61], strides = [1, 1, 1]} : vector<6x4x81xf32> to vector<6x4x61xf32>
    %145 = vector.shape_cast %143 : vector<4x1xf32> to vector<1x4x1xf32>
    %146 = vector.broadcast %145 : vector<1x4x1xf32> to vector<6x4x61xf32>
    %147 = arith.mulf %144, %146 : vector<6x4x61xf32>
    %148 = arith.addf %141, %147 : vector<6x4x61xf32>
    %149 = vector.extract_strided_slice %2 {offsets = [15, 0, 0], sizes = [1, 4, 1], strides = [1, 1, 1]} : vector<45x4x1xf32> to vector<1x4x1xf32>
    %150 = vector.shape_cast %149 : vector<1x4x1xf32> to vector<4x1xf32>
    %151 = vector.extract_strided_slice %106 {offsets = [0, 0, 18], sizes = [6, 4, 61], strides = [1, 1, 1]} : vector<6x4x81xf32> to vector<6x4x61xf32>
    %152 = vector.shape_cast %150 : vector<4x1xf32> to vector<1x4x1xf32>
    %153 = vector.broadcast %152 : vector<1x4x1xf32> to vector<6x4x61xf32>
    %154 = arith.mulf %151, %153 : vector<6x4x61xf32>
    %155 = arith.addf %148, %154 : vector<6x4x61xf32>
    %156 = vector.extract_strided_slice %2 {offsets = [16, 0, 0], sizes = [1, 4, 1], strides = [1, 1, 1]} : vector<45x4x1xf32> to vector<1x4x1xf32>
    %157 = vector.shape_cast %156 : vector<1x4x1xf32> to vector<4x1xf32>
    %158 = vector.extract_strided_slice %106 {offsets = [0, 0, 19], sizes = [6, 4, 61], strides = [1, 1, 1]} : vector<6x4x81xf32> to vector<6x4x61xf32>
    %159 = vector.shape_cast %157 : vector<4x1xf32> to vector<1x4x1xf32>
    %160 = vector.broadcast %159 : vector<1x4x1xf32> to vector<6x4x61xf32>
    %161 = arith.mulf %158, %160 : vector<6x4x61xf32>
    %162 = arith.addf %155, %161 : vector<6x4x61xf32>
    %163 = vector.extract_strided_slice %2 {offsets = [17, 0, 0], sizes = [1, 4, 1], strides = [1, 1, 1]} : vector<45x4x1xf32> to vector<1x4x1xf32>
    %164 = vector.shape_cast %163 : vector<1x4x1xf32> to vector<4x1xf32>
    %165 = vector.extract_strided_slice %106 {offsets = [0, 0, 20], sizes = [6, 4, 61], strides = [1, 1, 1]} : vector<6x4x81xf32> to vector<6x4x61xf32>
    %166 = vector.shape_cast %164 : vector<4x1xf32> to vector<1x4x1xf32>
    %167 = vector.broadcast %166 : vector<1x4x1xf32> to vector<6x4x61xf32>
    %168 = arith.mulf %165, %167 : vector<6x4x61xf32>
    %169 = arith.addf %162, %168 : vector<6x4x61xf32>
    %170 = vector.extract_strided_slice %1 {offsets = [0, 0, 0], sizes = [1, 4, 81], strides = [1, 1, 1]} : vector<16x4x81xf32> to vector<1x4x81xf32>
    %171 = vector.shape_cast %170 : vector<1x4x81xf32> to vector<4x81xf32>
    %172 = vector.extract_strided_slice %1 {offsets = [3, 0, 0], sizes = [1, 4, 81], strides = [1, 1, 1]} : vector<16x4x81xf32> to vector<1x4x81xf32>
    %173 = vector.shape_cast %172 : vector<1x4x81xf32> to vector<4x81xf32>
    %174 = vector.extract_strided_slice %1 {offsets = [6, 0, 0], sizes = [1, 4, 81], strides = [1, 1, 1]} : vector<16x4x81xf32> to vector<1x4x81xf32>
    %175 = vector.shape_cast %174 : vector<1x4x81xf32> to vector<4x81xf32>
    %176 = vector.extract_strided_slice %1 {offsets = [9, 0, 0], sizes = [1, 4, 81], strides = [1, 1, 1]} : vector<16x4x81xf32> to vector<1x4x81xf32>
    %177 = vector.shape_cast %176 : vector<1x4x81xf32> to vector<4x81xf32>
    %178 = vector.extract_strided_slice %1 {offsets = [12, 0, 0], sizes = [1, 4, 81], strides = [1, 1, 1]} : vector<16x4x81xf32> to vector<1x4x81xf32>
    %179 = vector.shape_cast %178 : vector<1x4x81xf32> to vector<4x81xf32>
    %180 = vector.extract_strided_slice %1 {offsets = [15, 0, 0], sizes = [1, 4, 81], strides = [1, 1, 1]} : vector<16x4x81xf32> to vector<1x4x81xf32>
    %181 = vector.shape_cast %180 : vector<1x4x81xf32> to vector<4x81xf32>
    %182 = vector.shape_cast %171 : vector<4x81xf32> to vector<1x4x81xf32>
    %183 = vector.shape_cast %173 : vector<4x81xf32> to vector<1x4x81xf32>
    %184 = vector.shape_cast %175 : vector<4x81xf32> to vector<1x4x81xf32>
    %185 = vector.shape_cast %177 : vector<4x81xf32> to vector<1x4x81xf32>
    %186 = vector.shape_cast %179 : vector<4x81xf32> to vector<1x4x81xf32>
    %187 = vector.shape_cast %181 : vector<4x81xf32> to vector<1x4x81xf32>
    %188 = tpu.concatenate %182, %183, %184, %185, %186, %187 in 0 : vector<1x4x81xf32>, vector<1x4x81xf32>, vector<1x4x81xf32>, vector<1x4x81xf32>, vector<1x4x81xf32>, vector<1x4x81xf32> -> vector<6x4x81xf32>
    %189 = vector.extract_strided_slice %2 {offsets = [18, 0, 0], sizes = [1, 4, 1], strides = [1, 1, 1]} : vector<45x4x1xf32> to vector<1x4x1xf32>
    %190 = vector.shape_cast %189 : vector<1x4x1xf32> to vector<4x1xf32>
    %191 = vector.extract_strided_slice %188 {offsets = [0, 0, 0], sizes = [6, 4, 61], strides = [1, 1, 1]} : vector<6x4x81xf32> to vector<6x4x61xf32>
    %192 = vector.shape_cast %190 : vector<4x1xf32> to vector<1x4x1xf32>
    %193 = vector.broadcast %192 : vector<1x4x1xf32> to vector<6x4x61xf32>
    %194 = arith.mulf %191, %193 : vector<6x4x61xf32>
    %195 = arith.addf %169, %194 : vector<6x4x61xf32>
    %196 = vector.extract_strided_slice %2 {offsets = [19, 0, 0], sizes = [1, 4, 1], strides = [1, 1, 1]} : vector<45x4x1xf32> to vector<1x4x1xf32>
    %197 = vector.shape_cast %196 : vector<1x4x1xf32> to vector<4x1xf32>
    %198 = vector.extract_strided_slice %188 {offsets = [0, 0, 1], sizes = [6, 4, 61], strides = [1, 1, 1]} : vector<6x4x81xf32> to vector<6x4x61xf32>
    %199 = vector.shape_cast %197 : vector<4x1xf32> to vector<1x4x1xf32>
    %200 = vector.broadcast %199 : vector<1x4x1xf32> to vector<6x4x61xf32>
    %201 = arith.mulf %198, %200 : vector<6x4x61xf32>
    %202 = arith.addf %195, %201 : vector<6x4x61xf32>
    %203 = vector.extract_strided_slice %2 {offsets = [20, 0, 0], sizes = [1, 4, 1], strides = [1, 1, 1]} : vector<45x4x1xf32> to vector<1x4x1xf32>
    %204 = vector.shape_cast %203 : vector<1x4x1xf32> to vector<4x1xf32>
    %205 = vector.extract_strided_slice %188 {offsets = [0, 0, 2], sizes = [6, 4, 61], strides = [1, 1, 1]} : vector<6x4x81xf32> to vector<6x4x61xf32>
    %206 = vector.shape_cast %204 : vector<4x1xf32> to vector<1x4x1xf32>
    %207 = vector.broadcast %206 : vector<1x4x1xf32> to vector<6x4x61xf32>
    %208 = arith.mulf %205, %207 : vector<6x4x61xf32>
    %209 = arith.addf %202, %208 : vector<6x4x61xf32>
    %210 = vector.extract_strided_slice %2 {offsets = [21, 0, 0], sizes = [1, 4, 1], strides = [1, 1, 1]} : vector<45x4x1xf32> to vector<1x4x1xf32>
    %211 = vector.shape_cast %210 : vector<1x4x1xf32> to vector<4x1xf32>
    %212 = vector.extract_strided_slice %188 {offsets = [0, 0, 9], sizes = [6, 4, 61], strides = [1, 1, 1]} : vector<6x4x81xf32> to vector<6x4x61xf32>
    %213 = vector.shape_cast %211 : vector<4x1xf32> to vector<1x4x1xf32>
    %214 = vector.broadcast %213 : vector<1x4x1xf32> to vector<6x4x61xf32>
    %215 = arith.mulf %212, %214 : vector<6x4x61xf32>
    %216 = arith.addf %209, %215 : vector<6x4x61xf32>
    %217 = vector.extract_strided_slice %2 {offsets = [22, 0, 0], sizes = [1, 4, 1], strides = [1, 1, 1]} : vector<45x4x1xf32> to vector<1x4x1xf32>
    %218 = vector.shape_cast %217 : vector<1x4x1xf32> to vector<4x1xf32>
    %219 = vector.extract_strided_slice %188 {offsets = [0, 0, 10], sizes = [6, 4, 61], strides = [1, 1, 1]} : vector<6x4x81xf32> to vector<6x4x61xf32>
    %220 = vector.shape_cast %218 : vector<4x1xf32> to vector<1x4x1xf32>
    %221 = vector.broadcast %220 : vector<1x4x1xf32> to vector<6x4x61xf32>
    %222 = arith.mulf %219, %221 : vector<6x4x61xf32>
    %223 = arith.addf %216, %222 : vector<6x4x61xf32>
    %224 = vector.extract_strided_slice %2 {offsets = [23, 0, 0], sizes = [1, 4, 1], strides = [1, 1, 1]} : vector<45x4x1xf32> to vector<1x4x1xf32>
    %225 = vector.shape_cast %224 : vector<1x4x1xf32> to vector<4x1xf32>
    %226 = vector.extract_strided_slice %188 {offsets = [0, 0, 11], sizes = [6, 4, 61], strides = [1, 1, 1]} : vector<6x4x81xf32> to vector<6x4x61xf32>
    %227 = vector.shape_cast %225 : vector<4x1xf32> to vector<1x4x1xf32>
    %228 = vector.broadcast %227 : vector<1x4x1xf32> to vector<6x4x61xf32>
    %229 = arith.mulf %226, %228 : vector<6x4x61xf32>
    %230 = arith.addf %223, %229 : vector<6x4x61xf32>
    %231 = vector.extract_strided_slice %2 {offsets = [24, 0, 0], sizes = [1, 4, 1], strides = [1, 1, 1]} : vector<45x4x1xf32> to vector<1x4x1xf32>
    %232 = vector.shape_cast %231 : vector<1x4x1xf32> to vector<4x1xf32>
    %233 = vector.extract_strided_slice %188 {offsets = [0, 0, 18], sizes = [6, 4, 61], strides = [1, 1, 1]} : vector<6x4x81xf32> to vector<6x4x61xf32>
    %234 = vector.shape_cast %232 : vector<4x1xf32> to vector<1x4x1xf32>
    %235 = vector.broadcast %234 : vector<1x4x1xf32> to vector<6x4x61xf32>
    %236 = arith.mulf %233, %235 : vector<6x4x61xf32>
    %237 = arith.addf %230, %236 : vector<6x4x61xf32>
    %238 = vector.extract_strided_slice %2 {offsets = [25, 0, 0], sizes = [1, 4, 1], strides = [1, 1, 1]} : vector<45x4x1xf32> to vector<1x4x1xf32>
    %239 = vector.shape_cast %238 : vector<1x4x1xf32> to vector<4x1xf32>
    %240 = vector.extract_strided_slice %188 {offsets = [0, 0, 19], sizes = [6, 4, 61], strides = [1, 1, 1]} : vector<6x4x81xf32> to vector<6x4x61xf32>
    %241 = vector.shape_cast %239 : vector<4x1xf32> to vector<1x4x1xf32>
    %242 = vector.broadcast %241 : vector<1x4x1xf32> to vector<6x4x61xf32>
    %243 = arith.mulf %240, %242 : vector<6x4x61xf32>
    %244 = arith.addf %237, %243 : vector<6x4x61xf32>
    %245 = vector.extract_strided_slice %2 {offsets = [26, 0, 0], sizes = [1, 4, 1], strides = [1, 1, 1]} : vector<45x4x1xf32> to vector<1x4x1xf32>
    %246 = vector.shape_cast %245 : vector<1x4x1xf32> to vector<4x1xf32>
    %247 = vector.extract_strided_slice %188 {offsets = [0, 0, 20], sizes = [6, 4, 61], strides = [1, 1, 1]} : vector<6x4x81xf32> to vector<6x4x61xf32>
    %248 = vector.shape_cast %246 : vector<4x1xf32> to vector<1x4x1xf32>
    %249 = vector.broadcast %248 : vector<1x4x1xf32> to vector<6x4x61xf32>
    %250 = arith.mulf %247, %249 : vector<6x4x61xf32>
    %251 = arith.addf %244, %250 : vector<6x4x61xf32>
    %252 = vector.extract_strided_slice %1 {offsets = [1, 0, 0], sizes = [1, 4, 81], strides = [1, 1, 1]} : vector<16x4x81xf32> to vector<1x4x81xf32>
    %253 = vector.shape_cast %252 : vector<1x4x81xf32> to vector<4x81xf32>
    %254 = vector.extract_strided_slice %1 {offsets = [4, 0, 0], sizes = [1, 4, 81], strides = [1, 1, 1]} : vector<16x4x81xf32> to vector<1x4x81xf32>
    %255 = vector.shape_cast %254 : vector<1x4x81xf32> to vector<4x81xf32>
    %256 = vector.extract_strided_slice %1 {offsets = [7, 0, 0], sizes = [1, 4, 81], strides = [1, 1, 1]} : vector<16x4x81xf32> to vector<1x4x81xf32>
    %257 = vector.shape_cast %256 : vector<1x4x81xf32> to vector<4x81xf32>
    %258 = vector.extract_strided_slice %1 {offsets = [10, 0, 0], sizes = [1, 4, 81], strides = [1, 1, 1]} : vector<16x4x81xf32> to vector<1x4x81xf32>
    %259 = vector.shape_cast %258 : vector<1x4x81xf32> to vector<4x81xf32>
    %260 = vector.extract_strided_slice %1 {offsets = [13, 0, 0], sizes = [1, 4, 81], strides = [1, 1, 1]} : vector<16x4x81xf32> to vector<1x4x81xf32>
    %261 = vector.shape_cast %260 : vector<1x4x81xf32> to vector<4x81xf32>
    %262 = vector.shape_cast %253 : vector<4x81xf32> to vector<1x4x81xf32>
    %263 = vector.shape_cast %255 : vector<4x81xf32> to vector<1x4x81xf32>
    %264 = vector.shape_cast %257 : vector<4x81xf32> to vector<1x4x81xf32>
    %265 = vector.shape_cast %259 : vector<4x81xf32> to vector<1x4x81xf32>
    %266 = vector.shape_cast %261 : vector<4x81xf32> to vector<1x4x81xf32>
    %267 = vector.shape_cast %8 : vector<4x81xf32> to vector<1x4x81xf32>
    %268 = tpu.concatenate %262, %263, %264, %265, %266, %267 in 0 : vector<1x4x81xf32>, vector<1x4x81xf32>, vector<1x4x81xf32>, vector<1x4x81xf32>, vector<1x4x81xf32>, vector<1x4x81xf32> -> vector<6x4x81xf32>
    %269 = vector.extract_strided_slice %2 {offsets = [27, 0, 0], sizes = [1, 4, 1], strides = [1, 1, 1]} : vector<45x4x1xf32> to vector<1x4x1xf32>
    %270 = vector.shape_cast %269 : vector<1x4x1xf32> to vector<4x1xf32>
    %271 = vector.extract_strided_slice %268 {offsets = [0, 0, 0], sizes = [6, 4, 61], strides = [1, 1, 1]} : vector<6x4x81xf32> to vector<6x4x61xf32>
    %272 = vector.shape_cast %270 : vector<4x1xf32> to vector<1x4x1xf32>
    %273 = vector.broadcast %272 : vector<1x4x1xf32> to vector<6x4x61xf32>
    %274 = arith.mulf %271, %273 : vector<6x4x61xf32>
    %275 = arith.addf %251, %274 : vector<6x4x61xf32>
    %276 = vector.extract_strided_slice %2 {offsets = [28, 0, 0], sizes = [1, 4, 1], strides = [1, 1, 1]} : vector<45x4x1xf32> to vector<1x4x1xf32>
    %277 = vector.shape_cast %276 : vector<1x4x1xf32> to vector<4x1xf32>
    %278 = vector.extract_strided_slice %268 {offsets = [0, 0, 1], sizes = [6, 4, 61], strides = [1, 1, 1]} : vector<6x4x81xf32> to vector<6x4x61xf32>
    %279 = vector.shape_cast %277 : vector<4x1xf32> to vector<1x4x1xf32>
    %280 = vector.broadcast %279 : vector<1x4x1xf32> to vector<6x4x61xf32>
    %281 = arith.mulf %278, %280 : vector<6x4x61xf32>
    %282 = arith.addf %275, %281 : vector<6x4x61xf32>
    %283 = vector.extract_strided_slice %2 {offsets = [29, 0, 0], sizes = [1, 4, 1], strides = [1, 1, 1]} : vector<45x4x1xf32> to vector<1x4x1xf32>
    %284 = vector.shape_cast %283 : vector<1x4x1xf32> to vector<4x1xf32>
    %285 = vector.extract_strided_slice %268 {offsets = [0, 0, 2], sizes = [6, 4, 61], strides = [1, 1, 1]} : vector<6x4x81xf32> to vector<6x4x61xf32>
    %286 = vector.shape_cast %284 : vector<4x1xf32> to vector<1x4x1xf32>
    %287 = vector.broadcast %286 : vector<1x4x1xf32> to vector<6x4x61xf32>
    %288 = arith.mulf %285, %287 : vector<6x4x61xf32>
    %289 = arith.addf %282, %288 : vector<6x4x61xf32>
    %290 = vector.extract_strided_slice %2 {offsets = [30, 0, 0], sizes = [1, 4, 1], strides = [1, 1, 1]} : vector<45x4x1xf32> to vector<1x4x1xf32>
    %291 = vector.shape_cast %290 : vector<1x4x1xf32> to vector<4x1xf32>
    %292 = vector.extract_strided_slice %268 {offsets = [0, 0, 9], sizes = [6, 4, 61], strides = [1, 1, 1]} : vector<6x4x81xf32> to vector<6x4x61xf32>
    %293 = vector.shape_cast %291 : vector<4x1xf32> to vector<1x4x1xf32>
    %294 = vector.broadcast %293 : vector<1x4x1xf32> to vector<6x4x61xf32>
    %295 = arith.mulf %292, %294 : vector<6x4x61xf32>
    %296 = arith.addf %289, %295 : vector<6x4x61xf32>
    %297 = vector.extract_strided_slice %2 {offsets = [31, 0, 0], sizes = [1, 4, 1], strides = [1, 1, 1]} : vector<45x4x1xf32> to vector<1x4x1xf32>
    %298 = vector.shape_cast %297 : vector<1x4x1xf32> to vector<4x1xf32>
    %299 = vector.extract_strided_slice %268 {offsets = [0, 0, 10], sizes = [6, 4, 61], strides = [1, 1, 1]} : vector<6x4x81xf32> to vector<6x4x61xf32>
    %300 = vector.shape_cast %298 : vector<4x1xf32> to vector<1x4x1xf32>
    %301 = vector.broadcast %300 : vector<1x4x1xf32> to vector<6x4x61xf32>
    %302 = arith.mulf %299, %301 : vector<6x4x61xf32>
    %303 = arith.addf %296, %302 : vector<6x4x61xf32>
    %304 = vector.extract_strided_slice %2 {offsets = [32, 0, 0], sizes = [1, 4, 1], strides = [1, 1, 1]} : vector<45x4x1xf32> to vector<1x4x1xf32>
    %305 = vector.shape_cast %304 : vector<1x4x1xf32> to vector<4x1xf32>
    %306 = vector.extract_strided_slice %268 {offsets = [0, 0, 11], sizes = [6, 4, 61], strides = [1, 1, 1]} : vector<6x4x81xf32> to vector<6x4x61xf32>
    %307 = vector.shape_cast %305 : vector<4x1xf32> to vector<1x4x1xf32>
    %308 = vector.broadcast %307 : vector<1x4x1xf32> to vector<6x4x61xf32>
    %309 = arith.mulf %306, %308 : vector<6x4x61xf32>
    %310 = arith.addf %303, %309 : vector<6x4x61xf32>
    %311 = vector.extract_strided_slice %2 {offsets = [33, 0, 0], sizes = [1, 4, 1], strides = [1, 1, 1]} : vector<45x4x1xf32> to vector<1x4x1xf32>
    %312 = vector.shape_cast %311 : vector<1x4x1xf32> to vector<4x1xf32>
    %313 = vector.extract_strided_slice %268 {offsets = [0, 0, 18], sizes = [6, 4, 61], strides = [1, 1, 1]} : vector<6x4x81xf32> to vector<6x4x61xf32>
    %314 = vector.shape_cast %312 : vector<4x1xf32> to vector<1x4x1xf32>
    %315 = vector.broadcast %314 : vector<1x4x1xf32> to vector<6x4x61xf32>
    %316 = arith.mulf %313, %315 : vector<6x4x61xf32>
    %317 = arith.addf %310, %316 : vector<6x4x61xf32>
    %318 = vector.extract_strided_slice %2 {offsets = [34, 0, 0], sizes = [1, 4, 1], strides = [1, 1, 1]} : vector<45x4x1xf32> to vector<1x4x1xf32>
    %319 = vector.shape_cast %318 : vector<1x4x1xf32> to vector<4x1xf32>
    %320 = vector.extract_strided_slice %268 {offsets = [0, 0, 19], sizes = [6, 4, 61], strides = [1, 1, 1]} : vector<6x4x81xf32> to vector<6x4x61xf32>
    %321 = vector.shape_cast %319 : vector<4x1xf32> to vector<1x4x1xf32>
    %322 = vector.broadcast %321 : vector<1x4x1xf32> to vector<6x4x61xf32>
    %323 = arith.mulf %320, %322 : vector<6x4x61xf32>
    %324 = arith.addf %317, %323 : vector<6x4x61xf32>
    %325 = vector.extract_strided_slice %2 {offsets = [35, 0, 0], sizes = [1, 4, 1], strides = [1, 1, 1]} : vector<45x4x1xf32> to vector<1x4x1xf32>
    %326 = vector.shape_cast %325 : vector<1x4x1xf32> to vector<4x1xf32>
    %327 = vector.extract_strided_slice %268 {offsets = [0, 0, 20], sizes = [6, 4, 61], strides = [1, 1, 1]} : vector<6x4x81xf32> to vector<6x4x61xf32>
    %328 = vector.shape_cast %326 : vector<4x1xf32> to vector<1x4x1xf32>
    %329 = vector.broadcast %328 : vector<1x4x1xf32> to vector<6x4x61xf32>
    %330 = arith.mulf %327, %329 : vector<6x4x61xf32>
    %331 = arith.addf %324, %330 : vector<6x4x61xf32>
    %332 = vector.extract_strided_slice %1 {offsets = [2, 0, 0], sizes = [1, 4, 81], strides = [1, 1, 1]} : vector<16x4x81xf32> to vector<1x4x81xf32>
    %333 = vector.shape_cast %332 : vector<1x4x81xf32> to vector<4x81xf32>
    %334 = vector.extract_strided_slice %1 {offsets = [5, 0, 0], sizes = [1, 4, 81], strides = [1, 1, 1]} : vector<16x4x81xf32> to vector<1x4x81xf32>
    %335 = vector.shape_cast %334 : vector<1x4x81xf32> to vector<4x81xf32>
    %336 = vector.extract_strided_slice %1 {offsets = [8, 0, 0], sizes = [1, 4, 81], strides = [1, 1, 1]} : vector<16x4x81xf32> to vector<1x4x81xf32>
    %337 = vector.shape_cast %336 : vector<1x4x81xf32> to vector<4x81xf32>
    %338 = vector.extract_strided_slice %1 {offsets = [11, 0, 0], sizes = [1, 4, 81], strides = [1, 1, 1]} : vector<16x4x81xf32> to vector<1x4x81xf32>
    %339 = vector.shape_cast %338 : vector<1x4x81xf32> to vector<4x81xf32>
    %340 = vector.extract_strided_slice %1 {offsets = [14, 0, 0], sizes = [1, 4, 81], strides = [1, 1, 1]} : vector<16x4x81xf32> to vector<1x4x81xf32>
    %341 = vector.shape_cast %340 : vector<1x4x81xf32> to vector<4x81xf32>
    %342 = vector.shape_cast %333 : vector<4x81xf32> to vector<1x4x81xf32>
    %343 = vector.shape_cast %335 : vector<4x81xf32> to vector<1x4x81xf32>
    %344 = vector.shape_cast %337 : vector<4x81xf32> to vector<1x4x81xf32>
    %345 = vector.shape_cast %339 : vector<4x81xf32> to vector<1x4x81xf32>
    %346 = vector.shape_cast %341 : vector<4x81xf32> to vector<1x4x81xf32>
    %347 = vector.shape_cast %8 : vector<4x81xf32> to vector<1x4x81xf32>
    %348 = tpu.concatenate %342, %343, %344, %345, %346, %347 in 0 : vector<1x4x81xf32>, vector<1x4x81xf32>, vector<1x4x81xf32>, vector<1x4x81xf32>, vector<1x4x81xf32>, vector<1x4x81xf32> -> vector<6x4x81xf32>
    %349 = vector.extract_strided_slice %2 {offsets = [36, 0, 0], sizes = [1, 4, 1], strides = [1, 1, 1]} : vector<45x4x1xf32> to vector<1x4x1xf32>
    %350 = vector.shape_cast %349 : vector<1x4x1xf32> to vector<4x1xf32>
    %351 = vector.extract_strided_slice %348 {offsets = [0, 0, 0], sizes = [6, 4, 61], strides = [1, 1, 1]} : vector<6x4x81xf32> to vector<6x4x61xf32>
    %352 = vector.shape_cast %350 : vector<4x1xf32> to vector<1x4x1xf32>
    %353 = vector.broadcast %352 : vector<1x4x1xf32> to vector<6x4x61xf32>
    %354 = arith.mulf %351, %353 : vector<6x4x61xf32>
    %355 = arith.addf %331, %354 : vector<6x4x61xf32>
    %356 = vector.extract_strided_slice %2 {offsets = [37, 0, 0], sizes = [1, 4, 1], strides = [1, 1, 1]} : vector<45x4x1xf32> to vector<1x4x1xf32>
    %357 = vector.shape_cast %356 : vector<1x4x1xf32> to vector<4x1xf32>
    %358 = vector.extract_strided_slice %348 {offsets = [0, 0, 1], sizes = [6, 4, 61], strides = [1, 1, 1]} : vector<6x4x81xf32> to vector<6x4x61xf32>
    %359 = vector.shape_cast %357 : vector<4x1xf32> to vector<1x4x1xf32>
    %360 = vector.broadcast %359 : vector<1x4x1xf32> to vector<6x4x61xf32>
    %361 = arith.mulf %358, %360 : vector<6x4x61xf32>
    %362 = arith.addf %355, %361 : vector<6x4x61xf32>
    %363 = vector.extract_strided_slice %2 {offsets = [38, 0, 0], sizes = [1, 4, 1], strides = [1, 1, 1]} : vector<45x4x1xf32> to vector<1x4x1xf32>
    %364 = vector.shape_cast %363 : vector<1x4x1xf32> to vector<4x1xf32>
    %365 = vector.extract_strided_slice %348 {offsets = [0, 0, 2], sizes = [6, 4, 61], strides = [1, 1, 1]} : vector<6x4x81xf32> to vector<6x4x61xf32>
    %366 = vector.shape_cast %364 : vector<4x1xf32> to vector<1x4x1xf32>
    %367 = vector.broadcast %366 : vector<1x4x1xf32> to vector<6x4x61xf32>
    %368 = arith.mulf %365, %367 : vector<6x4x61xf32>
    %369 = arith.addf %362, %368 : vector<6x4x61xf32>
    %370 = vector.extract_strided_slice %2 {offsets = [39, 0, 0], sizes = [1, 4, 1], strides = [1, 1, 1]} : vector<45x4x1xf32> to vector<1x4x1xf32>
    %371 = vector.shape_cast %370 : vector<1x4x1xf32> to vector<4x1xf32>
    %372 = vector.extract_strided_slice %348 {offsets = [0, 0, 9], sizes = [6, 4, 61], strides = [1, 1, 1]} : vector<6x4x81xf32> to vector<6x4x61xf32>
    %373 = vector.shape_cast %371 : vector<4x1xf32> to vector<1x4x1xf32>
    %374 = vector.broadcast %373 : vector<1x4x1xf32> to vector<6x4x61xf32>
    %375 = arith.mulf %372, %374 : vector<6x4x61xf32>
    %376 = arith.addf %369, %375 : vector<6x4x61xf32>
    %377 = vector.extract_strided_slice %2 {offsets = [40, 0, 0], sizes = [1, 4, 1], strides = [1, 1, 1]} : vector<45x4x1xf32> to vector<1x4x1xf32>
    %378 = vector.shape_cast %377 : vector<1x4x1xf32> to vector<4x1xf32>
    %379 = vector.extract_strided_slice %348 {offsets = [0, 0, 10], sizes = [6, 4, 61], strides = [1, 1, 1]} : vector<6x4x81xf32> to vector<6x4x61xf32>
    %380 = vector.shape_cast %378 : vector<4x1xf32> to vector<1x4x1xf32>
    %381 = vector.broadcast %380 : vector<1x4x1xf32> to vector<6x4x61xf32>
    %382 = arith.mulf %379, %381 : vector<6x4x61xf32>
    %383 = arith.addf %376, %382 : vector<6x4x61xf32>
    %384 = vector.extract_strided_slice %2 {offsets = [41, 0, 0], sizes = [1, 4, 1], strides = [1, 1, 1]} : vector<45x4x1xf32> to vector<1x4x1xf32>
    %385 = vector.shape_cast %384 : vector<1x4x1xf32> to vector<4x1xf32>
    %386 = vector.extract_strided_slice %348 {offsets = [0, 0, 11], sizes = [6, 4, 61], strides = [1, 1, 1]} : vector<6x4x81xf32> to vector<6x4x61xf32>
    %387 = vector.shape_cast %385 : vector<4x1xf32> to vector<1x4x1xf32>
    %388 = vector.broadcast %387 : vector<1x4x1xf32> to vector<6x4x61xf32>
    %389 = arith.mulf %386, %388 : vector<6x4x61xf32>
    %390 = arith.addf %383, %389 : vector<6x4x61xf32>
    %391 = vector.extract_strided_slice %2 {offsets = [42, 0, 0], sizes = [1, 4, 1], strides = [1, 1, 1]} : vector<45x4x1xf32> to vector<1x4x1xf32>
    %392 = vector.shape_cast %391 : vector<1x4x1xf32> to vector<4x1xf32>
    %393 = vector.extract_strided_slice %348 {offsets = [0, 0, 18], sizes = [6, 4, 61], strides = [1, 1, 1]} : vector<6x4x81xf32> to vector<6x4x61xf32>
    %394 = vector.shape_cast %392 : vector<4x1xf32> to vector<1x4x1xf32>
    %395 = vector.broadcast %394 : vector<1x4x1xf32> to vector<6x4x61xf32>
    %396 = arith.mulf %393, %395 : vector<6x4x61xf32>
    %397 = arith.addf %390, %396 : vector<6x4x61xf32>
    %398 = vector.extract_strided_slice %2 {offsets = [43, 0, 0], sizes = [1, 4, 1], strides = [1, 1, 1]} : vector<45x4x1xf32> to vector<1x4x1xf32>
    %399 = vector.shape_cast %398 : vector<1x4x1xf32> to vector<4x1xf32>
    %400 = vector.extract_strided_slice %348 {offsets = [0, 0, 19], sizes = [6, 4, 61], strides = [1, 1, 1]} : vector<6x4x81xf32> to vector<6x4x61xf32>
    %401 = vector.shape_cast %399 : vector<4x1xf32> to vector<1x4x1xf32>
    %402 = vector.broadcast %401 : vector<1x4x1xf32> to vector<6x4x61xf32>
    %403 = arith.mulf %400, %402 : vector<6x4x61xf32>
    %404 = arith.addf %397, %403 : vector<6x4x61xf32>
    %405 = vector.extract_strided_slice %2 {offsets = [44, 0, 0], sizes = [1, 4, 1], strides = [1, 1, 1]} : vector<45x4x1xf32> to vector<1x4x1xf32>
    %406 = vector.shape_cast %405 : vector<1x4x1xf32> to vector<4x1xf32>
    %407 = vector.extract_strided_slice %348 {offsets = [0, 0, 20], sizes = [6, 4, 61], strides = [1, 1, 1]} : vector<6x4x81xf32> to vector<6x4x61xf32>
    %408 = vector.shape_cast %406 : vector<4x1xf32> to vector<1x4x1xf32>
    %409 = vector.broadcast %408 : vector<1x4x1xf32> to vector<6x4x61xf32>
    %410 = arith.mulf %407, %409 : vector<6x4x61xf32>
    %411 = arith.addf %404, %410 : vector<6x4x61xf32>
    %412 = vector.shape_cast %3 : vector<4x1xf32> to vector<1x4x1xf32>
    %413 = vector.broadcast %412 : vector<1x4x1xf32> to vector<6x4x61xf32>
    %414 = arith.addf %411, %413 : vector<6x4x61xf32>
    %cst_18 = arith.constant 0.000000e+00 : f32
    %415 = vector.broadcast %cst_18 : f32 to vector<6x8x61xf32>
    %416 = vector.extract_strided_slice %414 {offsets = [0, 0, 0], sizes = [6, 1, 61], strides = [1, 1, 1]} : vector<6x4x61xf32> to vector<6x1x61xf32>
    %417 = vector.extract_strided_slice %4 {offsets = [0, 0, 0], sizes = [1, 8, 1], strides = [1, 1, 1]} : vector<4x8x1xf32> to vector<1x8x1xf32>
    %418 = vector.shape_cast %417 : vector<1x8x1xf32> to vector<8x1xf32>
    %419 = vector.shape_cast %418 : vector<8x1xf32> to vector<1x8x1xf32>
    %420 = vector.broadcast %416 : vector<6x1x61xf32> to vector<6x8x61xf32>
    %421 = vector.broadcast %419 : vector<1x8x1xf32> to vector<6x8x61xf32>
    %422 = arith.mulf %420, %421 : vector<6x8x61xf32>
    %423 = arith.addf %415, %422 : vector<6x8x61xf32>
    %424 = vector.extract_strided_slice %414 {offsets = [0, 1, 0], sizes = [6, 1, 61], strides = [1, 1, 1]} : vector<6x4x61xf32> to vector<6x1x61xf32>
    %425 = vector.extract_strided_slice %4 {offsets = [1, 0, 0], sizes = [1, 8, 1], strides = [1, 1, 1]} : vector<4x8x1xf32> to vector<1x8x1xf32>
    %426 = vector.shape_cast %425 : vector<1x8x1xf32> to vector<8x1xf32>
    %427 = vector.shape_cast %426 : vector<8x1xf32> to vector<1x8x1xf32>
    %428 = vector.broadcast %424 : vector<6x1x61xf32> to vector<6x8x61xf32>
    %429 = vector.broadcast %427 : vector<1x8x1xf32> to vector<6x8x61xf32>
    %430 = arith.mulf %428, %429 : vector<6x8x61xf32>
    %431 = arith.addf %423, %430 : vector<6x8x61xf32>
    %432 = vector.extract_strided_slice %414 {offsets = [0, 2, 0], sizes = [6, 1, 61], strides = [1, 1, 1]} : vector<6x4x61xf32> to vector<6x1x61xf32>
    %433 = vector.extract_strided_slice %4 {offsets = [2, 0, 0], sizes = [1, 8, 1], strides = [1, 1, 1]} : vector<4x8x1xf32> to vector<1x8x1xf32>
    %434 = vector.shape_cast %433 : vector<1x8x1xf32> to vector<8x1xf32>
    %435 = vector.shape_cast %434 : vector<8x1xf32> to vector<1x8x1xf32>
    %436 = vector.broadcast %432 : vector<6x1x61xf32> to vector<6x8x61xf32>
    %437 = vector.broadcast %435 : vector<1x8x1xf32> to vector<6x8x61xf32>
    %438 = arith.mulf %436, %437 : vector<6x8x61xf32>
    %439 = arith.addf %431, %438 : vector<6x8x61xf32>
    %440 = vector.extract_strided_slice %414 {offsets = [0, 3, 0], sizes = [6, 1, 61], strides = [1, 1, 1]} : vector<6x4x61xf32> to vector<6x1x61xf32>
    %441 = vector.extract_strided_slice %4 {offsets = [3, 0, 0], sizes = [1, 8, 1], strides = [1, 1, 1]} : vector<4x8x1xf32> to vector<1x8x1xf32>
    %442 = vector.shape_cast %441 : vector<1x8x1xf32> to vector<8x1xf32>
    %443 = vector.shape_cast %442 : vector<8x1xf32> to vector<1x8x1xf32>
    %444 = vector.broadcast %440 : vector<6x1x61xf32> to vector<6x8x61xf32>
    %445 = vector.broadcast %443 : vector<1x8x1xf32> to vector<6x8x61xf32>
    %446 = arith.mulf %444, %445 : vector<6x8x61xf32>
    %447 = arith.addf %439, %446 : vector<6x8x61xf32>
    %448 = vector.shape_cast %5 : vector<8x1xf32> to vector<1x8x1xf32>
    %449 = vector.broadcast %448 : vector<1x8x1xf32> to vector<6x8x61xf32>
    %450 = arith.addf %447, %449 : vector<6x8x61xf32>
    %cst_19 = arith.constant 0.000000e+00 : f32
    %451 = vector.broadcast %cst_19 : f32 to vector<6x8x61xf32>
    %452 = arith.maximumf %450, %451 : vector<6x8x61xf32>
    %453 = vector.shape_cast %6 : vector<8x1xf32> to vector<1x8x1xf32>
    %454 = vector.broadcast %453 : vector<1x8x1xf32> to vector<6x8x61xf32>
    %455 = arith.mulf %452, %454 : vector<6x8x61xf32>
    %456 = vector.shape_cast %7 : vector<8x1xf32> to vector<1x8x1xf32>
    %457 = vector.broadcast %456 : vector<1x8x1xf32> to vector<6x8x61xf32>
    %458 = arith.addf %455, %457 : vector<6x8x61xf32>
    %c0_20 = arith.constant 0 : index
    %c0_21 = arith.constant 0 : index
    %c0_22 = arith.constant 0 : index
    %459 = vector.load %arg8[%c0_20, %c0_21, %c0_22] : memref<45x8x1xf32, #tpu.memory_space<vmem>>, vector<45x8x1xf32>
    %c0_23 = arith.constant 0 : index
    %c0_24 = arith.constant 0 : index
    %460 = vector.load %arg9[%c0_23, %c0_24] : memref<8x1xf32, #tpu.memory_space<vmem>>, vector<8x1xf32>
    %c0_25 = arith.constant 0 : index
    %c0_26 = arith.constant 0 : index
    %c0_27 = arith.constant 0 : index
    %461 = vector.load %arg10[%c0_25, %c0_26, %c0_27] : memref<8x8x1xf32, #tpu.memory_space<vmem>>, vector<8x8x1xf32>
    %c0_28 = arith.constant 0 : index
    %c0_29 = arith.constant 0 : index
    %462 = vector.load %arg11[%c0_28, %c0_29] : memref<8x1xf32, #tpu.memory_space<vmem>>, vector<8x1xf32>
    %c0_30 = arith.constant 0 : index
    %c0_31 = arith.constant 0 : index
    %463 = vector.load %arg12[%c0_30, %c0_31] : memref<8x1xf32, #tpu.memory_space<vmem>>, vector<8x1xf32>
    %c0_32 = arith.constant 0 : index
    %c0_33 = arith.constant 0 : index
    %464 = vector.load %arg13[%c0_32, %c0_33] : memref<8x1xf32, #tpu.memory_space<vmem>>, vector<8x1xf32>
    %cst_34 = arith.constant 0.000000e+00 : f32
    %465 = vector.broadcast %cst_34 : f32 to vector<8x61xf32>
    %cst_35 = arith.constant 0.000000e+00 : f32
    %466 = vector.broadcast %cst_35 : f32 to vector<2x8x41xf32>
    %467 = vector.extract_strided_slice %458 {offsets = [2, 0, 0], sizes = [1, 8, 61], strides = [1, 1, 1]} : vector<6x8x61xf32> to vector<1x8x61xf32>
    %468 = vector.shape_cast %467 : vector<1x8x61xf32> to vector<8x61xf32>
    %469 = vector.shape_cast %465 : vector<8x61xf32> to vector<1x8x61xf32>
    %470 = vector.shape_cast %468 : vector<8x61xf32> to vector<1x8x61xf32>
    %471 = tpu.concatenate %469, %470 in 0 : vector<1x8x61xf32>, vector<1x8x61xf32> -> vector<2x8x61xf32>
    %472 = vector.extract_strided_slice %459 {offsets = [0, 0, 0], sizes = [1, 8, 1], strides = [1, 1, 1]} : vector<45x8x1xf32> to vector<1x8x1xf32>
    %473 = vector.shape_cast %472 : vector<1x8x1xf32> to vector<8x1xf32>
    %474 = vector.extract_strided_slice %471 {offsets = [0, 0, 0], sizes = [2, 8, 41], strides = [1, 1, 1]} : vector<2x8x61xf32> to vector<2x8x41xf32>
    %475 = vector.shape_cast %473 : vector<8x1xf32> to vector<1x8x1xf32>
    %476 = vector.broadcast %475 : vector<1x8x1xf32> to vector<2x8x41xf32>
    %477 = arith.mulf %474, %476 : vector<2x8x41xf32>
    %478 = arith.addf %466, %477 : vector<2x8x41xf32>
    %479 = vector.extract_strided_slice %459 {offsets = [1, 0, 0], sizes = [1, 8, 1], strides = [1, 1, 1]} : vector<45x8x1xf32> to vector<1x8x1xf32>
    %480 = vector.shape_cast %479 : vector<1x8x1xf32> to vector<8x1xf32>
    %481 = vector.extract_strided_slice %471 {offsets = [0, 0, 1], sizes = [2, 8, 41], strides = [1, 1, 1]} : vector<2x8x61xf32> to vector<2x8x41xf32>
    %482 = vector.shape_cast %480 : vector<8x1xf32> to vector<1x8x1xf32>
    %483 = vector.broadcast %482 : vector<1x8x1xf32> to vector<2x8x41xf32>
    %484 = arith.mulf %481, %483 : vector<2x8x41xf32>
    %485 = arith.addf %478, %484 : vector<2x8x41xf32>
    %486 = vector.extract_strided_slice %459 {offsets = [2, 0, 0], sizes = [1, 8, 1], strides = [1, 1, 1]} : vector<45x8x1xf32> to vector<1x8x1xf32>
    %487 = vector.shape_cast %486 : vector<1x8x1xf32> to vector<8x1xf32>
    %488 = vector.extract_strided_slice %471 {offsets = [0, 0, 2], sizes = [2, 8, 41], strides = [1, 1, 1]} : vector<2x8x61xf32> to vector<2x8x41xf32>
    %489 = vector.shape_cast %487 : vector<8x1xf32> to vector<1x8x1xf32>
    %490 = vector.broadcast %489 : vector<1x8x1xf32> to vector<2x8x41xf32>
    %491 = arith.mulf %488, %490 : vector<2x8x41xf32>
    %492 = arith.addf %485, %491 : vector<2x8x41xf32>
    %493 = vector.extract_strided_slice %459 {offsets = [3, 0, 0], sizes = [1, 8, 1], strides = [1, 1, 1]} : vector<45x8x1xf32> to vector<1x8x1xf32>
    %494 = vector.shape_cast %493 : vector<1x8x1xf32> to vector<8x1xf32>
    %495 = vector.extract_strided_slice %471 {offsets = [0, 0, 9], sizes = [2, 8, 41], strides = [1, 1, 1]} : vector<2x8x61xf32> to vector<2x8x41xf32>
    %496 = vector.shape_cast %494 : vector<8x1xf32> to vector<1x8x1xf32>
    %497 = vector.broadcast %496 : vector<1x8x1xf32> to vector<2x8x41xf32>
    %498 = arith.mulf %495, %497 : vector<2x8x41xf32>
    %499 = arith.addf %492, %498 : vector<2x8x41xf32>
    %500 = vector.extract_strided_slice %459 {offsets = [4, 0, 0], sizes = [1, 8, 1], strides = [1, 1, 1]} : vector<45x8x1xf32> to vector<1x8x1xf32>
    %501 = vector.shape_cast %500 : vector<1x8x1xf32> to vector<8x1xf32>
    %502 = vector.extract_strided_slice %471 {offsets = [0, 0, 10], sizes = [2, 8, 41], strides = [1, 1, 1]} : vector<2x8x61xf32> to vector<2x8x41xf32>
    %503 = vector.shape_cast %501 : vector<8x1xf32> to vector<1x8x1xf32>
    %504 = vector.broadcast %503 : vector<1x8x1xf32> to vector<2x8x41xf32>
    %505 = arith.mulf %502, %504 : vector<2x8x41xf32>
    %506 = arith.addf %499, %505 : vector<2x8x41xf32>
    %507 = vector.extract_strided_slice %459 {offsets = [5, 0, 0], sizes = [1, 8, 1], strides = [1, 1, 1]} : vector<45x8x1xf32> to vector<1x8x1xf32>
    %508 = vector.shape_cast %507 : vector<1x8x1xf32> to vector<8x1xf32>
    %509 = vector.extract_strided_slice %471 {offsets = [0, 0, 11], sizes = [2, 8, 41], strides = [1, 1, 1]} : vector<2x8x61xf32> to vector<2x8x41xf32>
    %510 = vector.shape_cast %508 : vector<8x1xf32> to vector<1x8x1xf32>
    %511 = vector.broadcast %510 : vector<1x8x1xf32> to vector<2x8x41xf32>
    %512 = arith.mulf %509, %511 : vector<2x8x41xf32>
    %513 = arith.addf %506, %512 : vector<2x8x41xf32>
    %514 = vector.extract_strided_slice %459 {offsets = [6, 0, 0], sizes = [1, 8, 1], strides = [1, 1, 1]} : vector<45x8x1xf32> to vector<1x8x1xf32>
    %515 = vector.shape_cast %514 : vector<1x8x1xf32> to vector<8x1xf32>
    %516 = vector.extract_strided_slice %471 {offsets = [0, 0, 18], sizes = [2, 8, 41], strides = [1, 1, 1]} : vector<2x8x61xf32> to vector<2x8x41xf32>
    %517 = vector.shape_cast %515 : vector<8x1xf32> to vector<1x8x1xf32>
    %518 = vector.broadcast %517 : vector<1x8x1xf32> to vector<2x8x41xf32>
    %519 = arith.mulf %516, %518 : vector<2x8x41xf32>
    %520 = arith.addf %513, %519 : vector<2x8x41xf32>
    %521 = vector.extract_strided_slice %459 {offsets = [7, 0, 0], sizes = [1, 8, 1], strides = [1, 1, 1]} : vector<45x8x1xf32> to vector<1x8x1xf32>
    %522 = vector.shape_cast %521 : vector<1x8x1xf32> to vector<8x1xf32>
    %523 = vector.extract_strided_slice %471 {offsets = [0, 0, 19], sizes = [2, 8, 41], strides = [1, 1, 1]} : vector<2x8x61xf32> to vector<2x8x41xf32>
    %524 = vector.shape_cast %522 : vector<8x1xf32> to vector<1x8x1xf32>
    %525 = vector.broadcast %524 : vector<1x8x1xf32> to vector<2x8x41xf32>
    %526 = arith.mulf %523, %525 : vector<2x8x41xf32>
    %527 = arith.addf %520, %526 : vector<2x8x41xf32>
    %528 = vector.extract_strided_slice %459 {offsets = [8, 0, 0], sizes = [1, 8, 1], strides = [1, 1, 1]} : vector<45x8x1xf32> to vector<1x8x1xf32>
    %529 = vector.shape_cast %528 : vector<1x8x1xf32> to vector<8x1xf32>
    %530 = vector.extract_strided_slice %471 {offsets = [0, 0, 20], sizes = [2, 8, 41], strides = [1, 1, 1]} : vector<2x8x61xf32> to vector<2x8x41xf32>
    %531 = vector.shape_cast %529 : vector<8x1xf32> to vector<1x8x1xf32>
    %532 = vector.broadcast %531 : vector<1x8x1xf32> to vector<2x8x41xf32>
    %533 = arith.mulf %530, %532 : vector<2x8x41xf32>
    %534 = arith.addf %527, %533 : vector<2x8x41xf32>
    %535 = vector.extract_strided_slice %458 {offsets = [0, 0, 0], sizes = [1, 8, 61], strides = [1, 1, 1]} : vector<6x8x61xf32> to vector<1x8x61xf32>
    %536 = vector.shape_cast %535 : vector<1x8x61xf32> to vector<8x61xf32>
    %537 = vector.extract_strided_slice %458 {offsets = [3, 0, 0], sizes = [1, 8, 61], strides = [1, 1, 1]} : vector<6x8x61xf32> to vector<1x8x61xf32>
    %538 = vector.shape_cast %537 : vector<1x8x61xf32> to vector<8x61xf32>
    %539 = vector.shape_cast %536 : vector<8x61xf32> to vector<1x8x61xf32>
    %540 = vector.shape_cast %538 : vector<8x61xf32> to vector<1x8x61xf32>
    %541 = tpu.concatenate %539, %540 in 0 : vector<1x8x61xf32>, vector<1x8x61xf32> -> vector<2x8x61xf32>
    %542 = vector.extract_strided_slice %459 {offsets = [9, 0, 0], sizes = [1, 8, 1], strides = [1, 1, 1]} : vector<45x8x1xf32> to vector<1x8x1xf32>
    %543 = vector.shape_cast %542 : vector<1x8x1xf32> to vector<8x1xf32>
    %544 = vector.extract_strided_slice %541 {offsets = [0, 0, 0], sizes = [2, 8, 41], strides = [1, 1, 1]} : vector<2x8x61xf32> to vector<2x8x41xf32>
    %545 = vector.shape_cast %543 : vector<8x1xf32> to vector<1x8x1xf32>
    %546 = vector.broadcast %545 : vector<1x8x1xf32> to vector<2x8x41xf32>
    %547 = arith.mulf %544, %546 : vector<2x8x41xf32>
    %548 = arith.addf %534, %547 : vector<2x8x41xf32>
    %549 = vector.extract_strided_slice %459 {offsets = [10, 0, 0], sizes = [1, 8, 1], strides = [1, 1, 1]} : vector<45x8x1xf32> to vector<1x8x1xf32>
    %550 = vector.shape_cast %549 : vector<1x8x1xf32> to vector<8x1xf32>
    %551 = vector.extract_strided_slice %541 {offsets = [0, 0, 1], sizes = [2, 8, 41], strides = [1, 1, 1]} : vector<2x8x61xf32> to vector<2x8x41xf32>
    %552 = vector.shape_cast %550 : vector<8x1xf32> to vector<1x8x1xf32>
    %553 = vector.broadcast %552 : vector<1x8x1xf32> to vector<2x8x41xf32>
    %554 = arith.mulf %551, %553 : vector<2x8x41xf32>
    %555 = arith.addf %548, %554 : vector<2x8x41xf32>
    %556 = vector.extract_strided_slice %459 {offsets = [11, 0, 0], sizes = [1, 8, 1], strides = [1, 1, 1]} : vector<45x8x1xf32> to vector<1x8x1xf32>
    %557 = vector.shape_cast %556 : vector<1x8x1xf32> to vector<8x1xf32>
    %558 = vector.extract_strided_slice %541 {offsets = [0, 0, 2], sizes = [2, 8, 41], strides = [1, 1, 1]} : vector<2x8x61xf32> to vector<2x8x41xf32>
    %559 = vector.shape_cast %557 : vector<8x1xf32> to vector<1x8x1xf32>
    %560 = vector.broadcast %559 : vector<1x8x1xf32> to vector<2x8x41xf32>
    %561 = arith.mulf %558, %560 : vector<2x8x41xf32>
    %562 = arith.addf %555, %561 : vector<2x8x41xf32>
    %563 = vector.extract_strided_slice %459 {offsets = [12, 0, 0], sizes = [1, 8, 1], strides = [1, 1, 1]} : vector<45x8x1xf32> to vector<1x8x1xf32>
    %564 = vector.shape_cast %563 : vector<1x8x1xf32> to vector<8x1xf32>
    %565 = vector.extract_strided_slice %541 {offsets = [0, 0, 9], sizes = [2, 8, 41], strides = [1, 1, 1]} : vector<2x8x61xf32> to vector<2x8x41xf32>
    %566 = vector.shape_cast %564 : vector<8x1xf32> to vector<1x8x1xf32>
    %567 = vector.broadcast %566 : vector<1x8x1xf32> to vector<2x8x41xf32>
    %568 = arith.mulf %565, %567 : vector<2x8x41xf32>
    %569 = arith.addf %562, %568 : vector<2x8x41xf32>
    %570 = vector.extract_strided_slice %459 {offsets = [13, 0, 0], sizes = [1, 8, 1], strides = [1, 1, 1]} : vector<45x8x1xf32> to vector<1x8x1xf32>
    %571 = vector.shape_cast %570 : vector<1x8x1xf32> to vector<8x1xf32>
    %572 = vector.extract_strided_slice %541 {offsets = [0, 0, 10], sizes = [2, 8, 41], strides = [1, 1, 1]} : vector<2x8x61xf32> to vector<2x8x41xf32>
    %573 = vector.shape_cast %571 : vector<8x1xf32> to vector<1x8x1xf32>
    %574 = vector.broadcast %573 : vector<1x8x1xf32> to vector<2x8x41xf32>
    %575 = arith.mulf %572, %574 : vector<2x8x41xf32>
    %576 = arith.addf %569, %575 : vector<2x8x41xf32>
    %577 = vector.extract_strided_slice %459 {offsets = [14, 0, 0], sizes = [1, 8, 1], strides = [1, 1, 1]} : vector<45x8x1xf32> to vector<1x8x1xf32>
    %578 = vector.shape_cast %577 : vector<1x8x1xf32> to vector<8x1xf32>
    %579 = vector.extract_strided_slice %541 {offsets = [0, 0, 11], sizes = [2, 8, 41], strides = [1, 1, 1]} : vector<2x8x61xf32> to vector<2x8x41xf32>
    %580 = vector.shape_cast %578 : vector<8x1xf32> to vector<1x8x1xf32>
    %581 = vector.broadcast %580 : vector<1x8x1xf32> to vector<2x8x41xf32>
    %582 = arith.mulf %579, %581 : vector<2x8x41xf32>
    %583 = arith.addf %576, %582 : vector<2x8x41xf32>
    %584 = vector.extract_strided_slice %459 {offsets = [15, 0, 0], sizes = [1, 8, 1], strides = [1, 1, 1]} : vector<45x8x1xf32> to vector<1x8x1xf32>
    %585 = vector.shape_cast %584 : vector<1x8x1xf32> to vector<8x1xf32>
    %586 = vector.extract_strided_slice %541 {offsets = [0, 0, 18], sizes = [2, 8, 41], strides = [1, 1, 1]} : vector<2x8x61xf32> to vector<2x8x41xf32>
    %587 = vector.shape_cast %585 : vector<8x1xf32> to vector<1x8x1xf32>
    %588 = vector.broadcast %587 : vector<1x8x1xf32> to vector<2x8x41xf32>
    %589 = arith.mulf %586, %588 : vector<2x8x41xf32>
    %590 = arith.addf %583, %589 : vector<2x8x41xf32>
    %591 = vector.extract_strided_slice %459 {offsets = [16, 0, 0], sizes = [1, 8, 1], strides = [1, 1, 1]} : vector<45x8x1xf32> to vector<1x8x1xf32>
    %592 = vector.shape_cast %591 : vector<1x8x1xf32> to vector<8x1xf32>
    %593 = vector.extract_strided_slice %541 {offsets = [0, 0, 19], sizes = [2, 8, 41], strides = [1, 1, 1]} : vector<2x8x61xf32> to vector<2x8x41xf32>
    %594 = vector.shape_cast %592 : vector<8x1xf32> to vector<1x8x1xf32>
    %595 = vector.broadcast %594 : vector<1x8x1xf32> to vector<2x8x41xf32>
    %596 = arith.mulf %593, %595 : vector<2x8x41xf32>
    %597 = arith.addf %590, %596 : vector<2x8x41xf32>
    %598 = vector.extract_strided_slice %459 {offsets = [17, 0, 0], sizes = [1, 8, 1], strides = [1, 1, 1]} : vector<45x8x1xf32> to vector<1x8x1xf32>
    %599 = vector.shape_cast %598 : vector<1x8x1xf32> to vector<8x1xf32>
    %600 = vector.extract_strided_slice %541 {offsets = [0, 0, 20], sizes = [2, 8, 41], strides = [1, 1, 1]} : vector<2x8x61xf32> to vector<2x8x41xf32>
    %601 = vector.shape_cast %599 : vector<8x1xf32> to vector<1x8x1xf32>
    %602 = vector.broadcast %601 : vector<1x8x1xf32> to vector<2x8x41xf32>
    %603 = arith.mulf %600, %602 : vector<2x8x41xf32>
    %604 = arith.addf %597, %603 : vector<2x8x41xf32>
    %605 = vector.extract_strided_slice %458 {offsets = [1, 0, 0], sizes = [1, 8, 61], strides = [1, 1, 1]} : vector<6x8x61xf32> to vector<1x8x61xf32>
    %606 = vector.shape_cast %605 : vector<1x8x61xf32> to vector<8x61xf32>
    %607 = vector.extract_strided_slice %458 {offsets = [4, 0, 0], sizes = [1, 8, 61], strides = [1, 1, 1]} : vector<6x8x61xf32> to vector<1x8x61xf32>
    %608 = vector.shape_cast %607 : vector<1x8x61xf32> to vector<8x61xf32>
    %609 = vector.shape_cast %606 : vector<8x61xf32> to vector<1x8x61xf32>
    %610 = vector.shape_cast %608 : vector<8x61xf32> to vector<1x8x61xf32>
    %611 = tpu.concatenate %609, %610 in 0 : vector<1x8x61xf32>, vector<1x8x61xf32> -> vector<2x8x61xf32>
    %612 = vector.extract_strided_slice %459 {offsets = [18, 0, 0], sizes = [1, 8, 1], strides = [1, 1, 1]} : vector<45x8x1xf32> to vector<1x8x1xf32>
    %613 = vector.shape_cast %612 : vector<1x8x1xf32> to vector<8x1xf32>
    %614 = vector.extract_strided_slice %611 {offsets = [0, 0, 0], sizes = [2, 8, 41], strides = [1, 1, 1]} : vector<2x8x61xf32> to vector<2x8x41xf32>
    %615 = vector.shape_cast %613 : vector<8x1xf32> to vector<1x8x1xf32>
    %616 = vector.broadcast %615 : vector<1x8x1xf32> to vector<2x8x41xf32>
    %617 = arith.mulf %614, %616 : vector<2x8x41xf32>
    %618 = arith.addf %604, %617 : vector<2x8x41xf32>
    %619 = vector.extract_strided_slice %459 {offsets = [19, 0, 0], sizes = [1, 8, 1], strides = [1, 1, 1]} : vector<45x8x1xf32> to vector<1x8x1xf32>
    %620 = vector.shape_cast %619 : vector<1x8x1xf32> to vector<8x1xf32>
    %621 = vector.extract_strided_slice %611 {offsets = [0, 0, 1], sizes = [2, 8, 41], strides = [1, 1, 1]} : vector<2x8x61xf32> to vector<2x8x41xf32>
    %622 = vector.shape_cast %620 : vector<8x1xf32> to vector<1x8x1xf32>
    %623 = vector.broadcast %622 : vector<1x8x1xf32> to vector<2x8x41xf32>
    %624 = arith.mulf %621, %623 : vector<2x8x41xf32>
    %625 = arith.addf %618, %624 : vector<2x8x41xf32>
    %626 = vector.extract_strided_slice %459 {offsets = [20, 0, 0], sizes = [1, 8, 1], strides = [1, 1, 1]} : vector<45x8x1xf32> to vector<1x8x1xf32>
    %627 = vector.shape_cast %626 : vector<1x8x1xf32> to vector<8x1xf32>
    %628 = vector.extract_strided_slice %611 {offsets = [0, 0, 2], sizes = [2, 8, 41], strides = [1, 1, 1]} : vector<2x8x61xf32> to vector<2x8x41xf32>
    %629 = vector.shape_cast %627 : vector<8x1xf32> to vector<1x8x1xf32>
    %630 = vector.broadcast %629 : vector<1x8x1xf32> to vector<2x8x41xf32>
    %631 = arith.mulf %628, %630 : vector<2x8x41xf32>
    %632 = arith.addf %625, %631 : vector<2x8x41xf32>
    %633 = vector.extract_strided_slice %459 {offsets = [21, 0, 0], sizes = [1, 8, 1], strides = [1, 1, 1]} : vector<45x8x1xf32> to vector<1x8x1xf32>
    %634 = vector.shape_cast %633 : vector<1x8x1xf32> to vector<8x1xf32>
    %635 = vector.extract_strided_slice %611 {offsets = [0, 0, 9], sizes = [2, 8, 41], strides = [1, 1, 1]} : vector<2x8x61xf32> to vector<2x8x41xf32>
    %636 = vector.shape_cast %634 : vector<8x1xf32> to vector<1x8x1xf32>
    %637 = vector.broadcast %636 : vector<1x8x1xf32> to vector<2x8x41xf32>
    %638 = arith.mulf %635, %637 : vector<2x8x41xf32>
    %639 = arith.addf %632, %638 : vector<2x8x41xf32>
    %640 = vector.extract_strided_slice %459 {offsets = [22, 0, 0], sizes = [1, 8, 1], strides = [1, 1, 1]} : vector<45x8x1xf32> to vector<1x8x1xf32>
    %641 = vector.shape_cast %640 : vector<1x8x1xf32> to vector<8x1xf32>
    %642 = vector.extract_strided_slice %611 {offsets = [0, 0, 10], sizes = [2, 8, 41], strides = [1, 1, 1]} : vector<2x8x61xf32> to vector<2x8x41xf32>
    %643 = vector.shape_cast %641 : vector<8x1xf32> to vector<1x8x1xf32>
    %644 = vector.broadcast %643 : vector<1x8x1xf32> to vector<2x8x41xf32>
    %645 = arith.mulf %642, %644 : vector<2x8x41xf32>
    %646 = arith.addf %639, %645 : vector<2x8x41xf32>
    %647 = vector.extract_strided_slice %459 {offsets = [23, 0, 0], sizes = [1, 8, 1], strides = [1, 1, 1]} : vector<45x8x1xf32> to vector<1x8x1xf32>
    %648 = vector.shape_cast %647 : vector<1x8x1xf32> to vector<8x1xf32>
    %649 = vector.extract_strided_slice %611 {offsets = [0, 0, 11], sizes = [2, 8, 41], strides = [1, 1, 1]} : vector<2x8x61xf32> to vector<2x8x41xf32>
    %650 = vector.shape_cast %648 : vector<8x1xf32> to vector<1x8x1xf32>
    %651 = vector.broadcast %650 : vector<1x8x1xf32> to vector<2x8x41xf32>
    %652 = arith.mulf %649, %651 : vector<2x8x41xf32>
    %653 = arith.addf %646, %652 : vector<2x8x41xf32>
    %654 = vector.extract_strided_slice %459 {offsets = [24, 0, 0], sizes = [1, 8, 1], strides = [1, 1, 1]} : vector<45x8x1xf32> to vector<1x8x1xf32>
    %655 = vector.shape_cast %654 : vector<1x8x1xf32> to vector<8x1xf32>
    %656 = vector.extract_strided_slice %611 {offsets = [0, 0, 18], sizes = [2, 8, 41], strides = [1, 1, 1]} : vector<2x8x61xf32> to vector<2x8x41xf32>
    %657 = vector.shape_cast %655 : vector<8x1xf32> to vector<1x8x1xf32>
    %658 = vector.broadcast %657 : vector<1x8x1xf32> to vector<2x8x41xf32>
    %659 = arith.mulf %656, %658 : vector<2x8x41xf32>
    %660 = arith.addf %653, %659 : vector<2x8x41xf32>
    %661 = vector.extract_strided_slice %459 {offsets = [25, 0, 0], sizes = [1, 8, 1], strides = [1, 1, 1]} : vector<45x8x1xf32> to vector<1x8x1xf32>
    %662 = vector.shape_cast %661 : vector<1x8x1xf32> to vector<8x1xf32>
    %663 = vector.extract_strided_slice %611 {offsets = [0, 0, 19], sizes = [2, 8, 41], strides = [1, 1, 1]} : vector<2x8x61xf32> to vector<2x8x41xf32>
    %664 = vector.shape_cast %662 : vector<8x1xf32> to vector<1x8x1xf32>
    %665 = vector.broadcast %664 : vector<1x8x1xf32> to vector<2x8x41xf32>
    %666 = arith.mulf %663, %665 : vector<2x8x41xf32>
    %667 = arith.addf %660, %666 : vector<2x8x41xf32>
    %668 = vector.extract_strided_slice %459 {offsets = [26, 0, 0], sizes = [1, 8, 1], strides = [1, 1, 1]} : vector<45x8x1xf32> to vector<1x8x1xf32>
    %669 = vector.shape_cast %668 : vector<1x8x1xf32> to vector<8x1xf32>
    %670 = vector.extract_strided_slice %611 {offsets = [0, 0, 20], sizes = [2, 8, 41], strides = [1, 1, 1]} : vector<2x8x61xf32> to vector<2x8x41xf32>
    %671 = vector.shape_cast %669 : vector<8x1xf32> to vector<1x8x1xf32>
    %672 = vector.broadcast %671 : vector<1x8x1xf32> to vector<2x8x41xf32>
    %673 = arith.mulf %670, %672 : vector<2x8x41xf32>
    %674 = arith.addf %667, %673 : vector<2x8x41xf32>
    %675 = vector.extract_strided_slice %458 {offsets = [2, 0, 0], sizes = [1, 8, 61], strides = [1, 1, 1]} : vector<6x8x61xf32> to vector<1x8x61xf32>
    %676 = vector.shape_cast %675 : vector<1x8x61xf32> to vector<8x61xf32>
    %677 = vector.extract_strided_slice %458 {offsets = [5, 0, 0], sizes = [1, 8, 61], strides = [1, 1, 1]} : vector<6x8x61xf32> to vector<1x8x61xf32>
    %678 = vector.shape_cast %677 : vector<1x8x61xf32> to vector<8x61xf32>
    %679 = vector.shape_cast %676 : vector<8x61xf32> to vector<1x8x61xf32>
    %680 = vector.shape_cast %678 : vector<8x61xf32> to vector<1x8x61xf32>
    %681 = tpu.concatenate %679, %680 in 0 : vector<1x8x61xf32>, vector<1x8x61xf32> -> vector<2x8x61xf32>
    %682 = vector.extract_strided_slice %459 {offsets = [27, 0, 0], sizes = [1, 8, 1], strides = [1, 1, 1]} : vector<45x8x1xf32> to vector<1x8x1xf32>
    %683 = vector.shape_cast %682 : vector<1x8x1xf32> to vector<8x1xf32>
    %684 = vector.extract_strided_slice %681 {offsets = [0, 0, 0], sizes = [2, 8, 41], strides = [1, 1, 1]} : vector<2x8x61xf32> to vector<2x8x41xf32>
    %685 = vector.shape_cast %683 : vector<8x1xf32> to vector<1x8x1xf32>
    %686 = vector.broadcast %685 : vector<1x8x1xf32> to vector<2x8x41xf32>
    %687 = arith.mulf %684, %686 : vector<2x8x41xf32>
    %688 = arith.addf %674, %687 : vector<2x8x41xf32>
    %689 = vector.extract_strided_slice %459 {offsets = [28, 0, 0], sizes = [1, 8, 1], strides = [1, 1, 1]} : vector<45x8x1xf32> to vector<1x8x1xf32>
    %690 = vector.shape_cast %689 : vector<1x8x1xf32> to vector<8x1xf32>
    %691 = vector.extract_strided_slice %681 {offsets = [0, 0, 1], sizes = [2, 8, 41], strides = [1, 1, 1]} : vector<2x8x61xf32> to vector<2x8x41xf32>
    %692 = vector.shape_cast %690 : vector<8x1xf32> to vector<1x8x1xf32>
    %693 = vector.broadcast %692 : vector<1x8x1xf32> to vector<2x8x41xf32>
    %694 = arith.mulf %691, %693 : vector<2x8x41xf32>
    %695 = arith.addf %688, %694 : vector<2x8x41xf32>
    %696 = vector.extract_strided_slice %459 {offsets = [29, 0, 0], sizes = [1, 8, 1], strides = [1, 1, 1]} : vector<45x8x1xf32> to vector<1x8x1xf32>
    %697 = vector.shape_cast %696 : vector<1x8x1xf32> to vector<8x1xf32>
    %698 = vector.extract_strided_slice %681 {offsets = [0, 0, 2], sizes = [2, 8, 41], strides = [1, 1, 1]} : vector<2x8x61xf32> to vector<2x8x41xf32>
    %699 = vector.shape_cast %697 : vector<8x1xf32> to vector<1x8x1xf32>
    %700 = vector.broadcast %699 : vector<1x8x1xf32> to vector<2x8x41xf32>
    %701 = arith.mulf %698, %700 : vector<2x8x41xf32>
    %702 = arith.addf %695, %701 : vector<2x8x41xf32>
    %703 = vector.extract_strided_slice %459 {offsets = [30, 0, 0], sizes = [1, 8, 1], strides = [1, 1, 1]} : vector<45x8x1xf32> to vector<1x8x1xf32>
    %704 = vector.shape_cast %703 : vector<1x8x1xf32> to vector<8x1xf32>
    %705 = vector.extract_strided_slice %681 {offsets = [0, 0, 9], sizes = [2, 8, 41], strides = [1, 1, 1]} : vector<2x8x61xf32> to vector<2x8x41xf32>
    %706 = vector.shape_cast %704 : vector<8x1xf32> to vector<1x8x1xf32>
    %707 = vector.broadcast %706 : vector<1x8x1xf32> to vector<2x8x41xf32>
    %708 = arith.mulf %705, %707 : vector<2x8x41xf32>
    %709 = arith.addf %702, %708 : vector<2x8x41xf32>
    %710 = vector.extract_strided_slice %459 {offsets = [31, 0, 0], sizes = [1, 8, 1], strides = [1, 1, 1]} : vector<45x8x1xf32> to vector<1x8x1xf32>
    %711 = vector.shape_cast %710 : vector<1x8x1xf32> to vector<8x1xf32>
    %712 = vector.extract_strided_slice %681 {offsets = [0, 0, 10], sizes = [2, 8, 41], strides = [1, 1, 1]} : vector<2x8x61xf32> to vector<2x8x41xf32>
    %713 = vector.shape_cast %711 : vector<8x1xf32> to vector<1x8x1xf32>
    %714 = vector.broadcast %713 : vector<1x8x1xf32> to vector<2x8x41xf32>
    %715 = arith.mulf %712, %714 : vector<2x8x41xf32>
    %716 = arith.addf %709, %715 : vector<2x8x41xf32>
    %717 = vector.extract_strided_slice %459 {offsets = [32, 0, 0], sizes = [1, 8, 1], strides = [1, 1, 1]} : vector<45x8x1xf32> to vector<1x8x1xf32>
    %718 = vector.shape_cast %717 : vector<1x8x1xf32> to vector<8x1xf32>
    %719 = vector.extract_strided_slice %681 {offsets = [0, 0, 11], sizes = [2, 8, 41], strides = [1, 1, 1]} : vector<2x8x61xf32> to vector<2x8x41xf32>
    %720 = vector.shape_cast %718 : vector<8x1xf32> to vector<1x8x1xf32>
    %721 = vector.broadcast %720 : vector<1x8x1xf32> to vector<2x8x41xf32>
    %722 = arith.mulf %719, %721 : vector<2x8x41xf32>
    %723 = arith.addf %716, %722 : vector<2x8x41xf32>
    %724 = vector.extract_strided_slice %459 {offsets = [33, 0, 0], sizes = [1, 8, 1], strides = [1, 1, 1]} : vector<45x8x1xf32> to vector<1x8x1xf32>
    %725 = vector.shape_cast %724 : vector<1x8x1xf32> to vector<8x1xf32>
    %726 = vector.extract_strided_slice %681 {offsets = [0, 0, 18], sizes = [2, 8, 41], strides = [1, 1, 1]} : vector<2x8x61xf32> to vector<2x8x41xf32>
    %727 = vector.shape_cast %725 : vector<8x1xf32> to vector<1x8x1xf32>
    %728 = vector.broadcast %727 : vector<1x8x1xf32> to vector<2x8x41xf32>
    %729 = arith.mulf %726, %728 : vector<2x8x41xf32>
    %730 = arith.addf %723, %729 : vector<2x8x41xf32>
    %731 = vector.extract_strided_slice %459 {offsets = [34, 0, 0], sizes = [1, 8, 1], strides = [1, 1, 1]} : vector<45x8x1xf32> to vector<1x8x1xf32>
    %732 = vector.shape_cast %731 : vector<1x8x1xf32> to vector<8x1xf32>
    %733 = vector.extract_strided_slice %681 {offsets = [0, 0, 19], sizes = [2, 8, 41], strides = [1, 1, 1]} : vector<2x8x61xf32> to vector<2x8x41xf32>
    %734 = vector.shape_cast %732 : vector<8x1xf32> to vector<1x8x1xf32>
    %735 = vector.broadcast %734 : vector<1x8x1xf32> to vector<2x8x41xf32>
    %736 = arith.mulf %733, %735 : vector<2x8x41xf32>
    %737 = arith.addf %730, %736 : vector<2x8x41xf32>
    %738 = vector.extract_strided_slice %459 {offsets = [35, 0, 0], sizes = [1, 8, 1], strides = [1, 1, 1]} : vector<45x8x1xf32> to vector<1x8x1xf32>
    %739 = vector.shape_cast %738 : vector<1x8x1xf32> to vector<8x1xf32>
    %740 = vector.extract_strided_slice %681 {offsets = [0, 0, 20], sizes = [2, 8, 41], strides = [1, 1, 1]} : vector<2x8x61xf32> to vector<2x8x41xf32>
    %741 = vector.shape_cast %739 : vector<8x1xf32> to vector<1x8x1xf32>
    %742 = vector.broadcast %741 : vector<1x8x1xf32> to vector<2x8x41xf32>
    %743 = arith.mulf %740, %742 : vector<2x8x41xf32>
    %744 = arith.addf %737, %743 : vector<2x8x41xf32>
    %745 = vector.extract_strided_slice %458 {offsets = [3, 0, 0], sizes = [1, 8, 61], strides = [1, 1, 1]} : vector<6x8x61xf32> to vector<1x8x61xf32>
    %746 = vector.shape_cast %745 : vector<1x8x61xf32> to vector<8x61xf32>
    %747 = vector.shape_cast %746 : vector<8x61xf32> to vector<1x8x61xf32>
    %748 = vector.shape_cast %465 : vector<8x61xf32> to vector<1x8x61xf32>
    %749 = tpu.concatenate %747, %748 in 0 : vector<1x8x61xf32>, vector<1x8x61xf32> -> vector<2x8x61xf32>
    %750 = vector.extract_strided_slice %459 {offsets = [36, 0, 0], sizes = [1, 8, 1], strides = [1, 1, 1]} : vector<45x8x1xf32> to vector<1x8x1xf32>
    %751 = vector.shape_cast %750 : vector<1x8x1xf32> to vector<8x1xf32>
    %752 = vector.extract_strided_slice %749 {offsets = [0, 0, 0], sizes = [2, 8, 41], strides = [1, 1, 1]} : vector<2x8x61xf32> to vector<2x8x41xf32>
    %753 = vector.shape_cast %751 : vector<8x1xf32> to vector<1x8x1xf32>
    %754 = vector.broadcast %753 : vector<1x8x1xf32> to vector<2x8x41xf32>
    %755 = arith.mulf %752, %754 : vector<2x8x41xf32>
    %756 = arith.addf %744, %755 : vector<2x8x41xf32>
    %757 = vector.extract_strided_slice %459 {offsets = [37, 0, 0], sizes = [1, 8, 1], strides = [1, 1, 1]} : vector<45x8x1xf32> to vector<1x8x1xf32>
    %758 = vector.shape_cast %757 : vector<1x8x1xf32> to vector<8x1xf32>
    %759 = vector.extract_strided_slice %749 {offsets = [0, 0, 1], sizes = [2, 8, 41], strides = [1, 1, 1]} : vector<2x8x61xf32> to vector<2x8x41xf32>
    %760 = vector.shape_cast %758 : vector<8x1xf32> to vector<1x8x1xf32>
    %761 = vector.broadcast %760 : vector<1x8x1xf32> to vector<2x8x41xf32>
    %762 = arith.mulf %759, %761 : vector<2x8x41xf32>
    %763 = arith.addf %756, %762 : vector<2x8x41xf32>
    %764 = vector.extract_strided_slice %459 {offsets = [38, 0, 0], sizes = [1, 8, 1], strides = [1, 1, 1]} : vector<45x8x1xf32> to vector<1x8x1xf32>
    %765 = vector.shape_cast %764 : vector<1x8x1xf32> to vector<8x1xf32>
    %766 = vector.extract_strided_slice %749 {offsets = [0, 0, 2], sizes = [2, 8, 41], strides = [1, 1, 1]} : vector<2x8x61xf32> to vector<2x8x41xf32>
    %767 = vector.shape_cast %765 : vector<8x1xf32> to vector<1x8x1xf32>
    %768 = vector.broadcast %767 : vector<1x8x1xf32> to vector<2x8x41xf32>
    %769 = arith.mulf %766, %768 : vector<2x8x41xf32>
    %770 = arith.addf %763, %769 : vector<2x8x41xf32>
    %771 = vector.extract_strided_slice %459 {offsets = [39, 0, 0], sizes = [1, 8, 1], strides = [1, 1, 1]} : vector<45x8x1xf32> to vector<1x8x1xf32>
    %772 = vector.shape_cast %771 : vector<1x8x1xf32> to vector<8x1xf32>
    %773 = vector.extract_strided_slice %749 {offsets = [0, 0, 9], sizes = [2, 8, 41], strides = [1, 1, 1]} : vector<2x8x61xf32> to vector<2x8x41xf32>
    %774 = vector.shape_cast %772 : vector<8x1xf32> to vector<1x8x1xf32>
    %775 = vector.broadcast %774 : vector<1x8x1xf32> to vector<2x8x41xf32>
    %776 = arith.mulf %773, %775 : vector<2x8x41xf32>
    %777 = arith.addf %770, %776 : vector<2x8x41xf32>
    %778 = vector.extract_strided_slice %459 {offsets = [40, 0, 0], sizes = [1, 8, 1], strides = [1, 1, 1]} : vector<45x8x1xf32> to vector<1x8x1xf32>
    %779 = vector.shape_cast %778 : vector<1x8x1xf32> to vector<8x1xf32>
    %780 = vector.extract_strided_slice %749 {offsets = [0, 0, 10], sizes = [2, 8, 41], strides = [1, 1, 1]} : vector<2x8x61xf32> to vector<2x8x41xf32>
    %781 = vector.shape_cast %779 : vector<8x1xf32> to vector<1x8x1xf32>
    %782 = vector.broadcast %781 : vector<1x8x1xf32> to vector<2x8x41xf32>
    %783 = arith.mulf %780, %782 : vector<2x8x41xf32>
    %784 = arith.addf %777, %783 : vector<2x8x41xf32>
    %785 = vector.extract_strided_slice %459 {offsets = [41, 0, 0], sizes = [1, 8, 1], strides = [1, 1, 1]} : vector<45x8x1xf32> to vector<1x8x1xf32>
    %786 = vector.shape_cast %785 : vector<1x8x1xf32> to vector<8x1xf32>
    %787 = vector.extract_strided_slice %749 {offsets = [0, 0, 11], sizes = [2, 8, 41], strides = [1, 1, 1]} : vector<2x8x61xf32> to vector<2x8x41xf32>
    %788 = vector.shape_cast %786 : vector<8x1xf32> to vector<1x8x1xf32>
    %789 = vector.broadcast %788 : vector<1x8x1xf32> to vector<2x8x41xf32>
    %790 = arith.mulf %787, %789 : vector<2x8x41xf32>
    %791 = arith.addf %784, %790 : vector<2x8x41xf32>
    %792 = vector.extract_strided_slice %459 {offsets = [42, 0, 0], sizes = [1, 8, 1], strides = [1, 1, 1]} : vector<45x8x1xf32> to vector<1x8x1xf32>
    %793 = vector.shape_cast %792 : vector<1x8x1xf32> to vector<8x1xf32>
    %794 = vector.extract_strided_slice %749 {offsets = [0, 0, 18], sizes = [2, 8, 41], strides = [1, 1, 1]} : vector<2x8x61xf32> to vector<2x8x41xf32>
    %795 = vector.shape_cast %793 : vector<8x1xf32> to vector<1x8x1xf32>
    %796 = vector.broadcast %795 : vector<1x8x1xf32> to vector<2x8x41xf32>
    %797 = arith.mulf %794, %796 : vector<2x8x41xf32>
    %798 = arith.addf %791, %797 : vector<2x8x41xf32>
    %799 = vector.extract_strided_slice %459 {offsets = [43, 0, 0], sizes = [1, 8, 1], strides = [1, 1, 1]} : vector<45x8x1xf32> to vector<1x8x1xf32>
    %800 = vector.shape_cast %799 : vector<1x8x1xf32> to vector<8x1xf32>
    %801 = vector.extract_strided_slice %749 {offsets = [0, 0, 19], sizes = [2, 8, 41], strides = [1, 1, 1]} : vector<2x8x61xf32> to vector<2x8x41xf32>
    %802 = vector.shape_cast %800 : vector<8x1xf32> to vector<1x8x1xf32>
    %803 = vector.broadcast %802 : vector<1x8x1xf32> to vector<2x8x41xf32>
    %804 = arith.mulf %801, %803 : vector<2x8x41xf32>
    %805 = arith.addf %798, %804 : vector<2x8x41xf32>
    %806 = vector.extract_strided_slice %459 {offsets = [44, 0, 0], sizes = [1, 8, 1], strides = [1, 1, 1]} : vector<45x8x1xf32> to vector<1x8x1xf32>
    %807 = vector.shape_cast %806 : vector<1x8x1xf32> to vector<8x1xf32>
    %808 = vector.extract_strided_slice %749 {offsets = [0, 0, 20], sizes = [2, 8, 41], strides = [1, 1, 1]} : vector<2x8x61xf32> to vector<2x8x41xf32>
    %809 = vector.shape_cast %807 : vector<8x1xf32> to vector<1x8x1xf32>
    %810 = vector.broadcast %809 : vector<1x8x1xf32> to vector<2x8x41xf32>
    %811 = arith.mulf %808, %810 : vector<2x8x41xf32>
    %812 = arith.addf %805, %811 : vector<2x8x41xf32>
    %813 = vector.shape_cast %460 : vector<8x1xf32> to vector<1x8x1xf32>
    %814 = vector.broadcast %813 : vector<1x8x1xf32> to vector<2x8x41xf32>
    %815 = arith.addf %812, %814 : vector<2x8x41xf32>
    %cst_36 = arith.constant 0.000000e+00 : f32
    %816 = vector.broadcast %cst_36 : f32 to vector<2x8x41xf32>
    %817 = vector.extract_strided_slice %815 {offsets = [0, 0, 0], sizes = [2, 1, 41], strides = [1, 1, 1]} : vector<2x8x41xf32> to vector<2x1x41xf32>
    %818 = vector.extract_strided_slice %461 {offsets = [0, 0, 0], sizes = [1, 8, 1], strides = [1, 1, 1]} : vector<8x8x1xf32> to vector<1x8x1xf32>
    %819 = vector.shape_cast %818 : vector<1x8x1xf32> to vector<8x1xf32>
    %820 = vector.shape_cast %819 : vector<8x1xf32> to vector<1x8x1xf32>
    %821 = vector.broadcast %817 : vector<2x1x41xf32> to vector<2x8x41xf32>
    %822 = vector.broadcast %820 : vector<1x8x1xf32> to vector<2x8x41xf32>
    %823 = arith.mulf %821, %822 : vector<2x8x41xf32>
    %824 = arith.addf %816, %823 : vector<2x8x41xf32>
    %825 = vector.extract_strided_slice %815 {offsets = [0, 1, 0], sizes = [2, 1, 41], strides = [1, 1, 1]} : vector<2x8x41xf32> to vector<2x1x41xf32>
    %826 = vector.extract_strided_slice %461 {offsets = [1, 0, 0], sizes = [1, 8, 1], strides = [1, 1, 1]} : vector<8x8x1xf32> to vector<1x8x1xf32>
    %827 = vector.shape_cast %826 : vector<1x8x1xf32> to vector<8x1xf32>
    %828 = vector.shape_cast %827 : vector<8x1xf32> to vector<1x8x1xf32>
    %829 = vector.broadcast %825 : vector<2x1x41xf32> to vector<2x8x41xf32>
    %830 = vector.broadcast %828 : vector<1x8x1xf32> to vector<2x8x41xf32>
    %831 = arith.mulf %829, %830 : vector<2x8x41xf32>
    %832 = arith.addf %824, %831 : vector<2x8x41xf32>
    %833 = vector.extract_strided_slice %815 {offsets = [0, 2, 0], sizes = [2, 1, 41], strides = [1, 1, 1]} : vector<2x8x41xf32> to vector<2x1x41xf32>
    %834 = vector.extract_strided_slice %461 {offsets = [2, 0, 0], sizes = [1, 8, 1], strides = [1, 1, 1]} : vector<8x8x1xf32> to vector<1x8x1xf32>
    %835 = vector.shape_cast %834 : vector<1x8x1xf32> to vector<8x1xf32>
    %836 = vector.shape_cast %835 : vector<8x1xf32> to vector<1x8x1xf32>
    %837 = vector.broadcast %833 : vector<2x1x41xf32> to vector<2x8x41xf32>
    %838 = vector.broadcast %836 : vector<1x8x1xf32> to vector<2x8x41xf32>
    %839 = arith.mulf %837, %838 : vector<2x8x41xf32>
    %840 = arith.addf %832, %839 : vector<2x8x41xf32>
    %841 = vector.extract_strided_slice %815 {offsets = [0, 3, 0], sizes = [2, 1, 41], strides = [1, 1, 1]} : vector<2x8x41xf32> to vector<2x1x41xf32>
    %842 = vector.extract_strided_slice %461 {offsets = [3, 0, 0], sizes = [1, 8, 1], strides = [1, 1, 1]} : vector<8x8x1xf32> to vector<1x8x1xf32>
    %843 = vector.shape_cast %842 : vector<1x8x1xf32> to vector<8x1xf32>
    %844 = vector.shape_cast %843 : vector<8x1xf32> to vector<1x8x1xf32>
    %845 = vector.broadcast %841 : vector<2x1x41xf32> to vector<2x8x41xf32>
    %846 = vector.broadcast %844 : vector<1x8x1xf32> to vector<2x8x41xf32>
    %847 = arith.mulf %845, %846 : vector<2x8x41xf32>
    %848 = arith.addf %840, %847 : vector<2x8x41xf32>
    %849 = vector.extract_strided_slice %815 {offsets = [0, 4, 0], sizes = [2, 1, 41], strides = [1, 1, 1]} : vector<2x8x41xf32> to vector<2x1x41xf32>
    %850 = vector.extract_strided_slice %461 {offsets = [4, 0, 0], sizes = [1, 8, 1], strides = [1, 1, 1]} : vector<8x8x1xf32> to vector<1x8x1xf32>
    %851 = vector.shape_cast %850 : vector<1x8x1xf32> to vector<8x1xf32>
    %852 = vector.shape_cast %851 : vector<8x1xf32> to vector<1x8x1xf32>
    %853 = vector.broadcast %849 : vector<2x1x41xf32> to vector<2x8x41xf32>
    %854 = vector.broadcast %852 : vector<1x8x1xf32> to vector<2x8x41xf32>
    %855 = arith.mulf %853, %854 : vector<2x8x41xf32>
    %856 = arith.addf %848, %855 : vector<2x8x41xf32>
    %857 = vector.extract_strided_slice %815 {offsets = [0, 5, 0], sizes = [2, 1, 41], strides = [1, 1, 1]} : vector<2x8x41xf32> to vector<2x1x41xf32>
    %858 = vector.extract_strided_slice %461 {offsets = [5, 0, 0], sizes = [1, 8, 1], strides = [1, 1, 1]} : vector<8x8x1xf32> to vector<1x8x1xf32>
    %859 = vector.shape_cast %858 : vector<1x8x1xf32> to vector<8x1xf32>
    %860 = vector.shape_cast %859 : vector<8x1xf32> to vector<1x8x1xf32>
    %861 = vector.broadcast %857 : vector<2x1x41xf32> to vector<2x8x41xf32>
    %862 = vector.broadcast %860 : vector<1x8x1xf32> to vector<2x8x41xf32>
    %863 = arith.mulf %861, %862 : vector<2x8x41xf32>
    %864 = arith.addf %856, %863 : vector<2x8x41xf32>
    %865 = vector.extract_strided_slice %815 {offsets = [0, 6, 0], sizes = [2, 1, 41], strides = [1, 1, 1]} : vector<2x8x41xf32> to vector<2x1x41xf32>
    %866 = vector.extract_strided_slice %461 {offsets = [6, 0, 0], sizes = [1, 8, 1], strides = [1, 1, 1]} : vector<8x8x1xf32> to vector<1x8x1xf32>
    %867 = vector.shape_cast %866 : vector<1x8x1xf32> to vector<8x1xf32>
    %868 = vector.shape_cast %867 : vector<8x1xf32> to vector<1x8x1xf32>
    %869 = vector.broadcast %865 : vector<2x1x41xf32> to vector<2x8x41xf32>
    %870 = vector.broadcast %868 : vector<1x8x1xf32> to vector<2x8x41xf32>
    %871 = arith.mulf %869, %870 : vector<2x8x41xf32>
    %872 = arith.addf %864, %871 : vector<2x8x41xf32>
    %873 = vector.extract_strided_slice %815 {offsets = [0, 7, 0], sizes = [2, 1, 41], strides = [1, 1, 1]} : vector<2x8x41xf32> to vector<2x1x41xf32>
    %874 = vector.extract_strided_slice %461 {offsets = [7, 0, 0], sizes = [1, 8, 1], strides = [1, 1, 1]} : vector<8x8x1xf32> to vector<1x8x1xf32>
    %875 = vector.shape_cast %874 : vector<1x8x1xf32> to vector<8x1xf32>
    %876 = vector.shape_cast %875 : vector<8x1xf32> to vector<1x8x1xf32>
    %877 = vector.broadcast %873 : vector<2x1x41xf32> to vector<2x8x41xf32>
    %878 = vector.broadcast %876 : vector<1x8x1xf32> to vector<2x8x41xf32>
    %879 = arith.mulf %877, %878 : vector<2x8x41xf32>
    %880 = arith.addf %872, %879 : vector<2x8x41xf32>
    %881 = vector.shape_cast %462 : vector<8x1xf32> to vector<1x8x1xf32>
    %882 = vector.broadcast %881 : vector<1x8x1xf32> to vector<2x8x41xf32>
    %883 = arith.addf %880, %882 : vector<2x8x41xf32>
    %cst_37 = arith.constant 0.000000e+00 : f32
    %884 = vector.broadcast %cst_37 : f32 to vector<2x8x41xf32>
    %885 = arith.maximumf %883, %884 : vector<2x8x41xf32>
    %886 = vector.shape_cast %463 : vector<8x1xf32> to vector<1x8x1xf32>
    %887 = vector.broadcast %886 : vector<1x8x1xf32> to vector<2x8x41xf32>
    %888 = arith.mulf %885, %887 : vector<2x8x41xf32>
    %889 = vector.shape_cast %464 : vector<8x1xf32> to vector<1x8x1xf32>
    %890 = vector.broadcast %889 : vector<1x8x1xf32> to vector<2x8x41xf32>
    %891 = arith.addf %888, %890 : vector<2x8x41xf32>
    %c0_38 = arith.constant 0 : index
    %c0_39 = arith.constant 0 : index
    %c0_40 = arith.constant 0 : index
    %892 = vector.load %arg14[%c0_38, %c0_39, %c0_40] : memref<45x8x1xf32, #tpu.memory_space<vmem>>, vector<45x8x1xf32>
    %c0_41 = arith.constant 0 : index
    %c0_42 = arith.constant 0 : index
    %893 = vector.load %arg15[%c0_41, %c0_42] : memref<8x1xf32, #tpu.memory_space<vmem>>, vector<8x1xf32>
    %c0_43 = arith.constant 0 : index
    %c0_44 = arith.constant 0 : index
    %c0_45 = arith.constant 0 : index
    %894 = vector.load %arg16[%c0_43, %c0_44, %c0_45] : memref<8x8x1xf32, #tpu.memory_space<vmem>>, vector<8x8x1xf32>
    %c0_46 = arith.constant 0 : index
    %c0_47 = arith.constant 0 : index
    %895 = vector.load %arg17[%c0_46, %c0_47] : memref<8x1xf32, #tpu.memory_space<vmem>>, vector<8x1xf32>
    %c0_48 = arith.constant 0 : index
    %c0_49 = arith.constant 0 : index
    %896 = vector.load %arg18[%c0_48, %c0_49] : memref<8x1xf32, #tpu.memory_space<vmem>>, vector<8x1xf32>
    %c0_50 = arith.constant 0 : index
    %c0_51 = arith.constant 0 : index
    %897 = vector.load %arg19[%c0_50, %c0_51] : memref<8x1xf32, #tpu.memory_space<vmem>>, vector<8x1xf32>
    %cst_52 = arith.constant 0.000000e+00 : f32
    %898 = vector.broadcast %cst_52 : f32 to vector<8x41xf32>
    %cst_53 = arith.constant 0.000000e+00 : f32
    %899 = vector.broadcast %cst_53 : f32 to vector<1x8x21xf32>
    %900 = vector.shape_cast %898 : vector<8x41xf32> to vector<1x8x41xf32>
    %901 = vector.extract_strided_slice %892 {offsets = [0, 0, 0], sizes = [1, 8, 1], strides = [1, 1, 1]} : vector<45x8x1xf32> to vector<1x8x1xf32>
    %902 = vector.shape_cast %901 : vector<1x8x1xf32> to vector<8x1xf32>
    %903 = vector.extract_strided_slice %900 {offsets = [0, 0, 0], sizes = [1, 8, 21], strides = [1, 1, 1]} : vector<1x8x41xf32> to vector<1x8x21xf32>
    %904 = vector.shape_cast %902 : vector<8x1xf32> to vector<1x8x1xf32>
    %905 = vector.broadcast %904 : vector<1x8x1xf32> to vector<1x8x21xf32>
    %906 = arith.mulf %903, %905 : vector<1x8x21xf32>
    %907 = arith.addf %899, %906 : vector<1x8x21xf32>
    %908 = vector.extract_strided_slice %892 {offsets = [1, 0, 0], sizes = [1, 8, 1], strides = [1, 1, 1]} : vector<45x8x1xf32> to vector<1x8x1xf32>
    %909 = vector.shape_cast %908 : vector<1x8x1xf32> to vector<8x1xf32>
    %910 = vector.extract_strided_slice %900 {offsets = [0, 0, 1], sizes = [1, 8, 21], strides = [1, 1, 1]} : vector<1x8x41xf32> to vector<1x8x21xf32>
    %911 = vector.shape_cast %909 : vector<8x1xf32> to vector<1x8x1xf32>
    %912 = vector.broadcast %911 : vector<1x8x1xf32> to vector<1x8x21xf32>
    %913 = arith.mulf %910, %912 : vector<1x8x21xf32>
    %914 = arith.addf %907, %913 : vector<1x8x21xf32>
    %915 = vector.extract_strided_slice %892 {offsets = [2, 0, 0], sizes = [1, 8, 1], strides = [1, 1, 1]} : vector<45x8x1xf32> to vector<1x8x1xf32>
    %916 = vector.shape_cast %915 : vector<1x8x1xf32> to vector<8x1xf32>
    %917 = vector.extract_strided_slice %900 {offsets = [0, 0, 2], sizes = [1, 8, 21], strides = [1, 1, 1]} : vector<1x8x41xf32> to vector<1x8x21xf32>
    %918 = vector.shape_cast %916 : vector<8x1xf32> to vector<1x8x1xf32>
    %919 = vector.broadcast %918 : vector<1x8x1xf32> to vector<1x8x21xf32>
    %920 = arith.mulf %917, %919 : vector<1x8x21xf32>
    %921 = arith.addf %914, %920 : vector<1x8x21xf32>
    %922 = vector.extract_strided_slice %892 {offsets = [3, 0, 0], sizes = [1, 8, 1], strides = [1, 1, 1]} : vector<45x8x1xf32> to vector<1x8x1xf32>
    %923 = vector.shape_cast %922 : vector<1x8x1xf32> to vector<8x1xf32>
    %924 = vector.extract_strided_slice %900 {offsets = [0, 0, 9], sizes = [1, 8, 21], strides = [1, 1, 1]} : vector<1x8x41xf32> to vector<1x8x21xf32>
    %925 = vector.shape_cast %923 : vector<8x1xf32> to vector<1x8x1xf32>
    %926 = vector.broadcast %925 : vector<1x8x1xf32> to vector<1x8x21xf32>
    %927 = arith.mulf %924, %926 : vector<1x8x21xf32>
    %928 = arith.addf %921, %927 : vector<1x8x21xf32>
    %929 = vector.extract_strided_slice %892 {offsets = [4, 0, 0], sizes = [1, 8, 1], strides = [1, 1, 1]} : vector<45x8x1xf32> to vector<1x8x1xf32>
    %930 = vector.shape_cast %929 : vector<1x8x1xf32> to vector<8x1xf32>
    %931 = vector.extract_strided_slice %900 {offsets = [0, 0, 10], sizes = [1, 8, 21], strides = [1, 1, 1]} : vector<1x8x41xf32> to vector<1x8x21xf32>
    %932 = vector.shape_cast %930 : vector<8x1xf32> to vector<1x8x1xf32>
    %933 = vector.broadcast %932 : vector<1x8x1xf32> to vector<1x8x21xf32>
    %934 = arith.mulf %931, %933 : vector<1x8x21xf32>
    %935 = arith.addf %928, %934 : vector<1x8x21xf32>
    %936 = vector.extract_strided_slice %892 {offsets = [5, 0, 0], sizes = [1, 8, 1], strides = [1, 1, 1]} : vector<45x8x1xf32> to vector<1x8x1xf32>
    %937 = vector.shape_cast %936 : vector<1x8x1xf32> to vector<8x1xf32>
    %938 = vector.extract_strided_slice %900 {offsets = [0, 0, 11], sizes = [1, 8, 21], strides = [1, 1, 1]} : vector<1x8x41xf32> to vector<1x8x21xf32>
    %939 = vector.shape_cast %937 : vector<8x1xf32> to vector<1x8x1xf32>
    %940 = vector.broadcast %939 : vector<1x8x1xf32> to vector<1x8x21xf32>
    %941 = arith.mulf %938, %940 : vector<1x8x21xf32>
    %942 = arith.addf %935, %941 : vector<1x8x21xf32>
    %943 = vector.extract_strided_slice %892 {offsets = [6, 0, 0], sizes = [1, 8, 1], strides = [1, 1, 1]} : vector<45x8x1xf32> to vector<1x8x1xf32>
    %944 = vector.shape_cast %943 : vector<1x8x1xf32> to vector<8x1xf32>
    %945 = vector.extract_strided_slice %900 {offsets = [0, 0, 18], sizes = [1, 8, 21], strides = [1, 1, 1]} : vector<1x8x41xf32> to vector<1x8x21xf32>
    %946 = vector.shape_cast %944 : vector<8x1xf32> to vector<1x8x1xf32>
    %947 = vector.broadcast %946 : vector<1x8x1xf32> to vector<1x8x21xf32>
    %948 = arith.mulf %945, %947 : vector<1x8x21xf32>
    %949 = arith.addf %942, %948 : vector<1x8x21xf32>
    %950 = vector.extract_strided_slice %892 {offsets = [7, 0, 0], sizes = [1, 8, 1], strides = [1, 1, 1]} : vector<45x8x1xf32> to vector<1x8x1xf32>
    %951 = vector.shape_cast %950 : vector<1x8x1xf32> to vector<8x1xf32>
    %952 = vector.extract_strided_slice %900 {offsets = [0, 0, 19], sizes = [1, 8, 21], strides = [1, 1, 1]} : vector<1x8x41xf32> to vector<1x8x21xf32>
    %953 = vector.shape_cast %951 : vector<8x1xf32> to vector<1x8x1xf32>
    %954 = vector.broadcast %953 : vector<1x8x1xf32> to vector<1x8x21xf32>
    %955 = arith.mulf %952, %954 : vector<1x8x21xf32>
    %956 = arith.addf %949, %955 : vector<1x8x21xf32>
    %957 = vector.extract_strided_slice %892 {offsets = [8, 0, 0], sizes = [1, 8, 1], strides = [1, 1, 1]} : vector<45x8x1xf32> to vector<1x8x1xf32>
    %958 = vector.shape_cast %957 : vector<1x8x1xf32> to vector<8x1xf32>
    %959 = vector.extract_strided_slice %900 {offsets = [0, 0, 20], sizes = [1, 8, 21], strides = [1, 1, 1]} : vector<1x8x41xf32> to vector<1x8x21xf32>
    %960 = vector.shape_cast %958 : vector<8x1xf32> to vector<1x8x1xf32>
    %961 = vector.broadcast %960 : vector<1x8x1xf32> to vector<1x8x21xf32>
    %962 = arith.mulf %959, %961 : vector<1x8x21xf32>
    %963 = arith.addf %956, %962 : vector<1x8x21xf32>
    %964 = vector.shape_cast %898 : vector<8x41xf32> to vector<1x8x41xf32>
    %965 = vector.extract_strided_slice %892 {offsets = [9, 0, 0], sizes = [1, 8, 1], strides = [1, 1, 1]} : vector<45x8x1xf32> to vector<1x8x1xf32>
    %966 = vector.shape_cast %965 : vector<1x8x1xf32> to vector<8x1xf32>
    %967 = vector.extract_strided_slice %964 {offsets = [0, 0, 0], sizes = [1, 8, 21], strides = [1, 1, 1]} : vector<1x8x41xf32> to vector<1x8x21xf32>
    %968 = vector.shape_cast %966 : vector<8x1xf32> to vector<1x8x1xf32>
    %969 = vector.broadcast %968 : vector<1x8x1xf32> to vector<1x8x21xf32>
    %970 = arith.mulf %967, %969 : vector<1x8x21xf32>
    %971 = arith.addf %963, %970 : vector<1x8x21xf32>
    %972 = vector.extract_strided_slice %892 {offsets = [10, 0, 0], sizes = [1, 8, 1], strides = [1, 1, 1]} : vector<45x8x1xf32> to vector<1x8x1xf32>
    %973 = vector.shape_cast %972 : vector<1x8x1xf32> to vector<8x1xf32>
    %974 = vector.extract_strided_slice %964 {offsets = [0, 0, 1], sizes = [1, 8, 21], strides = [1, 1, 1]} : vector<1x8x41xf32> to vector<1x8x21xf32>
    %975 = vector.shape_cast %973 : vector<8x1xf32> to vector<1x8x1xf32>
    %976 = vector.broadcast %975 : vector<1x8x1xf32> to vector<1x8x21xf32>
    %977 = arith.mulf %974, %976 : vector<1x8x21xf32>
    %978 = arith.addf %971, %977 : vector<1x8x21xf32>
    %979 = vector.extract_strided_slice %892 {offsets = [11, 0, 0], sizes = [1, 8, 1], strides = [1, 1, 1]} : vector<45x8x1xf32> to vector<1x8x1xf32>
    %980 = vector.shape_cast %979 : vector<1x8x1xf32> to vector<8x1xf32>
    %981 = vector.extract_strided_slice %964 {offsets = [0, 0, 2], sizes = [1, 8, 21], strides = [1, 1, 1]} : vector<1x8x41xf32> to vector<1x8x21xf32>
    %982 = vector.shape_cast %980 : vector<8x1xf32> to vector<1x8x1xf32>
    %983 = vector.broadcast %982 : vector<1x8x1xf32> to vector<1x8x21xf32>
    %984 = arith.mulf %981, %983 : vector<1x8x21xf32>
    %985 = arith.addf %978, %984 : vector<1x8x21xf32>
    %986 = vector.extract_strided_slice %892 {offsets = [12, 0, 0], sizes = [1, 8, 1], strides = [1, 1, 1]} : vector<45x8x1xf32> to vector<1x8x1xf32>
    %987 = vector.shape_cast %986 : vector<1x8x1xf32> to vector<8x1xf32>
    %988 = vector.extract_strided_slice %964 {offsets = [0, 0, 9], sizes = [1, 8, 21], strides = [1, 1, 1]} : vector<1x8x41xf32> to vector<1x8x21xf32>
    %989 = vector.shape_cast %987 : vector<8x1xf32> to vector<1x8x1xf32>
    %990 = vector.broadcast %989 : vector<1x8x1xf32> to vector<1x8x21xf32>
    %991 = arith.mulf %988, %990 : vector<1x8x21xf32>
    %992 = arith.addf %985, %991 : vector<1x8x21xf32>
    %993 = vector.extract_strided_slice %892 {offsets = [13, 0, 0], sizes = [1, 8, 1], strides = [1, 1, 1]} : vector<45x8x1xf32> to vector<1x8x1xf32>
    %994 = vector.shape_cast %993 : vector<1x8x1xf32> to vector<8x1xf32>
    %995 = vector.extract_strided_slice %964 {offsets = [0, 0, 10], sizes = [1, 8, 21], strides = [1, 1, 1]} : vector<1x8x41xf32> to vector<1x8x21xf32>
    %996 = vector.shape_cast %994 : vector<8x1xf32> to vector<1x8x1xf32>
    %997 = vector.broadcast %996 : vector<1x8x1xf32> to vector<1x8x21xf32>
    %998 = arith.mulf %995, %997 : vector<1x8x21xf32>
    %999 = arith.addf %992, %998 : vector<1x8x21xf32>
    %1000 = vector.extract_strided_slice %892 {offsets = [14, 0, 0], sizes = [1, 8, 1], strides = [1, 1, 1]} : vector<45x8x1xf32> to vector<1x8x1xf32>
    %1001 = vector.shape_cast %1000 : vector<1x8x1xf32> to vector<8x1xf32>
    %1002 = vector.extract_strided_slice %964 {offsets = [0, 0, 11], sizes = [1, 8, 21], strides = [1, 1, 1]} : vector<1x8x41xf32> to vector<1x8x21xf32>
    %1003 = vector.shape_cast %1001 : vector<8x1xf32> to vector<1x8x1xf32>
    %1004 = vector.broadcast %1003 : vector<1x8x1xf32> to vector<1x8x21xf32>
    %1005 = arith.mulf %1002, %1004 : vector<1x8x21xf32>
    %1006 = arith.addf %999, %1005 : vector<1x8x21xf32>
    %1007 = vector.extract_strided_slice %892 {offsets = [15, 0, 0], sizes = [1, 8, 1], strides = [1, 1, 1]} : vector<45x8x1xf32> to vector<1x8x1xf32>
    %1008 = vector.shape_cast %1007 : vector<1x8x1xf32> to vector<8x1xf32>
    %1009 = vector.extract_strided_slice %964 {offsets = [0, 0, 18], sizes = [1, 8, 21], strides = [1, 1, 1]} : vector<1x8x41xf32> to vector<1x8x21xf32>
    %1010 = vector.shape_cast %1008 : vector<8x1xf32> to vector<1x8x1xf32>
    %1011 = vector.broadcast %1010 : vector<1x8x1xf32> to vector<1x8x21xf32>
    %1012 = arith.mulf %1009, %1011 : vector<1x8x21xf32>
    %1013 = arith.addf %1006, %1012 : vector<1x8x21xf32>
    %1014 = vector.extract_strided_slice %892 {offsets = [16, 0, 0], sizes = [1, 8, 1], strides = [1, 1, 1]} : vector<45x8x1xf32> to vector<1x8x1xf32>
    %1015 = vector.shape_cast %1014 : vector<1x8x1xf32> to vector<8x1xf32>
    %1016 = vector.extract_strided_slice %964 {offsets = [0, 0, 19], sizes = [1, 8, 21], strides = [1, 1, 1]} : vector<1x8x41xf32> to vector<1x8x21xf32>
    %1017 = vector.shape_cast %1015 : vector<8x1xf32> to vector<1x8x1xf32>
    %1018 = vector.broadcast %1017 : vector<1x8x1xf32> to vector<1x8x21xf32>
    %1019 = arith.mulf %1016, %1018 : vector<1x8x21xf32>
    %1020 = arith.addf %1013, %1019 : vector<1x8x21xf32>
    %1021 = vector.extract_strided_slice %892 {offsets = [17, 0, 0], sizes = [1, 8, 1], strides = [1, 1, 1]} : vector<45x8x1xf32> to vector<1x8x1xf32>
    %1022 = vector.shape_cast %1021 : vector<1x8x1xf32> to vector<8x1xf32>
    %1023 = vector.extract_strided_slice %964 {offsets = [0, 0, 20], sizes = [1, 8, 21], strides = [1, 1, 1]} : vector<1x8x41xf32> to vector<1x8x21xf32>
    %1024 = vector.shape_cast %1022 : vector<8x1xf32> to vector<1x8x1xf32>
    %1025 = vector.broadcast %1024 : vector<1x8x1xf32> to vector<1x8x21xf32>
    %1026 = arith.mulf %1023, %1025 : vector<1x8x21xf32>
    %1027 = arith.addf %1020, %1026 : vector<1x8x21xf32>
    %1028 = vector.extract_strided_slice %891 {offsets = [0, 0, 0], sizes = [1, 8, 41], strides = [1, 1, 1]} : vector<2x8x41xf32> to vector<1x8x41xf32>
    %1029 = vector.shape_cast %1028 : vector<1x8x41xf32> to vector<8x41xf32>
    %1030 = vector.shape_cast %1029 : vector<8x41xf32> to vector<1x8x41xf32>
    %1031 = vector.extract_strided_slice %892 {offsets = [18, 0, 0], sizes = [1, 8, 1], strides = [1, 1, 1]} : vector<45x8x1xf32> to vector<1x8x1xf32>
    %1032 = vector.shape_cast %1031 : vector<1x8x1xf32> to vector<8x1xf32>
    %1033 = vector.extract_strided_slice %1030 {offsets = [0, 0, 0], sizes = [1, 8, 21], strides = [1, 1, 1]} : vector<1x8x41xf32> to vector<1x8x21xf32>
    %1034 = vector.shape_cast %1032 : vector<8x1xf32> to vector<1x8x1xf32>
    %1035 = vector.broadcast %1034 : vector<1x8x1xf32> to vector<1x8x21xf32>
    %1036 = arith.mulf %1033, %1035 : vector<1x8x21xf32>
    %1037 = arith.addf %1027, %1036 : vector<1x8x21xf32>
    %1038 = vector.extract_strided_slice %892 {offsets = [19, 0, 0], sizes = [1, 8, 1], strides = [1, 1, 1]} : vector<45x8x1xf32> to vector<1x8x1xf32>
    %1039 = vector.shape_cast %1038 : vector<1x8x1xf32> to vector<8x1xf32>
    %1040 = vector.extract_strided_slice %1030 {offsets = [0, 0, 1], sizes = [1, 8, 21], strides = [1, 1, 1]} : vector<1x8x41xf32> to vector<1x8x21xf32>
    %1041 = vector.shape_cast %1039 : vector<8x1xf32> to vector<1x8x1xf32>
    %1042 = vector.broadcast %1041 : vector<1x8x1xf32> to vector<1x8x21xf32>
    %1043 = arith.mulf %1040, %1042 : vector<1x8x21xf32>
    %1044 = arith.addf %1037, %1043 : vector<1x8x21xf32>
    %1045 = vector.extract_strided_slice %892 {offsets = [20, 0, 0], sizes = [1, 8, 1], strides = [1, 1, 1]} : vector<45x8x1xf32> to vector<1x8x1xf32>
    %1046 = vector.shape_cast %1045 : vector<1x8x1xf32> to vector<8x1xf32>
    %1047 = vector.extract_strided_slice %1030 {offsets = [0, 0, 2], sizes = [1, 8, 21], strides = [1, 1, 1]} : vector<1x8x41xf32> to vector<1x8x21xf32>
    %1048 = vector.shape_cast %1046 : vector<8x1xf32> to vector<1x8x1xf32>
    %1049 = vector.broadcast %1048 : vector<1x8x1xf32> to vector<1x8x21xf32>
    %1050 = arith.mulf %1047, %1049 : vector<1x8x21xf32>
    %1051 = arith.addf %1044, %1050 : vector<1x8x21xf32>
    %1052 = vector.extract_strided_slice %892 {offsets = [21, 0, 0], sizes = [1, 8, 1], strides = [1, 1, 1]} : vector<45x8x1xf32> to vector<1x8x1xf32>
    %1053 = vector.shape_cast %1052 : vector<1x8x1xf32> to vector<8x1xf32>
    %1054 = vector.extract_strided_slice %1030 {offsets = [0, 0, 9], sizes = [1, 8, 21], strides = [1, 1, 1]} : vector<1x8x41xf32> to vector<1x8x21xf32>
    %1055 = vector.shape_cast %1053 : vector<8x1xf32> to vector<1x8x1xf32>
    %1056 = vector.broadcast %1055 : vector<1x8x1xf32> to vector<1x8x21xf32>
    %1057 = arith.mulf %1054, %1056 : vector<1x8x21xf32>
    %1058 = arith.addf %1051, %1057 : vector<1x8x21xf32>
    %1059 = vector.extract_strided_slice %892 {offsets = [22, 0, 0], sizes = [1, 8, 1], strides = [1, 1, 1]} : vector<45x8x1xf32> to vector<1x8x1xf32>
    %1060 = vector.shape_cast %1059 : vector<1x8x1xf32> to vector<8x1xf32>
    %1061 = vector.extract_strided_slice %1030 {offsets = [0, 0, 10], sizes = [1, 8, 21], strides = [1, 1, 1]} : vector<1x8x41xf32> to vector<1x8x21xf32>
    %1062 = vector.shape_cast %1060 : vector<8x1xf32> to vector<1x8x1xf32>
    %1063 = vector.broadcast %1062 : vector<1x8x1xf32> to vector<1x8x21xf32>
    %1064 = arith.mulf %1061, %1063 : vector<1x8x21xf32>
    %1065 = arith.addf %1058, %1064 : vector<1x8x21xf32>
    %1066 = vector.extract_strided_slice %892 {offsets = [23, 0, 0], sizes = [1, 8, 1], strides = [1, 1, 1]} : vector<45x8x1xf32> to vector<1x8x1xf32>
    %1067 = vector.shape_cast %1066 : vector<1x8x1xf32> to vector<8x1xf32>
    %1068 = vector.extract_strided_slice %1030 {offsets = [0, 0, 11], sizes = [1, 8, 21], strides = [1, 1, 1]} : vector<1x8x41xf32> to vector<1x8x21xf32>
    %1069 = vector.shape_cast %1067 : vector<8x1xf32> to vector<1x8x1xf32>
    %1070 = vector.broadcast %1069 : vector<1x8x1xf32> to vector<1x8x21xf32>
    %1071 = arith.mulf %1068, %1070 : vector<1x8x21xf32>
    %1072 = arith.addf %1065, %1071 : vector<1x8x21xf32>
    %1073 = vector.extract_strided_slice %892 {offsets = [24, 0, 0], sizes = [1, 8, 1], strides = [1, 1, 1]} : vector<45x8x1xf32> to vector<1x8x1xf32>
    %1074 = vector.shape_cast %1073 : vector<1x8x1xf32> to vector<8x1xf32>
    %1075 = vector.extract_strided_slice %1030 {offsets = [0, 0, 18], sizes = [1, 8, 21], strides = [1, 1, 1]} : vector<1x8x41xf32> to vector<1x8x21xf32>
    %1076 = vector.shape_cast %1074 : vector<8x1xf32> to vector<1x8x1xf32>
    %1077 = vector.broadcast %1076 : vector<1x8x1xf32> to vector<1x8x21xf32>
    %1078 = arith.mulf %1075, %1077 : vector<1x8x21xf32>
    %1079 = arith.addf %1072, %1078 : vector<1x8x21xf32>
    %1080 = vector.extract_strided_slice %892 {offsets = [25, 0, 0], sizes = [1, 8, 1], strides = [1, 1, 1]} : vector<45x8x1xf32> to vector<1x8x1xf32>
    %1081 = vector.shape_cast %1080 : vector<1x8x1xf32> to vector<8x1xf32>
    %1082 = vector.extract_strided_slice %1030 {offsets = [0, 0, 19], sizes = [1, 8, 21], strides = [1, 1, 1]} : vector<1x8x41xf32> to vector<1x8x21xf32>
    %1083 = vector.shape_cast %1081 : vector<8x1xf32> to vector<1x8x1xf32>
    %1084 = vector.broadcast %1083 : vector<1x8x1xf32> to vector<1x8x21xf32>
    %1085 = arith.mulf %1082, %1084 : vector<1x8x21xf32>
    %1086 = arith.addf %1079, %1085 : vector<1x8x21xf32>
    %1087 = vector.extract_strided_slice %892 {offsets = [26, 0, 0], sizes = [1, 8, 1], strides = [1, 1, 1]} : vector<45x8x1xf32> to vector<1x8x1xf32>
    %1088 = vector.shape_cast %1087 : vector<1x8x1xf32> to vector<8x1xf32>
    %1089 = vector.extract_strided_slice %1030 {offsets = [0, 0, 20], sizes = [1, 8, 21], strides = [1, 1, 1]} : vector<1x8x41xf32> to vector<1x8x21xf32>
    %1090 = vector.shape_cast %1088 : vector<8x1xf32> to vector<1x8x1xf32>
    %1091 = vector.broadcast %1090 : vector<1x8x1xf32> to vector<1x8x21xf32>
    %1092 = arith.mulf %1089, %1091 : vector<1x8x21xf32>
    %1093 = arith.addf %1086, %1092 : vector<1x8x21xf32>
    %1094 = vector.extract_strided_slice %891 {offsets = [1, 0, 0], sizes = [1, 8, 41], strides = [1, 1, 1]} : vector<2x8x41xf32> to vector<1x8x41xf32>
    %1095 = vector.shape_cast %1094 : vector<1x8x41xf32> to vector<8x41xf32>
    %1096 = vector.shape_cast %1095 : vector<8x41xf32> to vector<1x8x41xf32>
    %1097 = vector.extract_strided_slice %892 {offsets = [27, 0, 0], sizes = [1, 8, 1], strides = [1, 1, 1]} : vector<45x8x1xf32> to vector<1x8x1xf32>
    %1098 = vector.shape_cast %1097 : vector<1x8x1xf32> to vector<8x1xf32>
    %1099 = vector.extract_strided_slice %1096 {offsets = [0, 0, 0], sizes = [1, 8, 21], strides = [1, 1, 1]} : vector<1x8x41xf32> to vector<1x8x21xf32>
    %1100 = vector.shape_cast %1098 : vector<8x1xf32> to vector<1x8x1xf32>
    %1101 = vector.broadcast %1100 : vector<1x8x1xf32> to vector<1x8x21xf32>
    %1102 = arith.mulf %1099, %1101 : vector<1x8x21xf32>
    %1103 = arith.addf %1093, %1102 : vector<1x8x21xf32>
    %1104 = vector.extract_strided_slice %892 {offsets = [28, 0, 0], sizes = [1, 8, 1], strides = [1, 1, 1]} : vector<45x8x1xf32> to vector<1x8x1xf32>
    %1105 = vector.shape_cast %1104 : vector<1x8x1xf32> to vector<8x1xf32>
    %1106 = vector.extract_strided_slice %1096 {offsets = [0, 0, 1], sizes = [1, 8, 21], strides = [1, 1, 1]} : vector<1x8x41xf32> to vector<1x8x21xf32>
    %1107 = vector.shape_cast %1105 : vector<8x1xf32> to vector<1x8x1xf32>
    %1108 = vector.broadcast %1107 : vector<1x8x1xf32> to vector<1x8x21xf32>
    %1109 = arith.mulf %1106, %1108 : vector<1x8x21xf32>
    %1110 = arith.addf %1103, %1109 : vector<1x8x21xf32>
    %1111 = vector.extract_strided_slice %892 {offsets = [29, 0, 0], sizes = [1, 8, 1], strides = [1, 1, 1]} : vector<45x8x1xf32> to vector<1x8x1xf32>
    %1112 = vector.shape_cast %1111 : vector<1x8x1xf32> to vector<8x1xf32>
    %1113 = vector.extract_strided_slice %1096 {offsets = [0, 0, 2], sizes = [1, 8, 21], strides = [1, 1, 1]} : vector<1x8x41xf32> to vector<1x8x21xf32>
    %1114 = vector.shape_cast %1112 : vector<8x1xf32> to vector<1x8x1xf32>
    %1115 = vector.broadcast %1114 : vector<1x8x1xf32> to vector<1x8x21xf32>
    %1116 = arith.mulf %1113, %1115 : vector<1x8x21xf32>
    %1117 = arith.addf %1110, %1116 : vector<1x8x21xf32>
    %1118 = vector.extract_strided_slice %892 {offsets = [30, 0, 0], sizes = [1, 8, 1], strides = [1, 1, 1]} : vector<45x8x1xf32> to vector<1x8x1xf32>
    %1119 = vector.shape_cast %1118 : vector<1x8x1xf32> to vector<8x1xf32>
    %1120 = vector.extract_strided_slice %1096 {offsets = [0, 0, 9], sizes = [1, 8, 21], strides = [1, 1, 1]} : vector<1x8x41xf32> to vector<1x8x21xf32>
    %1121 = vector.shape_cast %1119 : vector<8x1xf32> to vector<1x8x1xf32>
    %1122 = vector.broadcast %1121 : vector<1x8x1xf32> to vector<1x8x21xf32>
    %1123 = arith.mulf %1120, %1122 : vector<1x8x21xf32>
    %1124 = arith.addf %1117, %1123 : vector<1x8x21xf32>
    %1125 = vector.extract_strided_slice %892 {offsets = [31, 0, 0], sizes = [1, 8, 1], strides = [1, 1, 1]} : vector<45x8x1xf32> to vector<1x8x1xf32>
    %1126 = vector.shape_cast %1125 : vector<1x8x1xf32> to vector<8x1xf32>
    %1127 = vector.extract_strided_slice %1096 {offsets = [0, 0, 10], sizes = [1, 8, 21], strides = [1, 1, 1]} : vector<1x8x41xf32> to vector<1x8x21xf32>
    %1128 = vector.shape_cast %1126 : vector<8x1xf32> to vector<1x8x1xf32>
    %1129 = vector.broadcast %1128 : vector<1x8x1xf32> to vector<1x8x21xf32>
    %1130 = arith.mulf %1127, %1129 : vector<1x8x21xf32>
    %1131 = arith.addf %1124, %1130 : vector<1x8x21xf32>
    %1132 = vector.extract_strided_slice %892 {offsets = [32, 0, 0], sizes = [1, 8, 1], strides = [1, 1, 1]} : vector<45x8x1xf32> to vector<1x8x1xf32>
    %1133 = vector.shape_cast %1132 : vector<1x8x1xf32> to vector<8x1xf32>
    %1134 = vector.extract_strided_slice %1096 {offsets = [0, 0, 11], sizes = [1, 8, 21], strides = [1, 1, 1]} : vector<1x8x41xf32> to vector<1x8x21xf32>
    %1135 = vector.shape_cast %1133 : vector<8x1xf32> to vector<1x8x1xf32>
    %1136 = vector.broadcast %1135 : vector<1x8x1xf32> to vector<1x8x21xf32>
    %1137 = arith.mulf %1134, %1136 : vector<1x8x21xf32>
    %1138 = arith.addf %1131, %1137 : vector<1x8x21xf32>
    %1139 = vector.extract_strided_slice %892 {offsets = [33, 0, 0], sizes = [1, 8, 1], strides = [1, 1, 1]} : vector<45x8x1xf32> to vector<1x8x1xf32>
    %1140 = vector.shape_cast %1139 : vector<1x8x1xf32> to vector<8x1xf32>
    %1141 = vector.extract_strided_slice %1096 {offsets = [0, 0, 18], sizes = [1, 8, 21], strides = [1, 1, 1]} : vector<1x8x41xf32> to vector<1x8x21xf32>
    %1142 = vector.shape_cast %1140 : vector<8x1xf32> to vector<1x8x1xf32>
    %1143 = vector.broadcast %1142 : vector<1x8x1xf32> to vector<1x8x21xf32>
    %1144 = arith.mulf %1141, %1143 : vector<1x8x21xf32>
    %1145 = arith.addf %1138, %1144 : vector<1x8x21xf32>
    %1146 = vector.extract_strided_slice %892 {offsets = [34, 0, 0], sizes = [1, 8, 1], strides = [1, 1, 1]} : vector<45x8x1xf32> to vector<1x8x1xf32>
    %1147 = vector.shape_cast %1146 : vector<1x8x1xf32> to vector<8x1xf32>
    %1148 = vector.extract_strided_slice %1096 {offsets = [0, 0, 19], sizes = [1, 8, 21], strides = [1, 1, 1]} : vector<1x8x41xf32> to vector<1x8x21xf32>
    %1149 = vector.shape_cast %1147 : vector<8x1xf32> to vector<1x8x1xf32>
    %1150 = vector.broadcast %1149 : vector<1x8x1xf32> to vector<1x8x21xf32>
    %1151 = arith.mulf %1148, %1150 : vector<1x8x21xf32>
    %1152 = arith.addf %1145, %1151 : vector<1x8x21xf32>
    %1153 = vector.extract_strided_slice %892 {offsets = [35, 0, 0], sizes = [1, 8, 1], strides = [1, 1, 1]} : vector<45x8x1xf32> to vector<1x8x1xf32>
    %1154 = vector.shape_cast %1153 : vector<1x8x1xf32> to vector<8x1xf32>
    %1155 = vector.extract_strided_slice %1096 {offsets = [0, 0, 20], sizes = [1, 8, 21], strides = [1, 1, 1]} : vector<1x8x41xf32> to vector<1x8x21xf32>
    %1156 = vector.shape_cast %1154 : vector<8x1xf32> to vector<1x8x1xf32>
    %1157 = vector.broadcast %1156 : vector<1x8x1xf32> to vector<1x8x21xf32>
    %1158 = arith.mulf %1155, %1157 : vector<1x8x21xf32>
    %1159 = arith.addf %1152, %1158 : vector<1x8x21xf32>
    %1160 = vector.shape_cast %898 : vector<8x41xf32> to vector<1x8x41xf32>
    %1161 = vector.extract_strided_slice %892 {offsets = [36, 0, 0], sizes = [1, 8, 1], strides = [1, 1, 1]} : vector<45x8x1xf32> to vector<1x8x1xf32>
    %1162 = vector.shape_cast %1161 : vector<1x8x1xf32> to vector<8x1xf32>
    %1163 = vector.extract_strided_slice %1160 {offsets = [0, 0, 0], sizes = [1, 8, 21], strides = [1, 1, 1]} : vector<1x8x41xf32> to vector<1x8x21xf32>
    %1164 = vector.shape_cast %1162 : vector<8x1xf32> to vector<1x8x1xf32>
    %1165 = vector.broadcast %1164 : vector<1x8x1xf32> to vector<1x8x21xf32>
    %1166 = arith.mulf %1163, %1165 : vector<1x8x21xf32>
    %1167 = arith.addf %1159, %1166 : vector<1x8x21xf32>
    %1168 = vector.extract_strided_slice %892 {offsets = [37, 0, 0], sizes = [1, 8, 1], strides = [1, 1, 1]} : vector<45x8x1xf32> to vector<1x8x1xf32>
    %1169 = vector.shape_cast %1168 : vector<1x8x1xf32> to vector<8x1xf32>
    %1170 = vector.extract_strided_slice %1160 {offsets = [0, 0, 1], sizes = [1, 8, 21], strides = [1, 1, 1]} : vector<1x8x41xf32> to vector<1x8x21xf32>
    %1171 = vector.shape_cast %1169 : vector<8x1xf32> to vector<1x8x1xf32>
    %1172 = vector.broadcast %1171 : vector<1x8x1xf32> to vector<1x8x21xf32>
    %1173 = arith.mulf %1170, %1172 : vector<1x8x21xf32>
    %1174 = arith.addf %1167, %1173 : vector<1x8x21xf32>
    %1175 = vector.extract_strided_slice %892 {offsets = [38, 0, 0], sizes = [1, 8, 1], strides = [1, 1, 1]} : vector<45x8x1xf32> to vector<1x8x1xf32>
    %1176 = vector.shape_cast %1175 : vector<1x8x1xf32> to vector<8x1xf32>
    %1177 = vector.extract_strided_slice %1160 {offsets = [0, 0, 2], sizes = [1, 8, 21], strides = [1, 1, 1]} : vector<1x8x41xf32> to vector<1x8x21xf32>
    %1178 = vector.shape_cast %1176 : vector<8x1xf32> to vector<1x8x1xf32>
    %1179 = vector.broadcast %1178 : vector<1x8x1xf32> to vector<1x8x21xf32>
    %1180 = arith.mulf %1177, %1179 : vector<1x8x21xf32>
    %1181 = arith.addf %1174, %1180 : vector<1x8x21xf32>
    %1182 = vector.extract_strided_slice %892 {offsets = [39, 0, 0], sizes = [1, 8, 1], strides = [1, 1, 1]} : vector<45x8x1xf32> to vector<1x8x1xf32>
    %1183 = vector.shape_cast %1182 : vector<1x8x1xf32> to vector<8x1xf32>
    %1184 = vector.extract_strided_slice %1160 {offsets = [0, 0, 9], sizes = [1, 8, 21], strides = [1, 1, 1]} : vector<1x8x41xf32> to vector<1x8x21xf32>
    %1185 = vector.shape_cast %1183 : vector<8x1xf32> to vector<1x8x1xf32>
    %1186 = vector.broadcast %1185 : vector<1x8x1xf32> to vector<1x8x21xf32>
    %1187 = arith.mulf %1184, %1186 : vector<1x8x21xf32>
    %1188 = arith.addf %1181, %1187 : vector<1x8x21xf32>
    %1189 = vector.extract_strided_slice %892 {offsets = [40, 0, 0], sizes = [1, 8, 1], strides = [1, 1, 1]} : vector<45x8x1xf32> to vector<1x8x1xf32>
    %1190 = vector.shape_cast %1189 : vector<1x8x1xf32> to vector<8x1xf32>
    %1191 = vector.extract_strided_slice %1160 {offsets = [0, 0, 10], sizes = [1, 8, 21], strides = [1, 1, 1]} : vector<1x8x41xf32> to vector<1x8x21xf32>
    %1192 = vector.shape_cast %1190 : vector<8x1xf32> to vector<1x8x1xf32>
    %1193 = vector.broadcast %1192 : vector<1x8x1xf32> to vector<1x8x21xf32>
    %1194 = arith.mulf %1191, %1193 : vector<1x8x21xf32>
    %1195 = arith.addf %1188, %1194 : vector<1x8x21xf32>
    %1196 = vector.extract_strided_slice %892 {offsets = [41, 0, 0], sizes = [1, 8, 1], strides = [1, 1, 1]} : vector<45x8x1xf32> to vector<1x8x1xf32>
    %1197 = vector.shape_cast %1196 : vector<1x8x1xf32> to vector<8x1xf32>
    %1198 = vector.extract_strided_slice %1160 {offsets = [0, 0, 11], sizes = [1, 8, 21], strides = [1, 1, 1]} : vector<1x8x41xf32> to vector<1x8x21xf32>
    %1199 = vector.shape_cast %1197 : vector<8x1xf32> to vector<1x8x1xf32>
    %1200 = vector.broadcast %1199 : vector<1x8x1xf32> to vector<1x8x21xf32>
    %1201 = arith.mulf %1198, %1200 : vector<1x8x21xf32>
    %1202 = arith.addf %1195, %1201 : vector<1x8x21xf32>
    %1203 = vector.extract_strided_slice %892 {offsets = [42, 0, 0], sizes = [1, 8, 1], strides = [1, 1, 1]} : vector<45x8x1xf32> to vector<1x8x1xf32>
    %1204 = vector.shape_cast %1203 : vector<1x8x1xf32> to vector<8x1xf32>
    %1205 = vector.extract_strided_slice %1160 {offsets = [0, 0, 18], sizes = [1, 8, 21], strides = [1, 1, 1]} : vector<1x8x41xf32> to vector<1x8x21xf32>
    %1206 = vector.shape_cast %1204 : vector<8x1xf32> to vector<1x8x1xf32>
    %1207 = vector.broadcast %1206 : vector<1x8x1xf32> to vector<1x8x21xf32>
    %1208 = arith.mulf %1205, %1207 : vector<1x8x21xf32>
    %1209 = arith.addf %1202, %1208 : vector<1x8x21xf32>
    %1210 = vector.extract_strided_slice %892 {offsets = [43, 0, 0], sizes = [1, 8, 1], strides = [1, 1, 1]} : vector<45x8x1xf32> to vector<1x8x1xf32>
    %1211 = vector.shape_cast %1210 : vector<1x8x1xf32> to vector<8x1xf32>
    %1212 = vector.extract_strided_slice %1160 {offsets = [0, 0, 19], sizes = [1, 8, 21], strides = [1, 1, 1]} : vector<1x8x41xf32> to vector<1x8x21xf32>
    %1213 = vector.shape_cast %1211 : vector<8x1xf32> to vector<1x8x1xf32>
    %1214 = vector.broadcast %1213 : vector<1x8x1xf32> to vector<1x8x21xf32>
    %1215 = arith.mulf %1212, %1214 : vector<1x8x21xf32>
    %1216 = arith.addf %1209, %1215 : vector<1x8x21xf32>
    %1217 = vector.extract_strided_slice %892 {offsets = [44, 0, 0], sizes = [1, 8, 1], strides = [1, 1, 1]} : vector<45x8x1xf32> to vector<1x8x1xf32>
    %1218 = vector.shape_cast %1217 : vector<1x8x1xf32> to vector<8x1xf32>
    %1219 = vector.extract_strided_slice %1160 {offsets = [0, 0, 20], sizes = [1, 8, 21], strides = [1, 1, 1]} : vector<1x8x41xf32> to vector<1x8x21xf32>
    %1220 = vector.shape_cast %1218 : vector<8x1xf32> to vector<1x8x1xf32>
    %1221 = vector.broadcast %1220 : vector<1x8x1xf32> to vector<1x8x21xf32>
    %1222 = arith.mulf %1219, %1221 : vector<1x8x21xf32>
    %1223 = arith.addf %1216, %1222 : vector<1x8x21xf32>
    %1224 = vector.shape_cast %893 : vector<8x1xf32> to vector<1x8x1xf32>
    %1225 = vector.broadcast %1224 : vector<1x8x1xf32> to vector<1x8x21xf32>
    %1226 = arith.addf %1223, %1225 : vector<1x8x21xf32>
    %cst_54 = arith.constant 0.000000e+00 : f32
    %1227 = vector.broadcast %cst_54 : f32 to vector<1x8x21xf32>
    %1228 = vector.extract_strided_slice %1226 {offsets = [0, 0, 0], sizes = [1, 1, 21], strides = [1, 1, 1]} : vector<1x8x21xf32> to vector<1x1x21xf32>
    %1229 = vector.extract_strided_slice %894 {offsets = [0, 0, 0], sizes = [1, 8, 1], strides = [1, 1, 1]} : vector<8x8x1xf32> to vector<1x8x1xf32>
    %1230 = vector.shape_cast %1229 : vector<1x8x1xf32> to vector<8x1xf32>
    %1231 = vector.shape_cast %1230 : vector<8x1xf32> to vector<1x8x1xf32>
    %1232 = vector.broadcast %1228 : vector<1x1x21xf32> to vector<1x8x21xf32>
    %1233 = vector.broadcast %1231 : vector<1x8x1xf32> to vector<1x8x21xf32>
    %1234 = arith.mulf %1232, %1233 : vector<1x8x21xf32>
    %1235 = arith.addf %1227, %1234 : vector<1x8x21xf32>
    %1236 = vector.extract_strided_slice %1226 {offsets = [0, 1, 0], sizes = [1, 1, 21], strides = [1, 1, 1]} : vector<1x8x21xf32> to vector<1x1x21xf32>
    %1237 = vector.extract_strided_slice %894 {offsets = [1, 0, 0], sizes = [1, 8, 1], strides = [1, 1, 1]} : vector<8x8x1xf32> to vector<1x8x1xf32>
    %1238 = vector.shape_cast %1237 : vector<1x8x1xf32> to vector<8x1xf32>
    %1239 = vector.shape_cast %1238 : vector<8x1xf32> to vector<1x8x1xf32>
    %1240 = vector.broadcast %1236 : vector<1x1x21xf32> to vector<1x8x21xf32>
    %1241 = vector.broadcast %1239 : vector<1x8x1xf32> to vector<1x8x21xf32>
    %1242 = arith.mulf %1240, %1241 : vector<1x8x21xf32>
    %1243 = arith.addf %1235, %1242 : vector<1x8x21xf32>
    %1244 = vector.extract_strided_slice %1226 {offsets = [0, 2, 0], sizes = [1, 1, 21], strides = [1, 1, 1]} : vector<1x8x21xf32> to vector<1x1x21xf32>
    %1245 = vector.extract_strided_slice %894 {offsets = [2, 0, 0], sizes = [1, 8, 1], strides = [1, 1, 1]} : vector<8x8x1xf32> to vector<1x8x1xf32>
    %1246 = vector.shape_cast %1245 : vector<1x8x1xf32> to vector<8x1xf32>
    %1247 = vector.shape_cast %1246 : vector<8x1xf32> to vector<1x8x1xf32>
    %1248 = vector.broadcast %1244 : vector<1x1x21xf32> to vector<1x8x21xf32>
    %1249 = vector.broadcast %1247 : vector<1x8x1xf32> to vector<1x8x21xf32>
    %1250 = arith.mulf %1248, %1249 : vector<1x8x21xf32>
    %1251 = arith.addf %1243, %1250 : vector<1x8x21xf32>
    %1252 = vector.extract_strided_slice %1226 {offsets = [0, 3, 0], sizes = [1, 1, 21], strides = [1, 1, 1]} : vector<1x8x21xf32> to vector<1x1x21xf32>
    %1253 = vector.extract_strided_slice %894 {offsets = [3, 0, 0], sizes = [1, 8, 1], strides = [1, 1, 1]} : vector<8x8x1xf32> to vector<1x8x1xf32>
    %1254 = vector.shape_cast %1253 : vector<1x8x1xf32> to vector<8x1xf32>
    %1255 = vector.shape_cast %1254 : vector<8x1xf32> to vector<1x8x1xf32>
    %1256 = vector.broadcast %1252 : vector<1x1x21xf32> to vector<1x8x21xf32>
    %1257 = vector.broadcast %1255 : vector<1x8x1xf32> to vector<1x8x21xf32>
    %1258 = arith.mulf %1256, %1257 : vector<1x8x21xf32>
    %1259 = arith.addf %1251, %1258 : vector<1x8x21xf32>
    %1260 = vector.extract_strided_slice %1226 {offsets = [0, 4, 0], sizes = [1, 1, 21], strides = [1, 1, 1]} : vector<1x8x21xf32> to vector<1x1x21xf32>
    %1261 = vector.extract_strided_slice %894 {offsets = [4, 0, 0], sizes = [1, 8, 1], strides = [1, 1, 1]} : vector<8x8x1xf32> to vector<1x8x1xf32>
    %1262 = vector.shape_cast %1261 : vector<1x8x1xf32> to vector<8x1xf32>
    %1263 = vector.shape_cast %1262 : vector<8x1xf32> to vector<1x8x1xf32>
    %1264 = vector.broadcast %1260 : vector<1x1x21xf32> to vector<1x8x21xf32>
    %1265 = vector.broadcast %1263 : vector<1x8x1xf32> to vector<1x8x21xf32>
    %1266 = arith.mulf %1264, %1265 : vector<1x8x21xf32>
    %1267 = arith.addf %1259, %1266 : vector<1x8x21xf32>
    %1268 = vector.extract_strided_slice %1226 {offsets = [0, 5, 0], sizes = [1, 1, 21], strides = [1, 1, 1]} : vector<1x8x21xf32> to vector<1x1x21xf32>
    %1269 = vector.extract_strided_slice %894 {offsets = [5, 0, 0], sizes = [1, 8, 1], strides = [1, 1, 1]} : vector<8x8x1xf32> to vector<1x8x1xf32>
    %1270 = vector.shape_cast %1269 : vector<1x8x1xf32> to vector<8x1xf32>
    %1271 = vector.shape_cast %1270 : vector<8x1xf32> to vector<1x8x1xf32>
    %1272 = vector.broadcast %1268 : vector<1x1x21xf32> to vector<1x8x21xf32>
    %1273 = vector.broadcast %1271 : vector<1x8x1xf32> to vector<1x8x21xf32>
    %1274 = arith.mulf %1272, %1273 : vector<1x8x21xf32>
    %1275 = arith.addf %1267, %1274 : vector<1x8x21xf32>
    %1276 = vector.extract_strided_slice %1226 {offsets = [0, 6, 0], sizes = [1, 1, 21], strides = [1, 1, 1]} : vector<1x8x21xf32> to vector<1x1x21xf32>
    %1277 = vector.extract_strided_slice %894 {offsets = [6, 0, 0], sizes = [1, 8, 1], strides = [1, 1, 1]} : vector<8x8x1xf32> to vector<1x8x1xf32>
    %1278 = vector.shape_cast %1277 : vector<1x8x1xf32> to vector<8x1xf32>
    %1279 = vector.shape_cast %1278 : vector<8x1xf32> to vector<1x8x1xf32>
    %1280 = vector.broadcast %1276 : vector<1x1x21xf32> to vector<1x8x21xf32>
    %1281 = vector.broadcast %1279 : vector<1x8x1xf32> to vector<1x8x21xf32>
    %1282 = arith.mulf %1280, %1281 : vector<1x8x21xf32>
    %1283 = arith.addf %1275, %1282 : vector<1x8x21xf32>
    %1284 = vector.extract_strided_slice %1226 {offsets = [0, 7, 0], sizes = [1, 1, 21], strides = [1, 1, 1]} : vector<1x8x21xf32> to vector<1x1x21xf32>
    %1285 = vector.extract_strided_slice %894 {offsets = [7, 0, 0], sizes = [1, 8, 1], strides = [1, 1, 1]} : vector<8x8x1xf32> to vector<1x8x1xf32>
    %1286 = vector.shape_cast %1285 : vector<1x8x1xf32> to vector<8x1xf32>
    %1287 = vector.shape_cast %1286 : vector<8x1xf32> to vector<1x8x1xf32>
    %1288 = vector.broadcast %1284 : vector<1x1x21xf32> to vector<1x8x21xf32>
    %1289 = vector.broadcast %1287 : vector<1x8x1xf32> to vector<1x8x21xf32>
    %1290 = arith.mulf %1288, %1289 : vector<1x8x21xf32>
    %1291 = arith.addf %1283, %1290 : vector<1x8x21xf32>
    %1292 = vector.shape_cast %895 : vector<8x1xf32> to vector<1x8x1xf32>
    %1293 = vector.broadcast %1292 : vector<1x8x1xf32> to vector<1x8x21xf32>
    %1294 = arith.addf %1291, %1293 : vector<1x8x21xf32>
    %cst_55 = arith.constant 0.000000e+00 : f32
    %1295 = vector.broadcast %cst_55 : f32 to vector<1x8x21xf32>
    %1296 = arith.maximumf %1294, %1295 : vector<1x8x21xf32>
    %1297 = vector.shape_cast %896 : vector<8x1xf32> to vector<1x8x1xf32>
    %1298 = vector.broadcast %1297 : vector<1x8x1xf32> to vector<1x8x21xf32>
    %1299 = arith.mulf %1296, %1298 : vector<1x8x21xf32>
    %1300 = vector.shape_cast %897 : vector<8x1xf32> to vector<1x8x1xf32>
    %1301 = vector.broadcast %1300 : vector<1x8x1xf32> to vector<1x8x21xf32>
    %1302 = arith.addf %1299, %1301 : vector<1x8x21xf32>
    %1303 = vector.extract_strided_slice %1302 {offsets = [0, 0, 0], sizes = [1, 8, 3], strides = [1, 1, 1]} : vector<1x8x21xf32> to vector<1x8x3xf32>
    %cst_56 = arith.constant dense<0xFF800000> : vector<1x8xf32>
    %1304 = vector.multi_reduction <maximumf>, %1303, %cst_56 [2] : vector<1x8x3xf32> to vector<1x8xf32>
    %1305 = vector.shape_cast %1304 : vector<1x8xf32> to vector<1x8x1xf32>
    %1306 = vector.extract_strided_slice %1302 {offsets = [0, 0, 9], sizes = [1, 8, 3], strides = [1, 1, 1]} : vector<1x8x21xf32> to vector<1x8x3xf32>
    %cst_57 = arith.constant dense<0xFF800000> : vector<1x8xf32>
    %1307 = vector.multi_reduction <maximumf>, %1306, %cst_57 [2] : vector<1x8x3xf32> to vector<1x8xf32>
    %1308 = vector.shape_cast %1307 : vector<1x8xf32> to vector<1x8x1xf32>
    %1309 = arith.maximumf %1305, %1308 : vector<1x8x1xf32>
    %1310 = vector.extract_strided_slice %1302 {offsets = [0, 0, 18], sizes = [1, 8, 3], strides = [1, 1, 1]} : vector<1x8x21xf32> to vector<1x8x3xf32>
    %cst_58 = arith.constant dense<0xFF800000> : vector<1x8xf32>
    %1311 = vector.multi_reduction <maximumf>, %1310, %cst_58 [2] : vector<1x8x3xf32> to vector<1x8xf32>
    %1312 = vector.shape_cast %1311 : vector<1x8xf32> to vector<1x8x1xf32>
    %1313 = arith.maximumf %1309, %1312 : vector<1x8x1xf32>
    %c0_59 = arith.constant 0 : index
    %c0_60 = arith.constant 0 : index
    %c0_61 = arith.constant 0 : index
    %c0_62 = arith.constant 0 : index
    %1314 = vector.load %arg20[%c0_59, %c0_60, %c0_61, %c0_62] : memref<1x1x8x1xf32, #tpu.memory_space<vmem>>, vector<1x1x8x1xf32>
    %1315 = vector.shape_cast %1314 : vector<1x1x8x1xf32> to vector<1x8x1xf32>
    %1316 = vector.shape_cast %1313 : vector<1x8x1xf32> to vector<1x1x8x1xf32>
    tpu.vector_store %arg20[%c0_59, %c0_60, %c0_61, %c0_62], %1316 {strides = array<i32>} : memref<1x1x8x1xf32, #tpu.memory_space<vmem>>, vector<1x1x8x1xf32>,
    return
  }
  func.func @transform_0(%arg0: i32) -> (i32, i32, i32, i32) {
    %c0_i32 = arith.constant 0 : i32
    %c0_i32_0 = arith.constant 0 : i32
    %c0_i32_1 = arith.constant 0 : i32
    %c0_i32_2 = arith.constant 0 : i32
    return %arg0, %c0_i32, %c0_i32_0, %c0_i32_1 : i32, i32, i32, i32
  }
  func.func @transform_1(%arg0: i32) -> (i32, i32, i32) {
    %c0_i32 = arith.constant 0 : i32
    %c0_i32_0 = arith.constant 0 : i32
    %c0_i32_1 = arith.constant 0 : i32
    %c0_i32_2 = arith.constant 0 : i32
    return %c0_i32, %c0_i32_0, %c0_i32_1 : i32, i32, i32
  }
  func.func @transform_2(%arg0: i32) -> (i32, i32) {
    %c0_i32 = arith.constant 0 : i32
    %c0_i32_0 = arith.constant 0 : i32
    %c0_i32_1 = arith.constant 0 : i32
    return %c0_i32, %c0_i32_0 : i32, i32
  }
  func.func @transform_3(%arg0: i32) -> (i32, i32, i32) {
    %c0_i32 = arith.constant 0 : i32
    %c0_i32_0 = arith.constant 0 : i32
    %c0_i32_1 = arith.constant 0 : i32
    %c0_i32_2 = arith.constant 0 : i32
    return %c0_i32, %c0_i32_0, %c0_i32_1 : i32, i32, i32
  }
  func.func @transform_4(%arg0: i32) -> (i32, i32) {
    %c0_i32 = arith.constant 0 : i32
    %c0_i32_0 = arith.constant 0 : i32
    %c0_i32_1 = arith.constant 0 : i32
    return %c0_i32, %c0_i32_0 : i32, i32
  }
  func.func @transform_5(%arg0: i32) -> (i32, i32) {
    %c0_i32 = arith.constant 0 : i32
    %c0_i32_0 = arith.constant 0 : i32
    %c0_i32_1 = arith.constant 0 : i32
    return %c0_i32, %c0_i32_0 : i32, i32
  }
  func.func @transform_6(%arg0: i32) -> (i32, i32) {
    %c0_i32 = arith.constant 0 : i32
    %c0_i32_0 = arith.constant 0 : i32
    %c0_i32_1 = arith.constant 0 : i32
    return %c0_i32, %c0_i32_0 : i32, i32
  }
  func.func @transform_7(%arg0: i32) -> (i32, i32, i32) {
    %c0_i32 = arith.constant 0 : i32
    %c0_i32_0 = arith.constant 0 : i32
    %c0_i32_1 = arith.constant 0 : i32
    %c0_i32_2 = arith.constant 0 : i32
    return %c0_i32, %c0_i32_0, %c0_i32_1 : i32, i32, i32
  }
  func.func @transform_8(%arg0: i32) -> (i32, i32) {
    %c0_i32 = arith.constant 0 : i32
    %c0_i32_0 = arith.constant 0 : i32
    %c0_i32_1 = arith.constant 0 : i32
    return %c0_i32, %c0_i32_0 : i32, i32
  }
  func.func @transform_9(%arg0: i32) -> (i32, i32, i32) {
    %c0_i32 = arith.constant 0 : i32
    %c0_i32_0 = arith.constant 0 : i32
    %c0_i32_1 = arith.constant 0 : i32
    %c0_i32_2 = arith.constant 0 : i32
    return %c0_i32, %c0_i32_0, %c0_i32_1 : i32, i32, i32
  }
  func.func @transform_10(%arg0: i32) -> (i32, i32) {
    %c0_i32 = arith.constant 0 : i32
    %c0_i32_0 = arith.constant 0 : i32
    %c0_i32_1 = arith.constant 0 : i32
    return %c0_i32, %c0_i32_0 : i32, i32
  }
  func.func @transform_11(%arg0: i32) -> (i32, i32) {
    %c0_i32 = arith.constant 0 : i32
    %c0_i32_0 = arith.constant 0 : i32
    %c0_i32_1 = arith.constant 0 : i32
    return %c0_i32, %c0_i32_0 : i32, i32
  }
  func.func @transform_12(%arg0: i32) -> (i32, i32) {
    %c0_i32 = arith.constant 0 : i32
    %c0_i32_0 = arith.constant 0 : i32
    %c0_i32_1 = arith.constant 0 : i32
    return %c0_i32, %c0_i32_0 : i32, i32
  }
  func.func @transform_13(%arg0: i32) -> (i32, i32, i32) {
    %c0_i32 = arith.constant 0 : i32
    %c0_i32_0 = arith.constant 0 : i32
    %c0_i32_1 = arith.constant 0 : i32
    %c0_i32_2 = arith.constant 0 : i32
    return %c0_i32, %c0_i32_0, %c0_i32_1 : i32, i32, i32
  }
  func.func @transform_14(%arg0: i32) -> (i32, i32) {
    %c0_i32 = arith.constant 0 : i32
    %c0_i32_0 = arith.constant 0 : i32
    %c0_i32_1 = arith.constant 0 : i32
    return %c0_i32, %c0_i32_0 : i32, i32
  }
  func.func @transform_15(%arg0: i32) -> (i32, i32, i32) {
    %c0_i32 = arith.constant 0 : i32
    %c0_i32_0 = arith.constant 0 : i32
    %c0_i32_1 = arith.constant 0 : i32
    %c0_i32_2 = arith.constant 0 : i32
    return %c0_i32, %c0_i32_0, %c0_i32_1 : i32, i32, i32
  }
  func.func @transform_16(%arg0: i32) -> (i32, i32) {
    %c0_i32 = arith.constant 0 : i32
    %c0_i32_0 = arith.constant 0 : i32
    %c0_i32_1 = arith.constant 0 : i32
    return %c0_i32, %c0_i32_0 : i32, i32
  }
  func.func @transform_17(%arg0: i32) -> (i32, i32) {
    %c0_i32 = arith.constant 0 : i32
    %c0_i32_0 = arith.constant 0 : i32
    %c0_i32_1 = arith.constant 0 : i32
    return %c0_i32, %c0_i32_0 : i32, i32
  }
  func.func @transform_18(%arg0: i32) -> (i32, i32) {
    %c0_i32 = arith.constant 0 : i32
    %c0_i32_0 = arith.constant 0 : i32
    %c0_i32_1 = arith.constant 0 : i32
    return %c0_i32, %c0_i32_0 : i32, i32
  }
  func.func @transform_19(%arg0: i32) -> (i32, i32, i32, i32) {
    %c0_i32 = arith.constant 0 : i32
    %c0_i32_0 = arith.constant 0 : i32
    %c0_i32_1 = arith.constant 0 : i32
    %c0_i32_2 = arith.constant 0 : i32
    return %arg0, %c0_i32, %c0_i32_0, %c0_i32_1 : i32, i32, i32, i32
  }
}

</mosaic_0001>

<bundles_post_ra>
// kernel: net_depthwise_forward.1
= control target key start
LH: loop header
LB: loop body
LE: loop exit
PB: predicated region body
PF: predicated region fallthrough
CT: control target
= control target key end

     0   :  { %s6756_s0 = inlined_call_operand.vmem [shape: f32[2,16,4,81], index: 0, kind: input, shape index: {}]   ;;  %s6757_s1 = inlined_call_operand.vmem [shape: f32[45,4,1], index: 1, kind: input, shape index: {}]   ;;  %s6758_s2 = inlined_call_operand.vmem [shape: f32[4,1], index: 2, kind: input, shape index: {}]   ;;  %s6759_s3 = inlined_call_operand.vmem [shape: f32[4,8,1], index: 3, kind: input, shape index: {}]   ;;  %s6760_s4 = inlined_call_operand.vmem [shape: f32[8,1], index: 4, kind: input, shape index: {}]   ;;  %s6761_s5 = inlined_call_operand.vmem [shape: f32[8,1], index: 5, kind: input, shape index: {}]   ;;  %s6762_s6 = inlined_call_operand.vmem [shape: f32[8,1], index: 6, kind: input, shape index: {}]   ;;  %s6763_s7 = inlined_call_operand.vmem [shape: f32[45,8,1], index: 7, kind: input, shape index: {}]   ;;  %s6764_s8 = inlined_call_operand.vmem [shape: f32[8,1], index: 8, kind: input, shape index: {}]   ;;  %s6765_s9 = inlined_call_operand.vmem [shape: f32[8,8,1], index: 9, kind: input, shape index: {}]   ;;  %s6766_s10 = inlined_call_operand.vmem [shape: f32[8,1], index: 10, kind: input, shape index: {}]   ;;  %s6767_s11 = inlined_call_operand.vmem [shape: f32[8,1], index: 11, kind: input, shape index: {}]   ;;  %s6768_s12 = inlined_call_operand.vmem [shape: f32[8,1], index: 12, kind: input, shape index: {}]   ;;  %s6769_s13 = inlined_call_operand.vmem [shape: f32[45,8,1], index: 13, kind: input, shape index: {}]   ;;  %s6770_s14 = inlined_call_operand.vmem [shape: f32[8,1], index: 14, kind: input, shape index: {}]   ;;  %s6771_s15 = inlined_call_operand.vmem [shape: f32[8,8,1], index: 15, kind: input, shape index: {}]   ;;  %s6772_s16 = inlined_call_operand.vmem [shape: f32[8,1], index: 16, kind: input, shape index: {}]   ;;  %s6773_s17 = inlined_call_operand.vmem [shape: f32[8,1], index: 17, kind: input, shape index: {}]   ;;  %s6774_s18 = inlined_call_operand.vmem [shape: f32[8,1], index: 18, kind: input, shape index: {}]   ;;  %s6775_s19 = inlined_call_operand.vmem [shape: f32[2,1,8,1], index: 19, kind: output, shape index: {}]  }
   0x1   :  { %6799 = sst [smem:[#allocation198_spill]] %s6756_s0  ;;  %s4346_s0 = smov 0  }
   0x2   :  { %6800 = sst [smem:[#allocation199_spill]] %s6757_s1 }
   0x3   :  { %6801 = sst [smem:[#allocation200_spill]] %s6758_s2 }
   0x4   :  { %6802 = sst [smem:[#allocation201_spill]] %s6759_s3 }
   0x5   :  { %6803 = sst [smem:[#allocation202_spill]] %s6760_s4 }
   0x6   :  { %6804 = sst [smem:[#allocation203_spill]] %s6761_s5 }
   0x7   :  { %6805 = sst [smem:[#allocation204_spill]] %s6762_s6 }
   0x8   :  { %6806 = sst [smem:[#allocation205_spill]] %s6775_s19 }
   0x9 LB: > { %6807 = sst [smem:[#allocation2_spill]] %s4235_s0  ;;  %s4175_s30 = sadd.s32 4294967295, %s4235_s0   ;;  %s4235_s0 = sphi %s4346_s0, %s29_s0  }
   0xa   : > { %p4179_p0 = scmp.ge.s32.totalorder %s4235_s0, 1  ;;  %p537_p1 = scmp.lt.s32.totalorder %s4235_s0, 3 }
   0xc   : > { %p538_p2 = pnand %p4179_p0, %p537_p1 }
   0xe   : > { %541 = sbr.rel (%p538_p2) target bundleno = 9502 (0x251e), region = 96 }
  0x13   : > { %s6808_s1 = sld [smem:[#allocation199_spill]]  ;;  %v4237_v1 = vmov 0   ;;  %p592_p3 = scmp.lt.s32.totalorder %s4175_s30, 1  ;;  %vm4110_vm0 = vcmask 97352   ;;  %vm4106_vm1 = vcmask 23552   ;;  %vm4115_vm2 = vcmask 171152  }
  0x14   : > { %4203 = vset.pattern.permute.xlu0 %v4237_v1  ;;  %4204 = vset.pattern.permute.xlu1 %v4237_v1  ;;  %s6810_s2 = sld [smem:[#allocation198_spill]]  ;;  %s6790_s24 = smov 127   ;;  %vm4120_vm3 = vcmask 7168  }
  0x15   : > { %s7262_s30 = smov (!%p592_p3, %s4175_s30), 1  ;;  %s6788_s25 = smov 126  }
  0x16   : > { %6809 = sst [smem:[#allocation3_spill]] %s7262_s30  ;;  %s4185_s20 = sshll.u32 %s7262_s30, 6 }
  0x17   : > { %s6786_s3 = smov 119   ;;  %s6784_s26 = smov 118  }
  0x18   : > { %s6782_s27 = smov 117   ;;  %s6780_s28 = smov 110  }
  0x19   : > { %v617_v0 = vld [vmem:[%s6808_s1] sm:$0xf]  ;;  %v620_v2 = vld [vmem:[%s6808_s1 + $0xc] sm:$0xf]  ;;  %v618_v3 = vld [vmem:[%s6808_s1 + $0x4] sm:$0xf] }
  0x1a   : > { %672 = vperm.xlu0 %4203, %v617_v0   ;;  %771 = vperm.xlu1 %4204, %v620_v2   ;;  %v622_v4 = vld [vmem:[%s6808_s1 + $0x14] sm:$0xf]  ;;  %v619_v5 = vld [vmem:[%s6808_s1 + $0x8] sm:$0xf]  ;;  %v624_v6 = vld [vmem:[%s6808_s1 + $0x1c] sm:$0xf]  ;;  %s4402_s23 = scalar_lea.vmem %s6810_s2, %s4185_s20 }
  0x1b   : > { %v621_v7 = vld [vmem:[%s6808_s1 + $0x10] sm:$0xf]  ;;  %v626_v8 = vld [vmem:[%s6808_s1 + $0x24] sm:$0xf]  ;;  %v623_v9 = vld [vmem:[%s6808_s1 + $0x18] sm:$0xf] }
  0x1c   : > { %v628_v10 = vld [vmem:[%s6808_s1 + $0x2c] sm:$0xf]  ;;  %v625_v11 = vld [vmem:[%s6808_s1 + $0x20] sm:$0xf]  ;;  %v627_v12 = vld [vmem:[%s6808_s1 + $0x28] sm:$0xf] }
  0x1d   : > { %v4405_v14 = vld [vmem:[%s4402_s23 + $0x10] sm:$0xf]  ;;  %v4411_v18 = vld [vmem:[%s4402_s23 + $0x4] sm:$0xf]  ;;  %v4414_v19 = vld [vmem:[%s4402_s23 + $0x28] sm:$0xf] }
  0x1e   : > { %689 = vperm.xlu0 %4203, %v618_v3   ;;  %853 = vperm.xlu1 %4204, %v622_v4   ;;  %v4421_v23 = vld [vmem:[%s4402_s23 + $0x1c] sm:$0xf]  ;;  %v4428_v26 = vld [vmem:[%s4402_s23 + $0x34] sm:$0xf]  ;;  %s6778_s29 = smov 109   ;;  %s6794_s20 = smov 108  }
  0x1f   : > { %s6950_s21 = smov 110   ;;  %s7002_s22 = sld [smem:[#allocation201_spill]] }
  0x20   : > { %s7004_s4 = sld [smem:[#allocation202_spill]]  ;;  %s7011_s30 = smov 118  }
  0x21   : > { %s7005_s6 = sld [smem:[#allocation204_spill]] }
  0x22   : > { %730 = vperm.xlu0 %4203, %v619_v5   ;;  %935 = vperm.xlu1 %4204, %v624_v6   ;;  %s7006_s5 = sld [smem:[#allocation203_spill]] }
  0x23   : > { %s7258_s0 = sld [smem:[#allocation3_spill]] }
  0x26   : > { %812 = vperm.xlu0 %4203, %v621_v7   ;;  %1017 = vperm.xlu1 %4204, %v626_v8  }
  0x2a   : > { %894 = vperm.xlu0 %4203, %v623_v9   ;;  %1075 = vperm.xlu1 %4204, %v628_v10   ;;  %v4502_v10 = vld [vmem:[%s4402_s23 + $0x8] sm:$0xf] }
  0x2e   : > { %976 = vperm.xlu0 %4203, %v625_v11  }
  0x32   : > { %1034 = vperm.xlu0 %4203, %v627_v12  }
  0x95   : > { %v4397_v13 = vpop.permute.xlu0 %672  ;;  %v772_v31 = vpop.permute.xlu1 %771 }
  0x96   : > { %v774_v32 = vmul.f32 0.0, %v772_v31  ;;  %v776_v34 = vmul.f32 %v772_v31, %v4405_v14  ;;  %v778_v36 = vmul.f32 %v772_v31, %v4414_v19  ;;  %v775_v37 = vmul.f32 %v772_v31, %v4411_v18 }
  0x97   : > { %v777_v40 = vmul.f32 %v772_v31, %v4421_v23  ;;  %v779_v42 = vmul.f32 %v772_v31, %v4428_v26 }
  0x99   : > { %v690_v15 = vpop.permute.xlu0 %689  ;;  %v854_v45 = vpop.permute.xlu1 %853 }
  0x9a   : > { %v692_v16 = vmul.f32 0.0, %v690_v15  ;;  %v694_v17 = vmul.f32 %v690_v15, %v4405_v14  ;;  %v696_v20 = vmul.f32 %v690_v15, %v4414_v19  ;;  %v693_v21 = vmul.f32 %v690_v15, %v4411_v18 }
  0x9b   : > { %v695_v25 = vmul.f32 %v690_v15, %v4421_v23  ;;  %v697_v28 = vmul.f32 %v690_v15, %v4428_v26  ;;  %v856_v46 = vmul.f32 0.0, %v854_v45  ;;  %v858_v48 = vmul.f32 %v854_v45, %v4405_v14  ;;  %v4509_v15 = vld [vmem:[%s4402_s23 + $0x20] sm:$0xf] }
  0x9c   : > { %704 = vrot.lane.b32.xlu1 %v692_v16, %s6790_s24  ;;  %708 = vrot.lane.b32.xlu0 %v694_v17, %s6790_s24  ;;  %v860_v50 = vmul.f32 %v854_v45, %v4414_v19  ;;  %v857_v51 = vmul.f32 %v854_v45, %v4411_v18  ;;  %v859_v54 = vmul.f32 %v854_v45, %v4421_v23 }
  0x9d   : > { %v731_v22 = vpop.permute.xlu0 %730  ;;  %v861_v56 = vmul.f32 %v854_v45, %v4428_v26  ;;  %v936_v59 = vpop.permute.xlu1 %935 }
  0x9e   : > { %v734_v24 = vmul.f32 %v731_v22, %v4411_v18  ;;  %v736_v27 = vmul.f32 %v731_v22, %v4421_v23  ;;  %v738_v29 = vmul.f32 %v731_v22, %v4428_v26  ;;  %v733_v30 = vmul.f32 0.0, %v731_v22 }
  0x9f   : > { %v735_v33 = vmul.f32 %v731_v22, %v4405_v14  ;;  %v737_v35 = vmul.f32 %v731_v22, %v4414_v19  ;;  %v938_v60 = vmul.f32 0.0, %v936_v59  ;;  %v940_v62 = vmul.f32 %v936_v59, %v4405_v14 }
  0xa0   : > { %712 = vrot.lane.b32.xlu0 %v696_v20, %s6790_s24  ;;  %706 = vrot.lane.b32.xlu1 %v693_v21, %s6790_s24  ;;  %v942_v0 = vmul.f32 %v936_v59, %v4414_v19  ;;  %v939_v1 = vmul.f32 %v936_v59, %v4411_v18  ;;  %v941_v4 = vmul.f32 %v936_v59, %v4421_v23  ;;  %v4518_v21 = vld [vmem:[%s4402_s23 + $0x38] sm:$0xf] }
  0xa1   : > { %v813_v38 = vpop.permute.xlu0 %812  ;;  %v943_v6 = vmul.f32 %v936_v59, %v4428_v26  ;;  %v4513_v16 = vpop.permute.xlu1 %1017 }
  0xa2   : > { %v816_v39 = vmul.f32 %v813_v38, %v4411_v18  ;;  %v818_v41 = vmul.f32 %v813_v38, %v4421_v23  ;;  %v820_v43 = vmul.f32 %v813_v38, %v4428_v26  ;;  %v815_v44 = vmul.f32 0.0, %v813_v38 }
  0xa3   : > { %v817_v47 = vmul.f32 %v813_v38, %v4405_v14  ;;  %v819_v49 = vmul.f32 %v813_v38, %v4414_v19 }
  0xa4   : > { %747 = vrot.lane.b32.xlu0 %v734_v24, %s6788_s25  ;;  %710 = vrot.lane.b32.xlu1 %v695_v25, %s6790_s24 }
  0xa5   : > { %v895_v52 = vpop.permute.xlu0 %894  ;;  %v1076_v25 = vpop.permute.xlu1 %1075 }
  0xa6   : > { %v898_v53 = vmul.f32 %v895_v52, %v4411_v18  ;;  %v900_v55 = vmul.f32 %v895_v52, %v4421_v23  ;;  %v902_v57 = vmul.f32 %v895_v52, %v4428_v26  ;;  %v897_v58 = vmul.f32 0.0, %v895_v52 }
  0xa7   : > { %v899_v61 = vmul.f32 %v895_v52, %v4405_v14  ;;  %v901_v63 = vmul.f32 %v895_v52, %v4414_v19 }
  0xa8   : > { %751 = vrot.lane.b32.xlu0 %v736_v27, %s6788_s25  ;;  %714 = vrot.lane.b32.xlu1 %v697_v28, %s6790_s24  ;;  %v4524_v27 = vld [vmem:[%s4402_s23 + $0x14] sm:$0xf]  ;;  %v1078_v28 = vmul.f32 0.0, %v1076_v25 }
  0xa9   : > { %v977_v2 = vpop.permute.xlu0 %976  ;;  %v1080_v31 = vmul.f32 %v1076_v25, %v4524_v27 }
  0xaa   : > { %v980_v3 = vmul.f32 %v977_v2, %v4411_v18  ;;  %v982_v5 = vmul.f32 %v977_v2, %v4421_v23  ;;  %v984_v7 = vmul.f32 %v977_v2, %v4428_v26  ;;  %v979_v8 = vmul.f32 0.0, %v977_v2 }
  0xab   : > { %v981_v12 = vmul.f32 %v977_v2, %v4405_v14  ;;  %v983_v20 = vmul.f32 %v977_v2, %v4414_v19 }
  0xac   : > { %755 = vrot.lane.b32.xlu0 %v738_v29, %s6788_s25  ;;  %745 = vrot.lane.b32.xlu1 %v733_v30, %s6788_s25  ;;  %v4530_v30 = vld [vmem:[%s4402_s23 + $0x2c] sm:$0xf] }
  0xad   : > { %v1035_v9 = vpop.permute.xlu0 %1034 }
  0xae   : > { %v1038_v11 = vmul.f32 %v1035_v9, %v4502_v10  ;;  %v1040_v17 = vmul.f32 %v1035_v9, %v4509_v15  ;;  %v1042_v22 = vmul.f32 %v1035_v9, %v4518_v21  ;;  %v1037_v24 = vmul.f32 0.0, %v1035_v9 }
  0xaf   : > { %v1039_v29 = vmul.f32 %v1035_v9, %v4524_v27 }
  0xb0   : > { %786 = vrot.lane.b32.xlu0 %v774_v32, %s6786_s3  ;;  %749 = vrot.lane.b32.xlu1 %v735_v33, %s6788_s25  ;;  %v1041_v32 = vmul.f32 %v1035_v9, %v4530_v30  ;;  %v1082_v33 = vmul.f32 %v1076_v25, %v4530_v30 }
  0xb4   : > { %790 = vrot.lane.b32.xlu0 %v776_v34, %s6786_s3  ;;  %753 = vrot.lane.b32.xlu1 %v737_v35, %s6788_s25  ;;  %v1079_v34 = vmul.f32 %v1076_v25, %v4502_v10  ;;  %v629_v35 = vld [vmem:[%s6808_s1 + $0x30] sm:$0xf] }
  0xb8   : > { %794 = vrot.lane.b32.xlu0 %v778_v36, %s6786_s3  ;;  %788 = vrot.lane.b32.xlu1 %v775_v37, %s6786_s3  ;;  %v1081_v37 = vmul.f32 %v1076_v25, %v4509_v15 }
  0xbc   : > { %829 = vrot.lane.b32.xlu0 %v816_v39, %s6784_s26  ;;  %792 = vrot.lane.b32.xlu1 %v777_v40, %s6786_s3  ;;  %v1083_v39 = vmul.f32 %v1076_v25, %v4518_v21 }
  0xc0   : > { %833 = vrot.lane.b32.xlu0 %v818_v41, %s6784_s26  ;;  %796 = vrot.lane.b32.xlu1 %v779_v42, %s6786_s3 }
  0xc4   : > { %837 = vrot.lane.b32.xlu0 %v820_v43, %s6784_s26  ;;  %827 = vrot.lane.b32.xlu1 %v815_v44, %s6784_s26 }
  0xc8   : > { %868 = vrot.lane.b32.xlu0 %v856_v46, %s6782_s27  ;;  %831 = vrot.lane.b32.xlu1 %v817_v47, %s6784_s26 }
  0xcc   : > { %872 = vrot.lane.b32.xlu0 %v858_v48, %s6782_s27  ;;  %835 = vrot.lane.b32.xlu1 %v819_v49, %s6784_s26 }
  0xd0   : > { %876 = vrot.lane.b32.xlu0 %v860_v50, %s6782_s27  ;;  %870 = vrot.lane.b32.xlu1 %v857_v51, %s6782_s27 }
  0xd4   : > { %911 = vrot.lane.b32.xlu0 %v898_v53, %s6780_s28  ;;  %874 = vrot.lane.b32.xlu1 %v859_v54, %s6782_s27 }
  0xd8   : > { %915 = vrot.lane.b32.xlu0 %v900_v55, %s6780_s28  ;;  %878 = vrot.lane.b32.xlu1 %v861_v56, %s6782_s27 }
  0xdc   : > { %919 = vrot.lane.b32.xlu0 %v902_v57, %s6780_s28  ;;  %909 = vrot.lane.b32.xlu1 %v897_v58, %s6780_s28 }
  0xe0   : > { %950 = vrot.lane.b32.xlu0 %v938_v60, %s6778_s29  ;;  %913 = vrot.lane.b32.xlu1 %v899_v61, %s6780_s28 }
  0xe4   : > { %954 = vrot.lane.b32.xlu0 %v940_v62, %s6778_s29  ;;  %917 = vrot.lane.b32.xlu1 %v901_v63, %s6780_s28 }
  0xe8   : > { %958 = vrot.lane.b32.xlu0 %v942_v0, %s6778_s29  ;;  %952 = vrot.lane.b32.xlu1 %v939_v1, %s6778_s29 }
  0xec   : > { %993 = vrot.lane.b32.xlu0 %v980_v3, %s6794_s20  ;;  %956 = vrot.lane.b32.xlu1 %v941_v4, %s6778_s29 }
  0xf0   : > { %997 = vrot.lane.b32.xlu0 %v982_v5, %s6794_s20  ;;  %960 = vrot.lane.b32.xlu1 %v943_v6, %s6778_s29 }
  0xf4   : > { %1001 = vrot.lane.b32.xlu0 %v984_v7, %s6794_s20  ;;  %991 = vrot.lane.b32.xlu1 %v979_v8, %s6794_s20 }
  0xf8   : > { %1051 = vrot.lane.b32.xlu0 %v1038_v11, %s6790_s24  ;;  %995 = vrot.lane.b32.xlu1 %v981_v12, %s6794_s20 }
  0xfc   : > { %1055 = vrot.lane.b32.xlu0 %v1040_v17, %s6790_s24  ;;  %999 = vrot.lane.b32.xlu1 %v983_v20, %s6794_s20 }
 0x100   : > { %1059 = vrot.lane.b32.xlu0 %v1042_v22, %s6790_s24  ;;  %1049 = vrot.lane.b32.xlu1 %v1037_v24, %s6790_s24 }
 0x104   : > { %1090 = vrot.lane.b32.xlu0 %v1078_v28, %s6788_s25  ;;  %1053 = vrot.lane.b32.xlu1 %v1039_v29, %s6790_s24 }
 0x108   : > { %1094 = vrot.lane.b32.xlu0 %v1080_v31, %s6788_s25  ;;  %1057 = vrot.lane.b32.xlu1 %v1041_v32, %s6790_s24 }
 0x10c   : > { %1098 = vrot.lane.b32.xlu0 %v1082_v33, %s6788_s25  ;;  %1092 = vrot.lane.b32.xlu1 %v1079_v34, %s6788_s25 }
 0x10e   : > { %v4545_v36 = vpop.permute.xlu0 %708  ;;  %v4581_v54 = vpop.permute.xlu1 %704 }
 0x110   : > { %1116 = vperm.xlu0 %4203, %v629_v35   ;;  %1096 = vrot.lane.b32.xlu1 %v1081_v37, %s6788_s25  ;;  %v630_v35 = vld [vmem:[%s6808_s1 + $0x34] sm:$0xf] }
 0x112   : > { %v4549_v38 = vpop.permute.xlu0 %712  ;;  %v4587_v57 = vpop.permute.xlu1 %706 }
 0x113   : > { %6811 = vst [vmem:[#allocation4_spill] sm:$0xff] %v4549_v38  ;;  %6825 = vst [vmem:[#allocation18_spill] sm:$0xff] %v4587_v57 }
 0x114   : > { %1100 = vrot.lane.b32.xlu1 %v1083_v39, %s6788_s25 }
 0x116   : > { %v4553_v40 = vpop.permute.xlu0 %747  ;;  %v4591_v59 = vpop.permute.xlu1 %710 }
 0x117   : > { %6812 = vst [vmem:[#allocation5_spill] sm:$0xff] %v4553_v40 }
 0x11a   : > { %v4555_v41 = vpop.permute.xlu0 %751  ;;  %v4597_v62 = vpop.permute.xlu1 %714 }
 0x11b   : > { %6828 = vst [vmem:[#allocation21_spill] sm:$0xff] %v4597_v62 }
 0x11e   : > { %v4557_v42 = vpop.permute.xlu0 %755  ;;  %v4601_v0 = vpop.permute.xlu1 %745 }
 0x11f   : > { %6813 = vst [vmem:[#allocation6_spill] sm:$0xff] %v4557_v42 }
 0x122   : > { %v4559_v43 = vpop.permute.xlu0 %786  ;;  %v4607_v3 = vpop.permute.xlu1 %749 }
 0x123   : > { %6814 = vst [vmem:[#allocation7_spill] sm:$0xff] %v4559_v43 }
 0x126   : > { %v4561_v44 = vpop.permute.xlu0 %790  ;;  %v4611_v5 = vpop.permute.xlu1 %753 }
 0x127   : > { %6833 = vst [vmem:[#allocation26_spill] sm:$0xff] %v4611_v5 }
 0x12a   : > { %v4563_v45 = vpop.permute.xlu0 %794  ;;  %v4615_v7 = vpop.permute.xlu1 %788 }
 0x12b   : > { %6815 = vst [vmem:[#allocation8_spill] sm:$0xff] %v4563_v45  ;;  %6835 = vst [vmem:[#allocation28_spill] sm:$0xff] %v4615_v7 }
 0x12e   : > { %v4565_v46 = vpop.permute.xlu0 %829  ;;  %v4619_v9 = vpop.permute.xlu1 %792 }
 0x12f   : > { %6816 = vst [vmem:[#allocation9_spill] sm:$0xff] %v4565_v46  ;;  %6837 = vst [vmem:[#allocation30_spill] sm:$0xff] %v4619_v9 }
 0x132   : > { %v4567_v47 = vpop.permute.xlu0 %833  ;;  %v4623_v12 = vpop.permute.xlu1 %796 }
 0x133   : > { %6817 = vst [vmem:[#allocation10_spill] sm:$0xff] %v4567_v47  ;;  %6838 = vst [vmem:[#allocation31_spill] sm:$0xff] %v4623_v12 }
 0x136   : > { %v4569_v48 = vpop.permute.xlu0 %837  ;;  %v4627_v20 = vpop.permute.xlu1 %827 }
 0x137   : > { %6818 = vst [vmem:[#allocation11_spill] sm:$0xff] %v4569_v48  ;;  %6840 = vst [vmem:[#allocation33_spill] sm:$0xff] %v4627_v20 }
 0x13a   : > { %v4571_v49 = vpop.permute.xlu0 %868  ;;  %v4632_v28 = vpop.permute.xlu1 %831 }
 0x13b   : > { %6819 = vst [vmem:[#allocation12_spill] sm:$0xff] %v4571_v49 }
 0x13e   : > { %v4573_v50 = vpop.permute.xlu0 %872  ;;  %v4640_v34 = vpop.permute.xlu1 %835 }
 0x13f   : > { %6841 = vst [vmem:[#allocation34_spill] sm:$0xff] %v4640_v34 }
 0x142   : > { %v4575_v51 = vpop.permute.xlu0 %876  ;;  %v4647_v37 = vpop.permute.xlu1 %870 }
 0x143   : > { %6820 = vst [vmem:[#allocation13_spill] sm:$0xff] %v4575_v51  ;;  %6842 = vst [vmem:[#allocation35_spill] sm:$0xff] %v4647_v37 }
 0x146   : > { %v4577_v52 = vpop.permute.xlu0 %911  ;;  %v4649_v39 = vpop.permute.xlu1 %874 }
 0x147   : > { %6821 = vst [vmem:[#allocation14_spill] sm:$0xff] %v4577_v52  ;;  %6843 = vst [vmem:[#allocation36_spill] sm:$0xff] %v4649_v39 }
 0x14a   : > { %v4579_v53 = vpop.permute.xlu0 %915 }
 0x14b   : > { %6822 = vst [vmem:[#allocation15_spill] sm:$0xff] %v4579_v53 }
 0x14e   : > { %v4583_v55 = vpop.permute.xlu0 %919 }
 0x14f   : > { %6823 = vst [vmem:[#allocation16_spill] sm:$0xff] %v4583_v55 }
 0x152   : > { %v4585_v56 = vpop.permute.xlu0 %950 }
 0x153   : > { %6824 = vst [vmem:[#allocation17_spill] sm:$0xff] %v4585_v56 }
 0x156   : > { %v4589_v58 = vpop.permute.xlu0 %954 }
 0x15a   : > { %v4593_v60 = vpop.permute.xlu0 %958 }
 0x15b   : > { %6826 = vst [vmem:[#allocation19_spill] sm:$0xff] %v4593_v60 }
 0x15e   : > { %v4595_v61 = vpop.permute.xlu0 %993 }
 0x15f   : > { %6827 = vst [vmem:[#allocation20_spill] sm:$0xff] %v4595_v61 }
 0x162   : > { %v4599_v63 = vpop.permute.xlu0 %997 }
 0x163   : > { %6829 = vst [vmem:[#allocation22_spill] sm:$0xff] %v4599_v63 }
 0x166   : > { %v4603_v1 = vpop.permute.xlu0 %1001 }
 0x167   : > { %6830 = vst [vmem:[#allocation23_spill] sm:$0xff] %v4603_v1 }
 0x16a   : > { %v4605_v2 = vpop.permute.xlu0 %1051 }
 0x16b   : > { %6831 = vst [vmem:[#allocation24_spill] sm:$0xff] %v4605_v2 }
 0x16e   : > { %v4609_v4 = vpop.permute.xlu0 %1055 }
 0x16f   : > { %6832 = vst [vmem:[#allocation25_spill] sm:$0xff] %v4609_v4 }
 0x172   : > { %v4613_v6 = vpop.permute.xlu0 %1059 }
 0x173   : > { %6834 = vst [vmem:[#allocation27_spill] sm:$0xff] %v4613_v6 }
 0x176   : > { %v4617_v8 = vpop.permute.xlu0 %1090 }
 0x177   : > { %6836 = vst [vmem:[#allocation29_spill] sm:$0xff] %v4617_v8 }
 0x17a   : > { %v4621_v11 = vpop.permute.xlu0 %1094 }
 0x17e   : > { %v4625_v17 = vpop.permute.xlu0 %1098 }
 0x17f   : > { %6839 = vst [vmem:[#allocation32_spill] sm:$0xff] %v4625_v17 }
 0x18b   : > { %v1117_v22 = vpop.permute.xlu0 %1116 }
 0x18c   : > { %v1120_v24 = vmul.f32 %v1117_v22, %v4502_v10  ;;  %v1119_v25 = vmul.f32 0.0, %v1117_v22  ;;  %v1122_v29 = vmul.f32 %v1117_v22, %v4509_v15  ;;  %v1121_v31 = vmul.f32 %v1117_v22, %v4524_v27 }
 0x18d   : > { %v1124_v32 = vmul.f32 %v1117_v22, %v4518_v21  ;;  %v1123_v33 = vmul.f32 %v1117_v22, %v4530_v30 }
 0x18e   : > { %1133 = vrot.lane.b32.xlu0 %v1120_v24, %s6786_s3  ;;  %1131 = vrot.lane.b32.xlu1 %v1119_v25, %s6786_s3  ;;  %v4651_v24 = vpop.permute.xlu1 %878 }
 0x18f   : > { %6844 = vst [vmem:[#allocation37_spill] sm:$0xff] %v4651_v24 }
 0x192   : > { %1137 = vrot.lane.b32.xlu0 %v1122_v29, %s6786_s3  ;;  %1135 = vrot.lane.b32.xlu1 %v1121_v31, %s6786_s3  ;;  %v4653_v25 = vpop.permute.xlu1 %909 }
 0x193   : > { %6845 = vst [vmem:[#allocation38_spill] sm:$0xff] %v4653_v25 }
 0x196   : > { %1141 = vrot.lane.b32.xlu0 %v1124_v32, %s6786_s3  ;;  %1139 = vrot.lane.b32.xlu1 %v1123_v33, %s6786_s3  ;;  %v4655_v22 = vpop.permute.xlu1 %913 }
 0x19a   : > { %1157 = vperm.xlu1 %4204, %v630_v35   ;;  %v4657_v29 = vpop.permute.xlu1 %917 }
 0x19b   : > { %6846 = vst [vmem:[#allocation39_spill] sm:$0xff] %v4657_v29 }
 0x19e   : > { %v4659_v31 = vpop.permute.xlu1 %952 }
 0x19f   : > { %6847 = vst [vmem:[#allocation40_spill] sm:$0xff] %v4659_v31 }
 0x1a2   : > { %v4661_v32 = vpop.permute.xlu1 %956 }
 0x1a3   : > { %6848 = vst [vmem:[#allocation41_spill] sm:$0xff] %v4661_v32 }
 0x1a6   : > { %v4663_v33 = vpop.permute.xlu1 %960 }
 0x1a7   : > { %6849 = vst [vmem:[#allocation42_spill] sm:$0xff] %v4663_v33 }
 0x1aa   : > { %v4665_v6 = vpop.permute.xlu1 %991 }
 0x1ab   : > { %6850 = vst [vmem:[#allocation43_spill] sm:$0xff] %v4665_v6 }
 0x1ae   : > { %v4667_v35 = vpop.permute.xlu1 %995 }
 0x1b2   : > { %v4669_v1 = vpop.permute.xlu1 %999 }
 0x1b3   : > { %6851 = vst [vmem:[#allocation44_spill] sm:$0xff] %v4669_v1 }
 0x1b6   : > { %v4671_v55 = vpop.permute.xlu1 %1049 }
 0x1b7   : > { %6852 = vst [vmem:[#allocation45_spill] sm:$0xff] %v4671_v55 }
 0x1ba   : > { %v4673_v24 = vpop.permute.xlu1 %1053 }
 0x1be   : > { %v4675_v48 = vpop.permute.xlu1 %1057 }
 0x1bf   : > { %6853 = vst [vmem:[#allocation46_spill] sm:$0xff] %v4675_v48 }
 0x1c2   : > { %v4677_v12 = vpop.permute.xlu1 %1092 }
 0x1c3   : > { %6854 = vst [vmem:[#allocation47_spill] sm:$0xff] %v4677_v12 }
 0x1c6   : > { %v4679_v42 = vpop.permute.xlu1 %1096 }
 0x1c7   : > { %6855 = vst [vmem:[#allocation48_spill] sm:$0xff] %v4679_v42 }
 0x1ca   : > { %v4681_v62 = vpop.permute.xlu1 %1100 }
 0x1cb   : > { %6856 = vst [vmem:[#allocation49_spill] sm:$0xff] %v4681_v62 }
 0x200   : > { %v4683_v17 = vpop.permute.xlu1 %1131 }
 0x201   : > { %6857 = vst [vmem:[#allocation50_spill] sm:$0xff] %v4683_v17 }
 0x204   : > { %v4685_v33 = vpop.permute.xlu1 %1135 }
 0x208   : > { %v4687_v2 = vpop.permute.xlu1 %1139 }
 0x209   : > { %6858 = vst [vmem:[#allocation51_spill] sm:$0xff] %v4687_v2 }
 0x215   : > { %v1158_v61 = vpop.permute.xlu1 %1157 }
 0x216   : > { %v1161_v1 = vmul.f32 %v1158_v61, %v4502_v10  ;;  %v1160_v31 = vmul.f32 0.0, %v1158_v61  ;;  %v1163_v12 = vmul.f32 %v1158_v61, %v4509_v15  ;;  %v1162_v48 = vmul.f32 %v1158_v61, %v4524_v27 }
 0x217   : > { %v1165_v62 = vmul.f32 %v1158_v61, %v4518_v21  ;;  %v1164_v2 = vmul.f32 %v1158_v61, %v4530_v30 }
 0x218   : > { %1174 = vrot.lane.b32.xlu1 %v1161_v1, %s6784_s26  ;;  %1172 = vrot.lane.b32.xlu0 %v1160_v31, %s6784_s26  ;;  %v631_v1 = vld [vmem:[%s6808_s1 + $0x38] sm:$0xf]  ;;  %v4703_v31 = vpop.permute.xlu0 %1133 }
 0x219   : > { %6859 = vst [vmem:[#allocation52_spill] sm:$0xff] %v4703_v31 }
 0x21c   : > { %1178 = vrot.lane.b32.xlu1 %v1163_v12, %s6784_s26  ;;  %1176 = vrot.lane.b32.xlu0 %v1162_v48, %s6784_s26  ;;  %v4705_v60 = vpop.permute.xlu0 %1137 }
 0x21d   : > { %6860 = vst [vmem:[#allocation53_spill] sm:$0xff] %v4705_v60 }
 0x220   : > { %1182 = vrot.lane.b32.xlu1 %v1165_v62, %s6784_s26  ;;  %1180 = vrot.lane.b32.xlu0 %v1164_v2, %s6784_s26  ;;  %v4707_v12 = vpop.permute.xlu0 %1141 }
 0x221   : > { %6861 = vst [vmem:[#allocation54_spill] sm:$0xff] %v4707_v12 }
 0x224   : > { %1198 = vperm.xlu0 %4203, %v631_v1  }
 0x28a   : > { %v4709_v48 = vpop.permute.xlu0 %1172 }
 0x28b   : > { %6862 = vst [vmem:[#allocation55_spill] sm:$0xff] %v4709_v48 }
 0x28e   : > { %v4711_v29 = vpop.permute.xlu0 %1176 }
 0x292   : > { %v4713_v61 = vpop.permute.xlu0 %1180 }
 0x293   : > { %6863 = vst [vmem:[#allocation56_spill] sm:$0xff] %v4713_v61 }
 0x29f   : > { %v1199_v62 = vpop.permute.xlu0 %1198 }
 0x2a0   : > { %v1202_v2 = vmul.f32 %v1199_v62, %v4502_v10  ;;  %v1201_v52 = vmul.f32 0.0, %v1199_v62  ;;  %v1204_v1 = vmul.f32 %v1199_v62, %v4509_v15  ;;  %v1203_v31 = vmul.f32 %v1199_v62, %v4524_v27 }
 0x2a1   : > { %v1206_v12 = vmul.f32 %v1199_v62, %v4518_v21  ;;  %v1205_v61 = vmul.f32 %v1199_v62, %v4530_v30 }
 0x2a2   : > { %1215 = vrot.lane.b32.xlu0 %v1202_v2, %s6782_s27  ;;  %1213 = vrot.lane.b32.xlu1 %v1201_v52, %s6782_s27  ;;  %v632_v52 = vld [vmem:[%s6808_s1 + $0x3c] sm:$0xf]  ;;  %v4729_v2 = vpop.permute.xlu1 %1174 }
 0x2a3   : > { %6864 = vst [vmem:[#allocation57_spill] sm:$0xff] %v4729_v2 }
 0x2a6   : > { %1219 = vrot.lane.b32.xlu0 %v1204_v1, %s6782_s27  ;;  %1217 = vrot.lane.b32.xlu1 %v1203_v31, %s6782_s27  ;;  %v4731_v37 = vpop.permute.xlu1 %1178 }
 0x2a7   : > { %6865 = vst [vmem:[#allocation58_spill] sm:$0xff] %v4731_v37 }
 0x2aa   : > { %1223 = vrot.lane.b32.xlu0 %v1206_v12, %s6782_s27  ;;  %1221 = vrot.lane.b32.xlu1 %v1205_v61, %s6782_s27  ;;  %v4733_v1 = vpop.permute.xlu1 %1182 }
 0x2ab   : > { %6866 = vst [vmem:[#allocation59_spill] sm:$0xff] %v4733_v1 }
 0x2ae   : > { %1239 = vperm.xlu1 %4204, %v632_v52  }
 0x314   : > { %v4735_v31 = vpop.permute.xlu1 %1213 }
 0x315   : > { %6867 = vst [vmem:[#allocation60_spill] sm:$0xff] %v4735_v31 }
 0x318   : > { %v4737_v51 = vpop.permute.xlu1 %1217 }
 0x31c   : > { %v4739_v62 = vpop.permute.xlu1 %1221 }
 0x31d   : > { %6868 = vst [vmem:[#allocation61_spill] sm:$0xff] %v4739_v62 }
 0x329   : > { %v1240_v12 = vpop.permute.xlu1 %1239 }
 0x32a   : > { %v1243_v61 = vmul.f32 %v1240_v12, %v4502_v10  ;;  %v1242_v34 = vmul.f32 0.0, %v1240_v12  ;;  %v1245_v52 = vmul.f32 %v1240_v12, %v4509_v15  ;;  %v1244_v2 = vmul.f32 %v1240_v12, %v4524_v27 }
 0x32b   : > { %v1247_v1 = vmul.f32 %v1240_v12, %v4518_v21  ;;  %v1246_v62 = vmul.f32 %v1240_v12, %v4530_v30 }
 0x32c   : > { %1256 = vrot.lane.b32.xlu1 %v1243_v61, %s6780_s28  ;;  %1254 = vrot.lane.b32.xlu0 %v1242_v34, %s6780_s28  ;;  %v633_v34 = vld [vmem:[%s6808_s1 + $0x40] sm:$0xf]  ;;  %v4755_v61 = vpop.permute.xlu0 %1215 }
 0x32d   : > { %6869 = vst [vmem:[#allocation62_spill] sm:$0xff] %v4755_v61 }
 0x330   : > { %1260 = vrot.lane.b32.xlu1 %v1245_v52, %s6780_s28  ;;  %1258 = vrot.lane.b32.xlu0 %v1244_v2, %s6780_s28  ;;  %v4757_v46 = vpop.permute.xlu0 %1219 }
 0x331   : > { %6870 = vst [vmem:[#allocation63_spill] sm:$0xff] %v4757_v46 }
 0x334   : > { %1264 = vrot.lane.b32.xlu1 %v1247_v1, %s6780_s28  ;;  %1262 = vrot.lane.b32.xlu0 %v1246_v62, %s6780_s28  ;;  %v4759_v52 = vpop.permute.xlu0 %1223 }
 0x335   : > { %6871 = vst [vmem:[#allocation64_spill] sm:$0xff] %v4759_v52 }
 0x338   : > { %1280 = vperm.xlu0 %4203, %v633_v34  }
 0x39e   : > { %v4761_v2 = vpop.permute.xlu0 %1254 }
 0x39f   : > { %6872 = vst [vmem:[#allocation65_spill] sm:$0xff] %v4761_v2 }
 0x3a2   : > { %v4763_v7 = vpop.permute.xlu0 %1258 }
 0x3a6   : > { %v4765_v12 = vpop.permute.xlu0 %1262 }
 0x3a7   : > { %6873 = vst [vmem:[#allocation66_spill] sm:$0xff] %v4765_v12 }
 0x3b3   : > { %v1281_v1 = vpop.permute.xlu0 %1280 }
 0x3b4   : > { %v1284_v62 = vmul.f32 %v1281_v1, %v4502_v10  ;;  %v1283_v45 = vmul.f32 0.0, %v1281_v1  ;;  %v1286_v34 = vmul.f32 %v1281_v1, %v4509_v15  ;;  %v1285_v61 = vmul.f32 %v1281_v1, %v4524_v27 }
 0x3b5   : > { %v1288_v52 = vmul.f32 %v1281_v1, %v4518_v21  ;;  %v1287_v12 = vmul.f32 %v1281_v1, %v4530_v30 }
 0x3b6   : > { %1297 = vrot.lane.b32.xlu0 %v1284_v62, %s6778_s29  ;;  %1295 = vrot.lane.b32.xlu1 %v1283_v45, %s6778_s29  ;;  %v634_v45 = vld [vmem:[%s6808_s1 + $0x44] sm:$0xf]  ;;  %v4781_v62 = vpop.permute.xlu1 %1256 }
 0x3b7   : > { %6874 = vst [vmem:[#allocation67_spill] sm:$0xff] %v4781_v62  ;;  %v4838_v62 = vld [vmem:[%s4402_s23 + $0x30] sm:$0xf] }
 0x3ba   : > { %1301 = vrot.lane.b32.xlu0 %v1286_v34, %s6778_s29  ;;  %1299 = vrot.lane.b32.xlu1 %v1285_v61, %s6778_s29  ;;  %v4783_v5 = vpop.permute.xlu1 %1260 }
 0x3bb   : > { %6875 = vst [vmem:[#allocation68_spill] sm:$0xff] %v4783_v5 }
 0x3be   : > { %1305 = vrot.lane.b32.xlu0 %v1288_v52, %s6778_s29  ;;  %1303 = vrot.lane.b32.xlu1 %v1287_v12, %s6778_s29  ;;  %v4785_v34 = vpop.permute.xlu1 %1264  ;;  %s6914_s29 = smov 109  }
 0x3bf   : > { %6876 = vst [vmem:[#allocation69_spill] sm:$0xff] %v4785_v34 }
 0x3c2   : > { %1321 = vperm.xlu1 %4204, %v634_v45  }
 0x428   : > { %v4787_v61 = vpop.permute.xlu1 %1295 }
 0x429   : > { %6877 = vst [vmem:[#allocation70_spill] sm:$0xff] %v4787_v61 }
 0x42c   : > { %v4789_v40 = vpop.permute.xlu1 %1299 }
 0x430   : > { %v4791_v1 = vpop.permute.xlu1 %1303 }
 0x431   : > { %6878 = vst [vmem:[#allocation71_spill] sm:$0xff] %v4791_v1 }
 0x43d   : > { %v1322_v52 = vpop.permute.xlu1 %1321 }
 0x43e   : > { %v1325_v12 = vmul.f32 %v1322_v52, %v4502_v10  ;;  %v1324_v57 = vmul.f32 0.0, %v1322_v52  ;;  %v1327_v45 = vmul.f32 %v1322_v52, %v4509_v15  ;;  %v1326_v34 = vmul.f32 %v1322_v52, %v4524_v27  ;;  %v636_v15 = vld [vmem:[%s6808_s1 + $0x4c] sm:$0xf]  ;;  %v635_v27 = vld [vmem:[%s6808_s1 + $0x48] sm:$0xf] }
 0x43f   : > { %v1329_v1 = vmul.f32 %v1322_v52, %v4518_v21  ;;  %v1328_v10 = vmul.f32 %v1322_v52, %v4530_v30 }
 0x440   : > { %1338 = vrot.lane.b32.xlu1 %v1325_v12, %s6794_s20  ;;  %1336 = vrot.lane.b32.xlu0 %v1324_v57, %s6794_s20 }
 0x444   : > { %1342 = vrot.lane.b32.xlu1 %v1327_v45, %s6794_s20  ;;  %1340 = vrot.lane.b32.xlu0 %v1326_v34, %s6794_s20  ;;  %v4817_v34 = vld [vmem:[%s4402_s23 + $0xc] sm:$0xf] }
 0x448   : > { %1346 = vrot.lane.b32.xlu1 %v1329_v1, %s6794_s20  ;;  %1344 = vrot.lane.b32.xlu0 %v1328_v10, %s6794_s20  ;;  %v4820_v1 = vld [vmem:[%s4402_s23] sm:$0xf]  ;;  %v4825_v10 = vld [vmem:[%s4402_s23 + $0x24] sm:$0xf] }
 0x44c   : > { %1379 = vperm.xlu1 %4204, %v636_v15   ;;  %1362 = vperm.xlu0 %4203, %v635_v27   ;;  %v4828_v15 = vld [vmem:[%s4402_s23 + $0x18] sm:$0xf] }
 0x4b2   : > { %v4810_v21 = vpop.permute.xlu1 %1338 }
 0x4b3   : > { %6879 = vst [vmem:[#allocation72_spill] sm:$0xff] %v4810_v21  ;;  %v4835_v21 = vld [vmem:[%s4402_s23 + $0x3c] sm:$0xf] }
 0x4b6   : > { %v4812_v30 = vpop.permute.xlu1 %1342 }
 0x4b7   : > { %6880 = vst [vmem:[#allocation73_spill] sm:$0xff] %v4812_v30 }
 0x4ba   : > { %v4814_v57 = vpop.permute.xlu1 %1346 }
 0x4bb   : > { %6881 = vst [vmem:[#allocation74_spill] sm:$0xff] %v4814_v57 }
 0x4c7   : > { %v1380_v52 = vpop.permute.xlu1 %1379 }
 0x4c8   : > { %v1383_v12 = vmul.f32 %v1380_v52, %v4817_v34  ;;  %v1382_v45 = vmul.f32 %v1380_v52, %v4820_v1  ;;  %v1385_v27 = vmul.f32 %v1380_v52, %v4825_v10  ;;  %v1384_v57 = vmul.f32 %v1380_v52, %v4828_v15 }
 0x4c9   : > { %v1387_v38 = vmul.f32 %v1380_v52, %v4835_v21  ;;  %v1386_v30 = vmul.f32 %v1380_v52, %v4838_v62 }
 0x4ca   : > { %1396 = vrot.lane.b32.xlu1 %v1383_v12, %s6790_s24  ;;  %1394 = vrot.lane.b32.xlu0 %v1382_v45, %s6790_s24  ;;  %v637_v12 = vld [vmem:[%s6808_s1 + $0x50] sm:$0xf]  ;;  %v4849_v45 = vpop.permute.xlu0 %1297 }
 0x4cb   : > { %6882 = vst [vmem:[#allocation75_spill] sm:$0xff] %v4849_v45 }
 0x4ce   : > { %1400 = vrot.lane.b32.xlu1 %v1385_v27, %s6790_s24  ;;  %1398 = vrot.lane.b32.xlu0 %v1384_v57, %s6790_s24  ;;  %v4851_v61 = vpop.permute.xlu0 %1301 }
 0x4cf   : > { %6883 = vst [vmem:[#allocation76_spill] sm:$0xff] %v4851_v61 }
 0x4d2   : > { %1404 = vrot.lane.b32.xlu1 %v1387_v38, %s6790_s24  ;;  %1402 = vrot.lane.b32.xlu0 %v1386_v30, %s6790_s24  ;;  %v4853_v27 = vpop.permute.xlu0 %1305 }
 0x4d3   : > { %6884 = vst [vmem:[#allocation77_spill] sm:$0xff] %v4853_v27 }
 0x4d6   : > { %1420 = vperm.xlu0 %4203, %v637_v12   ;;  %v4855_v57 = vpop.permute.xlu0 %1336 }
 0x4d7   : > { %6885 = vst [vmem:[#allocation78_spill] sm:$0xff] %v4855_v57 }
 0x4da   : > { %v4857_v5 = vpop.permute.xlu0 %1340 }
 0x4de   : > { %v4859_v52 = vpop.permute.xlu0 %1344 }
 0x4df   : > { %6886 = vst [vmem:[#allocation79_spill] sm:$0xff] %v4859_v52 }
 0x4e2   : > { %v4861_v38 = vpop.permute.xlu0 %1362 }
 0x53c   : > { %v4863_v30 = vpop.permute.xlu0 %1394 }
 0x53d   : > { %6887 = vst [vmem:[#allocation80_spill] sm:$0xff] %v4863_v30 }
 0x540   : > { %v4865_v2 = vpop.permute.xlu0 %1398 }
 0x544   : > { %v4867_v46 = vpop.permute.xlu0 %1402 }
 0x545   : > { %6888 = vst [vmem:[#allocation81_spill] sm:$0xff] %v4867_v46 }
 0x551   : > { %v1421_v12 = vpop.permute.xlu0 %1420 }
 0x552   : > { %v1424_v45 = vmul.f32 %v1421_v12, %v4817_v34  ;;  %v1423_v61 = vmul.f32 %v1421_v12, %v4820_v1  ;;  %v1426_v27 = vmul.f32 %v1421_v12, %v4825_v10  ;;  %v1425_v52 = vmul.f32 %v1421_v12, %v4828_v15 }
 0x553   : > { %v1428_v30 = vmul.f32 %v1421_v12, %v4835_v21  ;;  %v1427_v46 = vmul.f32 %v1421_v12, %v4838_v62 }
 0x554   : > { %1437 = vrot.lane.b32.xlu0 %v1424_v45, %s6788_s25  ;;  %1435 = vrot.lane.b32.xlu1 %v1423_v61, %s6788_s25  ;;  %v638_v61 = vld [vmem:[%s6808_s1 + $0x54] sm:$0xf]  ;;  %v4884_v45 = vpop.permute.xlu1 %1396 }
 0x555   : > { %6889 = vst [vmem:[#allocation82_spill] sm:$0xff] %v4884_v45 }
 0x558   : > { %1441 = vrot.lane.b32.xlu0 %v1426_v27, %s6788_s25  ;;  %1439 = vrot.lane.b32.xlu1 %v1425_v52, %s6788_s25  ;;  %v4886_v57 = vpop.permute.xlu1 %1400 }
 0x559   : > { %6890 = vst [vmem:[#allocation83_spill] sm:$0xff] %v4886_v57 }
 0x55c   : > { %1445 = vrot.lane.b32.xlu0 %v1428_v30, %s6788_s25  ;;  %1443 = vrot.lane.b32.xlu1 %v1427_v46, %s6788_s25  ;;  %v4888_v27 = vpop.permute.xlu1 %1404 }
 0x55d   : > { %6891 = vst [vmem:[#allocation84_spill] sm:$0xff] %v4888_v27 }
 0x560   : > { %1461 = vperm.xlu1 %4204, %v638_v61  }
 0x5c6   : > { %v4890_v52 = vpop.permute.xlu1 %1435 }
 0x5c7   : > { %6892 = vst [vmem:[#allocation85_spill] sm:$0xff] %v4890_v52 }
 0x5ca   : > { %v4892_v31 = vpop.permute.xlu1 %1439 }
 0x5ce   : > { %v4894_v12 = vpop.permute.xlu1 %1443 }
 0x5cf   : > { %6893 = vst [vmem:[#allocation86_spill] sm:$0xff] %v4894_v12 }
 0x5db   : > { %v1462_v30 = vpop.permute.xlu1 %1461 }
 0x5dc   : > { %v1465_v46 = vmul.f32 %v1462_v30, %v4817_v34  ;;  %v1464_v37 = vmul.f32 %v1462_v30, %v4820_v1  ;;  %v1467_v61 = vmul.f32 %v1462_v30, %v4825_v10  ;;  %v1466_v45 = vmul.f32 %v1462_v30, %v4828_v15 }
 0x5dd   : > { %v1469_v27 = vmul.f32 %v1462_v30, %v4835_v21  ;;  %v1468_v12 = vmul.f32 %v1462_v30, %v4838_v62 }
 0x5de   : > { %1478 = vrot.lane.b32.xlu1 %v1465_v46, %s6786_s3  ;;  %1476 = vrot.lane.b32.xlu0 %v1464_v37, %s6786_s3  ;;  %v639_v37 = vld [vmem:[%s6808_s1 + $0x58] sm:$0xf]  ;;  %v4911_v46 = vpop.permute.xlu0 %1437 }
 0x5df   : > { %6894 = vst [vmem:[#allocation87_spill] sm:$0xff] %v4911_v46 }
 0x5e2   : > { %1482 = vrot.lane.b32.xlu1 %v1467_v61, %s6786_s3  ;;  %1480 = vrot.lane.b32.xlu0 %v1466_v45, %s6786_s3  ;;  %v4913_v52 = vpop.permute.xlu0 %1441 }
 0x5e3   : > { %6895 = vst [vmem:[#allocation88_spill] sm:$0xff] %v4913_v52 }
 0x5e6   : > { %1486 = vrot.lane.b32.xlu1 %v1469_v27, %s6786_s3  ;;  %1484 = vrot.lane.b32.xlu0 %v1468_v12, %s6786_s3  ;;  %v4915_v61 = vpop.permute.xlu0 %1445 }
 0x5e7   : > { %6896 = vst [vmem:[#allocation89_spill] sm:$0xff] %v4915_v61 }
 0x5ea   : > { %1502 = vperm.xlu0 %4203, %v639_v37  }
 0x650   : > { %v4917_v45 = vpop.permute.xlu0 %1476 }
 0x651   : > { %6897 = vst [vmem:[#allocation90_spill] sm:$0xff] %v4917_v45 }
 0x654   : > { %v4919_v57 = vpop.permute.xlu0 %1480 }
 0x658   : > { %v4921_v30 = vpop.permute.xlu0 %1484 }
 0x659   : > { %6898 = vst [vmem:[#allocation91_spill] sm:$0xff] %v4921_v30 }
 0x665   : > { %v1503_v27 = vpop.permute.xlu0 %1502 }
 0x666   : > { %v1506_v12 = vmul.f32 %v1503_v27, %v4817_v34  ;;  %v1505_v48 = vmul.f32 %v1503_v27, %v4820_v1  ;;  %v1508_v37 = vmul.f32 %v1503_v27, %v4825_v10  ;;  %v1507_v46 = vmul.f32 %v1503_v27, %v4828_v15 }
 0x667   : > { %v1510_v61 = vmul.f32 %v1503_v27, %v4835_v21  ;;  %v1509_v30 = vmul.f32 %v1503_v27, %v4838_v62 }
 0x668   : > { %1519 = vrot.lane.b32.xlu0 %v1506_v12, %s6784_s26  ;;  %1517 = vrot.lane.b32.xlu1 %v1505_v48, %s6784_s26  ;;  %v640_v48 = vld [vmem:[%s6808_s1 + $0x5c] sm:$0xf]  ;;  %v4938_v12 = vpop.permute.xlu1 %1478 }
 0x669   : > { %6899 = vst [vmem:[#allocation92_spill] sm:$0xff] %v4938_v12 }
 0x66c   : > { %1523 = vrot.lane.b32.xlu0 %v1508_v37, %s6784_s26  ;;  %1521 = vrot.lane.b32.xlu1 %v1507_v46, %s6784_s26  ;;  %v4940_v45 = vpop.permute.xlu1 %1482 }
 0x66d   : > { %6900 = vst [vmem:[#allocation93_spill] sm:$0xff] %v4940_v45 }
 0x670   : > { %1527 = vrot.lane.b32.xlu0 %v1510_v61, %s6784_s26  ;;  %1525 = vrot.lane.b32.xlu1 %v1509_v30, %s6784_s26  ;;  %v4942_v37 = vpop.permute.xlu1 %1486 }
 0x671   : > { %6901 = vst [vmem:[#allocation94_spill] sm:$0xff] %v4942_v37 }
 0x674   : > { %1543 = vperm.xlu1 %4204, %v640_v48  }
 0x6da   : > { %v4944_v46 = vpop.permute.xlu1 %1517 }
 0x6db   : > { %6902 = vst [vmem:[#allocation95_spill] sm:$0xff] %v4944_v46 }
 0x6de   : > { %v4946_v52 = vpop.permute.xlu1 %1521 }
 0x6e2   : > { %v4948_v27 = vpop.permute.xlu1 %1525 }
 0x6e3   : > { %6903 = vst [vmem:[#allocation96_spill] sm:$0xff] %v4948_v27 }
 0x6ef   : > { %v1544_v61 = vpop.permute.xlu1 %1543 }
 0x6f0   : > { %v1547_v30 = vmul.f32 %v1544_v61, %v4817_v34  ;;  %v1546_v60 = vmul.f32 %v1544_v61, %v4820_v1  ;;  %v1549_v48 = vmul.f32 %v1544_v61, %v4825_v10  ;;  %v1548_v12 = vmul.f32 %v1544_v61, %v4828_v15 }
 0x6f1   : > { %v1551_v37 = vmul.f32 %v1544_v61, %v4835_v21  ;;  %v1550_v27 = vmul.f32 %v1544_v61, %v4838_v62 }
 0x6f2   : > { %1560 = vrot.lane.b32.xlu1 %v1547_v30, %s6782_s27  ;;  %1558 = vrot.lane.b32.xlu0 %v1546_v60, %s6782_s27  ;;  %v641_v60 = vld [vmem:[%s6808_s1 + $0x60] sm:$0xf]  ;;  %v4965_v30 = vpop.permute.xlu0 %1519 }
 0x6f3   : > { %6904 = vst [vmem:[#allocation97_spill] sm:$0xff] %v4965_v30 }
 0x6f6   : > { %1564 = vrot.lane.b32.xlu1 %v1549_v48, %s6782_s27  ;;  %1562 = vrot.lane.b32.xlu0 %v1548_v12, %s6782_s27  ;;  %v4967_v46 = vpop.permute.xlu0 %1523 }
 0x6f7   : > { %6905 = vst [vmem:[#allocation98_spill] sm:$0xff] %v4967_v46 }
 0x6fa   : > { %1568 = vrot.lane.b32.xlu1 %v1551_v37, %s6782_s27  ;;  %1566 = vrot.lane.b32.xlu0 %v1550_v27, %s6782_s27  ;;  %v4969_v48 = vpop.permute.xlu0 %1527 }
 0x6fb   : > { %6906 = vst [vmem:[#allocation99_spill] sm:$0xff] %v4969_v48 }
 0x6fe   : > { %1584 = vperm.xlu0 %4203, %v641_v60  }
 0x764   : > { %v4971_v12 = vpop.permute.xlu0 %1558 }
 0x765   : > { %6907 = vst [vmem:[#allocation100_spill] sm:$0xff] %v4971_v12 }
 0x768   : > { %v4973_v45 = vpop.permute.xlu0 %1562 }
 0x76c   : > { %v4975_v61 = vpop.permute.xlu0 %1566 }
 0x76d   : > { %6908 = vst [vmem:[#allocation101_spill] sm:$0xff] %v4975_v61 }
 0x779   : > { %v1585_v37 = vpop.permute.xlu0 %1584 }
 0x77a   : > { %v1588_v27 = vmul.f32 %v1585_v37, %v4817_v34  ;;  %v1587_v17 = vmul.f32 %v1585_v37, %v4820_v1  ;;  %v1590_v60 = vmul.f32 %v1585_v37, %v4825_v10  ;;  %v1589_v30 = vmul.f32 %v1585_v37, %v4828_v15 }
 0x77b   : > { %v1592_v48 = vmul.f32 %v1585_v37, %v4835_v21  ;;  %v1591_v61 = vmul.f32 %v1585_v37, %v4838_v62 }
 0x77c   : > { %1601 = vrot.lane.b32.xlu0 %v1588_v27, %s6780_s28  ;;  %1599 = vrot.lane.b32.xlu1 %v1587_v17, %s6780_s28  ;;  %v642_v17 = vld [vmem:[%s6808_s1 + $0x64] sm:$0xf]  ;;  %v4992_v27 = vpop.permute.xlu1 %1560 }
 0x77d   : > { %6909 = vst [vmem:[#allocation102_spill] sm:$0xff] %v4992_v27 }
 0x780   : > { %1605 = vrot.lane.b32.xlu0 %v1590_v60, %s6780_s28  ;;  %1603 = vrot.lane.b32.xlu1 %v1589_v30, %s6780_s28  ;;  %v4994_v12 = vpop.permute.xlu1 %1564 }
 0x781   : > { %6910 = vst [vmem:[#allocation103_spill] sm:$0xff] %v4994_v12 }
 0x784   : > { %1609 = vrot.lane.b32.xlu0 %v1592_v48, %s6780_s28  ;;  %1607 = vrot.lane.b32.xlu1 %v1591_v61, %s6780_s28  ;;  %v4996_v60 = vpop.permute.xlu1 %1568  ;;  %s7017_s28 = smov 108  }
 0x785   : > { %6911 = vst [vmem:[#allocation104_spill] sm:$0xff] %v4996_v60 }
 0x788   : > { %1625 = vperm.xlu1 %4204, %v642_v17  }
 0x7ee   : > { %v4998_v30 = vpop.permute.xlu1 %1599 }
 0x7ef   : > { %6912 = vst [vmem:[#allocation105_spill] sm:$0xff] %v4998_v30 }
 0x7f2   : > { %v5000_v46 = vpop.permute.xlu1 %1603 }
 0x7f6   : > { %v5002_v37 = vpop.permute.xlu1 %1607 }
 0x7f7   : > { %6913 = vst [vmem:[#allocation106_spill] sm:$0xff] %v5002_v37 }
 0x803   : > { %v1626_v48 = vpop.permute.xlu1 %1625 }
 0x804   : > { %v1629_v61 = vmul.f32 %v1626_v48, %v4817_v34  ;;  %v1628_v42 = vmul.f32 %v1626_v48, %v4820_v1  ;;  %v1631_v17 = vmul.f32 %v1626_v48, %v4825_v10  ;;  %v1630_v27 = vmul.f32 %v1626_v48, %v4828_v15 }
 0x805   : > { %v1633_v60 = vmul.f32 %v1626_v48, %v4835_v21  ;;  %v1632_v37 = vmul.f32 %v1626_v48, %v4838_v62 }
 0x806   : > { %1642 = vrot.lane.b32.xlu1 %v1629_v61, %s6914_s29  ;;  %1640 = vrot.lane.b32.xlu0 %v1628_v42, %s6914_s29  ;;  %v643_v42 = vld [vmem:[%s6808_s1 + $0x68] sm:$0xf]  ;;  %v5019_v61 = vpop.permute.xlu0 %1601 }
 0x807   : > { %6915 = vst [vmem:[#allocation107_spill] sm:$0xff] %v5019_v61 }
 0x80a   : > { %1646 = vrot.lane.b32.xlu1 %v1631_v17, %s6914_s29  ;;  %1644 = vrot.lane.b32.xlu0 %v1630_v27, %s6914_s29  ;;  %v5021_v30 = vpop.permute.xlu0 %1605 }
 0x80b   : > { %6916 = vst [vmem:[#allocation108_spill] sm:$0xff] %v5021_v30 }
 0x80e   : > { %1650 = vrot.lane.b32.xlu1 %v1633_v60, %s6914_s29  ;;  %1648 = vrot.lane.b32.xlu0 %v1632_v37, %s6914_s29  ;;  %v5023_v17 = vpop.permute.xlu0 %1609 }
 0x80f   : > { %6917 = vst [vmem:[#allocation109_spill] sm:$0xff] %v5023_v17 }
 0x812   : > { %1666 = vperm.xlu0 %4203, %v643_v42  }
 0x878   : > { %v5025_v27 = vpop.permute.xlu0 %1640 }
 0x879   : > { %6918 = vst [vmem:[#allocation110_spill] sm:$0xff] %v5025_v27 }
 0x87c   : > { %v5027_v12 = vpop.permute.xlu0 %1644 }
 0x880   : > { %v5029_v48 = vpop.permute.xlu0 %1648 }
 0x881   : > { %6919 = vst [vmem:[#allocation111_spill] sm:$0xff] %v5029_v48 }
 0x88d   : > { %v1667_v60 = vpop.permute.xlu0 %1666 }
 0x88e   : > { %v1670_v37 = vmul.f32 %v1667_v60, %v4817_v34  ;;  %v1669_v8 = vmul.f32 %v1667_v60, %v4820_v1  ;;  %v1672_v42 = vmul.f32 %v1667_v60, %v4825_v10  ;;  %v1671_v61 = vmul.f32 %v1667_v60, %v4828_v15  ;;  %v644_v34 = vld [vmem:[%s6808_s1 + $0x6c] sm:$0xf] }
 0x88f   : > { %v1674_v17 = vmul.f32 %v1667_v60, %v4835_v21  ;;  %v1673_v48 = vmul.f32 %v1667_v60, %v4838_v62 }
 0x890   : > { %1683 = vrot.lane.b32.xlu0 %v1670_v37, %s6794_s20  ;;  %1681 = vrot.lane.b32.xlu1 %v1669_v8, %s6794_s20  ;;  %v645_v8 = vld [vmem:[%s6808_s1 + $0x70] sm:$0xf] }
 0x894   : > { %1687 = vrot.lane.b32.xlu0 %v1672_v42, %s6794_s20  ;;  %1685 = vrot.lane.b32.xlu1 %v1671_v61, %s6794_s20 }
 0x898   : > { %1691 = vrot.lane.b32.xlu0 %v1674_v17, %s6794_s20  ;;  %1689 = vrot.lane.b32.xlu1 %v1673_v48, %s6794_s20 }
 0x89c   : > { %1724 = vperm.xlu0 %4203, %v645_v8   ;;  %1707 = vperm.xlu1 %4204, %v644_v34  }
 0x902   : > { %v5049_v1 = vpop.permute.xlu0 %1683 }
 0x903   : > { %6920 = vst [vmem:[#allocation112_spill] sm:$0xff] %v5049_v1  ;;  %v5110_v1 = vld [vmem:[%s4402_s23 + $0x34] sm:$0xf] }
 0x906   : > { %v5051_v10 = vpop.permute.xlu0 %1687 }
 0x907   : > { %6921 = vst [vmem:[#allocation113_spill] sm:$0xff] %v5051_v10 }
 0x90a   : > { %v5053_v21 = vpop.permute.xlu0 %1691 }
 0x90b   : > { %6922 = vst [vmem:[#allocation114_spill] sm:$0xff] %v5053_v21  ;;  %v5100_v21 = vld [vmem:[%s4402_s23 + $0x28] sm:$0xf] }
 0x917   : > { %v1725_v62 = vpop.permute.xlu0 %1724 }
 0x918   : > { %v1728_v15 = vmul.f32 %v1725_v62, %v4405_v14  ;;  %v1727_v61 = vmul.f32 %v1725_v62, %v4411_v18  ;;  %v1730_v17 = vmul.f32 %v1725_v62, %v4414_v19  ;;  %v1729_v48 = vmul.f32 %v1725_v62, %v4421_v23  ;;  %v646_v14 = vld [vmem:[%s6808_s1 + $0x74] sm:$0xf]  ;;  %v5069_v18 = vpop.permute.xlu1 %1642 }
 0x919   : > { %v1732_v60 = vmul.f32 0.0, %v1725_v62  ;;  %v1731_v37 = vmul.f32 %v1725_v62, %v4428_v26  ;;  %6923 = vst [vmem:[#allocation115_spill] sm:$0xff] %v5069_v18 }
 0x91a   : > { %1741 = vrot.lane.b32.xlu0 %v1728_v15, %s6790_s24  ;;  %1739 = vrot.lane.b32.xlu1 %v1727_v61, %s6790_s24 }
 0x91c   : > { %v5071_v19 = vpop.permute.xlu1 %1646 }
 0x91d   : > { %6924 = vst [vmem:[#allocation116_spill] sm:$0xff] %v5071_v19 }
 0x91e   : > { %1745 = vrot.lane.b32.xlu0 %v1730_v17, %s6790_s24  ;;  %1743 = vrot.lane.b32.xlu1 %v1729_v48, %s6790_s24  ;;  %v5090_v48 = vld [vmem:[%s4402_s23 + $0x10] sm:$0xf] }
 0x920   : > { %v5073_v23 = vpop.permute.xlu1 %1650 }
 0x921   : > { %6925 = vst [vmem:[#allocation117_spill] sm:$0xff] %v5073_v23 }
 0x922   : > { %1749 = vrot.lane.b32.xlu0 %v1732_v60, %s6790_s24  ;;  %1747 = vrot.lane.b32.xlu1 %v1731_v37, %s6790_s24  ;;  %v5094_v37 = vld [vmem:[%s4402_s23 + $0x4] sm:$0xf] }
 0x924   : > { %v5075_v42 = vpop.permute.xlu1 %1681 }
 0x925   : > { %6926 = vst [vmem:[#allocation118_spill] sm:$0xff] %v5075_v42 }
 0x926   : > { %1765 = vperm.xlu1 %4204, %v646_v14  }
 0x928   : > { %v5077_v26 = vpop.permute.xlu1 %1685 }
 0x92c   : > { %v5079_v8 = vpop.permute.xlu1 %1689 }
 0x92d   : > { %6927 = vst [vmem:[#allocation119_spill] sm:$0xff] %v5079_v8  ;;  %v5104_v8 = vld [vmem:[%s4402_s23 + $0x1c] sm:$0xf] }
 0x930   : > { %v5081_v34 = vpop.permute.xlu1 %1707 }
 0x98c   : > { %v5083_v62 = vpop.permute.xlu1 %1739 }
 0x98d   : > { %6928 = vst [vmem:[#allocation120_spill] sm:$0xff] %v5083_v62 }
 0x990   : > { %v5085_v15 = vpop.permute.xlu1 %1743 }
 0x994   : > { %v5087_v61 = vpop.permute.xlu1 %1747 }
 0x995   : > { %6929 = vst [vmem:[#allocation121_spill] sm:$0xff] %v5087_v61 }
 0x9a1   : > { %v1766_v17 = vpop.permute.xlu1 %1765 }
 0x9a2   : > { %v1769_v60 = vmul.f32 %v5090_v48, %v1766_v17  ;;  %v1768_v14 = vmul.f32 %v5094_v37, %v1766_v17  ;;  %v1771_v23 = vmul.f32 %v5100_v21, %v1766_v17  ;;  %v1770_v61 = vmul.f32 %v5104_v8, %v1766_v17 }
 0x9a3   : > { %v1772_v18 = vmul.f32 %v5110_v1, %v1766_v17  ;;  %v1773_v62 = vmul.f32 0.0, %v1766_v17 }
 0x9a4   : > { %1782 = vrot.lane.b32.xlu1 %v1769_v60, %s6788_s25  ;;  %1780 = vrot.lane.b32.xlu0 %v1768_v14, %s6788_s25  ;;  %v647_v60 = vld [vmem:[%s6808_s1 + $0x78] sm:$0xf]  ;;  %v5118_v14 = vpop.permute.xlu0 %1741 }
 0x9a5   : > { %6930 = vst [vmem:[#allocation122_spill] sm:$0xff] %v5118_v14 }
 0x9a8   : > { %1786 = vrot.lane.b32.xlu1 %v1771_v23, %s6788_s25  ;;  %1784 = vrot.lane.b32.xlu0 %v1770_v61, %s6788_s25  ;;  %v5120_v10 = vpop.permute.xlu0 %1745 }
 0x9a9   : > { %6931 = vst [vmem:[#allocation123_spill] sm:$0xff] %v5120_v10 }
 0x9ac   : > { %1788 = vrot.lane.b32.xlu0 %v1772_v18, %s6788_s25  ;;  %1790 = vrot.lane.b32.xlu1 %v1773_v62, %s6788_s25  ;;  %v5122_v23 = vpop.permute.xlu0 %1749 }
 0x9ad   : > { %6932 = vst [vmem:[#allocation124_spill] sm:$0xff] %v5122_v23 }
 0x9b0   : > { %1806 = vperm.xlu0 %4203, %v647_v60  }
 0xa16   : > { %v5124_v61 = vpop.permute.xlu0 %1780 }
 0xa17   : > { %6933 = vst [vmem:[#allocation125_spill] sm:$0xff] %v5124_v61 }
 0xa1a   : > { %v5126_v42 = vpop.permute.xlu0 %1784 }
 0xa1e   : > { %v5128_v17 = vpop.permute.xlu0 %1788 }
 0xa1f   : > { %6934 = vst [vmem:[#allocation126_spill] sm:$0xff] %v5128_v17 }
 0xa2b   : > { %v1807_v18 = vpop.permute.xlu0 %1806 }
 0xa2c   : > { %v1810_v62 = vmul.f32 %v5090_v48, %v1807_v18  ;;  %v1809_v19 = vmul.f32 %v5094_v37, %v1807_v18  ;;  %v1812_v60 = vmul.f32 %v5100_v21, %v1807_v18  ;;  %v1811_v14 = vmul.f32 %v5104_v8, %v1807_v18 }
 0xa2d   : > { %v1814_v23 = vmul.f32 0.0, %v1807_v18  ;;  %v1813_v17 = vmul.f32 %v5110_v1, %v1807_v18 }
 0xa2e   : > { %1823 = vrot.lane.b32.xlu0 %v1810_v62, %s6786_s3  ;;  %1821 = vrot.lane.b32.xlu1 %v1809_v19, %s6786_s3  ;;  %v648_v62 = vld [vmem:[%s6808_s1 + $0x7c] sm:$0xf]  ;;  %v5144_v19 = vpop.permute.xlu1 %1782 }
 0xa2f   : > { %6935 = vst [vmem:[#allocation127_spill] sm:$0xff] %v5144_v19 }
 0xa32   : > { %1827 = vrot.lane.b32.xlu0 %v1812_v60, %s6786_s3  ;;  %1825 = vrot.lane.b32.xlu1 %v1811_v14, %s6786_s3  ;;  %v5146_v61 = vpop.permute.xlu1 %1786 }
 0xa33   : > { %6936 = vst [vmem:[#allocation128_spill] sm:$0xff] %v5146_v61 }
 0xa36   : > { %1831 = vrot.lane.b32.xlu0 %v1814_v23, %s6786_s3  ;;  %1829 = vrot.lane.b32.xlu1 %v1813_v17, %s6786_s3  ;;  %v5148_v10 = vpop.permute.xlu1 %1790 }
 0xa37   : > { %6937 = vst [vmem:[#allocation129_spill] sm:$0xff] %v5148_v10 }
 0xa3a   : > { %1847 = vperm.xlu1 %4204, %v648_v62  }
 0xaa0   : > { %v5150_v60 = vpop.permute.xlu1 %1821 }
 0xaa1   : > { %6938 = vst [vmem:[#allocation130_spill] sm:$0xff] %v5150_v60 }
 0xaa4   : > { %v5152_v14 = vpop.permute.xlu1 %1825 }
 0xaa8   : > { %v5154_v18 = vpop.permute.xlu1 %1829 }
 0xaa9   : > { %6939 = vst [vmem:[#allocation131_spill] sm:$0xff] %v5154_v18 }
 0xab5   : > { %v1848_v23 = vpop.permute.xlu1 %1847 }
 0xab6   : > { %v1851_v17 = vmul.f32 %v5090_v48, %v1848_v23  ;;  %v1850_v27 = vmul.f32 %v5094_v37, %v1848_v23  ;;  %v1853_v62 = vmul.f32 %v5100_v21, %v1848_v23  ;;  %v1852_v19 = vmul.f32 %v5104_v8, %v1848_v23 }
 0xab7   : > { %v1854_v10 = vmul.f32 %v5110_v1, %v1848_v23  ;;  %v1855_v18 = vmul.f32 0.0, %v1848_v23 }
 0xab8   : > { %1864 = vrot.lane.b32.xlu1 %v1851_v17, %s6784_s26  ;;  %1862 = vrot.lane.b32.xlu0 %v1850_v27, %s6784_s26  ;;  %v649_v17 = vld [vmem:[%s6808_s1 + $0x80] sm:$0xf]  ;;  %v5170_v27 = vpop.permute.xlu0 %1823 }
 0xab9   : > { %6940 = vst [vmem:[#allocation132_spill] sm:$0xff] %v5170_v27 }
 0xabc   : > { %1868 = vrot.lane.b32.xlu1 %v1853_v62, %s6784_s26  ;;  %1866 = vrot.lane.b32.xlu0 %v1852_v19, %s6784_s26  ;;  %v5172_v60 = vpop.permute.xlu0 %1827 }
 0xabd   : > { %6941 = vst [vmem:[#allocation133_spill] sm:$0xff] %v5172_v60 }
 0xac0   : > { %1870 = vrot.lane.b32.xlu0 %v1854_v10, %s6784_s26  ;;  %1872 = vrot.lane.b32.xlu1 %v1855_v18, %s6784_s26  ;;  %v5174_v61 = vpop.permute.xlu0 %1831 }
 0xac1   : > { %6942 = vst [vmem:[#allocation134_spill] sm:$0xff] %v5174_v61 }
 0xac4   : > { %1888 = vperm.xlu0 %4203, %v649_v17  }
 0xb2a   : > { %v5176_v62 = vpop.permute.xlu0 %1862 }
 0xb2b   : > { %6943 = vst [vmem:[#allocation135_spill] sm:$0xff] %v5176_v62 }
 0xb2e   : > { %v5178_v19 = vpop.permute.xlu0 %1866 }
 0xb32   : > { %v5180_v23 = vpop.permute.xlu0 %1870 }
 0xb33   : > { %6944 = vst [vmem:[#allocation136_spill] sm:$0xff] %v5180_v23 }
 0xb3f   : > { %v1889_v10 = vpop.permute.xlu0 %1888 }
 0xb40   : > { %v1892_v18 = vmul.f32 %v5090_v48, %v1889_v10  ;;  %v1891_v30 = vmul.f32 %v5094_v37, %v1889_v10  ;;  %v1894_v17 = vmul.f32 %v5100_v21, %v1889_v10  ;;  %v1893_v27 = vmul.f32 %v5104_v8, %v1889_v10 }
 0xb41   : > { %v1896_v61 = vmul.f32 0.0, %v1889_v10  ;;  %v1895_v23 = vmul.f32 %v5110_v1, %v1889_v10 }
 0xb42   : > { %1905 = vrot.lane.b32.xlu0 %v1892_v18, %s6782_s27  ;;  %1903 = vrot.lane.b32.xlu1 %v1891_v30, %s6782_s27  ;;  %v650_v18 = vld [vmem:[%s6808_s1 + $0x84] sm:$0xf]  ;;  %v5196_v30 = vpop.permute.xlu1 %1864 }
 0xb43   : > { %6945 = vst [vmem:[#allocation137_spill] sm:$0xff] %v5196_v30 }
 0xb46   : > { %1909 = vrot.lane.b32.xlu0 %v1894_v17, %s6782_s27  ;;  %1907 = vrot.lane.b32.xlu1 %v1893_v27, %s6782_s27  ;;  %v5198_v62 = vpop.permute.xlu1 %1868 }
 0xb47   : > { %6946 = vst [vmem:[#allocation138_spill] sm:$0xff] %v5198_v62 }
 0xb4a   : > { %1913 = vrot.lane.b32.xlu0 %v1896_v61, %s6782_s27  ;;  %1911 = vrot.lane.b32.xlu1 %v1895_v23, %s6782_s27  ;;  %v5200_v60 = vpop.permute.xlu1 %1872  ;;  %s6986_s27 = smov 117  }
 0xb4b   : > { %6947 = vst [vmem:[#allocation139_spill] sm:$0xff] %v5200_v60 }
 0xb4e   : > { %1929 = vperm.xlu1 %4204, %v650_v18  }
 0xbb4   : > { %v5202_v17 = vpop.permute.xlu1 %1903 }
 0xbb5   : > { %6948 = vst [vmem:[#allocation140_spill] sm:$0xff] %v5202_v17 }
 0xbb8   : > { %v5204_v27 = vpop.permute.xlu1 %1907 }
 0xbbc   : > { %v5206_v10 = vpop.permute.xlu1 %1911 }
 0xbbd   : > { %6949 = vst [vmem:[#allocation141_spill] sm:$0xff] %v5206_v10 }
 0xbc9   : > { %v1930_v61 = vpop.permute.xlu1 %1929 }
 0xbca   : > { %v1933_v23 = vmul.f32 %v5090_v48, %v1930_v61  ;;  %v1932_v55 = vmul.f32 %v5094_v37, %v1930_v61  ;;  %v1935_v18 = vmul.f32 %v5100_v21, %v1930_v61  ;;  %v1934_v30 = vmul.f32 %v5104_v8, %v1930_v61 }
 0xbcb   : > { %v1936_v60 = vmul.f32 %v5110_v1, %v1930_v61  ;;  %v1937_v10 = vmul.f32 0.0, %v1930_v61 }
 0xbcc   : > { %1946 = vrot.lane.b32.xlu1 %v1933_v23, %s6950_s21  ;;  %1944 = vrot.lane.b32.xlu0 %v1932_v55, %s6950_s21  ;;  %v651_v23 = vld [vmem:[%s6808_s1 + $0x88] sm:$0xf]  ;;  %v5222_v55 = vpop.permute.xlu0 %1905 }
 0xbcd   : > { %6951 = vst [vmem:[#allocation142_spill] sm:$0xff] %v5222_v55 }
 0xbd0   : > { %1950 = vrot.lane.b32.xlu1 %v1935_v18, %s6950_s21  ;;  %1948 = vrot.lane.b32.xlu0 %v1934_v30, %s6950_s21  ;;  %v5224_v17 = vpop.permute.xlu0 %1909 }
 0xbd1   : > { %6952 = vst [vmem:[#allocation143_spill] sm:$0xff] %v5224_v17 }
 0xbd4   : > { %1952 = vrot.lane.b32.xlu0 %v1936_v60, %s6950_s21  ;;  %1954 = vrot.lane.b32.xlu1 %v1937_v10, %s6950_s21  ;;  %v5226_v62 = vpop.permute.xlu0 %1913 }
 0xbd5   : > { %6953 = vst [vmem:[#allocation144_spill] sm:$0xff] %v5226_v62 }
 0xbd8   : > { %1970 = vperm.xlu0 %4203, %v651_v23  }
 0xc3e   : > { %v5228_v18 = vpop.permute.xlu0 %1944 }
 0xc3f   : > { %6954 = vst [vmem:[#allocation145_spill] sm:$0xff] %v5228_v18 }
 0xc42   : > { %v5230_v30 = vpop.permute.xlu0 %1948 }
 0xc46   : > { %v5232_v61 = vpop.permute.xlu0 %1952 }
 0xc47   : > { %6955 = vst [vmem:[#allocation146_spill] sm:$0xff] %v5232_v61 }
 0xc53   : > { %v1971_v60 = vpop.permute.xlu0 %1970 }
 0xc54   : > { %v1974_v10 = vmul.f32 %v5090_v48, %v1971_v60  ;;  %v1973_v4 = vmul.f32 %v5094_v37, %v1971_v60  ;;  %v1976_v23 = vmul.f32 %v5100_v21, %v1971_v60  ;;  %v1975_v55 = vmul.f32 %v5104_v8, %v1971_v60 }
 0xc55   : > { %v1978_v62 = vmul.f32 0.0, %v1971_v60  ;;  %v1977_v61 = vmul.f32 %v5110_v1, %v1971_v60 }
 0xc56   : > { %1987 = vrot.lane.b32.xlu0 %v1974_v10, %s6914_s29  ;;  %1985 = vrot.lane.b32.xlu1 %v1973_v4, %s6914_s29  ;;  %v652_v10 = vld [vmem:[%s6808_s1 + $0x8c] sm:$0xf]  ;;  %v5248_v4 = vpop.permute.xlu1 %1946 }
 0xc57   : > { %6956 = vst [vmem:[#allocation147_spill] sm:$0xff] %v5248_v4 }
 0xc5a   : > { %1991 = vrot.lane.b32.xlu0 %v1976_v23, %s6914_s29  ;;  %1989 = vrot.lane.b32.xlu1 %v1975_v55, %s6914_s29  ;;  %v5250_v18 = vpop.permute.xlu1 %1950 }
 0xc5b   : > { %6957 = vst [vmem:[#allocation148_spill] sm:$0xff] %v5250_v18 }
 0xc5e   : > { %1995 = vrot.lane.b32.xlu0 %v1978_v62, %s6914_s29  ;;  %1993 = vrot.lane.b32.xlu1 %v1977_v61, %s6914_s29  ;;  %v5252_v17 = vpop.permute.xlu1 %1954 }
 0xc5f   : > { %6958 = vst [vmem:[#allocation149_spill] sm:$0xff] %v5252_v17 }
 0xc62   : > { %2011 = vperm.xlu1 %4204, %v652_v10  }
 0xcc8   : > { %v5254_v23 = vpop.permute.xlu1 %1985 }
 0xcc9   : > { %6959 = vst [vmem:[#allocation150_spill] sm:$0xff] %v5254_v23 }
 0xccc   : > { %v5256_v55 = vpop.permute.xlu1 %1989 }
 0xcd0   : > { %v5258_v60 = vpop.permute.xlu1 %1993 }
 0xcd1   : > { %6960 = vst [vmem:[#allocation151_spill] sm:$0xff] %v5258_v60 }
 0xcdd   : > { %v2012_v62 = vpop.permute.xlu1 %2011 }
 0xcde   : > { %v2015_v61 = vmul.f32 %v5090_v48, %v2012_v62  ;;  %v2014_v6 = vmul.f32 %v5094_v37, %v2012_v62  ;;  %v2017_v10 = vmul.f32 %v5100_v21, %v2012_v62  ;;  %v2016_v17 = vmul.f32 %v5104_v8, %v2012_v62  ;;  %v654_v21 = vld [vmem:[%s6808_s1 + $0x94] sm:$0xf] }
 0xcdf   : > { %v2018_v60 = vmul.f32 %v5110_v1, %v2012_v62  ;;  %v2019_v4 = vmul.f32 0.0, %v2012_v62 }
 0xce0   : > { %2028 = vrot.lane.b32.xlu1 %v2015_v61, %s6794_s20  ;;  %2026 = vrot.lane.b32.xlu0 %v2014_v6, %s6794_s20  ;;  %v653_v6 = vld [vmem:[%s6808_s1 + $0x90] sm:$0xf]  ;;  %v5288_v61 = vld [vmem:[%s4402_s23 + $0x8] sm:$0xf] }
 0xce4   : > { %2032 = vrot.lane.b32.xlu1 %v2017_v10, %s6794_s20  ;;  %2030 = vrot.lane.b32.xlu0 %v2016_v17, %s6794_s20 }
 0xce8   : > { %2034 = vrot.lane.b32.xlu0 %v2018_v60, %s6794_s20  ;;  %2036 = vrot.lane.b32.xlu1 %v2019_v4, %s6794_s20  ;;  %v5284_v4 = vld [vmem:[%s4402_s23 + $0x14] sm:$0xf] }
 0xcec   : > { %2052 = vperm.xlu0 %4203, %v653_v6   ;;  %2069 = vperm.xlu1 %4204, %v654_v21   ;;  %v5294_v6 = vld [vmem:[%s4402_s23 + $0x2c] sm:$0xf] }
 0xd52   : > { %v5277_v37 = vpop.permute.xlu1 %2028 }
 0xd53   : > { %6961 = vst [vmem:[#allocation152_spill] sm:$0xff] %v5277_v37  ;;  %v5298_v37 = vld [vmem:[%s4402_s23 + $0x20] sm:$0xf] }
 0xd56   : > { %v5279_v1 = vpop.permute.xlu1 %2032 }
 0xd57   : > { %6962 = vst [vmem:[#allocation153_spill] sm:$0xff] %v5279_v1  ;;  %v5304_v1 = vld [vmem:[%s4402_s23 + $0x38] sm:$0xf] }
 0xd5a   : > { %v5281_v17 = vpop.permute.xlu1 %2036 }
 0xd5b   : > { %6963 = vst [vmem:[#allocation154_spill] sm:$0xff] %v5281_v17 }
 0xd67   : > { %v2070_v60 = vpop.permute.xlu1 %2069 }
 0xd68   : > { %v2073_v62 = vmul.f32 %v5284_v4, %v2070_v60  ;;  %v2072_v10 = vmul.f32 %v5288_v61, %v2070_v60  ;;  %v2075_v21 = vmul.f32 %v5294_v6, %v2070_v60  ;;  %v2074_v17 = vmul.f32 %v5298_v37, %v2070_v60 }
 0xd69   : > { %v2076_v23 = vmul.f32 %v5304_v1, %v2070_v60  ;;  %v2077_v18 = vmul.f32 0.0, %v2070_v60 }
 0xd6a   : > { %2086 = vrot.lane.b32.xlu1 %v2073_v62, %s6790_s24  ;;  %2084 = vrot.lane.b32.xlu0 %v2072_v10, %s6790_s24  ;;  %v655_v62 = vld [vmem:[%s6808_s1 + $0x98] sm:$0xf]  ;;  %v5312_v10 = vpop.permute.xlu0 %1987 }
 0xd6b   : > { %6964 = vst [vmem:[#allocation155_spill] sm:$0xff] %v5312_v10 }
 0xd6e   : > { %2090 = vrot.lane.b32.xlu1 %v2075_v21, %s6790_s24  ;;  %2088 = vrot.lane.b32.xlu0 %v2074_v17, %s6790_s24  ;;  %v5314_v63 = vpop.permute.xlu0 %1991 }
 0xd6f   : > { %6965 = vst [vmem:[#allocation156_spill] sm:$0xff] %v5314_v63 }
 0xd72   : > { %2092 = vrot.lane.b32.xlu0 %v2076_v23, %s6790_s24  ;;  %2094 = vrot.lane.b32.xlu1 %v2077_v18, %s6790_s24  ;;  %v5316_v21 = vpop.permute.xlu0 %1995  ;;  %s7010_s24 = smov 119  }
 0xd73   : > { %6966 = vst [vmem:[#allocation157_spill] sm:$0xff] %v5316_v21 }
 0xd76   : > { %2110 = vperm.xlu0 %4203, %v655_v62   ;;  %v5318_v17 = vpop.permute.xlu0 %2026 }
 0xd77   : > { %6967 = vst [vmem:[#allocation158_spill] sm:$0xff] %v5318_v17 }
 0xd7a   : > { %v5320_v32 = vpop.permute.xlu0 %2030 }
 0xd7e   : > { %v5322_v60 = vpop.permute.xlu0 %2034 }
 0xd7f   : > { %6968 = vst [vmem:[#allocation159_spill] sm:$0xff] %v5322_v60 }
 0xd82   : > { %v5324_v23 = vpop.permute.xlu0 %2052 }
 0xddc   : > { %v5326_v18 = vpop.permute.xlu0 %2084 }
 0xddd   : > { %6969 = vst [vmem:[#allocation160_spill] sm:$0xff] %v5326_v18 }
 0xde0   : > { %v5328_v56 = vpop.permute.xlu0 %2088 }
 0xde4   : > { %v5330_v25 = vpop.permute.xlu0 %2092 }
 0xde5   : > { %6970 = vst [vmem:[#allocation161_spill] sm:$0xff] %v5330_v25 }
 0xdf1   : > { %v2111_v62 = vpop.permute.xlu0 %2110 }
 0xdf2   : > { %v2114_v10 = vmul.f32 %v5284_v4, %v2111_v62  ;;  %v2113_v63 = vmul.f32 %v5288_v61, %v2111_v62  ;;  %v2116_v21 = vmul.f32 %v5294_v6, %v2111_v62  ;;  %v2115_v60 = vmul.f32 %v5298_v37, %v2111_v62 }
 0xdf3   : > { %v2118_v18 = vmul.f32 0.0, %v2111_v62  ;;  %v2117_v25 = vmul.f32 %v5304_v1, %v2111_v62 }
 0xdf4   : > { %2127 = vrot.lane.b32.xlu0 %v2114_v10, %s6788_s25  ;;  %2125 = vrot.lane.b32.xlu1 %v2113_v63, %s6788_s25  ;;  %v656_v10 = vld [vmem:[%s6808_s1 + $0x9c] sm:$0xf]  ;;  %v5346_v63 = vpop.permute.xlu1 %2086 }
 0xdf5   : > { %6971 = vst [vmem:[#allocation162_spill] sm:$0xff] %v5346_v63 }
 0xdf8   : > { %2131 = vrot.lane.b32.xlu0 %v2116_v21, %s6788_s25  ;;  %2129 = vrot.lane.b32.xlu1 %v2115_v60, %s6788_s25  ;;  %v5348_v17 = vpop.permute.xlu1 %2090 }
 0xdf9   : > { %6972 = vst [vmem:[#allocation163_spill] sm:$0xff] %v5348_v17 }
 0xdfc   : > { %2135 = vrot.lane.b32.xlu0 %v2118_v18, %s6788_s25  ;;  %2133 = vrot.lane.b32.xlu1 %v2117_v25, %s6788_s25  ;;  %v5350_v53 = vpop.permute.xlu1 %2094  ;;  %s7003_s25 = sld [smem:[#allocation200_spill]] }
 0xdfd   : > { %6973 = vst [vmem:[#allocation164_spill] sm:$0xff] %v5350_v53 }
 0xe00   : > { %2151 = vperm.xlu1 %4204, %v656_v10  }
 0xe66   : > { %v5352_v21 = vpop.permute.xlu1 %2125 }
 0xe67   : > { %6974 = vst [vmem:[#allocation165_spill] sm:$0xff] %v5352_v21 }
 0xe6a   : > { %v5354_v60 = vpop.permute.xlu1 %2129 }
 0xe6e   : > { %v5356_v62 = vpop.permute.xlu1 %2133 }
 0xe6f   : > { %6975 = vst [vmem:[#allocation166_spill] sm:$0xff] %v5356_v62 }
 0xe7b   : > { %v2152_v18 = vpop.permute.xlu1 %2151 }
 0xe7c   : > { %v2155_v25 = vmul.f32 %v5284_v4, %v2152_v18  ;;  %v2154_v39 = vmul.f32 %v5288_v61, %v2152_v18  ;;  %v2157_v10 = vmul.f32 %v5294_v6, %v2152_v18  ;;  %v2156_v63 = vmul.f32 %v5298_v37, %v2152_v18 }
 0xe7d   : > { %v2158_v53 = vmul.f32 %v5304_v1, %v2152_v18  ;;  %v2159_v62 = vmul.f32 0.0, %v2152_v18 }
 0xe7e   : > { %2168 = vrot.lane.b32.xlu1 %v2155_v25, %s6786_s3  ;;  %2166 = vrot.lane.b32.xlu0 %v2154_v39, %s6786_s3  ;;  %v657_v25 = vld [vmem:[%s6808_s1 + $0xa0] sm:$0xf]  ;;  %v5372_v39 = vpop.permute.xlu0 %2127 }
 0xe7f   : > { %6976 = vst [vmem:[#allocation167_spill] sm:$0xff] %v5372_v39 }
 0xe82   : > { %2172 = vrot.lane.b32.xlu1 %v2157_v10, %s6786_s3  ;;  %2170 = vrot.lane.b32.xlu0 %v2156_v63, %s6786_s3  ;;  %v5374_v21 = vpop.permute.xlu0 %2131 }
 0xe83   : > { %6977 = vst [vmem:[#allocation168_spill] sm:$0xff] %v5374_v21 }
 0xe86   : > { %2174 = vrot.lane.b32.xlu0 %v2158_v53, %s6786_s3  ;;  %2176 = vrot.lane.b32.xlu1 %v2159_v62, %s6786_s3  ;;  %v5376_v17 = vpop.permute.xlu0 %2135 }
 0xe87   : > { %6978 = vst [vmem:[#allocation169_spill] sm:$0xff] %v5376_v17 }
 0xe8a   : > { %2192 = vperm.xlu0 %4203, %v657_v25  }
 0xef0   : > { %v5378_v10 = vpop.permute.xlu0 %2166 }
 0xef1   : > { %6979 = vst [vmem:[#allocation170_spill] sm:$0xff] %v5378_v10 }
 0xef4   : > { %v5380_v63 = vpop.permute.xlu0 %2170 }
 0xef8   : > { %v5382_v18 = vpop.permute.xlu0 %2174 }
 0xef9   : > { %6980 = vst [vmem:[#allocation171_spill] sm:$0xff] %v5382_v18 }
 0xf05   : > { %v2193_v53 = vpop.permute.xlu0 %2192 }
 0xf06   : > { %v2196_v62 = vmul.f32 %v5284_v4, %v2193_v53  ;;  %v2195_v49 = vmul.f32 %v5288_v61, %v2193_v53  ;;  %v2198_v25 = vmul.f32 %v5294_v6, %v2193_v53  ;;  %v2197_v39 = vmul.f32 %v5298_v37, %v2193_v53 }
 0xf07   : > { %v2200_v17 = vmul.f32 0.0, %v2193_v53  ;;  %v2199_v18 = vmul.f32 %v5304_v1, %v2193_v53 }
 0xf08   : > { %2209 = vrot.lane.b32.xlu0 %v2196_v62, %s6784_s26  ;;  %2207 = vrot.lane.b32.xlu1 %v2195_v49, %s6784_s26  ;;  %v658_v62 = vld [vmem:[%s6808_s1 + $0xa4] sm:$0xf]  ;;  %v5398_v49 = vpop.permute.xlu1 %2168 }
 0xf09   : > { %6981 = vst [vmem:[#allocation172_spill] sm:$0xff] %v5398_v49 }
 0xf0c   : > { %2213 = vrot.lane.b32.xlu0 %v2198_v25, %s6784_s26  ;;  %2211 = vrot.lane.b32.xlu1 %v2197_v39, %s6784_s26  ;;  %v5400_v10 = vpop.permute.xlu1 %2172 }
 0xf0d   : > { %6982 = vst [vmem:[#allocation173_spill] sm:$0xff] %v5400_v10 }
 0xf10   : > { %2217 = vrot.lane.b32.xlu0 %v2200_v17, %s6784_s26  ;;  %2215 = vrot.lane.b32.xlu1 %v2199_v18, %s6784_s26  ;;  %v5402_v21 = vpop.permute.xlu1 %2176 }
 0xf11   : > { %6983 = vst [vmem:[#allocation174_spill] sm:$0xff] %v5402_v21 }
 0xf14   : > { %2233 = vperm.xlu1 %4204, %v658_v62  }
 0xf7a   : > { %v5404_v25 = vpop.permute.xlu1 %2207 }
 0xf7b   : > { %6984 = vst [vmem:[#allocation175_spill] sm:$0xff] %v5404_v25 }
 0xf7e   : > { %v5406_v39 = vpop.permute.xlu1 %2211 }
 0xf82   : > { %v5408_v53 = vpop.permute.xlu1 %2215 }
 0xf83   : > { %6985 = vst [vmem:[#allocation176_spill] sm:$0xff] %v5408_v53 }
 0xf8f   : > { %v2234_v17 = vpop.permute.xlu1 %2233 }
 0xf90   : > { %v2237_v18 = vmul.f32 %v5284_v4, %v2234_v17  ;;  %v2236_v20 = vmul.f32 %v5288_v61, %v2234_v17  ;;  %v2239_v62 = vmul.f32 %v5294_v6, %v2234_v17  ;;  %v2238_v49 = vmul.f32 %v5298_v37, %v2234_v17 }
 0xf91   : > { %v2240_v21 = vmul.f32 %v5304_v1, %v2234_v17  ;;  %v2241_v53 = vmul.f32 0.0, %v2234_v17 }
 0xf92   : > { %2250 = vrot.lane.b32.xlu1 %v2237_v18, %s6986_s27  ;;  %2248 = vrot.lane.b32.xlu0 %v2236_v20, %s6986_s27  ;;  %v659_v18 = vld [vmem:[%s6808_s1 + $0xa8] sm:$0xf]  ;;  %v5424_v20 = vpop.permute.xlu0 %2209 }
 0xf93   : > { %6987 = vst [vmem:[#allocation177_spill] sm:$0xff] %v5424_v20 }
 0xf96   : > { %2254 = vrot.lane.b32.xlu1 %v2239_v62, %s6986_s27  ;;  %2252 = vrot.lane.b32.xlu0 %v2238_v49, %s6986_s27  ;;  %v5426_v25 = vpop.permute.xlu0 %2213 }
 0xf97   : > { %6988 = vst [vmem:[#allocation178_spill] sm:$0xff] %v5426_v25 }
 0xf9a   : > { %2256 = vrot.lane.b32.xlu0 %v2240_v21, %s6986_s27  ;;  %2258 = vrot.lane.b32.xlu1 %v2241_v53, %s6986_s27  ;;  %v5428_v10 = vpop.permute.xlu0 %2217 }
 0xf9b   : > { %6989 = vst [vmem:[#allocation179_spill] sm:$0xff] %v5428_v10 }
 0xf9e   : > { %2274 = vperm.xlu0 %4203, %v659_v18  }
0x1004   : > { %v5430_v62 = vpop.permute.xlu0 %2248 }
0x1005   : > { %6990 = vst [vmem:[#allocation180_spill] sm:$0xff] %v5430_v62 }
0x1008   : > { %v5432_v49 = vpop.permute.xlu0 %2252 }
0x100c   : > { %v5434_v17 = vpop.permute.xlu0 %2256 }
0x100d   : > { %6991 = vst [vmem:[#allocation181_spill] sm:$0xff] %v5434_v17 }
0x1019   : > { %v2275_v21 = vpop.permute.xlu0 %2274 }
0x101a   : > { %v2278_v53 = vmul.f32 %v5284_v4, %v2275_v21  ;;  %v2277_v47 = vmul.f32 %v5288_v61, %v2275_v21  ;;  %v2280_v18 = vmul.f32 %v5294_v6, %v2275_v21  ;;  %v2279_v20 = vmul.f32 %v5298_v37, %v2275_v21 }
0x101b   : > { %v2282_v10 = vmul.f32 0.0, %v2275_v21  ;;  %v2281_v17 = vmul.f32 %v5304_v1, %v2275_v21 }
0x101c   : > { %2291 = vrot.lane.b32.xlu0 %v2278_v53, %s6950_s21  ;;  %2289 = vrot.lane.b32.xlu1 %v2277_v47, %s6950_s21  ;;  %v660_v53 = vld [vmem:[%s6808_s1 + $0xac] sm:$0xf]  ;;  %v5450_v47 = vpop.permute.xlu1 %2250 }
0x101d   : > { %6992 = vst [vmem:[#allocation182_spill] sm:$0xff] %v5450_v47 }
0x1020   : > { %2295 = vrot.lane.b32.xlu0 %v2280_v18, %s6950_s21  ;;  %2293 = vrot.lane.b32.xlu1 %v2279_v20, %s6950_s21  ;;  %v5452_v62 = vpop.permute.xlu1 %2254 }
0x1021   : > { %6993 = vst [vmem:[#allocation183_spill] sm:$0xff] %v5452_v62 }
0x1024   : > { %2299 = vrot.lane.b32.xlu0 %v2282_v10, %s6950_s21  ;;  %2297 = vrot.lane.b32.xlu1 %v2281_v17, %s6950_s21  ;;  %v5454_v25 = vpop.permute.xlu1 %2258 }
0x1025   : > { %6994 = vst [vmem:[#allocation184_spill] sm:$0xff] %v5454_v25 }
0x1028   : > { %2315 = vperm.xlu1 %4204, %v660_v53  }
0x108e   : > { %v5456_v18 = vpop.permute.xlu1 %2289 }
0x108f   : > { %6995 = vst [vmem:[#allocation185_spill] sm:$0xff] %v5456_v18 }
0x1092   : > { %v5458_v20 = vpop.permute.xlu1 %2293 }
0x1096   : > { %v5460_v21 = vpop.permute.xlu1 %2297 }
0x1097   : > { %6996 = vst [vmem:[#allocation186_spill] sm:$0xff] %v5460_v21 }
0x10a3   : > { %v2316_v10 = vpop.permute.xlu1 %2315 }
0x10a4   : > { %v2319_v17 = vmul.f32 %v5284_v4, %v2316_v10  ;;  %v2318_v9 = vmul.f32 %v5288_v61, %v2316_v10  ;;  %v2321_v53 = vmul.f32 %v5294_v6, %v2316_v10  ;;  %v2320_v47 = vmul.f32 %v5298_v37, %v2316_v10 }
0x10a5   : > { %v2322_v25 = vmul.f32 %v5304_v1, %v2316_v10  ;;  %v2323_v21 = vmul.f32 0.0, %v2316_v10 }
0x10a6   : > { %2332 = vrot.lane.b32.xlu1 %v2319_v17, %s6914_s29  ;;  %2330 = vrot.lane.b32.xlu0 %v2318_v9, %s6914_s29  ;;  %v661_v17 = vld [vmem:[%s6808_s1 + $0xb0] sm:$0xf]  ;;  %v5476_v9 = vpop.permute.xlu0 %2291 }
0x10a7   : > { %6997 = vst [vmem:[#allocation187_spill] sm:$0xff] %v5476_v9 }
0x10aa   : > { %2336 = vrot.lane.b32.xlu1 %v2321_v53, %s6914_s29  ;;  %2334 = vrot.lane.b32.xlu0 %v2320_v47, %s6914_s29  ;;  %v5478_v18 = vpop.permute.xlu0 %2295 }
0x10ab   : > { %6998 = vst [vmem:[#allocation188_spill] sm:$0xff] %v5478_v18 }
0x10ae   : > { %2338 = vrot.lane.b32.xlu0 %v2322_v25, %s6914_s29  ;;  %2340 = vrot.lane.b32.xlu1 %v2323_v21, %s6914_s29  ;;  %v5480_v62 = vpop.permute.xlu0 %2299 }
0x10af   : > { %6999 = vst [vmem:[#allocation189_spill] sm:$0xff] %v5480_v62 }
0x10b2   : > { %2356 = vperm.xlu0 %4203, %v661_v17  }
0x1118   : > { %v5482_v53 = vpop.permute.xlu0 %2330 }
0x1119   : > { %7000 = vst [vmem:[#allocation190_spill] sm:$0xff] %v5482_v53 }
0x111c   : > { %v5484_v47 = vpop.permute.xlu0 %2334 }
0x1120   : > { %v5486_v10 = vpop.permute.xlu0 %2338 }
0x1121   : > { %7001 = vst [vmem:[#allocation191_spill] sm:$0xff] %v5486_v10 }
0x112d   : > { %v2357_v25 = vpop.permute.xlu0 %2356 }
0x112e   : > { %v2360_v21 = vmul.f32 %v5284_v4, %v2357_v25  ;;  %v2359_v43 = vmul.f32 %v5288_v61, %v2357_v25  ;;  %v2362_v17 = vmul.f32 %v5294_v6, %v2357_v25  ;;  %v2361_v9 = vmul.f32 %v5298_v37, %v2357_v25 }
0x112f   : > { %v2364_v62 = vmul.f32 0.0, %v2357_v25  ;;  %v2363_v10 = vmul.f32 %v5304_v1, %v2357_v25  ;;  %v664_v1 = vld [vmem:[%s7002_s22 + $0x8] sm:$0xff]  ;;  %v669_v25 = vld [vmem:[%s7005_s6] sm:$0xff] }
0x1130   : > { %2373 = vrot.lane.b32.xlu0 %v2360_v21, %s6794_s20  ;;  %2371 = vrot.lane.b32.xlu1 %v2359_v43, %s6794_s20  ;;  %v663_v21 = vld [vmem:[%s7002_s22] sm:$0xff] }
0x1131   : > { %v662_v43 = vld [vmem:[%s7003_s25] sm:$0xf]  ;;  %s7009_s25 = smov 126  }
0x1134   : > { %2377 = vrot.lane.b32.xlu0 %v2362_v17, %s6794_s20  ;;  %2375 = vrot.lane.b32.xlu1 %v2361_v9, %s6794_s20  ;;  %v665_v9 = vld [vmem:[%s7002_s22 + $0x10] sm:$0xff]  ;;  %v668_v17 = vld [vmem:[%s7006_s5] sm:$0xff] }
0x1138   : > { %2381 = vrot.lane.b32.xlu0 %v2364_v62, %s6794_s20  ;;  %2379 = vrot.lane.b32.xlu1 %v2363_v10, %s6794_s20  ;;  %v667_v62 = vld [vmem:[%s7004_s4] sm:$0xff]  ;;  %v666_v10 = vld [vmem:[%s7002_s22 + $0x18] sm:$0xff]  ;;  %s7008_s20 = smov 127  }
0x113c   : > { %2432 = vperm.xlu0 %4203, %v663_v21   ;;  %2397 = vperm.xlu1 %4204, %v662_v43   ;;  %v2610_v21 = vld [vmem:[%s6763_s7 + $0x8] sm:$0xff]  ;;  %v2609_v43 = vld [vmem:[%s6763_s7] sm:$0xff] }
0x1140   : > { %2514 = vperm.xlu0 %4203, %v665_v9   ;;  %2473 = vperm.xlu1 %4204, %v664_v1   ;;  %v677_v9 = vmul.f32 %v5090_v48, %v4397_v13  ;;  %v1022_v48 = vmul.f32 %v5284_v4, %v4513_v16 }
0x1142   : > { %v724_v1 = vadd.f32 %v4545_v36, %v677_v9  ;;  %v1712_v9 = vmul.f32 %v5104_v8, %v5081_v34 }
0x1144   : > { %2572 = vperm.xlu0 %4203, %v667_v62   ;;  %2555 = vperm.xlu1 %4204, %v666_v10   ;;  %v765_v62 = vadd.f32 %v4607_v3, %v724_v1 }
0x1146   : > { %v806_v10 = vadd.f32 %v4561_v44, %v765_v62  ;;  %v5562_v62 = vpop.permute.xlu1 %2332 }
0x1148   : > { %2600 = vperm.xlu0 %4203, %v669_v25   ;;  %2589 = vperm.xlu1 %4204, %v668_v17   ;;  %v847_v25 = vadd.f32 %v4632_v28, %v806_v10 }
0x114a   : > { %v888_v17 = vadd.f32 %v4573_v50, %v847_v25 }
0x114c   : > { %2677 = vperm.xlu0 %4203, %v2610_v21   ;;  %2668 = vperm.xlu1 %4204, %v2609_v43   ;;  %v929_v53 = vadd.f32 %v4655_v22, %v888_v17 }
0x114e   : > { %v970_v18 = vadd.f32 %v4589_v58, %v929_v53  ;;  %v4215_v53 = vld [vmem:[%s4402_s23 + $0x18] sm:$0xf] }
0x1150   : > { %v1011_v21 = vadd.f32 %v4667_v35, %v970_v18  ;;  %v1367_v35 = vmul.f32 %v4215_v53, %v4861_v38 }
0x1152   : > { %v1028_v43 = vadd.f32 %v1022_v48, %v1011_v21 }
0x1154   : > { %v1069_v36 = vadd.f32 %v4673_v24, %v1028_v43  ;;  %v2406_v43 = vlaneseq }
0x1156   : > { %v1110_v3 = vadd.f32 %v4621_v11, %v1069_v36 }
0x1158   : > { %v1151_v44 = vadd.f32 %v4685_v33, %v1110_v3 }
0x115a   : > { %v1192_v28 = vadd.f32 %v4711_v29, %v1151_v44 }
0x115c   : > { %v1233_v50 = vadd.f32 %v4737_v51, %v1192_v28  ;;  %v5593_v28 = vshrl.u32 %v2406_v43, 7  ;;  %v2612_v43 = vld [vmem:[%s6763_s7 + $0x18] sm:$0xff] }
0x115e   : > { %v1274_v22 = vadd.f32 %v4763_v7, %v1233_v50  ;;  %7007 = vst [vmem:[#allocation192_spill] sm:$0xff] %v5593_v28  ;;  %v5611_v53 = vsub.s32 1, %v5593_v28 }
0x1160   : > { %v1315_v58 = vadd.f32 %v4789_v40, %v1274_v22 }
0x1162   : > { %v1356_v4 = vadd.f32 %v4857_v5, %v1315_v58 }
0x1164   : > { %v1373_v18 = vadd.f32 %v1367_v35, %v1356_v4 }
0x1166   : > { %v1414_v24 = vadd.f32 %v4865_v2, %v1373_v18 }
0x1168   : > { %v1455_v11 = vadd.f32 %v4892_v31, %v1414_v24 }
0x116a   : > { %v1496_v33 = vadd.f32 %v4919_v57, %v1455_v11 }
0x116c   : > { %v1537_v29 = vadd.f32 %v4946_v52, %v1496_v33  ;;  %v5622_v33 = vsub.s32 3, %v5593_v28 }
0x116e   : > { %v1578_v51 = vadd.f32 %v4973_v45, %v1537_v29  ;;  %v5567_v45 = vpop.permute.xlu1 %2336 }
0x1170   : > { %v1619_v7 = vadd.f32 %v5000_v46, %v1578_v51 }
0x1172   : > { %v1660_v40 = vadd.f32 %v5027_v12, %v1619_v7 }
0x1174   : > { %v1701_v5 = vadd.f32 %v5077_v26, %v1660_v40  ;;  %v2057_v26 = vmul.f32 %v5298_v37, %v5324_v23 }
0x1176   : > { %v1718_v1 = vadd.f32 %v1712_v9, %v1701_v5 }
0x1178   : > { %v1759_v2 = vadd.f32 %v5085_v15, %v1718_v1  ;;  %v5574_v15 = vpop.permute.xlu1 %2340 }
0x117a   : > { %v1800_v31 = vadd.f32 %v5126_v42, %v1759_v2 }
0x117c   : > { %v1841_v57 = vadd.f32 %v5152_v14, %v1800_v31 }
0x117e   : > { %v1882_v52 = vadd.f32 %v5178_v19, %v1841_v57 }
0x1180   : > { %v1923_v46 = vadd.f32 %v5204_v27, %v1882_v52 }
0x1182   : > { %v1964_v12 = vadd.f32 %v5230_v30, %v1923_v46  ;;  %v2611_v46 = vld [vmem:[%s6763_s7 + $0x10] sm:$0xff] }
0x1184   : > { %v2005_v10 = vadd.f32 %v5256_v55, %v1964_v12 }
0x1186   : > { %v2046_v25 = vadd.f32 %v5320_v32, %v2005_v10 }
0x1188   : > { %v2063_v42 = vadd.f32 %v2057_v26, %v2046_v25 }
0x118a   : > { %v2104_v19 = vadd.f32 %v5328_v56, %v2063_v42 }
0x118c   : > { %v2145_v27 = vadd.f32 %v5354_v60, %v2104_v19 }
0x118e   : > { %v2186_v30 = vadd.f32 %v5380_v63, %v2145_v27 }
0x1190   : > { %v2227_v48 = vadd.f32 %v5406_v39, %v2186_v30  ;;  %v5601_v39 = vsub.s32 0, %v5593_v28 }
0x1192   : > { %v2268_v36 = vadd.f32 %v5432_v49, %v2227_v48 }
0x1194   : > { %v2309_v32 = vadd.f32 %v5458_v20, %v2268_v36  ;;  %v5605_v20 = vsub.s32 2, %v5593_v28  ;;  %v7024_v28 = vld [vmem:[#allocation15_spill] sm:$0xff] }
0x1196   : > { %v2350_v56 = vadd.f32 %v5484_v47, %v2309_v32 }
0x11a2   : > { %v5577_v17 = vpop.permute.xlu0 %2373  ;;  %v5579_v14 = vpop.permute.xlu1 %2371 }
0x11a6   : > { %v5584_v21 = vpop.permute.xlu0 %2377  ;;  %v2376_v55 = vpop.permute.xlu1 %2375 }
0x11a7   : > { %v2391_v60 = vadd.f32 %v2376_v55, %v2350_v56 }
0x11aa   : > { %v5589_v3 = vpop.permute.xlu0 %2381  ;;  %v5591_v44 = vpop.permute.xlu1 %2379 }
0x11b7   : > { %v5596_v63 = vpop.permute.xlu0 %2432  ;;  %v5598_v50 = vpop.permute.xlu1 %2397 }
0x11b8   : > { %v2402_v49 = vadd.f32 %v5598_v50, %v2391_v60 }
0x11ba   : > { %v2417_v58 = vrot.slane %v2402_v49, %v5601_v39  ;;  %v2499_v35 = vrot.slane %v2402_v49, %v5605_v20  ;;  %v2458_v18 = vrot.slane %v2402_v49, %v5611_v53  ;;  %v2540_v5 = vrot.slane %v2402_v49, %v5622_v33 }
0x11bb   : > { %v5607_v22 = vpop.permute.xlu0 %2514  ;;  %v5613_v47 = vpop.permute.xlu1 %2473 }
0x11bc   : > { %v2437_v4 = vmul.f32 %v5596_v63, %v2417_v58  ;;  %v2478_v11 = vmul.f32 %v5613_v47, %v2458_v18  ;;  %v2519_v29 = vmul.f32 %v5607_v22, %v2499_v35  ;;  %v2613_v58 = vld [vmem:[%s6763_s7 + $0x20] sm:$0xff] }
0x11be   : > { %v2484_v51 = vadd.f32 %v2478_v11, %v2437_v4 }
0x11bf   : > { %v5618_v24 = vpop.permute.xlu0 %2572  ;;  %v5627_v40 = vpop.permute.xlu1 %2555 }
0x11c0   : > { %v2525_v9 = vadd.f32 %v2519_v29, %v2484_v51  ;;  %v2560_v1 = vmul.f32 %v5627_v40, %v2540_v5  ;;  %v2614_v51 = vld [vmem:[%s6763_s7 + $0x28] sm:$0xff] }
0x11c2   : > { %v2566_v57 = vadd.f32 %v2560_v1, %v2525_v9 }
0x11c3   : > { %v5625_v7 = vpop.permute.xlu0 %2600  ;;  %v5636_v10 = vpop.permute.xlu1 %2589 }
0x11c4   : > { %v2577_v52 = vadd.f32 %v5618_v24, %v2566_v57  ;;  %v2615_v57 = vld [vmem:[%s6763_s7 + $0x30] sm:$0xff] }
0x11c6   : > { %v2583_v12 = vmax.f32 %v2577_v52, 0.0 }
0x11c7   : > { %v2678_v2 = vpop.permute.xlu0 %2677  ;;  %v5644_v19 = vpop.permute.xlu1 %2668 }
0x11c8   : > { %v2680_v31 = vmul.f32 0.0, %v2678_v2  ;;  %v2594_v26 = vmul.f32 %v5636_v10, %v2583_v12 }
0x11ca   : > { %2684 = vrot.lane.b32.xlu1 %v2680_v31, %s7008_s20  ;;  %v5640_v25 = vadd.f32 %v5625_v7, %v2594_v26 }
0x11cc   : > { %v2681_v42 = vmul.f32 %v2678_v2, %v5640_v25 }
0x11ce   : > { %2694 = vperm.xlu1 %4204, %v2611_v46   ;;  %2686 = vrot.lane.b32.xlu0 %v2681_v42, %s7008_s20 }
0x123c   : > { %v5646_v27 = vpop.permute.xlu1 %2684 }
0x1240   : > { %v5654_v36 = vpop.permute.xlu0 %2686 }
0x1249   : > { %v2695_v30 = vpop.permute.xlu1 %2694 }
0x124a   : > { %v2697_v55 = vmul.f32 0.0, %v2695_v30  ;;  %v2698_v48 = vmul.f32 %v2695_v30, %v5640_v25  ;;  %v2616_v30 = vld [vmem:[%s6763_s7 + $0x38] sm:$0xff] }
0x124c   : > { %2703 = vrot.lane.b32.xlu1 %v2698_v48, %s7009_s25  ;;  %2701 = vrot.lane.b32.xlu0 %v2697_v55, %s7009_s25 }
0x1250   : > { %2711 = vperm.xlu0 %4203, %v2612_v43  }
0x12be   : > { %v5656_v32 = vpop.permute.xlu0 %2701  ;;  %v5664_v35 = vpop.permute.xlu1 %2703 }
0x12cb   : > { %v2712_v56 = vpop.permute.xlu0 %2711 }
0x12cc   : > { %v2714_v60 = vmul.f32 0.0, %v2712_v56  ;;  %v2715_v49 = vmul.f32 %v2712_v56, %v5640_v25 }
0x12ce   : > { %2720 = vrot.lane.b32.xlu0 %v2715_v49, %s7010_s24  ;;  %2718 = vrot.lane.b32.xlu1 %v2714_v60, %s7010_s24  ;;  %v2617_v49 = vld [vmem:[%s6763_s7 + $0x40] sm:$0xff] }
0x12d2   : > { %2728 = vperm.xlu1 %4204, %v2613_v58  }
0x1340   : > { %v5666_v4 = vpop.permute.xlu1 %2718  ;;  %v5674_v9 = vpop.permute.xlu0 %2720 }
0x134d   : > { %v2729_v18 = vpop.permute.xlu1 %2728 }
0x134e   : > { %v2731_v11 = vmul.f32 0.0, %v2729_v18  ;;  %v2732_v29 = vmul.f32 %v2729_v18, %v5640_v25 }
0x1350   : > { %2737 = vrot.lane.b32.xlu1 %v2732_v29, %s7011_s30  ;;  %2735 = vrot.lane.b32.xlu0 %v2731_v11, %s7011_s30  ;;  %v675_v29 = vmul.f32 0.0, %v4397_v13 }
0x1354   : > { %2745 = vperm.xlu0 %4203, %v2614_v51   ;;  %v678_v51 = vmul.f32 %v5104_v8, %v4397_v13 }
0x13c2   : > { %v5676_v5 = vpop.permute.xlu0 %2735  ;;  %v5684_v52 = vpop.permute.xlu1 %2737 }
0x13cf   : > { %v2746_v1 = vpop.permute.xlu0 %2745 }
0x13d0   : > { %v2748_v2 = vmul.f32 0.0, %v2746_v1  ;;  %v2749_v31 = vmul.f32 %v2746_v1, %v5640_v25 }
0x13d2   : > { %2754 = vrot.lane.b32.xlu0 %v2749_v31, %s6986_s27  ;;  %2752 = vrot.lane.b32.xlu1 %v2748_v2, %s6986_s27  ;;  %v722_v31 = vadd.f32 %v4581_v54, %v675_v29  ;;  %v7022_v29 = vld [vmem:[#allocation12_spill] sm:$0xff] }
0x13d6   : > { %2762 = vperm.xlu1 %4204, %v2615_v57   ;;  %v725_v57 = vadd.f32 %v4591_v59, %v678_v51 }
0x13d8   : > { %v766_v8 = vadd.f32 %v4555_v41, %v725_v57  ;;  %v7026_v57 = vld [vmem:[#allocation17_spill] sm:$0xff] }
0x1444   : > { %v5686_v46 = vpop.permute.xlu1 %2752  ;;  %v5694_v55 = vpop.permute.xlu0 %2754 }
0x1445   : > { %7012 = vst [vmem:[#allocation193_spill] sm:$0xff] %v5686_v46  ;;  %7013 = vst [vmem:[#allocation194_spill] sm:$0xff] %v5694_v55  ;;  %v7069_v55 = vld [vmem:[#allocation138_spill] sm:$0xff] }
0x1451   : > { %v2763_v12 = vpop.permute.xlu1 %2762 }
0x1452   : > { %v2765_v26 = vmul.f32 0.0, %v2763_v12  ;;  %v2766_v42 = vmul.f32 %v2763_v12, %v5640_v25  ;;  %v2619_v12 = vld [vmem:[%s6763_s7 + $0x50] sm:$0xff] }
0x1454   : > { %2771 = vrot.lane.b32.xlu1 %v2766_v42, %s6950_s21  ;;  %2769 = vrot.lane.b32.xlu0 %v2765_v26, %s6950_s21  ;;  %v2618_v26 = vld [vmem:[%s6763_s7 + $0x48] sm:$0xff]  ;;  %v763_v42 = vadd.f32 %v4601_v0, %v722_v31 }
0x1455   : > { %v7027_v31 = vld [vmem:[#allocation41_spill] sm:$0xff] }
0x1458   : > { %2779 = vperm.xlu0 %4203, %v2616_v30   ;;  %v7018_v30 = vld [vmem:[#allocation7_spill] sm:$0xff] }
0x1459   : > { %v804_v54 = vadd.f32 %v7018_v30, %v763_v42  ;;  %v7028_v30 = vld [vmem:[#allocation22_spill] sm:$0xff] }
0x14c6   : > { %v5696_v48 = vpop.permute.xlu0 %2769  ;;  %v5704_v58 = vpop.permute.xlu1 %2771 }
0x14c7   : > { %7014 = vst [vmem:[#allocation195_spill] sm:$0xff] %v5696_v48  ;;  %7015 = vst [vmem:[#allocation196_spill] sm:$0xff] %v5704_v58  ;;  %v7025_v48 = vld [vmem:[#allocation38_spill] sm:$0xff]  ;;  %v7068_v58 = vld [vmem:[#allocation135_spill] sm:$0xff] }
0x14d3   : > { %v2780_v43 = vpop.permute.xlu0 %2779 }
0x14d4   : > { %v2782_v56 = vmul.f32 0.0, %v2780_v43  ;;  %v2783_v60 = vmul.f32 %v2780_v43, %v5640_v25  ;;  %v7019_v43 = vld [vmem:[#allocation30_spill] sm:$0xff] }
0x14d5   : > { %v807_v59 = vadd.f32 %v7019_v43, %v766_v8  ;;  %v1023_v43 = vmul.f32 %v5298_v37, %v4513_v16 }
0x14d6   : > { %2788 = vrot.lane.b32.xlu0 %v2783_v60, %s6914_s29  ;;  %2786 = vrot.lane.b32.xlu1 %v2782_v56, %s6914_s29  ;;  %v7020_v56 = vld [vmem:[#allocation10_spill] sm:$0xff] }
0x14d7   : > { %v848_v60 = vadd.f32 %v7020_v56, %v807_v59 }
0x14da   : > { %2796 = vperm.xlu1 %4204, %v2617_v49   ;;  %v7021_v49 = vld [vmem:[#allocation33_spill] sm:$0xff] }
0x1548   : > { %v5706_v18 = vpop.permute.xlu1 %2786 }
0x1549   : > { %7016 = vst [vmem:[#allocation197_spill] sm:$0xff] %v5706_v18 }
0x1555   : > { %v2797_v11 = vpop.permute.xlu1 %2796 }
0x1556   : > { %v2799_v1 = vmul.f32 0.0, %v2797_v11  ;;  %v2800_v2 = vmul.f32 %v2797_v11, %v5640_v25  ;;  %v845_v11 = vadd.f32 %v7021_v49, %v804_v54  ;;  %v1020_v54 = vmul.f32 0.0, %v4513_v16  ;;  %v7031_v49 = vld [vmem:[#allocation45_spill] sm:$0xff] }
0x1558   : > { %2805 = vrot.lane.b32.xlu1 %v2800_v2, %s7017_s28  ;;  %2803 = vrot.lane.b32.xlu0 %v2799_v1, %s7017_s28  ;;  %v886_v51 = vadd.f32 %v7022_v29, %v845_v11  ;;  %v7023_v1 = vld [vmem:[#allocation36_spill] sm:$0xff]  ;;  %v7032_v11 = vld [vmem:[#allocation29_spill] sm:$0xff] }
0x1559   : > { %v889_v2 = vadd.f32 %v7023_v1, %v848_v60  ;;  %v7030_v60 = vld [vmem:[#allocation25_spill] sm:$0xff]  ;;  %v7034_v1 = vld [vmem:[#allocation50_spill] sm:$0xff] }
0x155a   : > { %v927_v41 = vadd.f32 %v7025_v48, %v886_v51 }
0x155b   : > { %v930_v18 = vadd.f32 %v7024_v28, %v889_v2 }
0x155c   : > { %2822 = vperm.xlu1 %4204, %v2619_v12   ;;  %2813 = vperm.xlu0 %4203, %v2618_v26   ;;  %v968_v0 = vadd.f32 %v7026_v57, %v927_v41  ;;  %v7029_v12 = vld [vmem:[#allocation43_spill] sm:$0xff]  ;;  %v7035_v41 = vld [vmem:[#allocation53_spill] sm:$0xff] }
0x155d   : > { %v971_v42 = vadd.f32 %v7027_v31, %v930_v18  ;;  %v7033_v18 = vld [vmem:[#allocation48_spill] sm:$0xff]  ;;  %v7037_v31 = vld [vmem:[#allocation58_spill] sm:$0xff] }
0x155e   : > { %v1009_v26 = vadd.f32 %v7029_v12, %v968_v0  ;;  %v7036_v0 = vld [vmem:[#allocation55_spill] sm:$0xff] }
0x155f   : > { %v1012_v8 = vadd.f32 %v7028_v30, %v971_v42  ;;  %v7038_v30 = vld [vmem:[#allocation60_spill] sm:$0xff]  ;;  %v7039_v12 = vld [vmem:[#allocation63_spill] sm:$0xff] }
0x1560   : > { %v1026_v56 = vadd.f32 %v1020_v54, %v1009_v26 }
0x1561   : > { %v1029_v59 = vadd.f32 %v1023_v43, %v1012_v8  ;;  %v7040_v43 = vld [vmem:[#allocation65_spill] sm:$0xff] }
0x1562   : > { %v1067_v48 = vadd.f32 %v7031_v49, %v1026_v56 }
0x1563   : > { %v1070_v28 = vadd.f32 %v7030_v60, %v1029_v59  ;;  %v7041_v59 = vld [vmem:[#allocation68_spill] sm:$0xff]  ;;  %v7042_v60 = vld [vmem:[#allocation70_spill] sm:$0xff] }
0x1564   : > { %v1108_v29 = vadd.f32 %v7032_v11, %v1067_v48  ;;  %v7043_v48 = vld [vmem:[#allocation76_spill] sm:$0xff] }
0x1565   : > { %v1111_v51 = vadd.f32 %v7033_v18, %v1070_v28  ;;  %v4216_v11 = vld [vmem:[%s4402_s23] sm:$0xf]  ;;  %v4217_v18 = vld [vmem:[%s4402_s23 + $0x24] sm:$0xf] }
0x1566   : > { %v1149_v2 = vadd.f32 %v7034_v1, %v1108_v29  ;;  %v1365_v29 = vmul.f32 %v4216_v11, %v4861_v38  ;;  %v7044_v1 = vld [vmem:[#allocation78_spill] sm:$0xff]  ;;  %v7052_v11 = vld [vmem:[#allocation95_spill] sm:$0xff] }
0x1567   : > { %v1152_v57 = vadd.f32 %v7035_v41, %v1111_v51  ;;  %v1368_v51 = vmul.f32 %v4217_v18, %v4861_v38  ;;  %v7045_v41 = vld [vmem:[#allocation73_spill] sm:$0xff]  ;;  %v7053_v18 = vld [vmem:[#allocation98_spill] sm:$0xff] }
0x1568   : > { %v1190_v37 = vadd.f32 %v7036_v0, %v1149_v2 }
0x1569   : > { %v1193_v42 = vadd.f32 %v7037_v31, %v1152_v57  ;;  %v7046_v31 = vld [vmem:[#allocation80_spill] sm:$0xff] }
0x156a   : > { %v1231_v8 = vadd.f32 %v7038_v30, %v1190_v37  ;;  %v7047_v30 = vld [vmem:[#allocation83_spill] sm:$0xff] }
0x156b   : > { %v1234_v26 = vadd.f32 %v7039_v12, %v1193_v42  ;;  %v7048_v12 = vld [vmem:[#allocation85_spill] sm:$0xff] }
0x156c   : > { %v1272_v54 = vadd.f32 %v7040_v43, %v1231_v8  ;;  %v7049_v43 = vld [vmem:[#allocation88_spill] sm:$0xff] }
0x156d   : > { %v1275_v56 = vadd.f32 %v7041_v59, %v1234_v26  ;;  %v7050_v59 = vld [vmem:[#allocation90_spill] sm:$0xff] }
0x156e   : > { %v1313_v49 = vadd.f32 %v7042_v60, %v1272_v54  ;;  %v7051_v60 = vld [vmem:[#allocation93_spill] sm:$0xff] }
0x156f   : > { %v1316_v28 = vadd.f32 %v7043_v48, %v1275_v56 }
0x1570   : > { %v1354_v2 = vadd.f32 %v7044_v1, %v1313_v49 }
0x1571   : > { %v1357_v57 = vadd.f32 %v7045_v41, %v1316_v28  ;;  %v7056_v41 = vld [vmem:[#allocation105_spill] sm:$0xff] }
0x1572   : > { %v1371_v0 = vadd.f32 %v1365_v29, %v1354_v2  ;;  %v7054_v29 = vld [vmem:[#allocation100_spill] sm:$0xff] }
0x1573   : > { %v1374_v37 = vadd.f32 %v1368_v51, %v1357_v57  ;;  %v7055_v51 = vld [vmem:[#allocation103_spill] sm:$0xff] }
0x1574   : > { %v1412_v42 = vadd.f32 %v7046_v31, %v1371_v0  ;;  %v7057_v0 = vld [vmem:[#allocation108_spill] sm:$0xff]  ;;  %v7058_v31 = vld [vmem:[#allocation110_spill] sm:$0xff] }
0x1575   : > { %v1415_v8 = vadd.f32 %v7047_v30, %v1374_v37  ;;  %v7059_v30 = vld [vmem:[#allocation116_spill] sm:$0xff] }
0x1576   : > { %v1453_v26 = vadd.f32 %v7048_v12, %v1412_v42  ;;  %v5774_v12 = vld [vmem:[%s4402_s23 + $0x4] sm:$0xf] }
0x1577   : > { %v1456_v54 = vadd.f32 %v7049_v43, %v1415_v8  ;;  %v5779_v43 = vld [vmem:[%s4402_s23 + $0x28] sm:$0xf] }
0x1578   : > { %v1494_v56 = vadd.f32 %v7050_v59, %v1453_v26  ;;  %v1710_v26 = vmul.f32 %v5774_v12, %v5081_v34  ;;  %v7060_v59 = vld [vmem:[#allocation118_spill] sm:$0xff] }
0x1579   : > { %v1497_v48 = vadd.f32 %v7051_v60, %v1456_v54  ;;  %v1713_v54 = vmul.f32 %v5779_v43, %v5081_v34  ;;  %v7061_v60 = vld [vmem:[#allocation113_spill] sm:$0xff] }
0x157a   : > { %v1535_v49 = vadd.f32 %v7052_v11, %v1494_v56 }
0x157b   : > { %v1538_v28 = vadd.f32 %v7053_v18, %v1497_v48  ;;  %v7062_v18 = vld [vmem:[#allocation120_spill] sm:$0xff] }
0x157c   : > { %v1576_v1 = vadd.f32 %v7054_v29, %v1535_v49  ;;  %v7063_v29 = vld [vmem:[#allocation123_spill] sm:$0xff] }
0x157d   : > { %v1579_v2 = vadd.f32 %v7055_v51, %v1538_v28  ;;  %v7064_v51 = vld [vmem:[#allocation125_spill] sm:$0xff] }
0x157e   : > { %v1617_v57 = vadd.f32 %v7056_v41, %v1576_v1  ;;  %v7065_v41 = vld [vmem:[#allocation128_spill] sm:$0xff] }
0x157f   : > { %v1620_v37 = vadd.f32 %v7057_v0, %v1579_v2  ;;  %v7066_v0 = vld [vmem:[#allocation130_spill] sm:$0xff] }
0x1580   : > { %v1658_v42 = vadd.f32 %v7058_v31, %v1617_v57  ;;  %v7067_v31 = vld [vmem:[#allocation133_spill] sm:$0xff] }
0x1581   : > { %v1661_v8 = vadd.f32 %v7059_v30, %v1620_v37 }
0x1582   : > { %v1699_v56 = vadd.f32 %v7060_v59, %v1658_v42  ;;  %v7070_v59 = vld [vmem:[#allocation140_spill] sm:$0xff] }
0x1583   : > { %v1702_v48 = vadd.f32 %v7061_v60, %v1661_v8 }
0x1584   : > { %v1716_v11 = vadd.f32 %v1710_v26, %v1699_v56  ;;  %v7071_v26 = vld [vmem:[#allocation143_spill] sm:$0xff]  ;;  %v7072_v56 = vld [vmem:[#allocation145_spill] sm:$0xff] }
0x1585   : > { %v1719_v49 = vadd.f32 %v1713_v54, %v1702_v48  ;;  %v7073_v48 = vld [vmem:[#allocation148_spill] sm:$0xff] }
0x1586   : > { %v1757_v28 = vadd.f32 %v7062_v18, %v1716_v11 }
0x1587   : > { %v1760_v1 = vadd.f32 %v7063_v29, %v1719_v49  ;;  %v7074_v49 = vld [vmem:[#allocation150_spill] sm:$0xff] }
0x1588   : > { %v1798_v2 = vadd.f32 %v7064_v51, %v1757_v28  ;;  %v7075_v28 = vld [vmem:[#allocation156_spill] sm:$0xff]  ;;  %v7076_v51 = vld [vmem:[#allocation158_spill] sm:$0xff] }
0x1589   : > { %v1801_v57 = vadd.f32 %v7065_v41, %v1760_v1  ;;  %v2055_v1 = vmul.f32 %v5288_v61, %v5324_v23  ;;  %v7083_v61 = vld [vmem:[#allocation173_spill] sm:$0xff] }
0x158a   : > { %v1839_v37 = vadd.f32 %v7066_v0, %v1798_v2  ;;  %v7077_v2 = vld [vmem:[#allocation153_spill] sm:$0xff]  ;;  %v7078_v0 = vld [vmem:[#allocation160_spill] sm:$0xff] }
0x158b   : > { %v1842_v30 = vadd.f32 %v7067_v31, %v1801_v57  ;;  %v7079_v31 = vld [vmem:[#allocation163_spill] sm:$0xff] }
0x158c   : > { %v1880_v46 = vadd.f32 %v7068_v58, %v1839_v37  ;;  %v2058_v58 = vmul.f32 %v5294_v6, %v5324_v23 }
0x158d   : > { %v1883_v42 = vadd.f32 %v7069_v55, %v1842_v30 }
0x158e   : > { %v1921_v8 = vadd.f32 %v7070_v59, %v1880_v46 }
0x158f   : > { %v1924_v54 = vadd.f32 %v7071_v26, %v1883_v42  ;;  %v7080_v42 = vld [vmem:[#allocation165_spill] sm:$0xff] }
0x1590   : > { %v1962_v60 = vadd.f32 %v7072_v56, %v1921_v8  ;;  %v7081_v8 = vld [vmem:[#allocation168_spill] sm:$0xff] }
0x1591   : > { %v1965_v11 = vadd.f32 %v7073_v48, %v1924_v54  ;;  %v7082_v54 = vld [vmem:[#allocation170_spill] sm:$0xff]  ;;  %v7084_v48 = vld [vmem:[#allocation175_spill] sm:$0xff] }
0x1592   : > { %v2003_v18 = vadd.f32 %v7074_v49, %v1962_v60 }
0x1593   : > { %v2006_v29 = vadd.f32 %v7075_v28, %v1965_v11  ;;  %v7085_v11 = vld [vmem:[#allocation178_spill] sm:$0xff] }
0x1594   : > { %v2044_v55 = vadd.f32 %v7076_v51, %v2003_v18  ;;  %v7086_v18 = vld [vmem:[#allocation180_spill] sm:$0xff] }
0x1595   : > { %v2047_v46 = vadd.f32 %v7077_v2, %v2006_v29  ;;  %v7087_v29 = vld [vmem:[#allocation183_spill] sm:$0xff] }
0x1596   : > { %v2061_v41 = vadd.f32 %v2055_v1, %v2044_v55  ;;  %v7089_v55 = vld [vmem:[#allocation188_spill] sm:$0xff] }
0x1597   : > { %v2064_v57 = vadd.f32 %v2058_v58, %v2047_v46  ;;  %v7088_v58 = vld [vmem:[#allocation185_spill] sm:$0xff]  ;;  %v7090_v46 = vld [vmem:[#allocation190_spill] sm:$0xff] }
0x1598   : > { %v2102_v37 = vadd.f32 %v7078_v0, %v2061_v41 }
0x1599   : > { %v2105_v30 = vadd.f32 %v7079_v31, %v2064_v57 }
0x159a   : > { %v2143_v59 = vadd.f32 %v7080_v42, %v2102_v37 }
0x159b   : > { %v2146_v26 = vadd.f32 %v7081_v8, %v2105_v30 }
0x159c   : > { %v2184_v56 = vadd.f32 %v7082_v54, %v2143_v59 }
0x159d   : > { %v2187_v60 = vadd.f32 %v7083_v61, %v2146_v26 }
0x159e   : > { %v2225_v6 = vadd.f32 %v7084_v48, %v2184_v56 }
0x159f   : > { %v2228_v49 = vadd.f32 %v7085_v11, %v2187_v60 }
0x15a0   : > { %v2266_v28 = vadd.f32 %v7086_v18, %v2225_v6 }
0x15a1   : > { %v2269_v1 = vadd.f32 %v7087_v29, %v2228_v49 }
0x15a2   : > { %v2307_v51 = vadd.f32 %v7088_v58, %v2266_v28 }
0x15a3   : > { %v2310_v2 = vadd.f32 %v7089_v55, %v2269_v1 }
0x15a4   : > { %v2348_v41 = vadd.f32 %v7090_v46, %v2307_v51 }
0x15a5   : > { %v2351_v57 = vadd.f32 %v5567_v45, %v2310_v2 }
0x15a6   : > { %v2389_v0 = vadd.f32 %v5579_v14, %v2348_v41 }
0x15a7   : > { %v2392_v37 = vadd.f32 %v5584_v21, %v2351_v57 }
0x15a8   : > { %v2400_v31 = vadd.f32 %v5598_v50, %v2389_v0 }
0x15a9   : > { %v2403_v30 = vadd.f32 %v5598_v50, %v2392_v37 }
0x15aa   : > { %v2409_v8 = vrot.slane %v2400_v31, %v5601_v39  ;;  %v2450_v26 = vrot.slane %v2400_v31, %v5611_v53  ;;  %v2491_v56 = vrot.slane %v2400_v31, %v5605_v20  ;;  %v2532_v18 = vrot.slane %v2400_v31, %v5622_v33 }
0x15ab   : > { %v2421_v42 = vrot.slane %v2403_v30, %v5601_v39  ;;  %v2462_v59 = vrot.slane %v2403_v30, %v5611_v53  ;;  %v2503_v61 = vrot.slane %v2403_v30, %v5605_v20  ;;  %v2544_v49 = vrot.slane %v2403_v30, %v5622_v33 }
0x15ac   : > { %v2435_v45 = vmul.f32 %v5596_v63, %v2409_v8  ;;  %v2476_v14 = vmul.f32 %v5613_v47, %v2450_v26  ;;  %v2517_v6 = vmul.f32 %v5607_v22, %v2491_v56  ;;  %v2558_v1 = vmul.f32 %v5627_v40, %v2532_v18 }
0x15ad   : > { %v2438_v54 = vmul.f32 %v5596_v63, %v2421_v42  ;;  %v2479_v21 = vmul.f32 %v5613_v47, %v2462_v59  ;;  %v2520_v11 = vmul.f32 %v5607_v22, %v2503_v61  ;;  %v2561_v58 = vmul.f32 %v5627_v40, %v2544_v49 }
0x15ae   : > { %v2482_v60 = vadd.f32 %v2476_v14, %v2435_v45  ;;  %v5858_v45 = vpop.permute.xlu0 %2788 }
0x15af   : > { %v2485_v48 = vadd.f32 %v2479_v21, %v2438_v54  ;;  %v2620_v54 = vld [vmem:[%s6763_s7 + $0x58] sm:$0xff] }
0x15b0   : > { %v2523_v29 = vadd.f32 %v2517_v6, %v2482_v60  ;;  %v2621_v6 = vld [vmem:[%s6763_s7 + $0x60] sm:$0xff] }
0x15b1   : > { %v2526_v28 = vadd.f32 %v2520_v11, %v2485_v48 }
0x15b2   : > { %v2564_v51 = vadd.f32 %v2558_v1, %v2523_v29  ;;  %v2622_v1 = vld [vmem:[%s6763_s7 + $0x68] sm:$0xff] }
0x15b3   : > { %v2567_v55 = vadd.f32 %v2561_v58, %v2526_v28 }
0x15b4   : > { %v2575_v46 = vadd.f32 %v5618_v24, %v2564_v51 }
0x15b5   : > { %v2578_v2 = vadd.f32 %v5618_v24, %v2567_v55 }
0x15b6   : > { %v2581_v57 = vmax.f32 %v2575_v46, 0.0 }
0x15b7   : > { %v2584_v41 = vmax.f32 %v2578_v2, 0.0 }
0x15b8   : > { %v2592_v0 = vmul.f32 %v5636_v10, %v2581_v57 }
0x15b9   : > { %v2595_v37 = vmul.f32 %v5636_v10, %v2584_v41  ;;  %v2623_v41 = vld [vmem:[%s6763_s7 + $0x70] sm:$0xff] }
0x15ba   : > { %v5846_v31 = vadd.f32 %v5625_v7, %v2592_v0 }
0x15bb   : > { %v5849_v42 = vadd.f32 %v5625_v7, %v2595_v37 }
0x15ca   : > { %v5843_v30 = vpop.permute.xlu1 %2805  ;;  %v5860_v14 = vpop.permute.xlu0 %2803 }
0x15cb   : > { %7091 = vst [vmem:[#allocation7_spill] sm:$0xff] %v5860_v14  ;;  %v7176_v14 = vld [vmem:[#allocation176_spill] sm:$0xff] }
0x15d7   : > { %v2823_v59 = vpop.permute.xlu1 %2822  ;;  %v5862_v21 = vpop.permute.xlu0 %2813 }
0x15d8   : > { %v2825_v8 = vmul.f32 %v2823_v59, %v5846_v31  ;;  %v2826_v26 = vmul.f32 %v2823_v59, %v5849_v42 }
0x15da   : > { %2831 = vrot.lane.b32.xlu1 %v2826_v26, %s7008_s20  ;;  %2829 = vrot.lane.b32.xlu0 %v2825_v8, %s7008_s20  ;;  %v2624_v26 = vld [vmem:[%s6763_s7 + $0x78] sm:$0xff] }
0x15de   : > { %2839 = vperm.xlu0 %4203, %v2620_v54  }
0x164c   : > { %v5864_v56 = vpop.permute.xlu0 %2829  ;;  %v5873_v11 = vpop.permute.xlu1 %2831 }
0x164d   : > { %7092 = vst [vmem:[#allocation30_spill] sm:$0xff] %v5864_v56  ;;  %7093 = vst [vmem:[#allocation10_spill] sm:$0xff] %v5873_v11  ;;  %v7175_v56 = vld [vmem:[#allocation177_spill] sm:$0xff] }
0x1659   : > { %v2840_v61 = vpop.permute.xlu0 %2839 }
0x165a   : > { %v2842_v60 = vmul.f32 %v2840_v61, %v5846_v31  ;;  %v2843_v48 = vmul.f32 %v2840_v61, %v5849_v42 }
0x165c   : > { %2848 = vrot.lane.b32.xlu0 %v2843_v48, %s7009_s25  ;;  %2846 = vrot.lane.b32.xlu1 %v2842_v60, %s7009_s25 }
0x1660   : > { %2856 = vperm.xlu1 %4204, %v2621_v6  }
0x16ce   : > { %v5875_v49 = vpop.permute.xlu1 %2846  ;;  %v5884_v58 = vpop.permute.xlu0 %2848 }
0x16cf   : > { %7094 = vst [vmem:[#allocation33_spill] sm:$0xff] %v5875_v49  ;;  %7095 = vst [vmem:[#allocation12_spill] sm:$0xff] %v5884_v58  ;;  %v7119_v49 = vld [vmem:[#allocation20_spill] sm:$0xff]  ;;  %v7159_v58 = vld [vmem:[#allocation137_spill] sm:$0xff] }
0x16db   : > { %v2857_v18 = vpop.permute.xlu1 %2856 }
0x16dc   : > { %v2859_v28 = vmul.f32 %v2857_v18, %v5846_v31  ;;  %v2860_v29 = vmul.f32 %v2857_v18, %v5849_v42  ;;  %v2625_v18 = vld [vmem:[%s6763_s7 + $0x80] sm:$0xff] }
0x16de   : > { %2865 = vrot.lane.b32.xlu1 %v2860_v29, %s7010_s24  ;;  %2863 = vrot.lane.b32.xlu0 %v2859_v28, %s7010_s24 }
0x16e2   : > { %2873 = vperm.xlu0 %4203, %v2622_v1  }
0x1750   : > { %v5886_v51 = vpop.permute.xlu0 %2863  ;;  %v5895_v57 = vpop.permute.xlu1 %2865 }
0x1751   : > { %7096 = vst [vmem:[#allocation36_spill] sm:$0xff] %v5886_v51  ;;  %7097 = vst [vmem:[#allocation15_spill] sm:$0xff] %v5895_v57  ;;  %v7115_v51 = vld [vmem:[#allocation14_spill] sm:$0xff] }
0x175d   : > { %v2874_v55 = vpop.permute.xlu0 %2873 }
0x175e   : > { %v2876_v2 = vmul.f32 %v2874_v55, %v5846_v31  ;;  %v2877_v46 = vmul.f32 %v2874_v55, %v5849_v42 }
0x1760   : > { %2882 = vrot.lane.b32.xlu0 %v2877_v46, %s7011_s30  ;;  %2880 = vrot.lane.b32.xlu1 %v2876_v2, %s7011_s30  ;;  %v2626_v46 = vld [vmem:[%s6763_s7 + $0x88] sm:$0xff] }
0x1764   : > { %2890 = vperm.xlu1 %4204, %v2623_v41  }
0x17d2   : > { %v5897_v0 = vpop.permute.xlu1 %2880  ;;  %v5906_v54 = vpop.permute.xlu0 %2882 }
0x17d3   : > { %7098 = vst [vmem:[#allocation38_spill] sm:$0xff] %v5897_v0  ;;  %7099 = vst [vmem:[#allocation17_spill] sm:$0xff] %v5906_v54  ;;  %v7114_v0 = vld [vmem:[#allocation35_spill] sm:$0xff] }
0x17df   : > { %v2891_v37 = vpop.permute.xlu1 %2890 }
0x17e0   : > { %v2893_v59 = vmul.f32 %v2891_v37, %v5846_v31  ;;  %v2894_v8 = vmul.f32 %v2891_v37, %v5849_v42 }
0x17e2   : > { %2899 = vrot.lane.b32.xlu1 %v2894_v8, %s6986_s27  ;;  %2897 = vrot.lane.b32.xlu0 %v2893_v59, %s6986_s27  ;;  %v676_v8 = vmul.f32 %v5774_v12, %v4397_v13  ;;  %v2627_v12 = vld [vmem:[%s6763_s7 + $0x90] sm:$0xff] }
0x17e6   : > { %2907 = vperm.xlu0 %4203, %v2624_v26   ;;  %v679_v26 = vmul.f32 %v5779_v43, %v4397_v13  ;;  %v7107_v43 = vld [vmem:[#allocation5_spill] sm:$0xff] }
0x1854   : > { %v5908_v61 = vpop.permute.xlu0 %2897  ;;  %v5917_v28 = vpop.permute.xlu1 %2899 }
0x1855   : > { %7100 = vst [vmem:[#allocation41_spill] sm:$0xff] %v5908_v61  ;;  %7101 = vst [vmem:[#allocation22_spill] sm:$0xff] %v5917_v28  ;;  %v7113_v61 = vld [vmem:[#allocation13_spill] sm:$0xff] }
0x1861   : > { %v2908_v60 = vpop.permute.xlu0 %2907 }
0x1862   : > { %v2910_v48 = vmul.f32 %v2908_v60, %v5846_v31  ;;  %v2911_v6 = vmul.f32 %v2908_v60, %v5849_v42 }
0x1864   : > { %2916 = vrot.lane.b32.xlu0 %v2911_v6, %s6950_s21  ;;  %2914 = vrot.lane.b32.xlu1 %v2910_v48, %s6950_s21  ;;  %v7105_v6 = vld [vmem:[#allocation4_spill] sm:$0xff] }
0x1868   : > { %2924 = vperm.xlu1 %4204, %v2625_v18   ;;  %v726_v18 = vadd.f32 %v7105_v6, %v679_v26  ;;  %v7109_v26 = vld [vmem:[#allocation8_spill] sm:$0xff] }
0x18d6   : > { %v5919_v29 = vpop.permute.xlu1 %2914  ;;  %v5928_v41 = vpop.permute.xlu0 %2916 }
0x18d7   : > { %7102 = vst [vmem:[#allocation43_spill] sm:$0xff] %v5919_v29  ;;  %7103 = vst [vmem:[#allocation25_spill] sm:$0xff] %v5928_v41  ;;  %v7112_v29 = vld [vmem:[#allocation34_spill] sm:$0xff] }
0x18e3   : > { %v2925_v1 = vpop.permute.xlu1 %2924 }
0x18e4   : > { %v2927_v55 = vmul.f32 %v2925_v1, %v5846_v31  ;;  %v2928_v2 = vmul.f32 %v2925_v1, %v5849_v42  ;;  %v7106_v1 = vld [vmem:[#allocation18_spill] sm:$0xff] }
0x18e6   : > { %2933 = vrot.lane.b32.xlu1 %v2928_v2, %s6914_s29  ;;  %2931 = vrot.lane.b32.xlu0 %v2927_v55, %s6914_s29  ;;  %v723_v55 = vadd.f32 %v7106_v1, %v676_v8  ;;  %v2628_v2 = vld [vmem:[%s6763_s7 + $0x98] sm:$0xff]  ;;  %v7110_v8 = vld [vmem:[#allocation28_spill] sm:$0xff] }
0x18ea   : > { %2941 = vperm.xlu0 %4203, %v2626_v46   ;;  %v764_v46 = vadd.f32 %v7107_v43, %v723_v55  ;;  %v7116_v43 = vld [vmem:[#allocation39_spill] sm:$0xff] }
0x1958   : > { %v5930_v37 = vpop.permute.xlu0 %2931 }
0x1959   : > { %7104 = vst [vmem:[#allocation45_spill] sm:$0xff] %v5930_v37  ;;  %v7108_v37 = vld [vmem:[#allocation26_spill] sm:$0xff] }
0x1965   : > { %v2942_v59 = vpop.permute.xlu0 %2941 }
0x1966   : > { %v2944_v60 = vmul.f32 %v2942_v59, %v5846_v31  ;;  %v2945_v48 = vmul.f32 %v2942_v59, %v5849_v42  ;;  %v767_v59 = vadd.f32 %v7108_v37, %v726_v18  ;;  %v7117_v37 = vld [vmem:[#allocation19_spill] sm:$0xff] }
0x1968   : > { %2950 = vrot.lane.b32.xlu0 %v2945_v48, %s7017_s28  ;;  %2948 = vrot.lane.b32.xlu1 %v2944_v60, %s7017_s28  ;;  %v808_v6 = vadd.f32 %v7109_v26, %v767_v59  ;;  %v805_v48 = vadd.f32 %v7110_v8, %v764_v46  ;;  %v7111_v60 = vld [vmem:[#allocation9_spill] sm:$0xff]  ;;  %v7118_v59 = vld [vmem:[#allocation40_spill] sm:$0xff] }
0x1969   : > { %v4220_v8 = vld [vmem:[%s4402_s23 + $0x8] sm:$0xf] }
0x196a   : > { %v846_v1 = vadd.f32 %v7111_v60, %v805_v48  ;;  %v849_v41 = vadd.f32 %v7112_v29, %v808_v6  ;;  %v1021_v48 = vmul.f32 %v4220_v8, %v4513_v16  ;;  %v4221_v29 = vld [vmem:[%s4402_s23 + $0x2c] sm:$0xf]  ;;  %v7123_v6 = vld [vmem:[#allocation32_spill] sm:$0xff] }
0x196c   : > { %2967 = vperm.xlu0 %4203, %v2628_v2   ;;  %2958 = vperm.xlu1 %4204, %v2627_v12   ;;  %v890_v28 = vadd.f32 %v7113_v61, %v849_v41  ;;  %v887_v54 = vadd.f32 %v7114_v0, %v846_v1  ;;  %v7120_v2 = vld [vmem:[#allocation44_spill] sm:$0xff]  ;;  %v1024_v61 = vmul.f32 %v4221_v29, %v4513_v16  ;;  %v7124_v1 = vld [vmem:[#allocation47_spill] sm:$0xff] }
0x196e   : > { %v928_v55 = vadd.f32 %v7115_v51, %v887_v54  ;;  %v931_v57 = vadd.f32 %v7116_v43, %v890_v28  ;;  %v7121_v51 = vld [vmem:[#allocation24_spill] sm:$0xff]  ;;  %v7122_v28 = vld [vmem:[#allocation46_spill] sm:$0xff] }
0x1970   : > { %v972_v18 = vadd.f32 %v7117_v37, %v931_v57  ;;  %v969_v26 = vadd.f32 %v7118_v59, %v928_v55  ;;  %v7125_v55 = vld [vmem:[#allocation52_spill] sm:$0xff]  ;;  %v7126_v37 = vld [vmem:[#allocation51_spill] sm:$0xff]  ;;  %v7127_v59 = vld [vmem:[#allocation57_spill] sm:$0xff] }
0x1972   : > { %v1010_v46 = vadd.f32 %v7119_v49, %v969_v26  ;;  %v1013_v12 = vadd.f32 %v7120_v2, %v972_v18  ;;  %v7128_v2 = vld [vmem:[#allocation56_spill] sm:$0xff] }
0x1974   : > { %v1027_v41 = vadd.f32 %v1021_v48, %v1010_v46  ;;  %v1030_v0 = vadd.f32 %v1024_v61, %v1013_v12  ;;  %v7129_v46 = vld [vmem:[#allocation62_spill] sm:$0xff]  ;;  %v7130_v12 = vld [vmem:[#allocation61_spill] sm:$0xff]  ;;  %v7131_v61 = vld [vmem:[#allocation67_spill] sm:$0xff] }
0x1976   : > { %v1068_v54 = vadd.f32 %v7121_v51, %v1027_v41  ;;  %v1071_v57 = vadd.f32 %v7122_v28, %v1030_v0  ;;  %v7132_v51 = vld [vmem:[#allocation66_spill] sm:$0xff]  ;;  %v7133_v28 = vld [vmem:[#allocation75_spill] sm:$0xff] }
0x1978   : > { %v1112_v60 = vadd.f32 %v7123_v6, %v1071_v57  ;;  %v1109_v49 = vadd.f32 %v7124_v1, %v1068_v54  ;;  %v7134_v6 = vld [vmem:[#allocation71_spill] sm:$0xff]  ;;  %v4222_v1 = vld [vmem:[%s4402_s23 + $0xc] sm:$0xf] }
0x197a   : > { %v1150_v43 = vadd.f32 %v7125_v55, %v1109_v49  ;;  %v1153_v18 = vadd.f32 %v7126_v37, %v1112_v60  ;;  %v1366_v49 = vmul.f32 %v4222_v1, %v4861_v38  ;;  %v4223_v60 = vld [vmem:[%s4402_s23 + $0x30] sm:$0xf] }
0x197b   : > { %v1369_v55 = vmul.f32 %v4223_v60, %v4861_v38  ;;  %v7143_v60 = vld [vmem:[#allocation97_spill] sm:$0xff] }
0x197c   : > { %v1191_v26 = vadd.f32 %v7127_v59, %v1150_v43  ;;  %v1194_v8 = vadd.f32 %v7128_v2, %v1153_v18  ;;  %v7135_v43 = vld [vmem:[#allocation72_spill] sm:$0xff]  ;;  %v7136_v18 = vld [vmem:[#allocation79_spill] sm:$0xff] }
0x197e   : > { %v1232_v48 = vadd.f32 %v7129_v46, %v1191_v26  ;;  %v1235_v29 = vadd.f32 %v7130_v12, %v1194_v8  ;;  %v7137_v8 = vld [vmem:[#allocation82_spill] sm:$0xff] }
0x1980   : > { %v1273_v41 = vadd.f32 %v7131_v61, %v1232_v48  ;;  %v1276_v0 = vadd.f32 %v7132_v51, %v1235_v29  ;;  %v7138_v48 = vld [vmem:[#allocation81_spill] sm:$0xff]  ;;  %v7139_v29 = vld [vmem:[#allocation87_spill] sm:$0xff] }
0x1982   : > { %v1314_v57 = vadd.f32 %v7133_v28, %v1273_v41  ;;  %v1317_v54 = vadd.f32 %v7134_v6, %v1276_v0  ;;  %v7140_v41 = vld [vmem:[#allocation86_spill] sm:$0xff]  ;;  %v7141_v0 = vld [vmem:[#allocation92_spill] sm:$0xff]  ;;  %v7142_v6 = vld [vmem:[#allocation91_spill] sm:$0xff] }
0x1984   : > { %v1355_v37 = vadd.f32 %v7135_v43, %v1314_v57  ;;  %v1358_v59 = vadd.f32 %v7136_v18, %v1317_v54  ;;  %v7144_v43 = vld [vmem:[#allocation96_spill] sm:$0xff] }
0x1986   : > { %v1372_v26 = vadd.f32 %v1366_v49, %v1355_v37  ;;  %v1375_v2 = vadd.f32 %v1369_v55, %v1358_v59  ;;  %v7145_v49 = vld [vmem:[#allocation102_spill] sm:$0xff]  ;;  %v7146_v55 = vld [vmem:[#allocation101_spill] sm:$0xff]  ;;  %v7147_v59 = vld [vmem:[#allocation107_spill] sm:$0xff] }
0x1988   : > { %v1413_v46 = vadd.f32 %v7137_v8, %v1372_v26  ;;  %v1416_v12 = vadd.f32 %v7138_v48, %v1375_v2  ;;  %v7148_v8 = vld [vmem:[#allocation106_spill] sm:$0xff]  ;;  %v7149_v48 = vld [vmem:[#allocation115_spill] sm:$0xff] }
0x198a   : > { %v1454_v61 = vadd.f32 %v7139_v29, %v1413_v46  ;;  %v1457_v51 = vadd.f32 %v7140_v41, %v1416_v12  ;;  %v7150_v29 = vld [vmem:[#allocation111_spill] sm:$0xff]  ;;  %v4224_v41 = vld [vmem:[%s4402_s23 + $0x10] sm:$0xf] }
0x198c   : > { %v1495_v28 = vadd.f32 %v7141_v0, %v1454_v61  ;;  %v1498_v1 = vadd.f32 %v7142_v6, %v1457_v51  ;;  %v1711_v61 = vmul.f32 %v4224_v41, %v5081_v34  ;;  %v6003_v51 = vld [vmem:[%s4402_s23 + $0x34] sm:$0xf] }
0x198d   : > { %v1714_v0 = vmul.f32 %v6003_v51, %v5081_v34 }
0x198e   : > { %v1536_v57 = vadd.f32 %v7143_v60, %v1495_v28  ;;  %v1539_v54 = vadd.f32 %v7144_v43, %v1498_v1  ;;  %v7151_v28 = vld [vmem:[#allocation112_spill] sm:$0xff]  ;;  %v7152_v1 = vld [vmem:[#allocation119_spill] sm:$0xff] }
0x1990   : > { %v1577_v37 = vadd.f32 %v7145_v49, %v1536_v57  ;;  %v1580_v18 = vadd.f32 %v7146_v55, %v1539_v54  ;;  %v7153_v54 = vld [vmem:[#allocation122_spill] sm:$0xff] }
0x1992   : > { %v1618_v26 = vadd.f32 %v7147_v59, %v1577_v37  ;;  %v1621_v2 = vadd.f32 %v7148_v8, %v1580_v18  ;;  %v7154_v37 = vld [vmem:[#allocation121_spill] sm:$0xff]  ;;  %v7155_v18 = vld [vmem:[#allocation127_spill] sm:$0xff] }
0x1994   : > { %v1659_v46 = vadd.f32 %v7149_v48, %v1618_v26  ;;  %v1662_v12 = vadd.f32 %v7150_v29, %v1621_v2  ;;  %v7156_v26 = vld [vmem:[#allocation126_spill] sm:$0xff]  ;;  %v7157_v2 = vld [vmem:[#allocation132_spill] sm:$0xff]  ;;  %v7158_v29 = vld [vmem:[#allocation131_spill] sm:$0xff] }
0x1996   : > { %v1700_v6 = vadd.f32 %v7151_v28, %v1659_v46  ;;  %v1703_v60 = vadd.f32 %v7152_v1, %v1662_v12  ;;  %v7160_v28 = vld [vmem:[#allocation136_spill] sm:$0xff] }
0x1998   : > { %v1717_v57 = vadd.f32 %v1711_v61, %v1700_v6  ;;  %v1720_v43 = vadd.f32 %v1714_v0, %v1703_v60  ;;  %v7161_v61 = vld [vmem:[#allocation142_spill] sm:$0xff]  ;;  %v7162_v0 = vld [vmem:[#allocation141_spill] sm:$0xff]  ;;  %v7163_v60 = vld [vmem:[#allocation147_spill] sm:$0xff] }
0x199a   : > { %v1758_v49 = vadd.f32 %v7153_v54, %v1717_v57  ;;  %v1761_v55 = vadd.f32 %v7154_v37, %v1720_v43  ;;  %v7164_v54 = vld [vmem:[#allocation146_spill] sm:$0xff]  ;;  %v7165_v37 = vld [vmem:[#allocation155_spill] sm:$0xff] }
0x199c   : > { %v1799_v59 = vadd.f32 %v7155_v18, %v1758_v49  ;;  %v1802_v8 = vadd.f32 %v7156_v26, %v1761_v55  ;;  %v7166_v18 = vld [vmem:[#allocation151_spill] sm:$0xff]  ;;  %v4226_v26 = vld [vmem:[%s4402_s23 + $0x14] sm:$0xf] }
0x199e   : > { %v1840_v48 = vadd.f32 %v7157_v2, %v1799_v59  ;;  %v1843_v41 = vadd.f32 %v7158_v29, %v1802_v8  ;;  %v2056_v59 = vmul.f32 %v4226_v26, %v5324_v23  ;;  %v6026_v8 = vld [vmem:[%s4402_s23 + $0x38] sm:$0xf]  ;;  %v7167_v2 = vld [vmem:[#allocation152_spill] sm:$0xff] }
0x199f   : > { %v7168_v29 = vld [vmem:[#allocation159_spill] sm:$0xff] }
0x19a0   : > { %v1881_v46 = vadd.f32 %v7159_v58, %v1840_v48  ;;  %v1884_v12 = vadd.f32 %v7160_v28, %v1843_v41  ;;  %v2059_v58 = vmul.f32 %v6026_v8, %v5324_v23 }
0x19a2   : > { %v1922_v6 = vadd.f32 %v7161_v61, %v1881_v46  ;;  %v1925_v1 = vadd.f32 %v7162_v0, %v1884_v12  ;;  %v7169_v12 = vld [vmem:[#allocation162_spill] sm:$0xff] }
0x19a4   : > { %v1963_v57 = vadd.f32 %v7163_v60, %v1922_v6  ;;  %v1966_v43 = vadd.f32 %v7164_v54, %v1925_v1  ;;  %v7170_v6 = vld [vmem:[#allocation161_spill] sm:$0xff]  ;;  %v7171_v1 = vld [vmem:[#allocation167_spill] sm:$0xff] }
0x19a6   : > { %v2004_v49 = vadd.f32 %v7165_v37, %v1963_v57  ;;  %v2007_v55 = vadd.f32 %v7166_v18, %v1966_v43  ;;  %v7172_v57 = vld [vmem:[#allocation166_spill] sm:$0xff]  ;;  %v7173_v43 = vld [vmem:[#allocation172_spill] sm:$0xff]  ;;  %v7174_v18 = vld [vmem:[#allocation171_spill] sm:$0xff] }
0x19a8   : > { %v2045_v48 = vadd.f32 %v7167_v2, %v2004_v49  ;;  %v2048_v41 = vadd.f32 %v7168_v29, %v2007_v55  ;;  %v7177_v2 = vld [vmem:[#allocation182_spill] sm:$0xff] }
0x19aa   : > { %v2062_v46 = vadd.f32 %v2056_v59, %v2045_v48  ;;  %v2065_v28 = vadd.f32 %v2059_v58, %v2048_v41  ;;  %v7178_v59 = vld [vmem:[#allocation181_spill] sm:$0xff]  ;;  %v7179_v48 = vld [vmem:[#allocation187_spill] sm:$0xff]  ;;  %v7180_v41 = vld [vmem:[#allocation186_spill] sm:$0xff] }
0x19ac   : > { %v2103_v61 = vadd.f32 %v7169_v12, %v2062_v46  ;;  %v2106_v0 = vadd.f32 %v7170_v6, %v2065_v28  ;;  %v7181_v12 = vld [vmem:[#allocation191_spill] sm:$0xff] }
0x19ae   : > { %v2144_v60 = vadd.f32 %v7171_v1, %v2103_v61  ;;  %v2147_v54 = vadd.f32 %v7172_v57, %v2106_v0 }
0x19b0   : > { %v2185_v37 = vadd.f32 %v7173_v43, %v2144_v60  ;;  %v2188_v26 = vadd.f32 %v7174_v18, %v2147_v54 }
0x19b2   : > { %v2226_v11 = vadd.f32 %v7175_v56, %v2185_v37  ;;  %v2229_v49 = vadd.f32 %v7176_v14, %v2188_v26 }
0x19b4   : > { %v2267_v55 = vadd.f32 %v7177_v2, %v2226_v11  ;;  %v2270_v58 = vadd.f32 %v7178_v59, %v2229_v49 }
0x19b6   : > { %v2308_v29 = vadd.f32 %v7179_v48, %v2267_v55  ;;  %v2311_v46 = vadd.f32 %v7180_v41, %v2270_v58 }
0x19b8   : > { %v2349_v28 = vadd.f32 %v5562_v62, %v2308_v29  ;;  %v2352_v61 = vadd.f32 %v7181_v12, %v2311_v46 }
0x19ba   : > { %v2390_v6 = vadd.f32 %v5577_v17, %v2349_v28  ;;  %v2393_v0 = vadd.f32 %v5591_v44, %v2352_v61 }
0x19bc   : > { %v2401_v56 = vadd.f32 %v5598_v50, %v2390_v6  ;;  %v2404_v14 = vadd.f32 %v5598_v50, %v2393_v0 }
0x19be   : > { %v2413_v11 = vrot.slane %v2401_v56, %v5601_v39  ;;  %v2425_v1 = vrot.slane %v2404_v14, %v5601_v39  ;;  %v2454_v60 = vrot.slane %v2401_v56, %v5611_v53  ;;  %v2466_v57 = vrot.slane %v2404_v14, %v5611_v53 }
0x19bf   : > { %v2495_v43 = vrot.slane %v2401_v56, %v5605_v20  ;;  %v2507_v37 = vrot.slane %v2404_v14, %v5605_v20  ;;  %v2536_v55 = vrot.slane %v2401_v56, %v5622_v33  ;;  %v2548_v59 = vrot.slane %v2404_v14, %v5622_v33 }
0x19c0   : > { %v2436_v62 = vmul.f32 %v5596_v63, %v2413_v11  ;;  %v2439_v54 = vmul.f32 %v5596_v63, %v2425_v1  ;;  %v2477_v17 = vmul.f32 %v5613_v47, %v2454_v60  ;;  %v2480_v44 = vmul.f32 %v5613_v47, %v2466_v57 }
0x19c1   : > { %v2518_v49 = vmul.f32 %v5607_v22, %v2495_v43  ;;  %v2521_v2 = vmul.f32 %v5607_v22, %v2507_v37  ;;  %v2559_v29 = vmul.f32 %v5627_v40, %v2536_v55  ;;  %v2562_v41 = vmul.f32 %v5627_v40, %v2548_v59  ;;  %v2630_v55 = vld [vmem:[%s6763_s7 + $0xa8] sm:$0xff] }
0x19c2   : > { %v2483_v18 = vadd.f32 %v2477_v17, %v2436_v62  ;;  %v2486_v26 = vadd.f32 %v2480_v44, %v2439_v54  ;;  %v2629_v17 = vld [vmem:[%s6763_s7 + $0xa0] sm:$0xff]  ;;  %v6085_v44 = vpop.permute.xlu1 %2933 }
0x19c4   : > { %v2524_v58 = vadd.f32 %v2518_v49, %v2483_v18  ;;  %v2527_v48 = vadd.f32 %v2521_v2, %v2486_v26 }
0x19c6   : > { %v2565_v46 = vadd.f32 %v2559_v29, %v2524_v58  ;;  %v2568_v28 = vadd.f32 %v2562_v41, %v2527_v48 }
0x19c8   : > { %v2576_v12 = vadd.f32 %v5618_v24, %v2565_v46  ;;  %v2579_v61 = vadd.f32 %v5618_v24, %v2568_v28  ;;  %v2631_v46 = vld [vmem:[%s6763_s7 + $0xb0] sm:$0xff] }
0x19ca   : > { %v2582_v6 = vmax.f32 %v2576_v12, 0.0  ;;  %v2585_v0 = vmax.f32 %v2579_v61, 0.0 }
0x19cc   : > { %v2593_v11 = vmul.f32 %v5636_v10, %v2582_v6  ;;  %v2596_v56 = vmul.f32 %v5636_v10, %v2585_v0 }
0x19ce   : > { %v6073_v14 = vadd.f32 %v5625_v7, %v2593_v11  ;;  %v6076_v60 = vadd.f32 %v5625_v7, %v2596_v56  ;;  %v2632_v11 = vld [vmem:[%s6763_s7 + $0xb8] sm:$0xff] }
0x19da   : > { %v6070_v1 = vpop.permute.xlu0 %2950  ;;  %v6087_v43 = vpop.permute.xlu1 %2948 }
0x19e7   : > { %v2968_v57 = vpop.permute.xlu0 %2967  ;;  %v6089_v37 = vpop.permute.xlu1 %2958 }
0x19e8   : > { %v2970_v62 = vmul.f32 %v2968_v57, %v6073_v14  ;;  %v2971_v54 = vmul.f32 %v2968_v57, %v6076_v60 }
0x19ea   : > { %2976 = vrot.lane.b32.xlu0 %v2971_v54, %s7008_s20  ;;  %2974 = vrot.lane.b32.xlu1 %v2970_v62, %s7008_s20 }
0x19ee   : > { %2984 = vperm.xlu1 %4204, %v2629_v17  }
0x1a5c   : > { %v6091_v18 = vpop.permute.xlu1 %2974  ;;  %v6100_v59 = vpop.permute.xlu0 %2976 }
0x1a69   : > { %v2985_v26 = vpop.permute.xlu1 %2984 }
0x1a6a   : > { %v2987_v49 = vmul.f32 %v2985_v26, %v6073_v14  ;;  %v2988_v2 = vmul.f32 %v2985_v26, %v6076_v60  ;;  %v2633_v26 = vld [vmem:[%s6763_s7 + $0xc0] sm:$0xff] }
0x1a6c   : > { %2993 = vrot.lane.b32.xlu1 %v2988_v2, %s7009_s25  ;;  %2991 = vrot.lane.b32.xlu0 %v2987_v49, %s7009_s25 }
0x1a70   : > { %3001 = vperm.xlu0 %4203, %v2630_v55  }
0x1ade   : > { %v6102_v58 = vpop.permute.xlu0 %2991  ;;  %v6111_v28 = vpop.permute.xlu1 %2993 }
0x1aeb   : > { %v3002_v48 = vpop.permute.xlu0 %3001 }
0x1aec   : > { %v3004_v29 = vmul.f32 %v3002_v48, %v6073_v14  ;;  %v3005_v41 = vmul.f32 %v3002_v48, %v6076_v60 }
0x1aee   : > { %3010 = vrot.lane.b32.xlu0 %v3005_v41, %s7010_s24  ;;  %3008 = vrot.lane.b32.xlu1 %v3004_v29, %s7010_s24  ;;  %v2634_v41 = vld [vmem:[%s6763_s7 + $0xc8] sm:$0xff] }
0x1af2   : > { %3018 = vperm.xlu1 %4204, %v2631_v46  }
0x1b60   : > { %v6113_v12 = vpop.permute.xlu1 %3008  ;;  %v6122_v56 = vpop.permute.xlu0 %3010 }
0x1b61   : > { %7182 = vst [vmem:[#allocation29_spill] sm:$0xff] %v6113_v12  ;;  %7183 = vst [vmem:[#allocation48_spill] sm:$0xff] %v6122_v56  ;;  %v7202_v56 = vld [vmem:[#allocation59_spill] sm:$0xff] }
0x1b6d   : > { %v3019_v61 = vpop.permute.xlu1 %3018 }
0x1b6e   : > { %v3021_v6 = vmul.f32 %v3019_v61, %v6073_v14  ;;  %v3022_v0 = vmul.f32 %v3019_v61, %v6076_v60 }
0x1b70   : > { %3027 = vrot.lane.b32.xlu1 %v3022_v0, %s7011_s30  ;;  %3025 = vrot.lane.b32.xlu0 %v3021_v6, %s7011_s30 }
0x1b74   : > { %3035 = vperm.xlu0 %4203, %v2632_v11  }
0x1be2   : > { %v6124_v57 = vpop.permute.xlu0 %3025  ;;  %v6133_v49 = vpop.permute.xlu1 %3027 }
0x1be3   : > { %7184 = vst [vmem:[#allocation50_spill] sm:$0xff] %v6124_v57  ;;  %7185 = vst [vmem:[#allocation53_spill] sm:$0xff] %v6133_v49  ;;  %v1025_v49 = vmul.f32 %v6026_v8, %v4513_v16 }
0x1bef   : > { %v3036_v62 = vpop.permute.xlu0 %3035 }
0x1bf0   : > { %v3038_v54 = vmul.f32 %v3036_v62, %v6073_v14  ;;  %v3039_v17 = vmul.f32 %v3036_v62, %v6076_v60  ;;  %v2635_v62 = vld [vmem:[%s6763_s7 + $0xd0] sm:$0xff] }
0x1bf2   : > { %3044 = vrot.lane.b32.xlu0 %v3039_v17, %s6986_s27  ;;  %3042 = vrot.lane.b32.xlu1 %v3038_v54, %s6986_s27 }
0x1bf6   : > { %3052 = vperm.xlu1 %4204, %v2633_v26  }
0x1c64   : > { %v6135_v2 = vpop.permute.xlu1 %3042  ;;  %v6144_v46 = vpop.permute.xlu0 %3044 }
0x1c65   : > { %7186 = vst [vmem:[#allocation55_spill] sm:$0xff] %v6135_v2  ;;  %7187 = vst [vmem:[#allocation58_spill] sm:$0xff] %v6144_v46  ;;  %v7198_v46 = vld [vmem:[#allocation23_spill] sm:$0xff] }
0x1c71   : > { %v3053_v55 = vpop.permute.xlu1 %3052 }
0x1c72   : > { %v3055_v48 = vmul.f32 %v3053_v55, %v6073_v14  ;;  %v3056_v29 = vmul.f32 %v3053_v55, %v6076_v60  ;;  %v680_v55 = vmul.f32 %v6003_v51, %v4397_v13  ;;  %v7193_v51 = vld [vmem:[#allocation31_spill] sm:$0xff] }
0x1c74   : > { %3061 = vrot.lane.b32.xlu1 %v3056_v29, %s6950_s21  ;;  %3059 = vrot.lane.b32.xlu0 %v3055_v48, %s6950_s21 }
0x1c78   : > { %3069 = vperm.xlu0 %4203, %v2634_v41   ;;  %v7191_v41 = vld [vmem:[#allocation21_spill] sm:$0xff] }
0x1ce6   : > { %v6146_v61 = vpop.permute.xlu0 %3059  ;;  %v6155_v54 = vpop.permute.xlu1 %3061 }
0x1ce7   : > { %7188 = vst [vmem:[#allocation60_spill] sm:$0xff] %v6146_v61  ;;  %7189 = vst [vmem:[#allocation63_spill] sm:$0xff] %v6155_v54  ;;  %v7197_v54 = vld [vmem:[#allocation42_spill] sm:$0xff] }
0x1cf3   : > { %v3070_v6 = vpop.permute.xlu0 %3069 }
0x1cf4   : > { %v3072_v0 = vmul.f32 %v3070_v6, %v6073_v14  ;;  %v3073_v11 = vmul.f32 %v3070_v6, %v6076_v60  ;;  %v727_v6 = vadd.f32 %v7191_v41, %v680_v55 }
0x1cf6   : > { %3078 = vrot.lane.b32.xlu0 %v3073_v11, %s6914_s29  ;;  %3076 = vrot.lane.b32.xlu1 %v3072_v0, %s6914_s29  ;;  %v2637_v0 = vld [vmem:[%s6763_s7 + $0xe0] sm:$0xff]  ;;  %v2636_v11 = vld [vmem:[%s6763_s7 + $0xd8] sm:$0xff] }
0x1cfa   : > { %3086 = vperm.xlu1 %4204, %v2635_v62   ;;  %v7192_v62 = vld [vmem:[#allocation6_spill] sm:$0xff] }
0x1cfb   : > { %v768_v13 = vadd.f32 %v7192_v62, %v727_v6  ;;  %v7199_v6 = vld [vmem:[#allocation27_spill] sm:$0xff] }
0x1d68   : > { %v6157_v17 = vpop.permute.xlu1 %3076 }
0x1d69   : > { %7190 = vst [vmem:[#allocation65_spill] sm:$0xff] %v6157_v17  ;;  %v809_v17 = vadd.f32 %v7193_v51, %v768_v13  ;;  %v7200_v13 = vld [vmem:[#allocation49_spill] sm:$0xff]  ;;  %v7201_v51 = vld [vmem:[#allocation54_spill] sm:$0xff] }
0x1d75   : > { %v3087_v26 = vpop.permute.xlu1 %3086 }
0x1d76   : > { %v3089_v48 = vmul.f32 %v3087_v26, %v6073_v14  ;;  %v3090_v29 = vmul.f32 %v3087_v26, %v6076_v60  ;;  %v7194_v26 = vld [vmem:[#allocation11_spill] sm:$0xff] }
0x1d77   : > { %v850_v55 = vadd.f32 %v7194_v26, %v809_v17  ;;  %v7203_v26 = vld [vmem:[#allocation64_spill] sm:$0xff] }
0x1d78   : > { %3095 = vrot.lane.b32.xlu1 %v3090_v29, %s7017_s28  ;;  %3093 = vrot.lane.b32.xlu0 %v3089_v48, %s7017_s28  ;;  %v7195_v29 = vld [vmem:[#allocation37_spill] sm:$0xff]  ;;  %v7196_v48 = vld [vmem:[#allocation16_spill] sm:$0xff] }
0x1d79   : > { %v891_v41 = vadd.f32 %v7195_v29, %v850_v55  ;;  %v7204_v29 = vld [vmem:[#allocation69_spill] sm:$0xff] }
0x1d7b   : > { %v932_v61 = vadd.f32 %v7196_v48, %v891_v41  ;;  %v7205_v48 = vld [vmem:[#allocation77_spill] sm:$0xff] }
0x1d7c   : > { %3112 = vperm.xlu1 %4204, %v2637_v0   ;;  %3103 = vperm.xlu0 %4203, %v2636_v11  }
0x1d7d   : > { %v973_v2 = vadd.f32 %v7197_v54, %v932_v61  ;;  %v4228_v54 = vld [vmem:[%s4402_s23 + $0x3c] sm:$0xf] }
0x1d7f   : > { %v1014_v57 = vadd.f32 %v7198_v46, %v973_v2  ;;  %v1370_v2 = vmul.f32 %v4228_v54, %v4861_v38  ;;  %v7206_v46 = vld [vmem:[#allocation74_spill] sm:$0xff]  ;;  %v7215_v54 = vld [vmem:[#allocation124_spill] sm:$0xff] }
0x1d80   : > { %v7214_v38 = vld [vmem:[#allocation114_spill] sm:$0xff] }
0x1d81   : > { %v1031_v12 = vadd.f32 %v1025_v49, %v1014_v57  ;;  %v7207_v57 = vld [vmem:[#allocation84_spill] sm:$0xff]  ;;  %v7208_v49 = vld [vmem:[#allocation89_spill] sm:$0xff] }
0x1d83   : > { %v1072_v62 = vadd.f32 %v7199_v6, %v1031_v12 }
0x1d85   : > { %v1113_v0 = vadd.f32 %v7200_v13, %v1072_v62  ;;  %v7209_v62 = vld [vmem:[#allocation94_spill] sm:$0xff] }
0x1d87   : > { %v1154_v11 = vadd.f32 %v7201_v51, %v1113_v0  ;;  %v7210_v0 = vld [vmem:[#allocation99_spill] sm:$0xff]  ;;  %v7211_v51 = vld [vmem:[#allocation104_spill] sm:$0xff] }
0x1d89   : > { %v1195_v17 = vadd.f32 %v7202_v56, %v1154_v11 }
0x1d8b   : > { %v1236_v55 = vadd.f32 %v7203_v26, %v1195_v17  ;;  %v7212_v17 = vld [vmem:[#allocation109_spill] sm:$0xff] }
0x1d8d   : > { %v1277_v41 = vadd.f32 %v7204_v29, %v1236_v55  ;;  %v7213_v55 = vld [vmem:[#allocation117_spill] sm:$0xff] }
0x1d8f   : > { %v1318_v61 = vadd.f32 %v7205_v48, %v1277_v41  ;;  %v1715_v41 = vmul.f32 0.0, %v5081_v34  ;;  %v7222_v34 = vld [vmem:[#allocation154_spill] sm:$0xff] }
0x1d91   : > { %v1359_v16 = vadd.f32 %v7206_v46, %v1318_v61  ;;  %v7216_v46 = vld [vmem:[#allocation129_spill] sm:$0xff] }
0x1d93   : > { %v1376_v8 = vadd.f32 %v1370_v2, %v1359_v16 }
0x1d95   : > { %v1417_v12 = vadd.f32 %v7207_v57, %v1376_v8  ;;  %v7217_v8 = vld [vmem:[#allocation134_spill] sm:$0xff] }
0x1d97   : > { %v1458_v6 = vadd.f32 %v7208_v49, %v1417_v12  ;;  %v7218_v12 = vld [vmem:[#allocation139_spill] sm:$0xff] }
0x1d99   : > { %v1499_v13 = vadd.f32 %v7209_v62, %v1458_v6  ;;  %v7219_v6 = vld [vmem:[#allocation144_spill] sm:$0xff] }
0x1d9b   : > { %v1540_v56 = vadd.f32 %v7210_v0, %v1499_v13  ;;  %v7220_v13 = vld [vmem:[#allocation149_spill] sm:$0xff] }
0x1d9d   : > { %v1581_v11 = vadd.f32 %v7211_v51, %v1540_v56  ;;  %v7221_v56 = vld [vmem:[#allocation157_spill] sm:$0xff] }
0x1d9f   : > { %v1622_v26 = vadd.f32 %v7212_v17, %v1581_v11  ;;  %v2060_v11 = vmul.f32 0.0, %v5324_v23 }
0x1da1   : > { %v1663_v29 = vadd.f32 %v7213_v55, %v1622_v26  ;;  %v7223_v55 = vld [vmem:[#allocation164_spill] sm:$0xff] }
0x1da3   : > { %v1704_v48 = vadd.f32 %v7214_v38, %v1663_v29 }
0x1da5   : > { %v1721_v61 = vadd.f32 %v1715_v41, %v1704_v48  ;;  %v7224_v41 = vld [vmem:[#allocation169_spill] sm:$0xff]  ;;  %v7225_v48 = vld [vmem:[#allocation174_spill] sm:$0xff] }
0x1da7   : > { %v1762_v2 = vadd.f32 %v7215_v54, %v1721_v61  ;;  %v7226_v54 = vld [vmem:[#allocation179_spill] sm:$0xff] }
0x1da9   : > { %v1803_v16 = vadd.f32 %v7216_v46, %v1762_v2  ;;  %v7227_v46 = vld [vmem:[#allocation184_spill] sm:$0xff] }
0x1dab   : > { %v1844_v57 = vadd.f32 %v7217_v8, %v1803_v16  ;;  %v7228_v8 = vld [vmem:[#allocation189_spill] sm:$0xff] }
0x1dad   : > { %v1885_v49 = vadd.f32 %v7218_v12, %v1844_v57 }
0x1daf   : > { %v1926_v62 = vadd.f32 %v7219_v6, %v1885_v49 }
0x1db1   : > { %v1967_v0 = vadd.f32 %v7220_v13, %v1926_v62 }
0x1db3   : > { %v2008_v51 = vadd.f32 %v7221_v56, %v1967_v0 }
0x1db5   : > { %v2049_v17 = vadd.f32 %v7222_v34, %v2008_v51 }
0x1db7   : > { %v2066_v26 = vadd.f32 %v2060_v11, %v2049_v17 }
0x1db9   : > { %v2107_v29 = vadd.f32 %v7223_v55, %v2066_v26 }
0x1dbb   : > { %v2148_v38 = vadd.f32 %v7224_v41, %v2107_v29 }
0x1dbd   : > { %v2189_v61 = vadd.f32 %v7225_v48, %v2148_v38 }
0x1dbf   : > { %v2230_v2 = vadd.f32 %v7226_v54, %v2189_v61 }
0x1dc1   : > { %v2271_v16 = vadd.f32 %v7227_v46, %v2230_v2  ;;  %v2639_v2 = vld [vmem:[%s6763_s7 + $0xf0] sm:$0xff] }
0x1dc3   : > { %v2312_v57 = vadd.f32 %v7228_v8, %v2271_v16 }
0x1dc5   : > { %v2353_v12 = vadd.f32 %v5574_v15, %v2312_v57 }
0x1dc7   : > { %v2394_v49 = vadd.f32 %v5589_v3, %v2353_v12 }
0x1dc9   : > { %v2405_v23 = vadd.f32 %v5598_v50, %v2394_v49  ;;  %v2640_v49 = vld [vmem:[%s6763_s7 + $0xf8] sm:$0xff] }
0x1dcb   : > { %v2429_v6 = vrot.slane %v2405_v23, %v5601_v39  ;;  %v2470_v62 = vrot.slane %v2405_v23, %v5611_v53  ;;  %v2511_v56 = vrot.slane %v2405_v23, %v5605_v20  ;;  %v2552_v34 = vrot.slane %v2405_v23, %v5622_v33 }
0x1dcd   : > { %v2440_v13 = vmul.f32 %v5596_v63, %v2429_v6  ;;  %v2481_v0 = vmul.f32 %v5613_v47, %v2470_v62  ;;  %v2522_v11 = vmul.f32 %v5607_v22, %v2511_v56  ;;  %v2563_v3 = vmul.f32 %v5627_v40, %v2552_v34  ;;  %v6240_v40 = vpop.permute.xlu0 %3078  ;;  %v2641_v56 = vld [vmem:[%s6763_s7 + $0x100] sm:$0xff] }
0x1dcf   : > { %v2487_v51 = vadd.f32 %v2481_v0, %v2440_v13 }
0x1dd1   : > { %v2528_v15 = vadd.f32 %v2522_v11, %v2487_v51 }
0x1dd3   : > { %v2569_v17 = vadd.f32 %v2563_v3, %v2528_v15 }
0x1dd5   : > { %v2580_v50 = vadd.f32 %v5618_v24, %v2569_v17  ;;  %v2638_v24 = vld [vmem:[%s6763_s7 + $0xe8] sm:$0xff] }
0x1dd6   : > { %v2642_v17 = vld [vmem:[%s6763_s7 + $0x108] sm:$0xff] }
0x1dd7   : > { %v2586_v26 = vmax.f32 %v2580_v50, 0.0 }
0x1dd9   : > { %v2597_v55 = vmul.f32 %v5636_v10, %v2586_v26 }
0x1ddb   : > { %v6231_v63 = vadd.f32 %v5625_v7, %v2597_v55 }
0x1dea   : > { %v6228_v29 = vpop.permute.xlu1 %3095  ;;  %v6242_v10 = vpop.permute.xlu0 %3093 }
0x1df7   : > { %v3113_v47 = vpop.permute.xlu1 %3112  ;;  %v6244_v7 = vpop.permute.xlu0 %3103 }
0x1df8   : > { %v3115_v41 = vmul.f32 %v3113_v47, %v5640_v25  ;;  %v3116_v22 = vmul.f32 %v3113_v47, %v6231_v63 }
0x1dfa   : > { %3121 = vrot.lane.b32.xlu1 %v3116_v22, %s7008_s20  ;;  %3119 = vrot.lane.b32.xlu0 %v3115_v41, %s7008_s20  ;;  %v2643_v22 = vld [vmem:[%s6763_s7 + $0x110] sm:$0xff] }
0x1dfe   : > { %3129 = vperm.xlu0 %4203, %v2638_v24  }
0x1e6c   : > { %v6246_v38 = vpop.permute.xlu0 %3119  ;;  %v6255_v46 = vpop.permute.xlu1 %3121 }
0x1e79   : > { %v3130_v48 = vpop.permute.xlu0 %3129 }
0x1e7a   : > { %v3132_v61 = vmul.f32 %v3130_v48, %v5640_v25  ;;  %v3133_v54 = vmul.f32 %v3130_v48, %v6231_v63 }
0x1e7c   : > { %3138 = vrot.lane.b32.xlu0 %v3133_v54, %s7009_s25  ;;  %3136 = vrot.lane.b32.xlu1 %v3132_v61, %s7009_s25 }
0x1e80   : > { %3146 = vperm.xlu1 %4204, %v2639_v2  }
0x1eee   : > { %v6257_v16 = vpop.permute.xlu1 %3136  ;;  %v6266_v23 = vpop.permute.xlu0 %3138 }
0x1efb   : > { %v3147_v8 = vpop.permute.xlu1 %3146 }
0x1efc   : > { %v3149_v57 = vmul.f32 %v3147_v8, %v5640_v25  ;;  %v3150_v12 = vmul.f32 %v3147_v8, %v6231_v63  ;;  %v2644_v8 = vld [vmem:[%s6763_s7 + $0x118] sm:$0xff] }
0x1efe   : > { %3155 = vrot.lane.b32.xlu1 %v3150_v12, %s7010_s24  ;;  %3153 = vrot.lane.b32.xlu0 %v3149_v57, %s7010_s24 }
0x1f02   : > { %3163 = vperm.xlu0 %4203, %v2640_v49  }
0x1f70   : > { %v6268_v6 = vpop.permute.xlu0 %3153  ;;  %v6277_v51 = vpop.permute.xlu1 %3155 }
0x1f7d   : > { %v3164_v62 = vpop.permute.xlu0 %3163 }
0x1f7e   : > { %v3166_v13 = vmul.f32 %v3164_v62, %v5640_v25  ;;  %v3167_v0 = vmul.f32 %v3164_v62, %v6231_v63 }
0x1f80   : > { %3172 = vrot.lane.b32.xlu0 %v3167_v0, %s7011_s30  ;;  %3170 = vrot.lane.b32.xlu1 %v3166_v13, %s7011_s30  ;;  %v2646_v0 = vld [vmem:[%s6763_s7 + $0x128] sm:$0xff] }
0x1f84   : > { %3180 = vperm.xlu1 %4204, %v2641_v56   ;;  %v2645_v56 = vld [vmem:[%s6763_s7 + $0x120] sm:$0xff] }
0x1ff2   : > { %v6279_v11 = vpop.permute.xlu1 %3170  ;;  %v6288_v50 = vpop.permute.xlu0 %3172 }
0x1fff   : > { %v3181_v34 = vpop.permute.xlu1 %3180 }
0x2000   : > { %v3183_v15 = vmul.f32 %v3181_v34, %v5640_v25  ;;  %v3184_v3 = vmul.f32 %v3181_v34, %v6231_v63 }
0x2002   : > { %3189 = vrot.lane.b32.xlu1 %v3184_v3, %s6986_s27  ;;  %3187 = vrot.lane.b32.xlu0 %v3183_v15, %s6986_s27 }
0x2006   : > { %3197 = vperm.xlu0 %4203, %v2642_v17  }
0x2074   : > { %v6290_v26 = vpop.permute.xlu0 %3187  ;;  %v6299_v24 = vpop.permute.xlu1 %3189 }
0x2081   : > { %v3198_v55 = vpop.permute.xlu0 %3197 }
0x2082   : > { %v3200_v47 = vmul.f32 %v3198_v55, %v5640_v25  ;;  %v3201_v41 = vmul.f32 %v3198_v55, %v6231_v63  ;;  %v2647_v55 = vld [vmem:[%s6763_s7 + $0x130] sm:$0xff] }
0x2084   : > { %3206 = vrot.lane.b32.xlu0 %v3201_v41, %s6950_s21  ;;  %3204 = vrot.lane.b32.xlu1 %v3200_v47, %s6950_s21  ;;  %v2648_v47 = vld [vmem:[%s6763_s7 + $0x138] sm:$0xff]  ;;  %v2650_v41 = vld [vmem:[%s6763_s7 + $0x148] sm:$0xff] }
0x2088   : > { %3214 = vperm.xlu1 %4204, %v2643_v22   ;;  %v2652_v22 = vld [vmem:[%s6763_s7 + $0x158] sm:$0xff] }
0x20f6   : > { %v6301_v48 = vpop.permute.xlu1 %3204  ;;  %v6310_v57 = vpop.permute.xlu0 %3206 }
0x2103   : > { %v3215_v61 = vpop.permute.xlu1 %3214 }
0x2104   : > { %v3217_v54 = vmul.f32 %v3215_v61, %v5640_v25  ;;  %v3218_v2 = vmul.f32 %v3215_v61, %v6231_v63 }
0x2106   : > { %3223 = vrot.lane.b32.xlu1 %v3218_v2, %s6914_s29  ;;  %3221 = vrot.lane.b32.xlu0 %v3217_v54, %s6914_s29 }
0x210a   : > { %3231 = vperm.xlu0 %4203, %v2644_v8  }
0x2178   : > { %v6312_v12 = vpop.permute.xlu0 %3221  ;;  %v6341_v61 = vpop.permute.xlu1 %3223 }
0x2185   : > { %v3232_v49 = vpop.permute.xlu0 %3231 }
0x2186   : > { %v3234_v62 = vmul.f32 %v3232_v49, %v5640_v25  ;;  %v3235_v13 = vmul.f32 %v3232_v49, %v6231_v63 }
0x2188   : > { %3240 = vrot.lane.b32.xlu0 %v3235_v13, %s7017_s28  ;;  %3238 = vrot.lane.b32.xlu1 %v3234_v62, %s7017_s28 }
0x218c   : > { %3257 = vperm.xlu0 %4203, %v2646_v0   ;;  %3248 = vperm.xlu1 %4204, %v2645_v56   ;;  %v2649_v56 = vld [vmem:[%s6763_s7 + $0x140] sm:$0xff] }
0x21fa   : > { %v6324_v34 = vpop.permute.xlu0 %3240  ;;  %v6343_v54 = vpop.permute.xlu1 %3238 }
0x2207   : > { %v3258_v15 = vpop.permute.xlu0 %3257  ;;  %v6345_v2 = vpop.permute.xlu1 %3248 }
0x2208   : > { %v3260_v3 = vmul.f32 %v3258_v15, %v5849_v42  ;;  %v3261_v17 = vmul.f32 0.0, %v3258_v15 }
0x220a   : > { %3266 = vrot.lane.b32.xlu0 %v3261_v17, %s7008_s20  ;;  %3264 = vrot.lane.b32.xlu1 %v3260_v3, %s7008_s20  ;;  %v2651_v3 = vld [vmem:[%s6763_s7 + $0x150] sm:$0xff]  ;;  %v2653_v17 = vld [vmem:[%s6763_s7 + $0x160] sm:$0xff] }
0x220e   : > { %3274 = vperm.xlu1 %4204, %v2647_v55  }
0x2212   : > { %3291 = vperm.xlu1 %4204, %v2648_v47  }
0x2216   : > { %3325 = vperm.xlu1 %4204, %v2650_v41  }
0x221a   : > { %3359 = vperm.xlu1 %4204, %v2652_v22  }
0x227c   : > { %v6347_v8 = vpop.permute.xlu1 %3264  ;;  %v6364_v47 = vpop.permute.xlu0 %3266 }
0x2289   : > { %v3275_v49 = vpop.permute.xlu1 %3274 }
0x228a   : > { %v3277_v62 = vmul.f32 %v3275_v49, %v5849_v42  ;;  %v3278_v13 = vmul.f32 0.0, %v3275_v49 }
0x228c   : > { %3281 = vrot.lane.b32.xlu0 %v3277_v62, %s7009_s25  ;;  %3283 = vrot.lane.b32.xlu1 %v3278_v13, %s7009_s25 }
0x228d   : > { %v3292_v0 = vpop.permute.xlu1 %3291 }
0x228e   : > { %v3295_v15 = vmul.f32 0.0, %v3292_v0  ;;  %v3294_v55 = vmul.f32 %v3292_v0, %v5849_v42 }
0x2290   : > { %3308 = vperm.xlu0 %4203, %v2649_v56   ;;  %3300 = vrot.lane.b32.xlu1 %v3295_v15, %s7010_s24 }
0x2291   : > { %v3326_v13 = vpop.permute.xlu1 %3325 }
0x2292   : > { %v3328_v56 = vmul.f32 %v3326_v13, %v5849_v42  ;;  %v3329_v15 = vmul.f32 0.0, %v3326_v13 }
0x2294   : > { %3342 = vperm.xlu0 %4203, %v2651_v3  }
0x2298   : > { %3376 = vperm.xlu0 %4203, %v2653_v17  }
0x229c   : > { %3298 = vrot.lane.b32.xlu0 %v3294_v55, %s7010_s24  ;;  %v3360_v55 = vpop.permute.xlu1 %3359 }
0x22fe   : > { %v6366_v41 = vpop.permute.xlu0 %3281 }
0x230b   : > { %v3309_v22 = vpop.permute.xlu0 %3308 }
0x230c   : > { %v3311_v49 = vmul.f32 %v3309_v22, %v5849_v42  ;;  %v3312_v62 = vmul.f32 0.0, %v3309_v22  ;;  %v3362_v22 = vmul.f32 %v3360_v55, %v5849_v42 }
0x230e   : > { %3315 = vrot.lane.b32.xlu0 %v3311_v49, %s7011_s30  ;;  %3317 = vrot.lane.b32.xlu1 %v3312_v62, %s7011_s30  ;;  %v3363_v49 = vmul.f32 0.0, %v3360_v55  ;;  %v2658_v55 = vld [vmem:[%s6765_s9 + $0x18] sm:$0xff] }
0x230f   : > { %v3343_v3 = vpop.permute.xlu0 %3342 }
0x2310   : > { %v3345_v0 = vmul.f32 %v3343_v3, %v5849_v42  ;;  %v3346_v17 = vmul.f32 0.0, %v3343_v3  ;;  %v2655_v3 = vld [vmem:[%s6765_s9] sm:$0xff] }
0x2312   : > { %3332 = vrot.lane.b32.xlu0 %v3328_v56, %s6986_s27  ;;  %3334 = vrot.lane.b32.xlu1 %v3329_v15, %s6986_s27  ;;  %v2654_v15 = vld [vmem:[%s6764_s8] sm:$0xff] }
0x2313   : > { %v3377_v62 = vpop.permute.xlu0 %3376 }
0x2314   : > { %v3379_v13 = vmul.f32 %v3377_v62, %v5849_v42  ;;  %v3380_v56 = vmul.f32 0.0, %v3377_v62  ;;  %v2661_v62 = vld [vmem:[%s6765_s9 + $0x30] sm:$0xff] }
0x2316   : > { %3349 = vrot.lane.b32.xlu0 %v3345_v0, %s6950_s21  ;;  %3351 = vrot.lane.b32.xlu1 %v3346_v17, %s6950_s21  ;;  %v2656_v0 = vld [vmem:[%s6765_s9 + $0x8] sm:$0xff]  ;;  %v2657_v17 = vld [vmem:[%s6765_s9 + $0x10] sm:$0xff] }
0x231a   : > { %3366 = vrot.lane.b32.xlu0 %v3362_v22, %s6914_s29  ;;  %3368 = vrot.lane.b32.xlu1 %v3363_v49, %s6914_s29  ;;  %v2659_v22 = vld [vmem:[%s6765_s9 + $0x20] sm:$0xff]  ;;  %v2660_v49 = vld [vmem:[%s6765_s9 + $0x28] sm:$0xff] }
0x231e   : > { %3383 = vrot.lane.b32.xlu0 %v3379_v13, %s7017_s28  ;;  %3385 = vrot.lane.b32.xlu1 %v3380_v56, %s7017_s28  ;;  %v2662_v13 = vld [vmem:[%s6765_s9 + $0x38] sm:$0xff]  ;;  %v2663_v56 = vld [vmem:[%s6766_s10] sm:$0xff] }
0x2322   : > { %3393 = vperm.xlu0 %4203, %v2654_v15   ;;  %3408 = vperm.xlu1 %4204, %v2655_v3   ;;  %v2664_v15 = vld [vmem:[%s6767_s11] sm:$0xff] }
0x2323   : > { %v2665_v3 = vld [vmem:[%s6768_s12] sm:$0xff] }
0x2326   : > { %3425 = vperm.xlu0 %4203, %v2656_v0   ;;  %3442 = vperm.xlu1 %4204, %v2657_v17   ;;  %v3557_v0 = vld [vmem:[%s6769_s13] sm:$0xff]  ;;  %v3576_v17 = vld [vmem:[%s6769_s13 + $0x98] sm:$0xff] }
0x232a   : > { %3459 = vperm.xlu0 %4203, %v2658_v55   ;;  %3476 = vperm.xlu1 %4204, %v2659_v22   ;;  %v3577_v55 = vld [vmem:[%s6769_s13 + $0xa0] sm:$0xff]  ;;  %v3578_v22 = vld [vmem:[%s6769_s13 + $0xa8] sm:$0xff] }
0x232e   : > { %3493 = vperm.xlu0 %4203, %v2660_v49   ;;  %3510 = vperm.xlu1 %4204, %v2661_v62   ;;  %v3579_v49 = vld [vmem:[%s6769_s13 + $0xb0] sm:$0xff]  ;;  %v3580_v62 = vld [vmem:[%s6769_s13 + $0xb8] sm:$0xff] }
0x2332   : > { %3527 = vperm.xlu0 %4203, %v2662_v13   ;;  %3536 = vperm.xlu1 %4204, %v2663_v56   ;;  %v2672_v13 = vmul.f32 %v5644_v19, %v5640_v25  ;;  %v3581_v56 = vld [vmem:[%s6769_s13 + $0xc0] sm:$0xff] }
0x2336   : > { %3545 = vperm.xlu0 %4203, %v2664_v15   ;;  %3552 = vperm.xlu1 %4204, %v2665_v3   ;;  %v3582_v15 = vld [vmem:[%s6769_s13 + $0xc8] sm:$0xff]  ;;  %v2671_v3 = vmul.f32 0.0, %v5644_v19 }
0x233a   : > { %3616 = vperm.xlu0 %4203, %v3557_v0   ;;  %3749 = vperm.xlu1 %4204, %v3576_v17   ;;  %v2691_v0 = vadd.f32 %v5654_v36, %v2672_v13  ;;  %v2690_v17 = vadd.f32 %v5646_v27, %v2671_v3  ;;  %v3558_v13 = vld [vmem:[%s6769_s13 + $0x8] sm:$0xff] }
0x233b   : > { %v7230_v3 = vld [vmem:[#allocation193_spill] sm:$0xff] }
0x233e   : > { %3760 = vperm.xlu0 %4203, %v3577_v55   ;;  %3771 = vperm.xlu1 %4204, %v3578_v22   ;;  %v2708_v55 = vadd.f32 %v5664_v35, %v2691_v0  ;;  %v3583_v22 = vld [vmem:[%s6769_s13 + $0xd0] sm:$0xff]  ;;  %v3586_v35 = vld [vmem:[%s6769_s13 + $0xe8] sm:$0xff] }
0x2340   : > { %v2725_v19 = vadd.f32 %v5674_v9, %v2708_v55  ;;  %v7232_v55 = vld [vmem:[#allocation195_spill] sm:$0xff] }
0x2342   : > { %3782 = vperm.xlu0 %4203, %v3579_v49   ;;  %3793 = vperm.xlu1 %4204, %v3580_v62   ;;  %v3585_v49 = vld [vmem:[%s6769_s13 + $0xe0] sm:$0xff]  ;;  %v2707_v62 = vadd.f32 %v5656_v32, %v2690_v17  ;;  %v2742_v27 = vadd.f32 %v5684_v52, %v2725_v19  ;;  %v3587_v52 = vld [vmem:[%s6769_s13 + $0xf0] sm:$0xff] }
0x2343   : > { %v3559_v17 = vld [vmem:[%s6769_s13 + $0x10] sm:$0xff] }
0x2344   : > { %v2724_v36 = vadd.f32 %v5666_v4, %v2707_v62  ;;  %v7231_v4 = vld [vmem:[#allocation196_spill] sm:$0xff]  ;;  %v7233_v62 = vld [vmem:[#allocation197_spill] sm:$0xff] }
0x2346   : > { %3804 = vperm.xlu0 %4203, %v3581_v56   ;;  %3815 = vperm.xlu1 %4204, %v3582_v15   ;;  %v2741_v56 = vadd.f32 %v5676_v5, %v2724_v36  ;;  %v7229_v15 = vld [vmem:[#allocation194_spill] sm:$0xff]  ;;  %v2816_v36 = vmul.f32 %v5862_v21, %v5846_v31 }
0x2347   : > { %v2759_v32 = vadd.f32 %v7229_v15, %v2742_v27 }
0x2348   : > { %v2758_v9 = vadd.f32 %v7230_v3, %v2741_v56  ;;  %v7235_v3 = vld [vmem:[#allocation10_spill] sm:$0xff] }
0x2349   : > { %v2776_v0 = vadd.f32 %v7231_v4, %v2759_v32 }
0x234a   : > { %3826 = vperm.xlu0 %4203, %v3583_v22   ;;  %3844 = vperm.xlu1 %4204, %v3585_v49   ;;  %v2775_v22 = vadd.f32 %v7232_v55, %v2758_v9  ;;  %v2817_v49 = vmul.f32 %v5862_v21, %v5849_v42  ;;  %v3561_v21 = vld [vmem:[%s6769_s13 + $0x20] sm:$0xff]  ;;  %v7236_v9 = vld [vmem:[#allocation30_spill] sm:$0xff] }
0x234b   : > { %v2793_v5 = vadd.f32 %v5858_v45, %v2776_v0  ;;  %v3560_v45 = vld [vmem:[%s6769_s13 + $0x18] sm:$0xff]  ;;  %v7237_v0 = vld [vmem:[#allocation12_spill] sm:$0xff] }
0x234c   : > { %v2792_v19 = vadd.f32 %v7233_v62, %v2775_v22  ;;  %v7239_v22 = vld [vmem:[#allocation15_spill] sm:$0xff]  ;;  %v3562_v62 = vld [vmem:[%s6769_s13 + $0x28] sm:$0xff] }
0x234d   : > { %v2810_v27 = vadd.f32 %v5843_v30, %v2793_v5  ;;  %v3589_v30 = vld [vmem:[%s6769_s13 + $0x100] sm:$0xff] }
0x234e   : > { %3855 = vperm.xlu0 %4203, %v3586_v35   ;;  %3623 = vperm.xlu1 %4204, %v3558_v13   ;;  %v3588_v35 = vld [vmem:[%s6769_s13 + $0xf8] sm:$0xff] }
0x234f   : > { %v7234_v13 = vld [vmem:[#allocation7_spill] sm:$0xff]  ;;  %v2819_v15 = vadd.f32 %v2817_v49, %v2810_v27  ;;  %v3590_v49 = vld [vmem:[%s6769_s13 + $0x108] sm:$0xff] }
0x2350   : > { %v2809_v56 = vadd.f32 %v7234_v13, %v2792_v19  ;;  %v7240_v19 = vld [vmem:[#allocation36_spill] sm:$0xff]  ;;  %v7241_v27 = vld [vmem:[#allocation17_spill] sm:$0xff] }
0x2351   : > { %v2836_v31 = vadd.f32 %v7235_v3, %v2819_v15  ;;  %v3563_v3 = vld [vmem:[%s6769_s13 + $0x30] sm:$0xff] }
0x2352   : > { %3866 = vperm.xlu0 %4203, %v3587_v52   ;;  %3630 = vperm.xlu1 %4204, %v3559_v17   ;;  %v2818_v32 = vadd.f32 %v2816_v36, %v2809_v56  ;;  %v7238_v17 = vld [vmem:[#allocation33_spill] sm:$0xff]  ;;  %v7243_v56 = vld [vmem:[#allocation22_spill] sm:$0xff] }
0x2353   : > { %v2853_v52 = vadd.f32 %v7237_v0, %v2836_v31  ;;  %v7244_v31 = vld [vmem:[#allocation41_spill] sm:$0xff] }
0x2354   : > { %v2835_v4 = vadd.f32 %v7236_v9, %v2818_v32  ;;  %v3591_v32 = vld [vmem:[%s6769_s13 + $0x110] sm:$0xff] }
0x2355   : > { %v2870_v5 = vadd.f32 %v7239_v22, %v2853_v52  ;;  %v3564_v22 = vld [vmem:[%s6769_s13 + $0x38] sm:$0xff] }
0x2356   : > { %3877 = vperm.xlu0 %4203, %v3588_v35   ;;  %3637 = vperm.xlu1 %4204, %v3560_v45   ;;  %v2852_v55 = vadd.f32 %v7238_v17, %v2835_v4  ;;  %v7242_v45 = vld [vmem:[#allocation38_spill] sm:$0xff]  ;;  %v7246_v4 = vld [vmem:[#allocation43_spill] sm:$0xff]  ;;  %v2962_v17 = vmul.f32 %v6089_v37, %v6076_v60 }
0x2357   : > { %v2887_v35 = vadd.f32 %v7241_v27, %v2870_v5  ;;  %v7247_v5 = vld [vmem:[#allocation45_spill] sm:$0xff] }
0x2358   : > { %v2869_v36 = vadd.f32 %v7240_v19, %v2852_v55  ;;  %v3592_v55 = vld [vmem:[%s6769_s13 + $0x118] sm:$0xff]  ;;  %v3566_v27 = vld [vmem:[%s6769_s13 + $0x48] sm:$0xff] }
0x2359   : > { %v2904_v15 = vadd.f32 %v7243_v56, %v2887_v35  ;;  %v7248_v56 = vld [vmem:[#allocation48_spill] sm:$0xff] }
0x235a   : > { %3888 = vperm.xlu0 %4203, %v3589_v30   ;;  %3644 = vperm.xlu1 %4204, %v3561_v21   ;;  %v2886_v13 = vadd.f32 %v7242_v45, %v2869_v36  ;;  %v7245_v21 = vld [vmem:[#allocation25_spill] sm:$0xff]  ;;  %v3565_v36 = vld [vmem:[%s6769_s13 + $0x40] sm:$0xff] }
0x235b   : > { %v2921_v9 = vadd.f32 %v7245_v21, %v2904_v15 }
0x235c   : > { %v2903_v30 = vadd.f32 %v7244_v31, %v2886_v13  ;;  %v3570_v31 = vld [vmem:[%s6769_s13 + $0x68] sm:$0xff] }
0x235d   : > { %v2938_v52 = vadd.f32 %v6085_v44, %v2921_v9  ;;  %v7252_v9 = vld [vmem:[#allocation58_spill] sm:$0xff] }
0x235e   : > { %3899 = vperm.xlu0 %4203, %v3590_v49   ;;  %3651 = vperm.xlu1 %4204, %v3562_v62   ;;  %v2920_v0 = vadd.f32 %v7246_v4, %v2903_v30  ;;  %v2961_v62 = vmul.f32 %v6089_v37, %v6073_v14  ;;  %v3568_v37 = vld [vmem:[%s6769_s13 + $0x58] sm:$0xff]  ;;  %v7251_v30 = vld [vmem:[#allocation50_spill] sm:$0xff] }
0x235f   : > { %v2955_v19 = vadd.f32 %v6070_v1, %v2938_v52  ;;  %v7253_v4 = vld [vmem:[#allocation55_spill] sm:$0xff] }
0x2360   : > { %v2937_v49 = vadd.f32 %v7247_v5, %v2920_v0  ;;  %v7254_v52 = vld [vmem:[#allocation63_spill] sm:$0xff]  ;;  %v7255_v5 = vld [vmem:[#allocation60_spill] sm:$0xff] }
0x2361   : > { %v2964_v60 = vadd.f32 %v2962_v17, %v2955_v19  ;;  %v7256_v19 = vld [vmem:[#allocation65_spill] sm:$0xff] }
0x2362   : > { %3910 = vperm.xlu0 %4203, %v3591_v32   ;;  %3658 = vperm.xlu1 %4204, %v3563_v3   ;;  %v2954_v44 = vadd.f32 %v6087_v43, %v2937_v49  ;;  %v3567_v43 = vld [vmem:[%s6769_s13 + $0x50] sm:$0xff]  ;;  %v7249_v32 = vld [vmem:[#allocation29_spill] sm:$0xff] }
0x2363   : > { %v2981_v45 = vadd.f32 %v6100_v59, %v2964_v60  ;;  %v3106_v60 = vmul.f32 %v6244_v7, %v5640_v25 }
0x2364   : > { %v2963_v35 = vadd.f32 %v2961_v62, %v2954_v44 }
0x2365   : > { %v2998_v1 = vadd.f32 %v6111_v28, %v2981_v45  ;;  %v3569_v28 = vld [vmem:[%s6769_s13 + $0x60] sm:$0xff]  ;;  %v3574_v45 = vld [vmem:[%s6769_s13 + $0x88] sm:$0xff] }
0x2366   : > { %3921 = vperm.xlu0 %4203, %v3592_v55   ;;  %3665 = vperm.xlu1 %4204, %v3564_v22   ;;  %v2980_v14 = vadd.f32 %v6091_v18, %v2963_v35  ;;  %v7250_v18 = vld [vmem:[#allocation53_spill] sm:$0xff]  ;;  %v3571_v55 = vld [vmem:[%s6769_s13 + $0x70] sm:$0xff]  ;;  %v3572_v22 = vld [vmem:[%s6769_s13 + $0x78] sm:$0xff] }
0x2367   : > { %v3015_v15 = vadd.f32 %v7248_v56, %v2998_v1  ;;  %v3573_v35 = vld [vmem:[%s6769_s13 + $0x80] sm:$0xff] }
0x2368   : > { %v2997_v13 = vadd.f32 %v6102_v58, %v2980_v14 }
0x2369   : > { %v3032_v3 = vadd.f32 %v7250_v18, %v3015_v15 }
0x236a   : > { %3672 = vperm.xlu0 %4203, %v3565_v36   ;;  %3679 = vperm.xlu1 %4204, %v3566_v27   ;;  %v3014_v59 = vadd.f32 %v7249_v32, %v2997_v13  ;;  %v3107_v36 = vmul.f32 %v6244_v7, %v6231_v63  ;;  %v3284_v27 = vpop.permute.xlu1 %3283  ;;  %v3575_v63 = vld [vmem:[%s6769_s13 + $0x90] sm:$0xff]  ;;  %v3299_v13 = vpop.permute.xlu0 %3298 }
0x236b   : > { %v3049_v58 = vadd.f32 %v7252_v9, %v3032_v3 }
0x236c   : > { %v3031_v21 = vadd.f32 %v7251_v30, %v3014_v59  ;;  %v3251_v30 = vmul.f32 %v6345_v2, %v5849_v42 }
0x236d   : > { %v3066_v17 = vadd.f32 %v7254_v52, %v3049_v58 }
0x236e   : > { %3686 = vperm.xlu0 %4203, %v3567_v43   ;;  %3693 = vperm.xlu1 %4204, %v3568_v37   ;;  %v3048_v0 = vadd.f32 %v7253_v4, %v3031_v21  ;;  %v3301_v37 = vpop.permute.xlu1 %3300 }
0x236f   : > { %v3083_v62 = vadd.f32 %v6240_v40, %v3066_v17 }
0x2370   : > { %v3065_v49 = vadd.f32 %v7255_v5, %v3048_v0 }
0x2371   : > { %v3100_v40 = vadd.f32 %v6228_v29, %v3083_v62 }
0x2372   : > { %3700 = vperm.xlu0 %4203, %v3569_v28   ;;  %3707 = vperm.xlu1 %4204, %v3570_v31   ;;  %v3082_v44 = vadd.f32 %v7256_v19, %v3065_v49 }
0x2373   : > { %v3109_v1 = vadd.f32 %v3107_v36, %v3100_v40 }
0x2374   : > { %v3099_v14 = vadd.f32 %v6242_v10, %v3082_v44 }
0x2375   : > { %v3126_v7 = vadd.f32 %v6255_v46, %v3109_v1 }
0x2376   : > { %3714 = vperm.xlu0 %4203, %v3571_v55   ;;  %3721 = vperm.xlu1 %4204, %v3572_v22   ;;  %v3108_v25 = vadd.f32 %v3106_v60, %v3099_v14 }
0x2377   : > { %v3143_v56 = vadd.f32 %v6266_v23, %v3126_v7  ;;  %v7257_v7 = vld [vmem:[#allocation192_spill] sm:$0xff] }
0x2378   : > { %v3125_v43 = vadd.f32 %v6246_v38, %v3108_v25 }
0x2379   : > { %v3160_v10 = vadd.f32 %v6277_v51, %v3143_v56 }
0x237a   : > { %3728 = vperm.xlu0 %4203, %v3573_v35   ;;  %3735 = vperm.xlu1 %4204, %v3574_v45   ;;  %v3142_v29 = vadd.f32 %v6257_v16, %v3125_v43  ;;  %v6616_v43 = vsub.s32 4, %v7257_v7 }
0x237b   : > { %v3177_v18 = vadd.f32 %v6288_v50, %v3160_v10  ;;  %v3252_v50 = vmul.f32 0.0, %v6345_v2 }
0x237c   : > { %v3159_v15 = vadd.f32 %v6268_v6, %v3142_v29 }
0x237d   : > { %v3194_v46 = vadd.f32 %v6299_v24, %v3177_v18 }
0x237e   : > { %3742 = vperm.xlu0 %4203, %v3575_v63   ;;  %v3176_v3 = vadd.f32 %v6279_v11, %v3159_v15 }
0x237f   : > { %v3211_v28 = vadd.f32 %v6310_v57, %v3194_v46 }
0x2380   : > { %v3316_v32 = vpop.permute.xlu0 %3315  ;;  %v3318_v59 = vpop.permute.xlu1 %3317  ;;  %v3193_v38 = vadd.f32 %v6290_v26, %v3176_v3 }
0x2381   : > { %v3228_v51 = vadd.f32 %v6341_v61, %v3211_v28 }
0x2382   : > { %v3210_v23 = vadd.f32 %v6301_v48, %v3193_v38 }
0x2383   : > { %v3245_v11 = vadd.f32 %v6324_v34, %v3228_v51 }
0x2384   : > { %v3333_v16 = vpop.permute.xlu0 %3332  ;;  %v3335_v31 = vpop.permute.xlu1 %3334  ;;  %v3227_v6 = vadd.f32 %v6312_v12, %v3210_v23 }
0x2385   : > { %v3254_v26 = vadd.f32 %v3252_v50, %v3245_v11  ;;  %v6629_v11 = vsub.s32 7, %v7257_v7 }
0x2386   : > { %v3244_v24 = vadd.f32 %v6343_v54, %v3227_v6 }
0x2387   : > { %v3271_v48 = vadd.f32 %v6364_v47, %v3254_v26 }
0x2388   : > { %v3253_v21 = vadd.f32 %v3251_v30, %v3244_v24  ;;  %v3350_v57 = vpop.permute.xlu0 %3349  ;;  %v3352_v9 = vpop.permute.xlu1 %3351 }
0x2389   : > { %v3288_v12 = vadd.f32 %v3284_v27, %v3271_v48 }
0x238a   : > { %v3270_v58 = vadd.f32 %v6347_v8, %v3253_v21 }
0x238b   : > { %v3305_v4 = vadd.f32 %v3301_v37, %v3288_v12 }
0x238c   : > { %v3287_v61 = vadd.f32 %v6366_v41, %v3270_v58  ;;  %v3367_v42 = vpop.permute.xlu0 %3366  ;;  %v3369_v52 = vpop.permute.xlu1 %3368 }
0x238d   : > { %v3322_v17 = vadd.f32 %v3318_v59, %v3305_v4 }
0x238e   : > { %v3304_v0 = vadd.f32 %v3299_v13, %v3287_v61 }
0x238f   : > { %v3339_v55 = vadd.f32 %v3335_v31, %v3322_v17 }
0x2390   : > { %v3321_v2 = vadd.f32 %v3316_v32, %v3304_v0  ;;  %v3384_v5 = vpop.permute.xlu0 %3383  ;;  %v3386_v49 = vpop.permute.xlu1 %3385  ;;  %v6621_v32 = vsub.s32 5, %v7257_v7 }
0x2391   : > { %v3356_v22 = vadd.f32 %v3352_v9, %v3339_v55 }
0x2392   : > { %v3338_v34 = vadd.f32 %v3333_v16, %v3321_v2  ;;  %v6625_v16 = vsub.s32 6, %v7257_v7 }
0x2393   : > { %v3373_v19 = vadd.f32 %v3369_v52, %v3356_v22 }
0x2394   : > { %v3355_v54 = vadd.f32 %v3350_v57, %v3338_v34 }
0x2395   : > { %v3390_v44 = vadd.f32 %v3386_v49, %v3373_v19 }
0x2396   : > { %v3372_v62 = vadd.f32 %v3367_v42, %v3355_v54 }
0x2398   : > { %v3389_v47 = vadd.f32 %v3384_v5, %v3372_v62 }
0x239d   : > { %v3394_v8 = vpop.permute.xlu0 %3393  ;;  %v3409_v60 = vpop.permute.xlu1 %3408 }
0x239e   : > { %v3396_v41 = vadd.f32 %v3394_v8, %v3389_v47  ;;  %v3397_v36 = vadd.f32 %v3394_v8, %v3390_v44 }
0x23a0   : > { %v3405_v27 = vrot.slane %v3397_v36, %v5601_v39  ;;  %v3401_v35 = vrot.slane %v3396_v41, %v5601_v39  ;;  %v3418_v45 = vrot.slane %v3396_v41, %v5611_v53  ;;  %v3422_v40 = vrot.slane %v3397_v36, %v5611_v53 }
0x23a1   : > { %v3426_v14 = vpop.permute.xlu0 %3425  ;;  %v3439_v1 = vrot.slane %v3397_v36, %v5605_v20  ;;  %v3443_v25 = vpop.permute.xlu1 %3442  ;;  %v3435_v63 = vrot.slane %v3396_v41, %v5605_v20  ;;  %v3452_v10 = vrot.slane %v3396_v41, %v5622_v33  ;;  %v3456_v15 = vrot.slane %v3397_v36, %v5622_v33 }
0x23a2   : > { %v3411_v37 = vmul.f32 %v3409_v60, %v3401_v35  ;;  %v3412_v13 = vmul.f32 %v3409_v60, %v3405_v27  ;;  %v3428_v56 = vmul.f32 %v3426_v14, %v3418_v45  ;;  %v3429_v29 = vmul.f32 %v3426_v14, %v3422_v40 }
0x23a3   : > { %v3445_v3 = vmul.f32 %v3443_v25, %v3435_v63  ;;  %v3446_v46 = vmul.f32 %v3443_v25, %v3439_v1  ;;  %v3469_v23 = vrot.slane %v3396_v41, %v6616_v43  ;;  %v3473_v50 = vrot.slane %v3397_v36, %v6616_v43 }
0x23a4   : > { %v3430_v59 = vadd.f32 %v3428_v56, %v3411_v37  ;;  %v3431_v18 = vadd.f32 %v3429_v29, %v3412_v13  ;;  %v3486_v57 = vrot.slane %v3396_v41, %v6621_v32  ;;  %v3490_v48 = vrot.slane %v3397_v36, %v6621_v32 }
0x23a5   : > { %v3460_v38 = vpop.permute.xlu0 %3459  ;;  %v3477_v28 = vpop.permute.xlu1 %3476  ;;  %v3503_v0 = vrot.slane %v3396_v41, %v6625_v16  ;;  %v3520_v42 = vrot.slane %v3396_v41, %v6629_v11  ;;  %v3507_v62 = vrot.slane %v3397_v36, %v6625_v16  ;;  %v3524_v60 = vrot.slane %v3397_v36, %v6629_v11 }
0x23a6   : > { %v3447_v31 = vadd.f32 %v3445_v3, %v3430_v59  ;;  %v3448_v51 = vadd.f32 %v3446_v46, %v3431_v18  ;;  %v3462_v6 = vmul.f32 %v3460_v38, %v3452_v10  ;;  %v3463_v30 = vmul.f32 %v3460_v38, %v3456_v15  ;;  %v3584_v38 = vld [vmem:[%s6769_s13 + $0xd8] sm:$0xff] }
0x23a7   : > { %v3479_v21 = vmul.f32 %v3477_v28, %v3469_v23  ;;  %v3480_v61 = vmul.f32 %v3477_v28, %v3473_v50 }
0x23a8   : > { %v3464_v24 = vadd.f32 %v3462_v6, %v3447_v31  ;;  %v3465_v26 = vadd.f32 %v3463_v30, %v3448_v51 }
0x23a9   : > { %v3494_v9 = vpop.permute.xlu0 %3493  ;;  %v3511_v58 = vpop.permute.xlu1 %3510 }
0x23aa   : > { %v3481_v12 = vadd.f32 %v3479_v21, %v3464_v24  ;;  %v3496_v4 = vmul.f32 %v3494_v9, %v3486_v57  ;;  %v3482_v52 = vadd.f32 %v3480_v61, %v3465_v26  ;;  %v3497_v2 = vmul.f32 %v3494_v9, %v3490_v48 }
0x23ab   : > { %v3513_v34 = vmul.f32 %v3511_v58, %v3503_v0  ;;  %v3514_v8 = vmul.f32 %v3511_v58, %v3507_v62 }
0x23ac   : > { %v3498_v17 = vadd.f32 %v3496_v4, %v3481_v12  ;;  %v3499_v49 = vadd.f32 %v3497_v2, %v3482_v52  ;;  %v3593_v2 = vld [vmem:[%s6769_s13 + $0x120] sm:$0xff] }
0x23ad   : > { %v3528_v55 = vpop.permute.xlu0 %3527  ;;  %v3537_v54 = vpop.permute.xlu1 %3536 }
0x23ae   : > { %v3515_v22 = vadd.f32 %v3513_v34, %v3498_v17  ;;  %v3530_v5 = vmul.f32 %v3528_v55, %v3520_v42  ;;  %v3516_v35 = vadd.f32 %v3514_v8, %v3499_v49  ;;  %v3531_v41 = vmul.f32 %v3528_v55, %v3524_v60  ;;  %v3594_v49 = vld [vmem:[%s6769_s13 + $0x128] sm:$0xff] }
0x23b0   : > { %v3532_v19 = vadd.f32 %v3530_v5, %v3515_v22  ;;  %v3533_v25 = vadd.f32 %v3531_v41, %v3516_v35  ;;  %v3595_v35 = vld [vmem:[%s6769_s13 + $0x130] sm:$0xff] }
0x23b1   : > { %v3546_v47 = vpop.permute.xlu0 %3545  ;;  %v3553_v44 = vpop.permute.xlu1 %3552 }
0x23b2   : > { %v3539_v27 = vadd.f32 %v3537_v54, %v3532_v19  ;;  %v3540_v29 = vadd.f32 %v3537_v54, %v3533_v25 }
0x23b4   : > { %v3541_v45 = vmax.f32 %v3539_v27, 0.0  ;;  %v3542_v18 = vmax.f32 %v3540_v29, 0.0 }
0x23b5   : > { %v3617_v40 = vpop.permute.xlu0 %3616  ;;  %v3750_v14 = vpop.permute.xlu1 %3749 }
0x23b6   : > { %v3548_v1 = vmul.f32 %v3546_v47, %v3541_v45  ;;  %v3549_v23 = vmul.f32 %v3546_v47, %v3542_v18  ;;  %v3619_v55 = vmul.f32 0.0, %v3617_v40  ;;  %v3598_v18 = vld [vmem:[%s6769_s13 + $0x148] sm:$0xff] }
0x23b8   : > { %v6637_v63 = vadd.f32 %v3553_v44, %v3548_v1  ;;  %v6654_v50 = vadd.f32 %v3553_v44, %v3549_v23 }
0x23b9   : > { %v3761_v7 = vpop.permute.xlu0 %3760  ;;  %v3772_v37 = vpop.permute.xlu1 %3771 }
0x23ba   : > { %v3752_v13 = vmul.f32 %v3750_v14, %v6637_v63  ;;  %v3763_v56 = vmul.f32 %v3761_v7, %v6637_v63  ;;  %v3774_v15 = vmul.f32 %v3772_v37, %v6637_v63  ;;  %v3596_v37 = vld [vmem:[%s6769_s13 + $0x138] sm:$0xff] }
0x23bc   : > { %3765 = vrot.lane.b32.xlu0 %v3763_v56, %s7009_s25  ;;  %3754 = vrot.lane.b32.xlu1 %v3752_v13, %s7008_s20 }
0x23bd   : > { %v3783_v36 = vpop.permute.xlu0 %3782  ;;  %v3794_v10 = vpop.permute.xlu1 %3793 }
0x23be   : > { %v3785_v59 = vmul.f32 %v3783_v36, %v6637_v63  ;;  %v3796_v28 = vmul.f32 %v3794_v10, %v6637_v63 }
0x23c0   : > { %3787 = vrot.lane.b32.xlu0 %v3785_v59, %s7011_s30  ;;  %3776 = vrot.lane.b32.xlu1 %v3774_v15, %s7010_s24  ;;  %v3597_v59 = vld [vmem:[%s6769_s13 + $0x140] sm:$0xff] }
0x23c1   : > { %v3805_v3 = vpop.permute.xlu0 %3804  ;;  %v3816_v46 = vpop.permute.xlu1 %3815 }
0x23c2   : > { %v3807_v6 = vmul.f32 %v3805_v3, %v6637_v63  ;;  %v3818_v30 = vmul.f32 %v3816_v46, %v6637_v63 }
0x23c4   : > { %3837 = vperm.xlu0 %4203, %v3584_v38   ;;  %3798 = vrot.lane.b32.xlu1 %v3796_v28, %s6986_s27 }
0x23c5   : > { %v3827_v31 = vpop.permute.xlu0 %3826  ;;  %v3845_v51 = vpop.permute.xlu1 %3844 }
0x23c6   : > { %v3829_v21 = vmul.f32 %v3827_v31, %v6637_v63  ;;  %v3847_v57 = vmul.f32 %v3845_v51, %v6654_v50  ;;  %v3599_v51 = vld [vmem:[%s6769_s13 + $0x150] sm:$0xff] }
0x23c8   : > { %3820 = vrot.lane.b32.xlu0 %v3818_v30, %s6914_s29  ;;  %3809 = vrot.lane.b32.xlu1 %v3807_v6, %s6950_s21  ;;  %v3600_v6 = vld [vmem:[%s6769_s13 + $0x158] sm:$0xff] }
0x23c9   : > { %v3856_v24 = vpop.permute.xlu0 %3855  ;;  %v3624_v26 = vpop.permute.xlu1 %3623 }
0x23ca   : > { %v3858_v58 = vmul.f32 %v3856_v24, %v6654_v50  ;;  %v3626_v17 = vmul.f32 0.0, %v3624_v26 }
0x23cc   : > { %3849 = vrot.lane.b32.xlu0 %v3847_v57, %s7008_s20  ;;  %3831 = vrot.lane.b32.xlu1 %v3829_v21, %s7017_s28  ;;  %v3627_v62 = vadd.f32 %v3626_v17, %v3619_v55  ;;  %v3604_v17 = vld [vmem:[%s6771_s15 + $0x8] sm:$0xff] }
0x23cd   : > { %v3867_v9 = vpop.permute.xlu0 %3866  ;;  %v3631_v48 = vpop.permute.xlu1 %3630 }
0x23ce   : > { %v3869_v61 = vmul.f32 %v3867_v9, %v6654_v50  ;;  %v3633_v54 = vmul.f32 0.0, %v3631_v48  ;;  %v3601_v48 = vld [vmem:[%s6769_s13 + $0x160] sm:$0xff] }
0x23d0   : > { %3871 = vrot.lane.b32.xlu0 %v3869_v61, %s7010_s24  ;;  %3860 = vrot.lane.b32.xlu1 %v3858_v58, %s7009_s25  ;;  %v3634_v44 = vadd.f32 %v3633_v54, %v3627_v62  ;;  %v3602_v58 = vld [vmem:[%s6770_s14] sm:$0xff]  ;;  %v3605_v62 = vld [vmem:[%s6771_s15 + $0x10] sm:$0xff] }
0x23d1   : > { %v3878_v12 = vpop.permute.xlu0 %3877  ;;  %v3638_v4 = vpop.permute.xlu1 %3637 }
0x23d2   : > { %v3880_v0 = vmul.f32 %v3878_v12, %v6654_v50  ;;  %v3640_v19 = vmul.f32 0.0, %v3638_v4 }
0x23d4   : > { %3882 = vrot.lane.b32.xlu1 %v3880_v0, %s7011_s30  ;;  %v3641_v41 = vadd.f32 %v3640_v19, %v3634_v44  ;;  %v3606_v19 = vld [vmem:[%s6771_s15 + $0x18] sm:$0xff] }
0x23d5   : > { %v3889_v42 = vpop.permute.xlu0 %3888  ;;  %v3645_v52 = vpop.permute.xlu1 %3644 }
0x23d6   : > { %v3891_v34 = vmul.f32 %v3889_v42, %v6654_v50  ;;  %v3647_v8 = vmul.f32 0.0, %v3645_v52 }
0x23d8   : > { %3893 = vrot.lane.b32.xlu0 %v3891_v34, %s6986_s27  ;;  %3932 = vperm.xlu1 %4204, %v3593_v2   ;;  %v3648_v14 = vadd.f32 %v3647_v8, %v3641_v41  ;;  %v3603_v2 = vld [vmem:[%s6771_s15] sm:$0xff]  ;;  %v3608_v41 = vld [vmem:[%s6771_s15 + $0x28] sm:$0xff] }
0x23d9   : > { %v3900_v22 = vpop.permute.xlu0 %3899  ;;  %v3652_v5 = vpop.permute.xlu1 %3651 }
0x23da   : > { %v3902_v47 = vmul.f32 %v3900_v22, %v6654_v50  ;;  %v3654_v45 = vmul.f32 0.0, %v3652_v5 }
0x23dc   : > { %3904 = vrot.lane.b32.xlu0 %v3902_v47, %s6950_s21  ;;  %3939 = vperm.xlu1 %4204, %v3594_v49   ;;  %v3655_v13 = vadd.f32 %v3654_v45, %v3648_v14  ;;  %s4182_s21 = sshll.u32 %s7258_s0, 3 }
0x23dd   : > { %v3911_v60 = vpop.permute.xlu0 %3910  ;;  %v3659_v27 = vpop.permute.xlu1 %3658 }
0x23de   : > { %v3913_v40 = vmul.f32 %v3911_v60, %v6654_v50  ;;  %v3661_v1 = vmul.f32 0.0, %v3659_v27 }
0x23e0   : > { %3915 = vrot.lane.b32.xlu0 %v3913_v40, %s6914_s29  ;;  %3946 = vperm.xlu1 %4204, %v3595_v35   ;;  %v3662_v36 = vadd.f32 %v3661_v1, %v3655_v13  ;;  %v3607_v35 = vld [vmem:[%s6771_s15 + $0x20] sm:$0xff]  ;;  %v3609_v1 = vld [vmem:[%s6771_s15 + $0x30] sm:$0xff]  ;;  %s7259_s29 = sld [smem:[#allocation205_spill]] }
0x23e1   : > { %v3922_v25 = vpop.permute.xlu0 %3921  ;;  %v3666_v7 = vpop.permute.xlu1 %3665 }
0x23e2   : > { %v3924_v56 = vmul.f32 %v3922_v25, %v6654_v50  ;;  %v3668_v29 = vmul.f32 0.0, %v3666_v7  ;;  %v3610_v25 = vld [vmem:[%s6771_s15 + $0x38] sm:$0xff]  ;;  %v3611_v7 = vld [vmem:[%s6772_s16] sm:$0xff] }
0x23e4   : > { %3926 = vrot.lane.b32.xlu0 %v3924_v56, %s7017_s28  ;;  %3953 = vperm.xlu1 %4204, %v3596_v37   ;;  %v3669_v3 = vadd.f32 %v3668_v29, %v3662_v36  ;;  %v3613_v37 = vld [vmem:[%s6774_s18] sm:$0xff] }
0x23e5   : > { %v3673_v10 = vpop.permute.xlu0 %3672  ;;  %v3680_v15 = vpop.permute.xlu1 %3679 }
0x23e6   : > { %v3675_v46 = vmul.f32 0.0, %v3673_v10  ;;  %v3682_v28 = vmul.f32 0.0, %v3680_v15  ;;  %s600_s26 = scalar_lea.vmem %s7259_s29, %s4182_s21 }
0x23e8   : > { %v3676_v38 = vadd.f32 %v3675_v46, %v3669_v3  ;;  %3960 = vperm.xlu0 %4203, %v3597_v59   ;;  %3967 = vperm.xlu1 %4204, %v3598_v18  }
0x23e9   : > { %v3687_v23 = vpop.permute.xlu0 %3686  ;;  %v3694_v31 = vpop.permute.xlu1 %3693 }
0x23ea   : > { %v3683_v30 = vadd.f32 %v3682_v28, %v3676_v38  ;;  %v3689_v24 = vmul.f32 0.0, %v3687_v23  ;;  %v3696_v21 = vmul.f32 0.0, %v3694_v31 }
0x23ec   : > { %v3690_v26 = vadd.f32 %v3689_v24, %v3683_v30  ;;  %3974 = vperm.xlu0 %4203, %v3599_v51   ;;  %3981 = vperm.xlu1 %4204, %v3600_v6  }
0x23ed   : > { %v3701_v57 = vpop.permute.xlu0 %3700  ;;  %v3708_v9 = vpop.permute.xlu1 %3707 }
0x23ee   : > { %v3697_v61 = vadd.f32 %v3696_v21, %v3690_v26  ;;  %v3703_v12 = vmul.f32 0.0, %v3701_v57  ;;  %v3710_v0 = vmul.f32 0.0, %v3708_v9 }
0x23f0   : > { %v3704_v4 = vadd.f32 %v3703_v12, %v3697_v61  ;;  %3988 = vperm.xlu0 %4203, %v3601_v48   ;;  %3995 = vperm.xlu1 %4204, %v3602_v58  }
0x23f1   : > { %v3715_v42 = vpop.permute.xlu0 %3714  ;;  %v3722_v52 = vpop.permute.xlu1 %3721 }
0x23f2   : > { %v3711_v34 = vadd.f32 %v3710_v0, %v3704_v4  ;;  %v3717_v55 = vmul.f32 0.0, %v3715_v42  ;;  %v3724_v22 = vmul.f32 0.0, %v3722_v52 }
0x23f4   : > { %v3718_v54 = vadd.f32 %v3717_v55, %v3711_v34  ;;  %4005 = vperm.xlu0 %4203, %v3603_v2   ;;  %4016 = vperm.xlu1 %4204, %v3604_v17  }
0x23f5   : > { %v3729_v5 = vpop.permute.xlu0 %3728  ;;  %v3736_v49 = vpop.permute.xlu1 %3735 }
0x23f6   : > { %v3725_v47 = vadd.f32 %v3724_v22, %v3718_v54  ;;  %v3731_v44 = vmul.f32 0.0, %v3729_v5  ;;  %v3738_v60 = vmul.f32 0.0, %v3736_v49 }
0x23f8   : > { %v3732_v8 = vadd.f32 %v3731_v44, %v3725_v47  ;;  %4027 = vperm.xlu0 %4203, %v3605_v62   ;;  %4038 = vperm.xlu1 %4204, %v3606_v19  }
0x23f9   : > { %v3743_v27 = vpop.permute.xlu0 %3742 }
0x23fa   : > { %v3739_v45 = vadd.f32 %v3738_v60, %v3732_v8  ;;  %v3745_v40 = vmul.f32 %v3743_v27, %v6637_v63  ;;  %v3612_v63 = vld [vmem:[%s6773_s17] sm:$0xff] }
0x23fc   : > { %4049 = vperm.xlu0 %4203, %v3607_v35   ;;  %4060 = vperm.xlu1 %4204, %v3608_v41   ;;  %v3746_v14 = vadd.f32 %v3745_v40, %v3739_v45 }
0x2400   : > { %4071 = vperm.xlu0 %4203, %v3609_v1   ;;  %4082 = vperm.xlu1 %4204, %v3610_v25  }
0x2404   : > { %4089 = vperm.xlu0 %4203, %v3611_v7   ;;  %4096 = vperm.xlu1 %4204, %v3612_v63  }
0x2408   : > { %4102 = vperm.xlu0 %4203, %v3613_v37  }
0x242e   : > { %v3755_v13 = vpop.permute.xlu1 %3754  ;;  %v3766_v36 = vpop.permute.xlu0 %3765 }
0x242f   : > { %v3757_v56 = vadd.f32 %v3755_v13, %v3746_v14 }
0x2431   : > { %v3768_v10 = vadd.f32 %v3766_v36, %v3757_v56 }
0x2432   : > { %v3777_v29 = vpop.permute.xlu1 %3776  ;;  %v3788_v18 = vpop.permute.xlu0 %3787 }
0x2433   : > { %v3779_v59 = vadd.f32 %v3777_v29, %v3768_v10 }
0x2435   : > { %v3790_v3 = vadd.f32 %v3788_v18, %v3779_v59 }
0x2436   : > { %v3799_v15 = vpop.permute.xlu1 %3798 }
0x2437   : > { %v3801_v28 = vadd.f32 %v3799_v15, %v3790_v3 }
0x243a   : > { %v3810_v46 = vpop.permute.xlu1 %3809 }
0x243b   : > { %v3812_v23 = vadd.f32 %v3810_v46, %v3801_v28 }
0x243e   : > { %v3832_v31 = vpop.permute.xlu1 %3831 }
0x243f   : > { %v3838_v38 = vpop.permute.xlu0 %3837 }
0x2440   : > { %v3840_v30 = vmul.f32 %v3838_v38, %v6654_v50 }
0x2442   : > { %v3861_v57 = vpop.permute.xlu1 %3860 }
0x2443   : > { %v3821_v51 = vpop.permute.xlu0 %3820 }
0x2444   : > { %v3823_v6 = vadd.f32 %v3821_v51, %v3812_v23 }
0x2446   : > { %v3834_v24 = vadd.f32 %v3832_v31, %v3823_v6  ;;  %v3883_v12 = vpop.permute.xlu1 %3882 }
0x2447   : > { %v3850_v26 = vpop.permute.xlu0 %3849 }
0x2448   : > { %v3841_v21 = vadd.f32 %v3840_v30, %v3834_v24 }
0x244a   : > { %v3852_v9 = vadd.f32 %v3850_v26, %v3841_v21 }
0x244b   : > { %v3872_v48 = vpop.permute.xlu0 %3871 }
0x244c   : > { %v3863_v58 = vadd.f32 %v3861_v57, %v3852_v9 }
0x244e   : > { %v3874_v61 = vadd.f32 %v3872_v48, %v3863_v58 }
0x244f   : > { %v3894_v4 = vpop.permute.xlu0 %3893 }
0x2450   : > { %v3885_v0 = vadd.f32 %v3883_v12, %v3874_v61 }
0x2452   : > { %v3896_v2 = vadd.f32 %v3894_v4, %v3885_v0 }
0x2453   : > { %v3905_v42 = vpop.permute.xlu0 %3904  ;;  %v3933_v52 = vpop.permute.xlu1 %3932 }
0x2454   : > { %v3907_v55 = vadd.f32 %v3905_v42, %v3896_v2  ;;  %v3935_v5 = vmul.f32 0.0, %v3933_v52 }
0x2457   : > { %v3916_v17 = vpop.permute.xlu0 %3915  ;;  %v3940_v34 = vpop.permute.xlu1 %3939 }
0x2458   : > { %v3918_v54 = vadd.f32 %v3916_v17, %v3907_v55  ;;  %v3942_v62 = vmul.f32 0.0, %v3940_v34 }
0x245b   : > { %v3927_v22 = vpop.permute.xlu0 %3926  ;;  %v3947_v50 = vpop.permute.xlu1 %3946 }
0x245c   : > { %v3929_v49 = vadd.f32 %v3927_v22, %v3918_v54  ;;  %v3949_v8 = vmul.f32 0.0, %v3947_v50 }
0x245e   : > { %v3936_v19 = vadd.f32 %v3935_v5, %v3929_v49 }
0x245f   : > { %v3954_v47 = vpop.permute.xlu1 %3953 }
0x2460   : > { %v3943_v44 = vadd.f32 %v3942_v62, %v3936_v19  ;;  %v3956_v27 = vmul.f32 0.0, %v3954_v47 }
0x2462   : > { %v3950_v60 = vadd.f32 %v3949_v8, %v3943_v44 }
0x2463   : > { %v3961_v35 = vpop.permute.xlu0 %3960  ;;  %v3968_v41 = vpop.permute.xlu1 %3967 }
0x2464   : > { %v3957_v45 = vadd.f32 %v3956_v27, %v3950_v60  ;;  %v3963_v40 = vmul.f32 0.0, %v3961_v35  ;;  %v3970_v1 = vmul.f32 0.0, %v3968_v41 }
0x2466   : > { %v3964_v14 = vadd.f32 %v3963_v40, %v3957_v45 }
0x2467   : > { %v3975_v25 = vpop.permute.xlu0 %3974  ;;  %v3982_v7 = vpop.permute.xlu1 %3981 }
0x2468   : > { %v3971_v63 = vadd.f32 %v3970_v1, %v3964_v14  ;;  %v3977_v37 = vmul.f32 0.0, %v3975_v25  ;;  %v3984_v56 = vmul.f32 0.0, %v3982_v7 }
0x246a   : > { %v3978_v13 = vadd.f32 %v3977_v37, %v3971_v63 }
0x246b   : > { %v3989_v29 = vpop.permute.xlu0 %3988  ;;  %v3996_v36 = vpop.permute.xlu1 %3995 }
0x246c   : > { %v3985_v10 = vadd.f32 %v3984_v56, %v3978_v13  ;;  %v3991_v15 = vmul.f32 0.0, %v3989_v29 }
0x246e   : > { %v3992_v59 = vadd.f32 %v3991_v15, %v3985_v10 }
0x246f   : > { %v4006_v18 = vpop.permute.xlu0 %4005  ;;  %v4017_v3 = vpop.permute.xlu1 %4016 }
0x2470   : > { %v3998_v46 = vadd.f32 %v3996_v36, %v3992_v59 }
0x2472   : > { %v4002_v38 = vrot.slane %v3998_v46, %v5601_v39  ;;  %v4013_v28 = vrot.slane %v3998_v46, %v5611_v53  ;;  %v4024_v23 = vrot.slane %v3998_v46, %v5605_v20  ;;  %v4035_v24 = vrot.slane %v3998_v46, %v5622_v33 }
0x2473   : > { %v4028_v31 = vpop.permute.xlu0 %4027  ;;  %v4039_v51 = vpop.permute.xlu1 %4038  ;;  %v4046_v61 = vrot.slane %v3998_v46, %v6616_v43  ;;  %v4057_v53 = vrot.slane %v3998_v46, %v6621_v32  ;;  %v4068_v42 = vrot.slane %v3998_v46, %v6625_v16  ;;  %v4079_v17 = vrot.slane %v3998_v46, %v6629_v11 }
0x2474   : > { %v4008_v6 = vmul.f32 %v4006_v18, %v4002_v38  ;;  %v4019_v30 = vmul.f32 %v4017_v3, %v4013_v28  ;;  %v4030_v21 = vmul.f32 %v4028_v31, %v4024_v23  ;;  %v4041_v58 = vmul.f32 %v4039_v51, %v4035_v24 }
0x2476   : > { %v4020_v26 = vadd.f32 %v4019_v30, %v4008_v6 }
0x2477   : > { %v4050_v57 = vpop.permute.xlu0 %4049  ;;  %v4061_v9 = vpop.permute.xlu1 %4060 }
0x2478   : > { %v4031_v48 = vadd.f32 %v4030_v21, %v4020_v26  ;;  %v4052_v39 = vmul.f32 %v4050_v57, %v4046_v61  ;;  %v4063_v0 = vmul.f32 %v4061_v9, %v4057_v53 }
0x247a   : > { %v4042_v12 = vadd.f32 %v4041_v58, %v4031_v48 }
0x247b   : > { %v4072_v4 = vpop.permute.xlu0 %4071  ;;  %v4083_v52 = vpop.permute.xlu1 %4082 }
0x247c   : > { %v4053_v20 = vadd.f32 %v4052_v39, %v4042_v12  ;;  %v4074_v33 = vmul.f32 %v4072_v4, %v4068_v42  ;;  %v4085_v55 = vmul.f32 %v4083_v52, %v4079_v17 }
0x247e   : > { %v4064_v2 = vadd.f32 %v4063_v0, %v4053_v20 }
0x247f   : > { %v4090_v22 = vpop.permute.xlu0 %4089  ;;  %v4097_v5 = vpop.permute.xlu1 %4096 }
0x2480   : > { %v4075_v34 = vadd.f32 %v4074_v33, %v4064_v2 }
0x2482   : > { %v4086_v54 = vadd.f32 %v4085_v55, %v4075_v34 }
0x2483   : > { %v4103_v32 = vpop.permute.xlu0 %4102 }
0x2484   : > { %v4092_v50 = vadd.f32 %v4090_v22, %v4086_v54 }
0x2486   : > { %v4093_v43 = vmax.f32 %v4092_v50, 0.0 }
0x2488   : > { %v4099_v49 = vmul.f32 %v4097_v5, %v4093_v43 }
0x248a   : > { %v4105_v62 = vadd.f32 %v4103_v32, %v4099_v49 }
0x248c   : > { %v4111_v19 = vsel %vm4110_vm0, %v4105_v62, -inf  ;;  %v4107_v16 = vsel %vm4106_vm1, %v4105_v62, -inf  ;;  %v4116_v47 = vsel %vm4115_vm2, %v4105_v62, -inf }
0x248d   : > { %4112 = vmax.xlane.f32.xlu0 %v4111_v19  ;;  %4108 = vmax.xlane.f32.xlu1 %v4107_v16 }
0x2491   : > { %4117 = vmax.xlane.f32.xlu0 %v4116_v47 }
0x2516   : > { %v4113_v11 = vpop.xlane.xlu0 %4112  ;;  %v4109_v44 = vpop.xlane.xlu1 %4108 }
0x2517   : > { %v4114_v8 = vmax.f32 %v4109_v44, %v4113_v11 }
0x251a   : > { %v4118_v60 = vpop.xlane.xlu0 %4117 }
0x251b   : > { %v4119_v27 = vmax.f32 %v4114_v8, %v4118_v60 }
0x251d   : > { %4121 = vst.msk [vmem:[%s600_s26] sm:$0xff] %vm4120_vm3, %v4119_v27 }
0x251e PF: > { %s7260_s28 = sld [smem:[#allocation2_spill]] }
0x2524   : > { %s29_s0 = sadd.s32 1, %s7260_s28  }
0x2525   : > { %p26_p4 = scmp.ge.s32.totalorder %s29_s0, 4  }
0x2527   :  { %28 = sbr.rel (!%p26_p4) target bundleno = 9 (0x9), region = 126 }

</bundles_post_ra>
